<compile_context>
chip_gen: v5e
topology: v5e:2x2
jax: 0.10.0
libtpu: 0.0.40
codegen_flags: <defaults>
</compile_context>

<pallas_src>
import functools

import jax
import jax.numpy as jnp
from jax.experimental import pallas as pl
from jax.experimental.pallas import tpu as pltpu

LEAKY_SLOPE = 0.01  # PyTorch nn.LeakyReLU default


# --------------------------------------------------------------------------- #
# Kernel helpers
# --------------------------------------------------------------------------- #
def _leaky_relu(x):
    # slope in (0,1)  =>  max(x, slope*x) == LeakyReLU(x)
    return jnp.maximum(x, LEAKY_SLOPE * x)


def _zero_halo(ref):
    """Zero only the 1-pixel border of a (H+2, W+2, C) padded VMEM scratch.

    Done every grid step (cheap thin strips) so it is safe under megacore
    grid sharding; the interior is fully overwritten each step anyway.
    """
    hp, wp, c = ref.shape
    dt = ref.dtype
    ref[0:1, :, :] = jnp.zeros((1, wp, c), dt)          # top row
    ref[hp - 1:hp, :, :] = jnp.zeros((1, wp, c), dt)    # bottom row
    ref[:, 0:1, :] = jnp.zeros((hp, 1, c), dt)          # left column
    ref[:, wp - 1:wp, :] = jnp.zeros((hp, 1, c), dt)    # right column


def _im2col_3x3(src, H, W):
    """(H+2, W+2, Cs) zero-padded image -> (H*W, 9*Cs) patch matrix.

    Column order is tap-major ((dy, dx) outer, channel inner), matching a
    row-major reshape of an HWIO (3, 3, Cs, Co) weight to (9*Cs, Co), so each
    3x3 conv becomes a single MXU matmul.
    """
    cs = src.shape[-1]
    cols = []
    for dy in range(3):
        for dx in range(3):
            cols.append(src[dy:dy + H, dx:dx + W, :].reshape(H * W, cs))
    return jnp.concatenate(cols, axis=-1)               # (H*W, 9*Cs)


# --------------------------------------------------------------------------- #
# Fused EncoderBlock kernel (one batch element per grid step)
# --------------------------------------------------------------------------- #
def _encoder_block_kernel(x_ref, w1_ref, b1_ref, w2_ref, b2_ref, w3_ref, b3_ref,
                          o_ref, cat_ref, h1p_ref, *, H, W, Cin, Cint):
    # 1-pixel zero halos (border strips only — no full-scratch fills).
    _zero_halo(cat_ref)
    _zero_halo(h1p_ref)

    # x lives in the leading Cin lanes of the shared "concat" scratch; h2 will
    # be written into the trailing Cint lanes later (w3 is re-ordered to the
    # [x, h2] channel order host-side).
    cat_ref[1:H + 1, 1:W + 1, 0:Cin] = x_ref[0].astype(cat_ref.dtype)

    # encoder1, conv 1: one matmul, K = 9*Cin, bf16 x bf16 -> f32 accumulate.
    p1 = _im2col_3x3(cat_ref[:, :, 0:Cin], H, W)                       # (H*W, 9*Cin)
    h1 = jnp.dot(p1, w1_ref[...], preferred_element_type=jnp.float32) + b1_ref[...]
    h1 = _leaky_relu(h1)
    h1p_ref[1:H + 1, 1:W + 1, :] = h1.astype(h1p_ref.dtype).reshape(H, W, Cint)

    # encoder1, conv 2: one matmul, K = 9*Cint.
    p2 = _im2col_3x3(h1p_ref[...], H, W)                               # (H*W, 9*Cint)
    h2 = jnp.dot(p2, w2_ref[...], preferred_element_type=jnp.float32) + b2_ref[...]
    h2 = _leaky_relu(h2)
    cat_ref[1:H + 1, 1:W + 1, Cin:Cin + Cint] = h2.astype(cat_ref.dtype).reshape(H, W, Cint)

    # encoder2 conv on concat([enc1_out, x]): ONE 9-tap conv over the shared
    # scratch, K = 9*(Cin+Cint).  No separate x-pass, no channel concat.
    p3 = _im2col_3x3(cat_ref[...], H, W)                               # (H*W, 9*(Cin+Cint))
    c = jnp.dot(p3, w3_ref[...], preferred_element_type=jnp.float32) + b3_ref[...]
    cout = c.shape[-1]

    # MaxPool2d(2,2) entirely at value level (no scratch round trip):
    # rows via leading-dim split + max, columns via sublane-pair split + max.
    c = c.reshape(H // 2, 2, W, cout)
    c = jnp.max(c, axis=1)                                             # (H//2, W, Cout)
    c = c.reshape(H // 2, W // 2, 2, cout)
    pooled = jnp.max(c, axis=2)                                        # (H//2, W//2, Cout)
    y = _leaky_relu(pooled)

    # Lane-dense output slab: (H//2, (W//2)*Cout).
    o_ref[0] = y.astype(o_ref.dtype).reshape(H // 2, (W // 2) * cout)


# --------------------------------------------------------------------------- #
# pallas_call wrapper (public API: NCHW in / NCHW out, like PyTorch)
# --------------------------------------------------------------------------- #
def encoder_block(x_nchw, p):
    """Full EncoderBlock.forward as one fused Pallas kernel."""
    x = jnp.transpose(x_nchw, (0, 2, 3, 1))              # NCHW -> NHWC
    N, H, W, Cin = x.shape
    Cint = p["w1"].shape[-1]
    Cout = p["w3"].shape[-1]
    assert H % 2 == 0 and W % 2 == 0, "MaxPool2d(2,2) needs even H and W"

    cdt = jnp.bfloat16                                   # scratch / MXU operand dtype

    # im2col weight matrices (tap-major rows), bf16 operands.
    w1 = p["w1"].reshape(9 * Cin, Cint).astype(cdt)
    w2 = p["w2"].reshape(9 * Cint, Cint).astype(cdt)
    # The module concatenates [enc1_out, x]; the kernel keeps x in the leading
    # lanes of the shared scratch, so swap w3's input-channel blocks to [x, h2].
    w3 = jnp.concatenate([p["w3"][:, :, Cint:, :], p["w3"][:, :, :Cint, :]], axis=2)
    w3 = w3.reshape(9 * (Cin + Cint), Cout).astype(cdt)
    b1 = p["b1"].reshape(1, Cint).astype(jnp.float32)
    b2 = p["b2"].reshape(1, Cint).astype(jnp.float32)
    b3 = p["b3"].reshape(1, Cout).astype(jnp.float32)

    kernel = functools.partial(_encoder_block_kernel, H=H, W=W, Cin=Cin, Cint=Cint)
    y = pl.pallas_call(
        kernel,
        out_shape=jax.ShapeDtypeStruct((N, H // 2, (W // 2) * Cout), x.dtype),
        grid_spec=pltpu.PrefetchScalarGridSpec(
            num_scalar_prefetch=0,
            grid=(N,),
            in_specs=[
                pl.BlockSpec((1, H, W, Cin), lambda n: (n, 0, 0, 0)),
                pl.BlockSpec((9 * Cin, Cint), lambda n: (0, 0)),
                pl.BlockSpec((1, Cint), lambda n: (0, 0)),
                pl.BlockSpec((9 * Cint, Cint), lambda n: (0, 0)),
                pl.BlockSpec((1, Cint), lambda n: (0, 0)),
                pl.BlockSpec((9 * (Cin + Cint), Cout), lambda n: (0, 0)),
                pl.BlockSpec((1, Cout), lambda n: (0, 0)),
            ],
            out_specs=pl.BlockSpec((1, H // 2, (W // 2) * Cout),
                                   lambda n: (n, 0, 0)),
            scratch_shapes=[
                pltpu.VMEM((H + 2, W + 2, Cin + Cint), cdt),  # padded [x | h2]
                pltpu.VMEM((H + 2, W + 2, Cint), cdt),        # padded h1
            ]),
        compiler_params=pltpu.CompilerParams(
            dimension_semantics=("parallel",),
            vmem_limit_bytes=64 * 1024 * 1024),
    )(x, w1, b1, w2, b2, w3, b3)

    y = y.reshape(N, H // 2, W // 2, Cout)
    return jnp.transpose(y, (0, 3, 1, 2))                # NHWC -> NCHW


# --------------------------------------------------------------------------- #
# Deterministic parameter init (synthetic, not a checkpoint load)
# --------------------------------------------------------------------------- #
def init_params(key, cin, cint, cout):
    ks = jax.random.split(key, 6)

    def wgt(k, ci, co):
        return jax.random.normal(k, (3, 3, ci, co), jnp.float32) / jnp.sqrt(9.0 * ci)

    def bias(k, co):
        return 0.1 * jax.random.normal(k, (co,), jnp.float32)

    return dict(
        w1=wgt(ks[0], cin, cint), b1=bias(ks[1], cint),
        w2=wgt(ks[2], cint, cint), b2=bias(ks[3], cint),
        w3=wgt(ks[4], cint + cin, cout), b3=bias(ks[5], cout),
    )


# --------------------------------------------------------------------------- #
# Pure-JAX (f32) reference for validation
# --------------------------------------------------------------------------- #
def reference_forward(x_nchw, p):
    x = jnp.transpose(x_nchw, (0, 2, 3, 1))

    def conv(v, w, b):
        return jax.lax.conv_general_dilated(
            v, w, (1, 1), "SAME",
            dimension_numbers=("NHWC", "HWIO", "NHWC")) + b

    a = jax.nn.leaky_relu(conv(x, p["w1"], p["b1"]), LEAKY_SLOPE)
    a = jax.nn.leaky_relu(conv(a, p["w2"], p["b2"]), LEAKY_SLOPE)
    cat = jnp.concatenate([a, x], axis=-1)
    c = conv(cat, p["w3"], p["b3"])
    pooled = jax.lax.reduce_window(c, -jnp.inf, jax.lax.max,
                                   (1, 2, 2, 1), (1, 2, 2, 1), "VALID")
    y = jax.nn.leaky_relu(pooled, LEAKY_SLOPE)
    return jnp.transpose(y, (0, 3, 1, 2))


# --------------------------------------------------------------------------- #
if __name__ == "__main__":
    key = jax.random.PRNGKey(0)
    kx, kp = jax.random.split(key)

    N, Cin, H, W = 2, 4, 16, 16
    Cint, Cout = 8, 8

    x_nchw = jax.random.normal(kx, (N, Cin, H, W), jnp.float32)
    params = init_params(kp, Cin, Cint, Cout)

    y = encoder_block(x_nchw, params)
    y = jax.block_until_ready(y)

    assert y.shape == (N, Cout, H // 2, W // 2), y.shape

    y_ref = reference_forward(x_nchw, params)
    err = float(jnp.max(jnp.abs(y - y_ref)))
    scale = float(jnp.max(jnp.abs(y_ref)))
    # bf16 matmul operands / bf16 intermediate storage vs f32 reference.
    tol = 5e-2 + 2e-2 * scale
    if err > tol:
        raise AssertionError(
            f"Pallas output mismatch vs reference: max_err={err} (tol={tol})")

    print("KERNEL_OK")
</pallas_src>

<mosaic_0001>
module attributes {stable_mosaic.version = 11 : i64} {
  func.func @_encoder_block_kernel(%arg0: i32, %arg1: memref<1x16x16x4xf32, #tpu.memory_space<vmem>>, %arg2: memref<36x8xbf16, #tpu.memory_space<vmem>>, %arg3: memref<1x8xf32, #tpu.memory_space<vmem>>, %arg4: memref<72x8xbf16, #tpu.memory_space<vmem>>, %arg5: memref<1x8xf32, #tpu.memory_space<vmem>>, %arg6: memref<108x8xbf16, #tpu.memory_space<vmem>>, %arg7: memref<1x8xf32, #tpu.memory_space<vmem>>, %arg8: memref<1x8x64xf32, #tpu.memory_space<vmem>>, %arg9: memref<18x18x12xbf16, #tpu.memory_space<vmem>>, %arg10: memref<18x18x8xbf16, #tpu.memory_space<vmem>>) attributes {dimension_semantics = [#tpu.dimension_semantics<parallel>], iteration_bounds = array<i64: 2>, scalar_prefetch = 0 : i64, scratch_operands = 2 : i64, tpu.core_type = #tpu.core_type<tc>, window_params = [{transform_indices = @transform_0, window_bounds = array<i64: 1, 16, 16, 4>}, {pipeline_mode = #tpu.pipeline_mode<synchronous>, transform_indices = @transform_1, window_bounds = array<i64: 36, 8>}, {pipeline_mode = #tpu.pipeline_mode<synchronous>, transform_indices = @transform_2, window_bounds = array<i64: 1, 8>}, {pipeline_mode = #tpu.pipeline_mode<synchronous>, transform_indices = @transform_3, window_bounds = array<i64: 72, 8>}, {pipeline_mode = #tpu.pipeline_mode<synchronous>, transform_indices = @transform_4, window_bounds = array<i64: 1, 8>}, {pipeline_mode = #tpu.pipeline_mode<synchronous>, transform_indices = @transform_5, window_bounds = array<i64: 108, 8>}, {pipeline_mode = #tpu.pipeline_mode<synchronous>, transform_indices = @transform_6, window_bounds = array<i64: 1, 8>}, {transform_indices = @transform_7, window_bounds = array<i64: 1, 8, 64>}]} {
    %cst = arith.constant 0.000000e+00 : bf16
    %0 = vector.broadcast %cst : bf16 to vector<1x18x12xbf16>
    %c0 = arith.constant 0 : index
    %c0_0 = arith.constant 0 : index
    %c0_1 = arith.constant 0 : index
    %1 = vector.load %arg9[%c0, %c0_0, %c0_1] : memref<18x18x12xbf16, #tpu.memory_space<vmem>>, vector<1x18x12xbf16>
    tpu.vector_store %arg9[%c0, %c0_0, %c0_1], %0 {strides = array<i32>} : memref<18x18x12xbf16, #tpu.memory_space<vmem>>, vector<1x18x12xbf16>,
    %cst_2 = arith.constant 0.000000e+00 : bf16
    %2 = vector.broadcast %cst_2 : bf16 to vector<1x18x12xbf16>
    %c17 = arith.constant 17 : index
    %c0_3 = arith.constant 0 : index
    %c0_4 = arith.constant 0 : index
    %3 = vector.load %arg9[%c17, %c0_3, %c0_4] : memref<18x18x12xbf16, #tpu.memory_space<vmem>>, vector<1x18x12xbf16>
    tpu.vector_store %arg9[%c17, %c0_3, %c0_4], %2 {strides = array<i32>} : memref<18x18x12xbf16, #tpu.memory_space<vmem>>, vector<1x18x12xbf16>,
    %cst_5 = arith.constant 0.000000e+00 : bf16
    %4 = vector.broadcast %cst_5 : bf16 to vector<18x1x12xbf16>
    %c0_6 = arith.constant 0 : index
    %c0_7 = arith.constant 0 : index
    %c0_8 = arith.constant 0 : index
    %5 = vector.load %arg9[%c0_6, %c0_7, %c0_8] : memref<18x18x12xbf16, #tpu.memory_space<vmem>>, vector<18x1x12xbf16>
    tpu.vector_store %arg9[%c0_6, %c0_7, %c0_8], %4 {strides = array<i32>} : memref<18x18x12xbf16, #tpu.memory_space<vmem>>, vector<18x1x12xbf16>,
    %cst_9 = arith.constant 0.000000e+00 : bf16
    %6 = vector.broadcast %cst_9 : bf16 to vector<18x1x12xbf16>
    %c0_10 = arith.constant 0 : index
    %c17_11 = arith.constant 17 : index
    %c0_12 = arith.constant 0 : index
    %7 = vector.load %arg9[%c0_10, %c17_11, %c0_12] : memref<18x18x12xbf16, #tpu.memory_space<vmem>>, vector<18x1x12xbf16>
    tpu.vector_store %arg9[%c0_10, %c17_11, %c0_12], %6 {strides = array<i32>} : memref<18x18x12xbf16, #tpu.memory_space<vmem>>, vector<18x1x12xbf16>,
    %cst_13 = arith.constant 0.000000e+00 : bf16
    %8 = vector.broadcast %cst_13 : bf16 to vector<1x18x8xbf16>
    %c0_14 = arith.constant 0 : index
    %c0_15 = arith.constant 0 : index
    %c0_16 = arith.constant 0 : index
    %9 = vector.load %arg10[%c0_14, %c0_15, %c0_16] : memref<18x18x8xbf16, #tpu.memory_space<vmem>>, vector<1x18x8xbf16>
    tpu.vector_store %arg10[%c0_14, %c0_15, %c0_16], %8 {strides = array<i32>} : memref<18x18x8xbf16, #tpu.memory_space<vmem>>, vector<1x18x8xbf16>,
    %cst_17 = arith.constant 0.000000e+00 : bf16
    %10 = vector.broadcast %cst_17 : bf16 to vector<1x18x8xbf16>
    %c17_18 = arith.constant 17 : index
    %c0_19 = arith.constant 0 : index
    %c0_20 = arith.constant 0 : index
    %11 = vector.load %arg10[%c17_18, %c0_19, %c0_20] : memref<18x18x8xbf16, #tpu.memory_space<vmem>>, vector<1x18x8xbf16>
    tpu.vector_store %arg10[%c17_18, %c0_19, %c0_20], %10 {strides = array<i32>} : memref<18x18x8xbf16, #tpu.memory_space<vmem>>, vector<1x18x8xbf16>,
    %cst_21 = arith.constant 0.000000e+00 : bf16
    %12 = vector.broadcast %cst_21 : bf16 to vector<18x1x8xbf16>
    %c0_22 = arith.constant 0 : index
    %c0_23 = arith.constant 0 : index
    %c0_24 = arith.constant 0 : index
    %13 = vector.load %arg10[%c0_22, %c0_23, %c0_24] : memref<18x18x8xbf16, #tpu.memory_space<vmem>>, vector<18x1x8xbf16>
    tpu.vector_store %arg10[%c0_22, %c0_23, %c0_24], %12 {strides = array<i32>} : memref<18x18x8xbf16, #tpu.memory_space<vmem>>, vector<18x1x8xbf16>,
    %cst_25 = arith.constant 0.000000e+00 : bf16
    %14 = vector.broadcast %cst_25 : bf16 to vector<18x1x8xbf16>
    %c0_26 = arith.constant 0 : index
    %c17_27 = arith.constant 17 : index
    %c0_28 = arith.constant 0 : index
    %15 = vector.load %arg10[%c0_26, %c17_27, %c0_28] : memref<18x18x8xbf16, #tpu.memory_space<vmem>>, vector<18x1x8xbf16>
    tpu.vector_store %arg10[%c0_26, %c17_27, %c0_28], %14 {strides = array<i32>} : memref<18x18x8xbf16, #tpu.memory_space<vmem>>, vector<18x1x8xbf16>,
    %c0_29 = arith.constant 0 : index
    %c0_30 = arith.constant 0 : index
    %c0_31 = arith.constant 0 : index
    %c0_32 = arith.constant 0 : index
    %16 = vector.load %arg1[%c0_29, %c0_30, %c0_31, %c0_32] : memref<1x16x16x4xf32, #tpu.memory_space<vmem>>, vector<1x16x16x4xf32>
    %17 = vector.shape_cast %16 : vector<1x16x16x4xf32> to vector<16x16x4xf32>
    %18 = arith.truncf %17 : vector<16x16x4xf32> to vector<16x16x4xbf16>
    %c1 = arith.constant 1 : index
    %c1_33 = arith.constant 1 : index
    %c0_34 = arith.constant 0 : index
    %19 = vector.load %arg9[%c1, %c1_33, %c0_34] : memref<18x18x12xbf16, #tpu.memory_space<vmem>>, vector<16x16x4xbf16>
    tpu.vector_store %arg9[%c1, %c1_33, %c0_34], %18 {strides = array<i32>} : memref<18x18x12xbf16, #tpu.memory_space<vmem>>, vector<16x16x4xbf16>,
    %c0_35 = arith.constant 0 : index
    %c0_36 = arith.constant 0 : index
    %c0_37 = arith.constant 0 : index
    %20 = vector.load %arg9[%c0_35, %c0_36, %c0_37] : memref<18x18x12xbf16, #tpu.memory_space<vmem>>, vector<18x18x4xbf16>
    %21 = vector.extract_strided_slice %20 {offsets = [0, 0, 0], sizes = [16, 16, 4], strides = [1, 1, 1]} : vector<18x18x4xbf16> to vector<16x16x4xbf16>
    %22 = vector.shape_cast %21 : vector<16x16x4xbf16> to vector<256x4xbf16>
    %23 = vector.extract_strided_slice %20 {offsets = [0, 1, 0], sizes = [16, 16, 4], strides = [1, 1, 1]} : vector<18x18x4xbf16> to vector<16x16x4xbf16>
    %24 = vector.shape_cast %23 : vector<16x16x4xbf16> to vector<256x4xbf16>
    %25 = vector.extract_strided_slice %20 {offsets = [0, 2, 0], sizes = [16, 16, 4], strides = [1, 1, 1]} : vector<18x18x4xbf16> to vector<16x16x4xbf16>
    %26 = vector.shape_cast %25 : vector<16x16x4xbf16> to vector<256x4xbf16>
    %27 = vector.extract_strided_slice %20 {offsets = [1, 0, 0], sizes = [16, 16, 4], strides = [1, 1, 1]} : vector<18x18x4xbf16> to vector<16x16x4xbf16>
    %28 = vector.shape_cast %27 : vector<16x16x4xbf16> to vector<256x4xbf16>
    %29 = vector.extract_strided_slice %20 {offsets = [1, 1, 0], sizes = [16, 16, 4], strides = [1, 1, 1]} : vector<18x18x4xbf16> to vector<16x16x4xbf16>
    %30 = vector.shape_cast %29 : vector<16x16x4xbf16> to vector<256x4xbf16>
    %31 = vector.extract_strided_slice %20 {offsets = [1, 2, 0], sizes = [16, 16, 4], strides = [1, 1, 1]} : vector<18x18x4xbf16> to vector<16x16x4xbf16>
    %32 = vector.shape_cast %31 : vector<16x16x4xbf16> to vector<256x4xbf16>
    %33 = vector.extract_strided_slice %20 {offsets = [2, 0, 0], sizes = [16, 16, 4], strides = [1, 1, 1]} : vector<18x18x4xbf16> to vector<16x16x4xbf16>
    %34 = vector.shape_cast %33 : vector<16x16x4xbf16> to vector<256x4xbf16>
    %35 = vector.extract_strided_slice %20 {offsets = [2, 1, 0], sizes = [16, 16, 4], strides = [1, 1, 1]} : vector<18x18x4xbf16> to vector<16x16x4xbf16>
    %36 = vector.shape_cast %35 : vector<16x16x4xbf16> to vector<256x4xbf16>
    %37 = vector.extract_strided_slice %20 {offsets = [2, 2, 0], sizes = [16, 16, 4], strides = [1, 1, 1]} : vector<18x18x4xbf16> to vector<16x16x4xbf16>
    %38 = vector.shape_cast %37 : vector<16x16x4xbf16> to vector<256x4xbf16>
    %39 = tpu.concatenate %22, %24, %26, %28, %30, %32, %34, %36, %38 in 1 : vector<256x4xbf16>, vector<256x4xbf16>, vector<256x4xbf16>, vector<256x4xbf16>, vector<256x4xbf16>, vector<256x4xbf16>, vector<256x4xbf16>, vector<256x4xbf16>, vector<256x4xbf16> -> vector<256x36xbf16>
    %c0_38 = arith.constant 0 : index
    %c0_39 = arith.constant 0 : index
    %40 = vector.load %arg2[%c0_38, %c0_39] : memref<36x8xbf16, #tpu.memory_space<vmem>>, vector<36x8xbf16>
    %cst_40 = arith.constant dense<0.000000e+00> : vector<256x8xf32>
    %41 = tpu.matmul %39, %40, %cst_40 {dimension_numbers = #tpu.dot_dimension_numbers<[1], [0], [0], [1], [0, 0, 1, 1], [], []>} : vector<256x36xbf16>, vector<36x8xbf16>, vector<256x8xf32> -> vector<256x8xf32>
    %c0_41 = arith.constant 0 : index
    %c0_42 = arith.constant 0 : index
    %42 = vector.load %arg3[%c0_41, %c0_42] : memref<1x8xf32, #tpu.memory_space<vmem>>, vector<1x8xf32>
    %43 = vector.broadcast %42 : vector<1x8xf32> to vector<256x8xf32>
    %44 = arith.addf %41, %43 : vector<256x8xf32>
    %cst_43 = arith.constant 0.00999999977 : f32
    %45 = vector.broadcast %cst_43 : f32 to vector<256x8xf32>
    %46 = arith.mulf %45, %44 : vector<256x8xf32>
    %47 = arith.maximumf %44, %46 : vector<256x8xf32>
    %48 = arith.truncf %47 : vector<256x8xf32> to vector<256x8xbf16>
    %49 = vector.shape_cast %48 : vector<256x8xbf16> to vector<16x16x8xbf16>
    %c1_44 = arith.constant 1 : index
    %c1_45 = arith.constant 1 : index
    %c0_46 = arith.constant 0 : index
    %50 = vector.load %arg10[%c1_44, %c1_45, %c0_46] : memref<18x18x8xbf16, #tpu.memory_space<vmem>>, vector<16x16x8xbf16>
    tpu.vector_store %arg10[%c1_44, %c1_45, %c0_46], %49 {strides = array<i32>} : memref<18x18x8xbf16, #tpu.memory_space<vmem>>, vector<16x16x8xbf16>,
    %c0_47 = arith.constant 0 : index
    %c0_48 = arith.constant 0 : index
    %c0_49 = arith.constant 0 : index
    %51 = vector.load %arg10[%c0_47, %c0_48, %c0_49] : memref<18x18x8xbf16, #tpu.memory_space<vmem>>, vector<18x18x8xbf16>
    %52 = vector.extract_strided_slice %51 {offsets = [0, 0, 0], sizes = [16, 16, 8], strides = [1, 1, 1]} : vector<18x18x8xbf16> to vector<16x16x8xbf16>
    %53 = vector.shape_cast %52 : vector<16x16x8xbf16> to vector<256x8xbf16>
    %54 = vector.extract_strided_slice %51 {offsets = [0, 1, 0], sizes = [16, 16, 8], strides = [1, 1, 1]} : vector<18x18x8xbf16> to vector<16x16x8xbf16>
    %55 = vector.shape_cast %54 : vector<16x16x8xbf16> to vector<256x8xbf16>
    %56 = vector.extract_strided_slice %51 {offsets = [0, 2, 0], sizes = [16, 16, 8], strides = [1, 1, 1]} : vector<18x18x8xbf16> to vector<16x16x8xbf16>
    %57 = vector.shape_cast %56 : vector<16x16x8xbf16> to vector<256x8xbf16>
    %58 = vector.extract_strided_slice %51 {offsets = [1, 0, 0], sizes = [16, 16, 8], strides = [1, 1, 1]} : vector<18x18x8xbf16> to vector<16x16x8xbf16>
    %59 = vector.shape_cast %58 : vector<16x16x8xbf16> to vector<256x8xbf16>
    %60 = vector.extract_strided_slice %51 {offsets = [1, 1, 0], sizes = [16, 16, 8], strides = [1, 1, 1]} : vector<18x18x8xbf16> to vector<16x16x8xbf16>
    %61 = vector.shape_cast %60 : vector<16x16x8xbf16> to vector<256x8xbf16>
    %62 = vector.extract_strided_slice %51 {offsets = [1, 2, 0], sizes = [16, 16, 8], strides = [1, 1, 1]} : vector<18x18x8xbf16> to vector<16x16x8xbf16>
    %63 = vector.shape_cast %62 : vector<16x16x8xbf16> to vector<256x8xbf16>
    %64 = vector.extract_strided_slice %51 {offsets = [2, 0, 0], sizes = [16, 16, 8], strides = [1, 1, 1]} : vector<18x18x8xbf16> to vector<16x16x8xbf16>
    %65 = vector.shape_cast %64 : vector<16x16x8xbf16> to vector<256x8xbf16>
    %66 = vector.extract_strided_slice %51 {offsets = [2, 1, 0], sizes = [16, 16, 8], strides = [1, 1, 1]} : vector<18x18x8xbf16> to vector<16x16x8xbf16>
    %67 = vector.shape_cast %66 : vector<16x16x8xbf16> to vector<256x8xbf16>
    %68 = vector.extract_strided_slice %51 {offsets = [2, 2, 0], sizes = [16, 16, 8], strides = [1, 1, 1]} : vector<18x18x8xbf16> to vector<16x16x8xbf16>
    %69 = vector.shape_cast %68 : vector<16x16x8xbf16> to vector<256x8xbf16>
    %70 = tpu.concatenate %53, %55, %57, %59, %61, %63, %65, %67, %69 in 1 : vector<256x8xbf16>, vector<256x8xbf16>, vector<256x8xbf16>, vector<256x8xbf16>, vector<256x8xbf16>, vector<256x8xbf16>, vector<256x8xbf16>, vector<256x8xbf16>, vector<256x8xbf16> -> vector<256x72xbf16>
    %c0_50 = arith.constant 0 : index
    %c0_51 = arith.constant 0 : index
    %71 = vector.load %arg4[%c0_50, %c0_51] : memref<72x8xbf16, #tpu.memory_space<vmem>>, vector<72x8xbf16>
    %cst_52 = arith.constant dense<0.000000e+00> : vector<256x8xf32>
    %72 = tpu.matmul %70, %71, %cst_52 {dimension_numbers = #tpu.dot_dimension_numbers<[1], [0], [0], [1], [0, 0, 1, 1], [], []>} : vector<256x72xbf16>, vector<72x8xbf16>, vector<256x8xf32> -> vector<256x8xf32>
    %c0_53 = arith.constant 0 : index
    %c0_54 = arith.constant 0 : index
    %73 = vector.load %arg5[%c0_53, %c0_54] : memref<1x8xf32, #tpu.memory_space<vmem>>, vector<1x8xf32>
    %74 = vector.broadcast %73 : vector<1x8xf32> to vector<256x8xf32>
    %75 = arith.addf %72, %74 : vector<256x8xf32>
    %cst_55 = arith.constant 0.00999999977 : f32
    %76 = vector.broadcast %cst_55 : f32 to vector<256x8xf32>
    %77 = arith.mulf %76, %75 : vector<256x8xf32>
    %78 = arith.maximumf %75, %77 : vector<256x8xf32>
    %79 = arith.truncf %78 : vector<256x8xf32> to vector<256x8xbf16>
    %80 = vector.shape_cast %79 : vector<256x8xbf16> to vector<16x16x8xbf16>
    %c1_56 = arith.constant 1 : index
    %c1_57 = arith.constant 1 : index
    %c4 = arith.constant 4 : index
    %81 = vector.load %arg9[%c1_56, %c1_57, %c4] : memref<18x18x12xbf16, #tpu.memory_space<vmem>>, vector<16x16x8xbf16>
    tpu.vector_store %arg9[%c1_56, %c1_57, %c4], %80 {strides = array<i32>} : memref<18x18x12xbf16, #tpu.memory_space<vmem>>, vector<16x16x8xbf16>,
    %c0_58 = arith.constant 0 : index
    %c0_59 = arith.constant 0 : index
    %c0_60 = arith.constant 0 : index
    %82 = vector.load %arg9[%c0_58, %c0_59, %c0_60] : memref<18x18x12xbf16, #tpu.memory_space<vmem>>, vector<18x18x12xbf16>
    %83 = vector.extract_strided_slice %82 {offsets = [0, 0, 0], sizes = [16, 16, 12], strides = [1, 1, 1]} : vector<18x18x12xbf16> to vector<16x16x12xbf16>
    %84 = vector.shape_cast %83 : vector<16x16x12xbf16> to vector<256x12xbf16>
    %85 = vector.extract_strided_slice %82 {offsets = [0, 1, 0], sizes = [16, 16, 12], strides = [1, 1, 1]} : vector<18x18x12xbf16> to vector<16x16x12xbf16>
    %86 = vector.shape_cast %85 : vector<16x16x12xbf16> to vector<256x12xbf16>
    %87 = vector.extract_strided_slice %82 {offsets = [0, 2, 0], sizes = [16, 16, 12], strides = [1, 1, 1]} : vector<18x18x12xbf16> to vector<16x16x12xbf16>
    %88 = vector.shape_cast %87 : vector<16x16x12xbf16> to vector<256x12xbf16>
    %89 = vector.extract_strided_slice %82 {offsets = [1, 0, 0], sizes = [16, 16, 12], strides = [1, 1, 1]} : vector<18x18x12xbf16> to vector<16x16x12xbf16>
    %90 = vector.shape_cast %89 : vector<16x16x12xbf16> to vector<256x12xbf16>
    %91 = vector.extract_strided_slice %82 {offsets = [1, 1, 0], sizes = [16, 16, 12], strides = [1, 1, 1]} : vector<18x18x12xbf16> to vector<16x16x12xbf16>
    %92 = vector.shape_cast %91 : vector<16x16x12xbf16> to vector<256x12xbf16>
    %93 = vector.extract_strided_slice %82 {offsets = [1, 2, 0], sizes = [16, 16, 12], strides = [1, 1, 1]} : vector<18x18x12xbf16> to vector<16x16x12xbf16>
    %94 = vector.shape_cast %93 : vector<16x16x12xbf16> to vector<256x12xbf16>
    %95 = vector.extract_strided_slice %82 {offsets = [2, 0, 0], sizes = [16, 16, 12], strides = [1, 1, 1]} : vector<18x18x12xbf16> to vector<16x16x12xbf16>
    %96 = vector.shape_cast %95 : vector<16x16x12xbf16> to vector<256x12xbf16>
    %97 = vector.extract_strided_slice %82 {offsets = [2, 1, 0], sizes = [16, 16, 12], strides = [1, 1, 1]} : vector<18x18x12xbf16> to vector<16x16x12xbf16>
    %98 = vector.shape_cast %97 : vector<16x16x12xbf16> to vector<256x12xbf16>
    %99 = vector.extract_strided_slice %82 {offsets = [2, 2, 0], sizes = [16, 16, 12], strides = [1, 1, 1]} : vector<18x18x12xbf16> to vector<16x16x12xbf16>
    %100 = vector.shape_cast %99 : vector<16x16x12xbf16> to vector<256x12xbf16>
    %101 = tpu.concatenate %84, %86, %88, %90, %92, %94, %96, %98, %100 in 1 : vector<256x12xbf16>, vector<256x12xbf16>, vector<256x12xbf16>, vector<256x12xbf16>, vector<256x12xbf16>, vector<256x12xbf16>, vector<256x12xbf16>, vector<256x12xbf16>, vector<256x12xbf16> -> vector<256x108xbf16>
    %c0_61 = arith.constant 0 : index
    %c0_62 = arith.constant 0 : index
    %102 = vector.load %arg6[%c0_61, %c0_62] : memref<108x8xbf16, #tpu.memory_space<vmem>>, vector<108x8xbf16>
    %cst_63 = arith.constant dense<0.000000e+00> : vector<256x8xf32>
    %103 = tpu.matmul %101, %102, %cst_63 {dimension_numbers = #tpu.dot_dimension_numbers<[1], [0], [0], [1], [0, 0, 1, 1], [], []>} : vector<256x108xbf16>, vector<108x8xbf16>, vector<256x8xf32> -> vector<256x8xf32>
    %c0_64 = arith.constant 0 : index
    %c0_65 = arith.constant 0 : index
    %104 = vector.load %arg7[%c0_64, %c0_65] : memref<1x8xf32, #tpu.memory_space<vmem>>, vector<1x8xf32>
    %105 = vector.broadcast %104 : vector<1x8xf32> to vector<256x8xf32>
    %106 = arith.addf %103, %105 : vector<256x8xf32>
    %107 = vector.shape_cast %106 : vector<256x8xf32> to vector<8x2x16x8xf32>
    %cst_66 = arith.constant dense<0xFF800000> : vector<8x16x8xf32>
    %108 = vector.multi_reduction <maximumf>, %107, %cst_66 [1] : vector<8x2x16x8xf32> to vector<8x16x8xf32>
    %109 = vector.shape_cast %108 : vector<8x16x8xf32> to vector<8x8x2x8xf32>
    %cst_67 = arith.constant dense<0xFF800000> : vector<8x8x8xf32>
    %110 = vector.multi_reduction <maximumf>, %109, %cst_67 [2] : vector<8x8x2x8xf32> to vector<8x8x8xf32>
    %cst_68 = arith.constant 0.00999999977 : f32
    %111 = vector.broadcast %cst_68 : f32 to vector<8x8x8xf32>
    %112 = arith.mulf %111, %110 : vector<8x8x8xf32>
    %113 = arith.maximumf %110, %112 : vector<8x8x8xf32>
    %114 = vector.shape_cast %113 : vector<8x8x8xf32> to vector<8x64xf32>
    %c0_69 = arith.constant 0 : index
    %c0_70 = arith.constant 0 : index
    %c0_71 = arith.constant 0 : index
    %115 = vector.load %arg8[%c0_69, %c0_70, %c0_71] : memref<1x8x64xf32, #tpu.memory_space<vmem>>, vector<1x8x64xf32>
    %116 = vector.shape_cast %115 : vector<1x8x64xf32> to vector<8x64xf32>
    %117 = vector.shape_cast %114 : vector<8x64xf32> to vector<1x8x64xf32>
    tpu.vector_store %arg8[%c0_69, %c0_70, %c0_71], %117 {strides = array<i32>} : memref<1x8x64xf32, #tpu.memory_space<vmem>>, vector<1x8x64xf32>,
    return
  }
  func.func @transform_0(%arg0: i32) -> (i32, i32, i32, i32) {
    %c0_i32 = arith.constant 0 : i32
    %c0_i32_0 = arith.constant 0 : i32
    %c0_i32_1 = arith.constant 0 : i32
    %c0_i32_2 = arith.constant 0 : i32
    return %arg0, %c0_i32, %c0_i32_0, %c0_i32_1 : i32, i32, i32, i32
  }
  func.func @transform_1(%arg0: i32) -> (i32, i32) {
    %c0_i32 = arith.constant 0 : i32
    %c0_i32_0 = arith.constant 0 : i32
    %c0_i32_1 = arith.constant 0 : i32
    return %c0_i32, %c0_i32_0 : i32, i32
  }
  func.func @transform_2(%arg0: i32) -> (i32, i32) {
    %c0_i32 = arith.constant 0 : i32
    %c0_i32_0 = arith.constant 0 : i32
    %c0_i32_1 = arith.constant 0 : i32
    return %c0_i32, %c0_i32_0 : i32, i32
  }
  func.func @transform_3(%arg0: i32) -> (i32, i32) {
    %c0_i32 = arith.constant 0 : i32
    %c0_i32_0 = arith.constant 0 : i32
    %c0_i32_1 = arith.constant 0 : i32
    return %c0_i32, %c0_i32_0 : i32, i32
  }
  func.func @transform_4(%arg0: i32) -> (i32, i32) {
    %c0_i32 = arith.constant 0 : i32
    %c0_i32_0 = arith.constant 0 : i32
    %c0_i32_1 = arith.constant 0 : i32
    return %c0_i32, %c0_i32_0 : i32, i32
  }
  func.func @transform_5(%arg0: i32) -> (i32, i32) {
    %c0_i32 = arith.constant 0 : i32
    %c0_i32_0 = arith.constant 0 : i32
    %c0_i32_1 = arith.constant 0 : i32
    return %c0_i32, %c0_i32_0 : i32, i32
  }
  func.func @transform_6(%arg0: i32) -> (i32, i32) {
    %c0_i32 = arith.constant 0 : i32
    %c0_i32_0 = arith.constant 0 : i32
    %c0_i32_1 = arith.constant 0 : i32
    return %c0_i32, %c0_i32_0 : i32, i32
  }
  func.func @transform_7(%arg0: i32) -> (i32, i32, i32) {
    %c0_i32 = arith.constant 0 : i32
    %c0_i32_0 = arith.constant 0 : i32
    %c0_i32_1 = arith.constant 0 : i32
    return %arg0, %c0_i32, %c0_i32_0 : i32, i32, i32
  }
}

</mosaic_0001>

<bundles_post_ra>
// kernel: tpu_custom_call.1
= control target key start
LH: loop header
LB: loop body
LE: loop exit
PB: predicated region body
PF: predicated region fallthrough
CT: control target
= control target key end

     0   :  { %12 = vsyncpa [#allocation5], 0  ;;  %s13062_s0 = inlined_call_operand.vmem [shape: f32[2,16,16,4], index: 0, kind: input, shape index: {}]   ;;  %s13063_s1 = inlined_call_operand.vmem [shape: bf16[36,8], index: 1, kind: input, shape index: {}]   ;;  %s13064_s2 = inlined_call_operand.vmem [shape: f32[1,8], index: 2, kind: input, shape index: {}]   ;;  %s13065_s3 = inlined_call_operand.vmem [shape: bf16[72,8], index: 3, kind: input, shape index: {}]   ;;  %s13066_s4 = inlined_call_operand.vmem [shape: f32[1,8], index: 4, kind: input, shape index: {}]   ;;  %s13067_s5 = inlined_call_operand.vmem [shape: bf16[108,8], index: 5, kind: input, shape index: {}]   ;;  %s13068_s6 = inlined_call_operand.vmem [shape: f32[1,8], index: 6, kind: input, shape index: {}]   ;;  %s13069_s7 = inlined_call_operand.hbm [shape: f32[2,8,64], index: 7, kind: output, shape index: {}]  }
   0x1   :  { %14 = vsyncpa [#allocation5 + $0x1], 0  ;;  %s8563_s24 = smov 0   ;;  %s8565_s25 = smov 0  }
   0x2   :  { %s8567_s26 = smov 0   ;;  %s8569_s27 = smov 0  }
   0x3 LB: > { %s8584_s28 = sadd.s32 4294967295, %s8501_s27   ;;  %s7870_s29 = sadd.s32 4294967294, %s8501_s27   ;;  %s8501_s27 = sphi %s8569_s27, %s13511_s27   ;;  %s8497_s26 = sphi %s8567_s26, %s13510_s26   ;;  %s8493_s25 = sphi %s8565_s25, %s13509_s25   ;;  %s8489_s24 = sphi %s8563_s24, %s13508_s24  }
   0x4   : > { %s8588_s30 = sadd.s32 1, %s8501_s27   ;;  %s179_s8 = sadd.s32 1, %s8497_s26 }
   0x5   : > { %s176_s9 = ssub.s32 %s8501_s27, %s8588_s30  ;;  %p189_p0 = scmp.ne.s32.totalorder %s8497_s26, %s8493_s25 }
   0x6   : > { %p177_p1 = scmp.eq.s32.totalorder %s176_s9, 0  ;;  %p190_p2 = scmp.eq.s32.totalorder %s8584_s28, 1 }
   0x7   : > { %p195_p3 = scmp.ne.s32.totalorder %s8493_s25, %s8489_s24  ;;  %p196_p4 = scmp.eq.s32.totalorder %s7870_s29, 1 }
   0x8   : > { %s8599_s10 = scalar_select %p177_p1, %s8497_s26, %s179_s8  }
   0x9   : > { %p8601_p5 = por %p190_p2, %p189_p0  ;;  %p8605_p6 = por %p196_p4, %p195_p3 }
   0xa   : > { %p7873_p7 = scmp.ge.s32.totalorder %s8501_s27, 1  ;;  %p240_p8 = scmp.lt.s32.totalorder %s8501_s27, 3 }
   0xc   : > { %p241_p9 = pnand %p7873_p7, %p240_p8 }
   0xe   : > { %244 = sbr.rel (%p241_p9) target bundleno = 2211 (0x8a3), region = 48 }
  0x13   : > { %vm278_vm0 = vcmask 93184   ;;  %vm281_vm1 = vcmask 90112   ;;  %v8503_v0 = vmov 0   ;;  %vm403_vm2 = vcmask 57344   ;;  %p272_p10 = scmp.lt.s32.totalorder %s8584_s28, 1  ;;  %s8504_s18 = smov 4  }
  0x14   : > { %279 = vst.msk [vmem:[#allocation2] sm:$0xf] %vm278_vm0, %v8503_v0  ;;  %vm13115_vm3 = vsmask.f32 256  ;;  %vm344_vm4 = vsmask.f32 7938 }
  0x15   : > { %280 = vst.msk [vmem:[#allocation2 + $0x4] sm:$0xf] %vm278_vm0, %v8503_v0  ;;  %vm8614_vm5 = vmand %vm403_vm2, %vm13115_vm3  ;;  %v13147_v1 = vmov 0  ;;  %v13150_v2 = vmov 0  ;;  %vm400_vm8 = vcmask 60416   ;;  %s273_s13 = scalar_select %p272_p10, %s8584_s28, 1 }
  0x16   : > { %282 = vst.msk [vmem:[#allocation2 + $0x8] sm:$0x1] %vm281_vm1, %v8503_v0  ;;  %v13148_v1 = vsel %vm8614_vm5, 4294967295, %v13147_v1  ;;  %vm8620_vm6 = vmand %vm403_vm2, %vm344_vm4  ;;  %v302_v4 = vld [vmem:[#allocation2 + $0x30] sm:$0x1]  ;;  %vm907_vm11 = vcmask 27648  }
  0x17   : > { %13149 = vst [vmem:[#allocation7_spill] sm:$0xff] %v13148_v1  ;;  %v13151_v2 = vsel %vm8620_vm6, 4294967295, %v13150_v2  ;;  %vm8627_vm7 = vmand %vm281_vm1, %vm13115_vm3  ;;  %vm584_vm9 = vsmask.f32 4368  ;;  %v358_v5 = vld [vmem:[#allocation2 + $0x38] sm:$0x1] }
  0x18   : > { %13152 = vst [vmem:[#allocation8_spill] sm:$0xff] %v13151_v2  ;;  %vm8636_vm10 = vmand %vm281_vm1, %vm344_vm4  ;;  %s8251_s14 = sshll.u32 %s273_s13, 8  ;;  %v296_v8 = vld [vmem:[#allocation2 + $0x18] sm:$0x1]  ;;  %v352_v9 = vld [vmem:[#allocation2 + $0x20] sm:$0x1] }
  0x19   : > { %284 = vst.msk [vmem:[#allocation2 + $0xcc] sm:$0xf] %vm278_vm0, %v8503_v0  ;;  %vm914_vm12 = vcmask 24576   ;;  %s8647_s17 = scalar_lea.vmem %s13062_s0, %s8251_s14  ;;  %v303_v12 = vsel %vm8627_vm7, 0, %v302_v4  ;;  %vm1078_vm13 = vsmask.f32 3328  ;;  %vm8678_vm15 = vmor %vm13115_vm3, %vm584_vm9 }
  0x1a   : > { %285 = vst.msk [vmem:[#allocation2 + $0xd0] sm:$0xf] %vm278_vm0, %v8503_v0  ;;  %vm1079_vm14 = vsmask.f32 7440  ;;  %v359_v17 = vsel %vm8636_vm10, 0, %v358_v5  ;;  %v526_v18 = vld [vmem:[%s8647_s17 + $0x30] sm:$0xff]  ;;  %vm8684_vm0 = vmand %vm907_vm11, %vm344_vm4 }
  0x1b   : > { %286 = vst.msk [vmem:[#allocation2 + $0xd4] sm:$0x1] %vm281_vm1, %v8503_v0  ;;  %v290_v6 = vld [vmem:[#allocation2] sm:$0x1]  ;;  %v527_v19 = vld [vmem:[%s8647_s17 + $0x38] sm:$0xff]  ;;  %v558_v22 = vpack.c.bf16 %v526_v18, %v526_v18  ;;  %v522_v24 = vld [vmem:[%s8647_s17 + $0x10] sm:$0xff] }
  0x1c   : > { %401 = vst.msk [vmem:[#allocation3] sm:$0xf] %vm400_vm8, %v8503_v0  ;;  %v291_v10 = vsel %vm8627_vm7, 0, %v290_v6  ;;  %v1025_v11 = vld [vmem:[#allocation2 + $0x4] sm:$0xf]  ;;  %v559_v23 = vpack.c.bf16 %v527_v19, %v527_v19  ;;  %v523_v25 = vld [vmem:[%s8647_s17 + $0x18] sm:$0xff]  ;;  %v554_v28 = vpack.c.bf16 %v522_v24, %v522_v24  ;;  %vm8691_vm1 = vmand %vm914_vm12, %vm13115_vm3 }
  0x1d   : > { %402 = vst.msk [vmem:[#allocation3 + $0x4] sm:$0xf] %vm400_vm8, %v8503_v0  ;;  %v346_v13 = vld [vmem:[#allocation2 + $0x8] sm:$0x1]  ;;  %v1091_v14 = vshll.u32 %v1025_v11, 16  ;;  %v1095_v15 = vshrl.u32 %v1025_v11, 16  ;;  %v555_v29 = vpack.c.bf16 %v523_v25, %v523_v25 }
  0x1e   : > { %404 = vst.msk [vmem:[#allocation3 + $0x8] sm:$0x1] %vm403_vm2, %v8503_v0  ;;  %v347_v16 = vsel %vm8636_vm10, 0, %v346_v13  ;;  %v297_v26 = vsel %vm8627_vm7, 0, %v296_v8  ;;  %v353_v27 = vsel %vm8636_vm10, 0, %v352_v9  ;;  %v638_v31 = vshrl.u32 %v558_v22, 16 }
  0x1f   : > { %292 = vst [vmem:[#allocation2] sm:$0x1] %v291_v10  ;;  %v8658_v20 = vrot.slane %v1091_v14, 5  ;;  %v1097_v21 = vrot.slane %v1095_v15, 4  ;;  %v641_v32 = vshll.u32 %v558_v22, 16  ;;  %v646_v33 = vshrl.u32 %v559_v23, 16 }
  0x20   : > { %406 = vst.msk [vmem:[#allocation3 + $0xcc] sm:$0xf] %vm400_vm8, %v8503_v0  ;;  %v520_v34 = vld [vmem:[%s8647_s17] sm:$0xff]  ;;  %v649_v35 = vshll.u32 %v559_v23, 16  ;;  %v604_v36 = vshrl.u32 %v554_v28, 16  ;;  %v607_v37 = vshll.u32 %v554_v28, 16 }
  0x21   : > { %348 = vst [vmem:[#allocation2 + $0x8] sm:$0x1] %v347_v16  ;;  %v1098_v30 = vor.u32 %v1097_v21, %v8658_v20  ;;  %v612_v38 = vshrl.u32 %v555_v29, 16  ;;  %v640_v40 = vrot.slane %v638_v31, 7  ;;  %v648_v41 = vrot.slane %v646_v33, 7  ;;  %v521_v60 = vld [vmem:[%s8647_s17 + $0x8] sm:$0xff] }
  0x22   : > { %407 = vst.msk [vmem:[#allocation3 + $0xd0] sm:$0xf] %vm400_vm8, %v8503_v0  ;;  %v615_v42 = vshll.u32 %v555_v29, 16  ;;  %v8670_v43 = vld [vmem:[#allocation2 + $0xc] sm:$0x1]  ;;  %v606_v46 = vrot.slane %v604_v36, 7  ;;  %v8674_v48 = vpack.c.bf16 %v520_v34, %v520_v34  ;;  %v553_v16 = vpack.c.bf16 %v521_v60, %v521_v60 }
  0x23   : > { %408 = vst.msk [vmem:[#allocation3 + $0xd4] sm:$0x1] %vm403_vm2, %v8503_v0  ;;  %v1099_v39 = vrot.slane %v1098_v30, 4  ;;  %v8672_v44 = vld [vmem:[#allocation2 + $0x14] sm:$0x1]  ;;  %v614_v47 = vrot.slane %v612_v38, 7  ;;  %v643_v52 = vor.u32 %v641_v32, %v640_v40  ;;  %v651_v56 = vor.u32 %v649_v35, %v648_v41  ;;  %vm8698_vm2 = vmor %vm1078_vm13, %vm1079_vm14 }
  0x24   : > { %304 = vst [vmem:[#allocation2 + $0x30] sm:$0x1] %v303_v12  ;;  %v13157_v49 = vmov 0  ;;  %v644_v53 = vrot.slane %v640_v40, 4  ;;  %v653_v57 = vrot.slane %v648_v41, 4  ;;  %v609_v58 = vor.u32 %v607_v37, %v606_v46  ;;  %v528_v5 = vld [vmem:[%s8647_s17 + $0x40] sm:$0xff] }
  0x25   : > { %360 = vst [vmem:[#allocation2 + $0x38] sm:$0x1] %v359_v17  ;;  %v13158_v49 = vsel %vm8678_vm15, 4294967295, %v13157_v49  ;;  %v610_v59 = vrot.slane %v606_v46, 4  ;;  %v617_v4 = vor.u32 %v615_v42, %v614_v47  ;;  %v13164_v6 = vmov 0  ;;  %v529_v38 = vld [vmem:[%s8647_s17 + $0x48] sm:$0xff] }
  0x26   : > { %v1024_v45 = vld [vmem:[#allocation2] sm:$0xf]  ;;  %298 = vst [vmem:[#allocation2 + $0x18] sm:$0x1] %v297_v26  ;;  %v13165_v6 = vsel %vm8698_vm2, 4294967295, %v13164_v6  ;;  %v652_v8 = vsel %vm8678_vm15, %v644_v53, %v651_v56  ;;  %v619_v9 = vrot.slane %v614_v47, 4  ;;  %v8720_v24 = vpack.c.bf16 %v528_v5, %v528_v5 }
  0x27   : > { %13159 = vst [vmem:[#allocation9_spill] sm:$0xff] %v13158_v49  ;;  %v1082_v50 = vshrl.u32 %v1024_v45, 16  ;;  %v1085_v51 = vshll.u32 %v1024_v45, 16  ;;  %v294_v10 = vsel %vm8627_vm7, 0, %v8670_v43  ;;  %v350_v11 = vsel %vm8636_vm10, 0, %v8672_v44  ;;  %v524_v43 = vld [vmem:[%s8647_s17 + $0x20] sm:$0xff] }
  0x28   : > { %354 = vst [vmem:[#allocation2 + $0x20] sm:$0x1] %v353_v27  ;;  %v1026_v55 = vld [vmem:[#allocation2 + $0x8] sm:$0x1]  ;;  %v618_v15 = vsel %vm8678_vm15, %v610_v59, %v617_v4  ;;  %v305_v17 = vld [vmem:[#allocation2 + $0x3c] sm:$0x1]  ;;  %v8749_v53 = vpack.c.bf16 %v529_v38, %v529_v38 }
  0x29   : > { %v1084_v62 = vrot.slane %v1082_v50, 4  ;;  %v1087_v63 = vrot.slane %v1085_v51, 5  ;;  %v1101_v0 = vshll.u32 %v1026_v55, 16  ;;  %13166 = vst [vmem:[#allocation10_spill] sm:$0xff] %v13165_v6  ;;  %v8713_v18 = vld [vmem:[#allocation2 + $0x44] sm:$0x1] }
  0x2a   : > { %936 = vst.msk [vmem:[#allocation2 + $0x34] sm:$0xf] %vm907_vm11, %v652_v8  ;;  %v587_v22 = vshrl.u32 %v8674_v48, 16  ;;  %v590_v23 = vshll.u32 %v8674_v48, 16  ;;  %v595_v29 = vshrl.u32 %v553_v16, 16  ;;  %v598_v34 = vshll.u32 %v553_v16, 16 }
  0x2b   : > { %v1088_v12 = vor.u32 %v1087_v63, %v1084_v62  ;;  %v1103_v13 = vrot.slane %v1101_v0, 5  ;;  %v933_v14 = vld [vmem:[#allocation2 + $0x30] sm:$0xf]  ;;  %922 = vst.msk [vmem:[#allocation2 + $0x1c] sm:$0xf] %vm907_vm11, %v618_v15  ;;  %v306_v42 = vsel %vm8627_vm7, 0, %v305_v17  ;;  %v8757_v62 = vpack.c.bf16 %v524_v43, %v524_v43 }
  0x2c   : > { %v934_v19 = vsel %vm8684_vm0, %v643_v52, %v933_v14  ;;  %v937_v21 = vld [vmem:[#allocation2 + $0x38] sm:$0x1]  ;;  %v589_v33 = vrot.slane %v587_v22, 7  ;;  %v8733_v37 = vrot.slane %v595_v29, 7  ;;  %295 = vst [vmem:[#allocation2 + $0xc] sm:$0x1] %v294_v10 }
  0x2d   : > { %v1089_v25 = vrot.slane %v1088_v12, 4  ;;  %v1104_v26 = vsel %vm8698_vm2, %v1099_v39, %v1103_v13  ;;  %935 = vst [vmem:[#allocation2 + $0x30] sm:$0xf] %v934_v19  ;;  %v938_v27 = vsel %vm8691_vm1, %v653_v57, %v937_v21  ;;  %v919_v28 = vld [vmem:[#allocation2 + $0x18] sm:$0xf]  ;;  %v655_v47 = vshrl.u32 %v8720_v24, 16 }
  0x2e   : > { %v1745_v30 = vunpack.c.l.b16 %v1104_v26  ;;  %939 = vst [vmem:[#allocation2 + $0x38] sm:$0x1] %v938_v27  ;;  %v920_v31 = vsel %vm8684_vm0, %v609_v58, %v919_v28  ;;  %v8736_v39 = vld [vmem:[#allocation2 + $0x24] sm:$0x1]  ;;  %v593_v41 = vrot.slane %v589_v33, 4  ;;  %v592_v44 = vor.u32 %v590_v23, %v589_v33  ;;  %v525_v48 = vld [vmem:[%s8647_s17 + $0x28] sm:$0xff] }
  0x2f   : > { %v923_v32 = vld [vmem:[#allocation2 + $0x20] sm:$0x1]  ;;  %v1094_v35 = vsel %vm8698_vm2, %v1089_v25, %v8658_v20  ;;  %921 = vst [vmem:[#allocation2 + $0x18] sm:$0xf] %v920_v31  ;;  %v362_v20 = vsel %vm8636_vm10, 0, %v8713_v18  ;;  %v600_v45 = vor.u32 %v598_v34, %v8733_v37  ;;  %v602_v46 = vrot.slane %v8733_v37, 4 }
  0x30   : > { %v924_v36 = vsel %vm8691_vm1, %v619_v9, %v923_v32  ;;  %v1744_v40 = vunpack.c.l.b16 %v1094_v35  ;;  %v530_v50 = vld [vmem:[%s8647_s17 + $0x50] sm:$0xff]  ;;  %351 = vst [vmem:[#allocation2 + $0x14] sm:$0x1] %v350_v11  ;;  %v658_v55 = vshll.u32 %v8720_v24, 16  ;;  %v300_v56 = vsel %vm8627_vm7, 0, %v8736_v39  ;;  %s13133_s19 = smov 8  }
  0x31   : > { %925 = vst [vmem:[#allocation2 + $0x20] sm:$0x1] %v924_v36  ;;  %v1037_v52 = vld [vmem:[#allocation2 + $0x34] sm:$0xf]  ;;  %v601_v60 = vsel %vm8678_vm15, %v593_v41, %v600_v45  ;;  %v8761_v5 = vpack.c.bf16 %v525_v48, %v525_v48  ;;  %v8763_v8 = vpack.c.bf16 %v530_v50, %v530_v50  ;;  %v8765_v18 = vrot.slane %v655_v47, 7  ;;  %s8506_s20 = smov 12  }
  0x32   : > { %v1776_v51 = vpack.c.b16 %v1745_v30, %v1744_v40  ;;  %v1187_v57 = vshll.u32 %v1037_v52, 16  ;;  %v1191_v58 = vshrl.u32 %v1037_v52, 16  ;;  %v1031_v59 = vld [vmem:[#allocation2 + $0x1c] sm:$0xf]  ;;  %307 = vst [vmem:[#allocation2 + $0x3c] sm:$0x1] %v306_v42 }
  0x33   : > { %v1139_v0 = vshll.u32 %v1031_v59, 16  ;;  %v1143_v4 = vshrl.u32 %v1031_v59, 16  ;;  %913 = vst.msk [vmem:[#allocation2 + $0x10] sm:$0xf] %vm907_vm11, %v601_v60  ;;  %v909_v29 = vld [vmem:[#allocation2 + $0xc] sm:$0xf]  ;;  %v660_v43 = vor.u32 %v658_v55, %v8765_v18 }
  0x34   : > { %1792 = vrot.lane.b32.xlu0 %v1776_v51, %s8504_s18  ;;  %v1036_v63 = vld [vmem:[#allocation2 + $0x30] sm:$0xf]  ;;  %v1189_v12 = vrot.slane %v1187_v57, 5  ;;  %v1193_v13 = vrot.slane %v1191_v58, 4  ;;  %v910_v33 = vsel %vm8684_vm0, %v592_v44, %v909_v29  ;;  %363 = vst [vmem:[#allocation2 + $0x44] sm:$0x1] %v362_v20 }
  0x35   : > { %v1038_v9 = vld [vmem:[#allocation2 + $0x38] sm:$0x1]  ;;  %v1178_v10 = vshrl.u32 %v1036_v63, 16  ;;  %v1181_v11 = vshll.u32 %v1036_v63, 16  ;;  %v1141_v16 = vrot.slane %v1139_v0, 5  ;;  %v1145_v17 = vrot.slane %v1143_v4, 4 }
  0x36   : > { %v1197_v14 = vshll.u32 %v1038_v9, 16  ;;  %v1030_v15 = vld [vmem:[#allocation2 + $0x18] sm:$0xf]  ;;  %v1194_v22 = vor.u32 %v1193_v13, %v1189_v12  ;;  %911 = vst [vmem:[#allocation2 + $0xc] sm:$0xf] %v910_v33  ;;  %v661_v44 = vrot.slane %v8765_v18, 4 }
  0x37   : > { %v1180_v19 = vrot.slane %v1178_v10, 4  ;;  %v1183_v21 = vrot.slane %v1181_v11, 5  ;;  %v1130_v24 = vshrl.u32 %v1030_v15, 16  ;;  %v1133_v26 = vshll.u32 %v1030_v15, 16  ;;  %v916_v34 = vld [vmem:[#allocation2 + $0x14] sm:$0x1] }
  0x38   : > { %v1032_v23 = vld [vmem:[#allocation2 + $0x20] sm:$0x1]  ;;  %v1199_v25 = vrot.slane %v1197_v14, 5  ;;  %v1146_v27 = vor.u32 %v1145_v17, %v1141_v16  ;;  %v1195_v31 = vrot.slane %v1194_v22, 4  ;;  %v917_v38 = vsel %vm8691_vm1, %v602_v46, %v916_v34  ;;  %v355_v39 = vld [vmem:[#allocation2 + $0x2c] sm:$0x1] }
  0x39   : > { %v1149_v28 = vshll.u32 %v1032_v23, 16  ;;  %v1184_v30 = vor.u32 %v1183_v21, %v1180_v19  ;;  %v1132_v32 = vrot.slane %v1130_v24, 4  ;;  %v1135_v35 = vrot.slane %v1133_v26, 5  ;;  %918 = vst [vmem:[#allocation2 + $0x14] sm:$0x1] %v917_v38  ;;  %v531_v34 = vld [vmem:[%s8647_s17 + $0x58] sm:$0xff] }
  0x3a   : > { %v1147_v36 = vrot.slane %v1146_v27, 4  ;;  %v1200_v41 = vsel %vm8698_vm2, %v1195_v31, %v1199_v25  ;;  %v1028_v42 = vld [vmem:[#allocation2 + $0x10] sm:$0xf]  ;;  %v940_v50 = vld [vmem:[#allocation2 + $0x3c] sm:$0xf]  ;;  %v663_v57 = vshrl.u32 %v8749_v53, 16 }
  0x3b   : > { %v1151_v37 = vrot.slane %v1149_v28, 5  ;;  %v1185_v40 = vrot.slane %v1184_v30, 4  ;;  %v1753_v45 = vunpack.c.l.b16 %v1200_v41  ;;  %v1136_v20 = vor.u32 %v1135_v35, %v1132_v32  ;;  %301 = vst [vmem:[#allocation2 + $0x24] sm:$0x1] %v300_v56  ;;  %v944_v11 = vld [vmem:[#allocation2 + $0x44] sm:$0x1] }
  0x3c   : > { %v1115_v48 = vshll.u32 %v1028_v42, 16  ;;  %v1119_v52 = vshrl.u32 %v1028_v42, 16  ;;  %v666_v60 = vshll.u32 %v8749_v53, 16  ;;  %v665_v0 = vrot.slane %v663_v57, 7  ;;  %v308_v19 = vld [vmem:[#allocation2 + $0x48] sm:$0x1] }
  0x3d   : > { %v1152_v47 = vsel %vm8698_vm2, %v1147_v36, %v1151_v37  ;;  %v1190_v46 = vsel %vm8698_vm2, %v1185_v40, %v1189_v12  ;;  %v1137_v59 = vrot.slane %v1136_v20, 4  ;;  %v941_v4 = vsel %vm8684_vm0, %v660_v43, %v940_v50  ;;  %v1027_v14 = vld [vmem:[#allocation2 + $0xc] sm:$0xf]  ;;  %v364_v29 = vld [vmem:[#allocation2 + $0x50] sm:$0x1]  ;;  %v535_v57 = vld [vmem:[%s8647_s17 + $0x78] sm:$0xff] }
  0x3e   : > { %v1749_v51 = vunpack.c.l.b16 %v1152_v47  ;;  %v1752_v58 = vunpack.c.l.b16 %v1190_v46  ;;  %v8780_v55 = vrot.slane %v1115_v48, 5  ;;  %v1121_v63 = vrot.slane %v1119_v52, 4  ;;  %942 = vst [vmem:[#allocation2 + $0x3c] sm:$0xf] %v941_v4  ;;  %s8507_s21 = smov 16   ;;  %s8508_s22 = smov 20  }
  0x3f   : > { %v356_v56 = vsel %vm8636_vm10, 0, %v355_v39  ;;  %v1142_v10 = vsel %vm8698_vm2, %v1137_v59, %v1141_v16  ;;  %v621_v12 = vshrl.u32 %v8757_v62, 16  ;;  %v624_v13 = vshll.u32 %v8757_v62, 16  ;;  %s8509_s23 = smov 24   ;;  %s8510_s29 = smov 28  }
  0x40   : > { %v8787_v9 = vpack.c.b16 %v1753_v45, %v1752_v58  ;;  %v1748_v53 = vunpack.c.l.b16 %v1142_v10  ;;  %v1122_v15 = vor.u32 %v1121_v63, %v8780_v55  ;;  %v668_v17 = vor.u32 %v666_v60, %v665_v0  ;;  %357 = vst [vmem:[#allocation2 + $0x2c] sm:$0x1] %v356_v56  ;;  %v1029_v21 = vld [vmem:[#allocation2 + $0x14] sm:$0x1]  ;;  %s13131_s8 = smov 32   ;;  %s13132_s14 = smov 40  }
  0x41   : > { %v670_v18 = vrot.slane %v665_v0, 4  ;;  %v1106_v16 = vshrl.u32 %v1027_v14, 16  ;;  %v1109_v22 = vshll.u32 %v1027_v14, 16  ;;  %v623_v23 = vrot.slane %v621_v12, 7  ;;  %s8513_s15 = smov 64   ;;  %s13130_s16 = smov 56  }
  0x42   : > { %13167 = vst [vmem:[#allocation11_spill] sm:$0xff] %v8787_v9  ;;  %1800 = vrot.lane.b32.xlu2 %v8787_v9, %s8504_s18  ;;  %v629_v24 = vshrl.u32 %v8761_v5, 16  ;;  %v8797_v25 = vpack.c.b16 %v1749_v51, %v1748_v53  ;;  %v1123_v62 = vrot.slane %v1122_v15, 4  ;;  %v1125_v26 = vshll.u32 %v1029_v21, 16  ;;  %v926_v28 = vld [vmem:[#allocation2 + $0x24] sm:$0xf] }
  0x43   : > { %v669_v27 = vsel %vm8678_vm15, %v661_v44, %v668_v17  ;;  %v1108_v30 = vrot.slane %v1106_v16, 4  ;;  %v1111_v31 = vrot.slane %v1109_v22, 5  ;;  %v945_v32 = vsel %vm8691_vm1, %v670_v18, %v944_v11  ;;  %v314_v11 = vld [vmem:[#allocation2 + $0x60] sm:$0x1]  ;;  %s8516_s13 = smov 36   ;;  %s8520_s9 = smov 96  }
  0x44   : > { %13168 = vst [vmem:[#allocation12_spill] sm:$0xff] %v8797_v25  ;;  %v626_v33 = vor.u32 %v624_v13, %v623_v23  ;;  %1796 = vrot.lane.b32.xlu1 %v8797_v25, %s8504_s18  ;;  %v1127_v35 = vrot.slane %v1125_v26, 5  ;;  %v627_v36 = vrot.slane %v623_v23, 4  ;;  %v631_v37 = vrot.slane %v629_v24, 7 }
  0x45   : > { %943 = vst.msk [vmem:[#allocation2 + $0x40] sm:$0xf] %vm907_vm11, %v669_v27  ;;  %v632_v38 = vshll.u32 %v8761_v5, 16  ;;  %v1112_v39 = vor.u32 %v1111_v31, %v1108_v30  ;;  %v309_v41 = vsel %vm8627_vm7, 0, %v308_v19  ;;  %v365_v42 = vsel %vm8636_vm10, 0, %v364_v29  ;;  %v534_v5 = vld [vmem:[%s8647_s17 + $0x70] sm:$0xff] }
  0x46   : > { %946 = vst [vmem:[#allocation2 + $0x44] sm:$0x1] %v945_v32  ;;  %v927_v40 = vsel %vm8684_vm0, %v626_v33, %v926_v28  ;;  %v1128_v43 = vsel %vm8698_vm2, %v1123_v62, %v1127_v35  ;;  %v1039_v44 = vld [vmem:[#allocation2 + $0x3c] sm:$0xf]  ;;  %v636_v20 = vrot.slane %v631_v37, 4  ;;  %v563_v47 = vpack.c.bf16 %v531_v34, %v531_v34 }
  0x47   : > { %v634_v45 = vor.u32 %v632_v38, %v631_v37  ;;  %928 = vst [vmem:[#allocation2 + $0x24] sm:$0xf] %v927_v40  ;;  %v1113_v48 = vrot.slane %v1112_v39, 4  ;;  %v1747_v50 = vunpack.c.l.b16 %v1128_v43  ;;  %v1202_v46 = vshrl.u32 %v1039_v44, 16  ;;  %v930_v52 = vld [vmem:[#allocation2 + $0x2c] sm:$0x1] }
  0x48   : > { %v1205_v51 = vshll.u32 %v1039_v44, 16  ;;  %v931_v59 = vsel %vm8691_vm1, %v636_v20, %v930_v52  ;;  %310 = vst [vmem:[#allocation2 + $0x48] sm:$0x1] %v309_v41  ;;  %v672_v60 = vshrl.u32 %v8763_v8, 16  ;;  %v675_v63 = vshll.u32 %v8763_v8, 16  ;;  %v532_v39 = vld [vmem:[%s8647_s17 + $0x60] sm:$0xff] }
  0x49   : > { %v635_v58 = vsel %vm8678_vm15, %v627_v36, %v634_v45  ;;  %v1118_v0 = vsel %vm8698_vm2, %v1113_v48, %v8780_v55  ;;  %v1204_v4 = vrot.slane %v1202_v46, 4  ;;  %v680_v10 = vshrl.u32 %v563_v47, 16  ;;  %932 = vst [vmem:[#allocation2 + $0x2c] sm:$0x1] %v931_v59  ;;  %v370_v33 = vld [vmem:[#allocation2 + $0x68] sm:$0x1] }
  0x4a   : > { %v1207_v56 = vrot.slane %v1205_v51, 5  ;;  %929 = vst.msk [vmem:[#allocation2 + $0x28] sm:$0xf] %vm907_vm11, %v635_v58  ;;  %v1746_v12 = vunpack.c.l.b16 %v1118_v0  ;;  %v674_v53 = vrot.slane %v672_v60, 7  ;;  %v683_v14 = vshll.u32 %v563_v47, 16 }
  0x4b   : > { %v8828_v15 = vpack.c.bf16 %v534_v5, %v534_v5  ;;  %366 = vst [vmem:[#allocation2 + $0x50] sm:$0x1] %v365_v42  ;;  %v8830_v21 = vpack.c.bf16 %v535_v57, %v535_v57  ;;  %v682_v28 = vrot.slane %v680_v10, 7  ;;  %v315_v32 = vsel %vm8627_vm7, 0, %v314_v11  ;;  %v367_v58 = vld [vmem:[#allocation2 + $0x5c] sm:$0x1] }
  0x4c   : > { %v1040_v13 = vld [vmem:[#allocation2 + $0x40] sm:$0xf]  ;;  %v1208_v18 = vor.u32 %v1207_v56, %v1204_v4  ;;  %v8832_v55 = vpack.c.b16 %v1747_v50, %v1746_v12  ;;  %v677_v22 = vor.u32 %v675_v63, %v674_v53  ;;  %v678_v23 = vrot.slane %v674_v53, 4  ;;  %316 = vst [vmem:[#allocation2 + $0x60] sm:$0x1] %v315_v32  ;;  %v13205_v61 = vld [vmem:[#allocation12_spill] sm:$0xff] }
  0x4d   : > { %v1041_v17 = vld [vmem:[#allocation2 + $0x44] sm:$0x1]  ;;  %v1211_v8 = vshll.u32 %v1040_v13, 16  ;;  %v1215_v19 = vshrl.u32 %v1040_v13, 16  ;;  %v685_v36 = vor.u32 %v683_v14, %v682_v28  ;;  %v687_v37 = vrot.slane %v682_v28, 4  ;;  %v9388_v54 = vld [vmem:[#allocation2 + $0x3c] sm:$0xff] }
  0x4e   : > { %13169 = vst [vmem:[#allocation13_spill] sm:$0xff] %v8832_v55  ;;  %v1221_v16 = vshll.u32 %v1041_v17, 16  ;;  %v1209_v24 = vrot.slane %v1208_v18, 4  ;;  %v1033_v27 = vld [vmem:[#allocation2 + $0x24] sm:$0xf]  ;;  %1794 = vrot.lane.b32.xlu0 %v8832_v55, %s8504_s18  ;;  %v371_v57 = vsel %vm8636_vm10, 0, %v370_v33  ;;  %v8847_v59 = vpack.c.bf16 %v532_v39, %v532_v39 }
  0x4f   : > { %v1213_v62 = vrot.slane %v1211_v8, 5  ;;  %v1217_v26 = vrot.slane %v1215_v19, 4  ;;  %v1154_v30 = vshrl.u32 %v1033_v27, 16  ;;  %v1157_v31 = vshll.u32 %v1033_v27, 16  ;;  %v947_v38 = vld [vmem:[#allocation2 + $0x48] sm:$0xf] }
  0x50   : > { %v1223_v29 = vrot.slane %v1221_v16, 5  ;;  %v948_v44 = vsel %vm8684_vm0, %v677_v22, %v947_v38  ;;  %v1035_v20 = vld [vmem:[#allocation2 + $0x2c] sm:$0x1]  ;;  %v686_v48 = vsel %vm8678_vm15, %v678_v23, %v685_v36  ;;  %v311_v50 = vld [vmem:[#allocation2 + $0x54] sm:$0x1]  ;;  %v706_v12 = vshrl.u32 %v8828_v15, 16 }
  0x51   : > { %v1214_v34 = vsel %vm8698_vm2, %v1209_v24, %v1213_v62  ;;  %v1218_v35 = vor.u32 %v1217_v26, %v1213_v62  ;;  %v1034_v41 = vld [vmem:[#allocation2 + $0x28] sm:$0xf]  ;;  %v1156_v42 = vrot.slane %v1154_v30, 4  ;;  %v1159_v43 = vrot.slane %v1157_v31, 5  ;;  %949 = vst [vmem:[#allocation2 + $0x48] sm:$0xf] %v948_v44 }
  0x52   : > { %v1754_v40 = vunpack.c.l.b16 %v1214_v34  ;;  %v1163_v47 = vshll.u32 %v1034_v41, 16  ;;  %v1167_v5 = vshrl.u32 %v1034_v41, 16  ;;  %v1173_v51 = vshll.u32 %v1035_v20, 16  ;;  %v951_v52 = vld [vmem:[#allocation2 + $0x50] sm:$0x1]  ;;  %v533_v18 = vld [vmem:[%s8647_s17 + $0x68] sm:$0xff] }
  0x53   : > { %v1219_v45 = vrot.slane %v1218_v35, 4  ;;  %v1160_v46 = vor.u32 %v1159_v43, %v1156_v42  ;;  %950 = vst.msk [vmem:[#allocation2 + $0x4c] sm:$0xf] %vm907_vm11, %v686_v48  ;;  %v952_v4 = vsel %vm8691_vm1, %v687_v37, %v951_v52  ;;  %v709_v53 = vshll.u32 %v8828_v15, 16  ;;  %v961_v22 = vld [vmem:[#allocation2 + $0x60] sm:$0xf] }
  0x54   : > { %v1165_v63 = vrot.slane %v1163_v47, 5  ;;  %v1169_v0 = vrot.slane %v1167_v5, 4  ;;  %v1175_v11 = vrot.slane %v1173_v51, 5  ;;  %953 = vst [vmem:[#allocation2 + $0x50] sm:$0x1] %v952_v4  ;;  %v714_v14 = vshrl.u32 %v8830_v21, 16 }
  0x55   : > { %v1224_v60 = vsel %vm8698_vm2, %v1219_v45, %v1223_v29  ;;  %v1161_v10 = vrot.slane %v1160_v46, 4  ;;  %372 = vst [vmem:[#allocation2 + $0x68] sm:$0x1] %v371_v57  ;;  %v717_v17 = vshll.u32 %v8830_v21, 16  ;;  %v708_v16 = vrot.slane %v706_v12, 7  ;;  %v536_v30 = vld [vmem:[%s8647_s17 + $0x80] sm:$0xff] }
  0x56   : > { %v1755_v56 = vunpack.c.l.b16 %v1224_v60  ;;  %v1170_v13 = vor.u32 %v1169_v0, %v1165_v63  ;;  %v312_v23 = vsel %vm8627_vm7, 0, %v311_v50  ;;  %v716_v26 = vrot.slane %v714_v14, 7  ;;  %v317_v45 = vld [vmem:[#allocation2 + $0x6c] sm:$0x1]  ;;  %v373_v20 = vld [vmem:[#allocation2 + $0x74] sm:$0x1] }
  0x57   : > { %v1166_v19 = vsel %vm8698_vm2, %v1161_v10, %v1165_v63  ;;  %313 = vst [vmem:[#allocation2 + $0x54] sm:$0x1] %v312_v23  ;;  %v368_v15 = vsel %vm8636_vm10, 0, %v367_v58  ;;  %v711_v21 = vor.u32 %v709_v53, %v708_v16  ;;  %v712_v27 = vrot.slane %v708_v16, 4  ;;  %v537_v51 = vld [vmem:[%s8647_s17 + $0x88] sm:$0xff]  ;;  %v540_v14 = vld [vmem:[%s8647_s17 + $0xa0] sm:$0xff] }
  0x58   : > { %v8859_v8 = vpack.c.b16 %v1755_v56, %v1754_v40  ;;  %v1171_v24 = vrot.slane %v1170_v13, 4  ;;  %v1750_v62 = vunpack.c.l.b16 %v1166_v19  ;;  %369 = vst [vmem:[#allocation2 + $0x5c] sm:$0x1] %v368_v15  ;;  %v565_v28 = vpack.c.bf16 %v533_v18, %v533_v18  ;;  %v8873_v32 = vld [vmem:[#allocation2 + $0x48] sm:$0xf] }
  0x59   : > { %v689_v29 = vshrl.u32 %v8847_v59, 16  ;;  %v719_v33 = vor.u32 %v717_v17, %v716_v26  ;;  %v721_v34 = vrot.slane %v716_v26, 4  ;;  %v692_v35 = vshll.u32 %v8847_v59, 16  ;;  %v541_v15 = vld [vmem:[%s8647_s17 + $0xa8] sm:$0xff]  ;;  %13189 = vst [vmem:[#allocation31_spill] sm:$0xff] %v9388_v54 }
  0x5a   : > { %13170 = vst [vmem:[#allocation14_spill] sm:$0xff] %v8859_v8  ;;  %1802 = vrot.lane.b32.xlu2 %v8859_v8, %s8504_s18  ;;  %v1176_v31 = vsel %vm8698_vm2, %v1171_v24, %v1175_v11  ;;  %v8876_v37 = vld [vmem:[#allocation2 + $0x4c] sm:$0xf]  ;;  %v1226_v38 = vshrl.u32 %v8873_v32, 16  ;;  %v1229_v39 = vshll.u32 %v8873_v32, 16  ;;  %v962_v40 = vsel %vm8684_vm0, %v711_v21, %v961_v22 }
  0x5b   : > { %v1751_v36 = vunpack.c.l.b16 %v1176_v31  ;;  %v8882_v41 = vld [vmem:[#allocation2 + $0x50] sm:$0x1]  ;;  %v1235_v42 = vshll.u32 %v8876_v37, 16  ;;  %v1239_v43 = vshrl.u32 %v8876_v37, 16  ;;  %v720_v44 = vsel %vm8678_vm15, %v712_v27, %v719_v33  ;;  %963 = vst [vmem:[#allocation2 + $0x60] sm:$0xf] %v962_v40 }
  0x5c   : > { %v8888_v47 = vpack.c.bf16 %v536_v30, %v536_v30  ;;  %v1228_v48 = vrot.slane %v1226_v38, 4  ;;  %v1231_v50 = vrot.slane %v1229_v39, 5  ;;  %v1245_v46 = vshll.u32 %v8882_v41, 16  ;;  %964 = vst.msk [vmem:[#allocation2 + $0x64] sm:$0xf] %vm907_vm11, %v720_v44 }
  0x5d   : > { %v8890_v5 = vpack.c.b16 %v1751_v36, %v1750_v62  ;;  %v1237_v52 = vrot.slane %v1235_v42, 5  ;;  %v1241_v57 = vrot.slane %v1239_v43, 4  ;;  %v965_v58 = vld [vmem:[#allocation2 + $0x68] sm:$0x1]  ;;  %v691_v59 = vrot.slane %v689_v29, 7 }
  0x5e   : > { %v697_v60 = vshrl.u32 %v565_v28, 16  ;;  %v1232_v63 = vor.u32 %v1231_v50, %v1228_v48  ;;  %v1247_v0 = vrot.slane %v1245_v46, 5  ;;  %v966_v4 = vsel %vm8691_vm1, %v721_v34, %v965_v58  ;;  %v954_v10 = vld [vmem:[#allocation2 + $0x54] sm:$0xf]  ;;  %v323_v43 = vld [vmem:[#allocation2 + $0x84] sm:$0x1] }
  0x5f   : > { %13171 = vst [vmem:[#allocation15_spill] sm:$0xff] %v8890_v5  ;;  %1798 = vrot.lane.b32.xlu1 %v8890_v5, %s8504_s18  ;;  %v700_v56 = vshll.u32 %v565_v28, 16  ;;  %v1242_v11 = vor.u32 %v1241_v57, %v1237_v52  ;;  %v694_v12 = vor.u32 %v692_v35, %v691_v59  ;;  %v695_v13 = vrot.slane %v691_v59, 4  ;;  %v958_v26 = vld [vmem:[#allocation2 + $0x5c] sm:$0x1]  ;;  %v538_v48 = vld [vmem:[%s8647_s17 + $0x90] sm:$0xff] }
  0x60   : > { %967 = vst [vmem:[#allocation2 + $0x68] sm:$0x1] %v966_v4  ;;  %v699_v53 = vrot.slane %v697_v60, 7  ;;  %v1233_v17 = vrot.slane %v1232_v63, 4  ;;  %v318_v18 = vsel %vm8627_vm7, 0, %v317_v45  ;;  %v374_v19 = vsel %vm8636_vm10, 0, %v373_v20 }
  0x61   : > { %v8904_v16 = vpack.c.bf16 %v537_v51, %v537_v51  ;;  %v1243_v22 = vrot.slane %v1242_v11, 4  ;;  %v955_v62 = vsel %vm8684_vm0, %v694_v12, %v954_v10  ;;  %319 = vst [vmem:[#allocation2 + $0x6c] sm:$0x1] %v318_v18  ;;  %v723_v28 = vshrl.u32 %v8888_v47, 16 }
  0x62   : > { %v702_v23 = vor.u32 %v700_v56, %v699_v53  ;;  %v704_v24 = vrot.slane %v699_v53, 4  ;;  %v1238_v21 = vsel %vm8698_vm2, %v1233_v17, %v1237_v52  ;;  %v8911_v27 = vld [vmem:[#allocation2 + $0x60] sm:$0xf]  ;;  %956 = vst [vmem:[#allocation2 + $0x54] sm:$0xf] %v955_v62  ;;  %v726_v29 = vshll.u32 %v8888_v47, 16 }
  0x63   : > { %v8915_v30 = vpack.c.bf16 %v540_v14, %v540_v14  ;;  %v1248_v31 = vsel %vm8698_vm2, %v1243_v22, %v1247_v0  ;;  %v1756_v33 = vunpack.c.l.b16 %v1238_v21  ;;  %v8919_v34 = vld [vmem:[#allocation2 + $0x64] sm:$0xf]  ;;  %v1274_v35 = vshrl.u32 %v8911_v27, 16  ;;  %375 = vst [vmem:[#allocation2 + $0x74] sm:$0x1] %v374_v19 }
  0x64   : > { %v1277_v36 = vshll.u32 %v8911_v27, 16  ;;  %v1757_v38 = vunpack.c.l.b16 %v1248_v31  ;;  %v1283_v39 = vshll.u32 %v8919_v34, 16  ;;  %v1287_v40 = vshrl.u32 %v8919_v34, 16  ;;  %v379_v0 = vld [vmem:[#allocation2 + $0x8c] sm:$0x1] }
  0x65   : > { %v703_v42 = vsel %vm8678_vm15, %v695_v13, %v702_v23  ;;  %v1276_v44 = vrot.slane %v1274_v35, 4  ;;  %v959_v20 = vsel %vm8691_vm1, %v704_v24, %v958_v26  ;;  %v725_v47 = vrot.slane %v723_v28, 7 }
  0x66   : > { %v1279_v45 = vrot.slane %v1277_v36, 5  ;;  %957 = vst.msk [vmem:[#allocation2 + $0x58] sm:$0xf] %vm907_vm11, %v703_v42  ;;  %v8931_v50 = vpack.c.b16 %v1757_v38, %v1756_v33  ;;  %v1285_v51 = vrot.slane %v1283_v39, 5  ;;  %v1289_v52 = vrot.slane %v1287_v40, 4 }
  0x67   : > { %v8933_v46 = vld [vmem:[#allocation2 + $0x68] sm:$0x1]  ;;  %960 = vst [vmem:[#allocation2 + $0x5c] sm:$0x1] %v959_v20  ;;  %v8935_v57 = vpack.c.bf16 %v541_v15, %v541_v15  ;;  %v728_v60 = vor.u32 %v726_v29, %v725_v47  ;;  %v729_v63 = vrot.slane %v725_v47, 4  ;;  %v731_v56 = vshrl.u32 %v8904_v16, 16 }
  0x68   : > { %13172 = vst [vmem:[#allocation16_spill] sm:$0xff] %v8931_v50  ;;  %v1280_v58 = vor.u32 %v1279_v45, %v1276_v44  ;;  %v1293_v59 = vshll.u32 %v8933_v46, 16  ;;  %1804 = vrot.lane.b32.xlu0 %v8931_v50, %s8504_s18  ;;  %v1290_v4 = vor.u32 %v1289_v52, %v1285_v51  ;;  %v734_v10 = vshll.u32 %v8904_v16, 16  ;;  %v968_v11 = vld [vmem:[#allocation2 + $0x6c] sm:$0xf]  ;;  %v539_v20 = vld [vmem:[%s8647_s17 + $0x98] sm:$0xff] }
  0x69   : > { %v324_v12 = vsel %vm8627_vm7, 0, %v323_v43  ;;  %v8944_v14 = vld [vmem:[#allocation2 + $0x54] sm:$0xf]  ;;  %v969_v17 = vsel %vm8684_vm0, %v728_v60, %v968_v11  ;;  %v8948_v18 = vpack.c.bf16 %v538_v48, %v538_v48  ;;  %v733_v16 = vrot.slane %v731_v56, 7 }
  0x6a   : > { %v1281_v13 = vrot.slane %v1280_v58, 4  ;;  %v1295_v53 = vrot.slane %v1293_v59, 5  ;;  %325 = vst [vmem:[#allocation2 + $0x84] sm:$0x1] %v324_v12  ;;  %v1291_v19 = vrot.slane %v1290_v4, 4  ;;  %v1250_v22 = vshrl.u32 %v8944_v14, 16 }
  0x6b   : > { %v1253_v23 = vshll.u32 %v8944_v14, 16  ;;  %970 = vst [vmem:[#allocation2 + $0x6c] sm:$0xf] %v969_v17  ;;  %v380_v62 = vsel %vm8636_vm10, 0, %v379_v0  ;;  %v757_v26 = vshrl.u32 %v8915_v30, 16  ;;  %v760_v15 = vshll.u32 %v8915_v30, 16 }
  0x6c   : > { %v1286_v24 = vsel %vm8698_vm2, %v1281_v13, %v1285_v51  ;;  %v1296_v21 = vsel %vm8698_vm2, %v1291_v19, %v1295_v53  ;;  %v1252_v31 = vrot.slane %v1250_v22, 4  ;;  %381 = vst [vmem:[#allocation2 + $0x8c] sm:$0x1] %v380_v62  ;;  %v736_v40 = vor.u32 %v734_v10, %v733_v16  ;;  %v972_v42 = vld [vmem:[#allocation2 + $0x74] sm:$0x1] }
  0x6d   : > { %v1760_v28 = vunpack.c.l.b16 %v1286_v24  ;;  %v8960_v29 = vld [vmem:[#allocation2 + $0x58] sm:$0xf]  ;;  %v1255_v33 = vrot.slane %v1253_v23, 5  ;;  %v1761_v35 = vunpack.c.l.b16 %v1296_v21  ;;  %v738_v44 = vrot.slane %v733_v16, 4  ;;  %v376_v59 = vld [vmem:[#allocation2 + $0x80] sm:$0x1] }
  0x6e   : > { %v8962_v36 = vld [vmem:[#allocation2 + $0x5c] sm:$0x1]  ;;  %v1259_v38 = vshll.u32 %v8960_v29, 16  ;;  %v1263_v39 = vshrl.u32 %v8960_v29, 16  ;;  %v759_v45 = vrot.slane %v757_v26, 7  ;;  %v737_v52 = vsel %vm8678_vm15, %v729_v63, %v736_v40 }
  0x6f   : > { %v1256_v30 = vor.u32 %v1255_v33, %v1252_v31  ;;  %v1269_v43 = vshll.u32 %v8962_v36, 16  ;;  %v8968_v47 = vpack.c.b16 %v1761_v35, %v1760_v28  ;;  %v320_v58 = vld [vmem:[#allocation2 + $0x78] sm:$0x1]  ;;  %971 = vst.msk [vmem:[#allocation2 + $0x70] sm:$0xf] %vm907_vm11, %v737_v52  ;;  %v973_v4 = vsel %vm8691_vm1, %v738_v44, %v972_v42 }
  0x70   : > { %v1261_v48 = vrot.slane %v1259_v38, 5  ;;  %v1265_v51 = vrot.slane %v1263_v39, 4  ;;  %v762_v56 = vor.u32 %v760_v15, %v759_v45  ;;  %974 = vst [vmem:[#allocation2 + $0x74] sm:$0x1] %v973_v4  ;;  %v763_v13 = vrot.slane %v759_v45, 4 }
  0x71   : > { %13173 = vst [vmem:[#allocation17_spill] sm:$0xff] %v8968_v47  ;;  %v1257_v60 = vrot.slane %v1256_v30, 4  ;;  %v1271_v0 = vrot.slane %v1269_v43, 5  ;;  %v982_v10 = vld [vmem:[#allocation2 + $0x84] sm:$0xf]  ;;  %1808 = vrot.lane.b32.xlu2 %v8968_v47, %s8504_s18  ;;  %v765_v63 = vshrl.u32 %v8935_v57, 16  ;;  %v571_v53 = vpack.c.bf16 %v539_v20, %v539_v20 }
  0x72   : > { %v1266_v11 = vor.u32 %v1265_v51, %v1261_v48  ;;  %v8977_v12 = vld [vmem:[#allocation2 + $0x6c] sm:$0xf]  ;;  %v768_v23 = vshll.u32 %v8935_v57, 16  ;;  %v983_v26 = vsel %vm8684_vm0, %v762_v56, %v982_v10  ;;  %v321_v31 = vsel %vm8627_vm7, 0, %v320_v58  ;;  %v326_v44 = vld [vmem:[#allocation2 + $0x90] sm:$0x1] }
  0x73   : > { %v1262_v17 = vsel %vm8698_vm2, %v1257_v60, %v1261_v48  ;;  %v1298_v19 = vshrl.u32 %v8977_v12, 16  ;;  %v1301_v22 = vshll.u32 %v8977_v12, 16  ;;  %v767_v62 = vrot.slane %v765_v63, 7  ;;  %v986_v15 = vld [vmem:[#allocation2 + $0x8c] sm:$0x1]  ;;  %v542_v56 = vld [vmem:[%s8647_s17 + $0xb0] sm:$0xff] }
  0x74   : > { %v1267_v16 = vrot.slane %v1266_v11, 4  ;;  %v1758_v24 = vunpack.c.l.b16 %v1262_v17  ;;  %984 = vst [vmem:[#allocation2 + $0x84] sm:$0xf] %v983_v26  ;;  %v377_v33 = vsel %vm8636_vm10, 0, %v376_v59  ;;  %v740_v39 = vshrl.u32 %v8948_v18, 16  ;;  %v543_v17 = vld [vmem:[%s8647_s17 + $0xb8] sm:$0xff] }
  0x75   : > { %v1300_v21 = vrot.slane %v1298_v19, 4  ;;  %v1303_v28 = vrot.slane %v1301_v22, 5  ;;  %v770_v57 = vor.u32 %v768_v23, %v767_v62  ;;  %v772_v38 = vrot.slane %v767_v62, 4  ;;  %322 = vst [vmem:[#allocation2 + $0x78] sm:$0x1] %v321_v31 }
  0x76   : > { %v1272_v35 = vsel %vm8698_vm2, %v1267_v16, %v1271_v0  ;;  %378 = vst [vmem:[#allocation2 + $0x80] sm:$0x1] %v377_v33  ;;  %v743_v30 = vshll.u32 %v8948_v18, 16  ;;  %v748_v43 = vshrl.u32 %v571_v53, 16  ;;  %v8995_v45 = vld [vmem:[#allocation2 + $0x70] sm:$0xf] }
  0x77   : > { %v1759_v40 = vunpack.c.l.b16 %v1272_v35  ;;  %v1304_v42 = vor.u32 %v1303_v28, %v1300_v21  ;;  %v771_v20 = vsel %vm8678_vm15, %v763_v13, %v770_v57  ;;  %v987_v48 = vsel %vm8691_vm1, %v772_v38, %v986_v15  ;;  %v382_v58 = vld [vmem:[#allocation2 + $0x98] sm:$0x1]  ;;  %v9003_v60 = vld [vmem:[#allocation2 + $0x74] sm:$0x1] }
  0x78   : > { %v742_v51 = vrot.slane %v740_v39, 7  ;;  %v751_v52 = vshll.u32 %v571_v53, 16  ;;  %v1307_v18 = vshll.u32 %v8995_v45, 16  ;;  %v1311_v4 = vshrl.u32 %v8995_v45, 16  ;;  %985 = vst.msk [vmem:[#allocation2 + $0x88] sm:$0xf] %vm907_vm11, %v771_v20 }
  0x79   : > { %v9001_v59 = vpack.c.b16 %v1759_v40, %v1758_v24  ;;  %v1305_v0 = vrot.slane %v1304_v42, 4  ;;  %v1317_v10 = vshll.u32 %v9003_v60, 16  ;;  %v750_v63 = vrot.slane %v748_v43, 7  ;;  %988 = vst [vmem:[#allocation2 + $0x8c] sm:$0x1] %v987_v48 }
  0x7a   : > { %v745_v11 = vor.u32 %v743_v30, %v742_v51  ;;  %v746_v13 = vrot.slane %v742_v51, 4  ;;  %v1309_v53 = vrot.slane %v1307_v18, 5  ;;  %v1313_v19 = vrot.slane %v1311_v4, 4  ;;  %v332_v30 = vld [vmem:[#allocation2 + $0xa8] sm:$0x1] }
  0x7b   : > { %13174 = vst [vmem:[#allocation18_spill] sm:$0xff] %v9001_v59  ;;  %1806 = vrot.lane.b32.xlu1 %v9001_v59, %s8504_s18  ;;  %v327_v22 = vsel %vm8627_vm7, 0, %v326_v44  ;;  %v383_v23 = vsel %vm8636_vm10, 0, %v382_v58  ;;  %v1319_v16 = vrot.slane %v1317_v10, 5  ;;  %v9017_v24 = vld [vmem:[#allocation2 + $0x84] sm:$0xf]  ;;  %v753_v62 = vor.u32 %v751_v52, %v750_v63 }
  0x7c   : > { %v755_v26 = vrot.slane %v750_v63, 4  ;;  %328 = vst [vmem:[#allocation2 + $0x90] sm:$0x1] %v327_v22  ;;  %v574_v15 = vpack.c.bf16 %v542_v56, %v542_v56  ;;  %v1310_v21 = vsel %vm8698_vm2, %v1305_v0, %v1309_v53  ;;  %v1314_v28 = vor.u32 %v1313_v19, %v1309_v53  ;;  %v975_v35 = vld [vmem:[#allocation2 + $0x78] sm:$0xf]  ;;  %v546_v52 = vld [vmem:[%s8647_s17 + $0xd0] sm:$0xff] }
  0x7d   : > { %v1346_v31 = vshrl.u32 %v9017_v24, 16  ;;  %v1349_v33 = vshll.u32 %v9017_v24, 16  ;;  %384 = vst [vmem:[#allocation2 + $0x98] sm:$0x1] %v383_v23  ;;  %v1762_v57 = vunpack.c.l.b16 %v1310_v21  ;;  %v754_v38 = vsel %vm8678_vm15, %v746_v13, %v753_v62  ;;  %v979_v40 = vld [vmem:[#allocation2 + $0x80] sm:$0x1] }
  0x7e   : > { %v976_v39 = vsel %vm8684_vm0, %v745_v11, %v975_v35  ;;  %v575_v42 = vpack.c.bf16 %v543_v17, %v543_v17  ;;  %v388_v43 = vld [vmem:[#allocation2 + $0xb0] sm:$0x1]  ;;  %v1315_v44 = vrot.slane %v1314_v28, 4  ;;  %v980_v51 = vsel %vm8691_vm1, %v755_v26, %v979_v40  ;;  %978 = vst.msk [vmem:[#allocation2 + $0x7c] sm:$0xf] %vm907_vm11, %v754_v38  ;;  %v547_v21 = vld [vmem:[%s8647_s17 + $0xd8] sm:$0xff] }
  0x7f   : > { %v1348_v20 = vrot.slane %v1346_v31, 4  ;;  %v1351_v48 = vrot.slane %v1349_v33, 5  ;;  %977 = vst [vmem:[#allocation2 + $0x78] sm:$0xf] %v976_v39  ;;  %v774_v58 = vshrl.u32 %v574_v15, 16  ;;  %v777_v0 = vshll.u32 %v574_v15, 16 }
  0x80   : > { %v782_v18 = vshrl.u32 %v575_v42, 16  ;;  %v785_v4 = vshll.u32 %v575_v42, 16  ;;  %v1320_v56 = vsel %vm8698_vm2, %v1315_v44, %v1319_v16  ;;  %v9033_v10 = vld [vmem:[#allocation2 + $0x88] sm:$0xf]  ;;  %981 = vst [vmem:[#allocation2 + $0x80] sm:$0x1] %v980_v51  ;;  %v578_v28 = vpack.c.bf16 %v546_v52, %v546_v52 }
  0x81   : > { %v1352_v11 = vor.u32 %v1351_v48, %v1348_v20  ;;  %v333_v13 = vsel %vm8627_vm7, 0, %v332_v30  ;;  %v389_v63 = vsel %vm8636_vm10, 0, %v388_v43  ;;  %v1763_v17 = vunpack.c.l.b16 %v1320_v56  ;;  %v9039_v53 = vld [vmem:[#allocation2 + $0x8c] sm:$0x1]  ;;  %v329_v56 = vld [vmem:[#allocation2 + $0x9c] sm:$0x1] }
  0x82   : > { %v1355_v19 = vshll.u32 %v9033_v10, 16  ;;  %v1359_v22 = vshrl.u32 %v9033_v10, 16  ;;  %v776_v23 = vrot.slane %v774_v58, 7  ;;  %v1365_v16 = vshll.u32 %v9039_v53, 16  ;;  %334 = vst [vmem:[#allocation2 + $0xa8] sm:$0x1] %v333_v13 }
  0x83   : > { %v1353_v62 = vrot.slane %v1352_v11, 4  ;;  %v784_v26 = vrot.slane %v782_v18, 7  ;;  %v989_v15 = vld [vmem:[#allocation2 + $0x90] sm:$0xf]  ;;  %v9045_v31 = vpack.c.b16 %v1763_v17, %v1762_v57  ;;  %390 = vst [vmem:[#allocation2 + $0xb0] sm:$0x1] %v389_v63  ;;  %v579_v51 = vpack.c.bf16 %v547_v21, %v547_v21 }
  0x84   : > { %v1357_v33 = vrot.slane %v1355_v19, 5  ;;  %v1361_v35 = vrot.slane %v1359_v22, 4  ;;  %v779_v38 = vor.u32 %v777_v0, %v776_v23  ;;  %v993_v39 = vld [vmem:[#allocation2 + $0x98] sm:$0x1]  ;;  %v1367_v40 = vrot.slane %v1365_v16, 5 }
  0x85   : > { %13175 = vst [vmem:[#allocation19_spill] sm:$0xff] %v9045_v31  ;;  %v780_v42 = vrot.slane %v776_v23, 4  ;;  %v787_v30 = vor.u32 %v785_v4, %v784_v26  ;;  %v789_v43 = vrot.slane %v784_v26, 4  ;;  %1810 = vrot.lane.b32.xlu0 %v9045_v31, %s8504_s18  ;;  %v9055_v58 = vld [vmem:[#allocation2 + $0x7c] sm:$0xf]  ;;  %v808_v16 = vshrl.u32 %v578_v28, 16 }
  0x86   : > { %v1358_v44 = vsel %vm8698_vm2, %v1353_v62, %v1357_v33  ;;  %v1362_v20 = vor.u32 %v1361_v35, %v1357_v33  ;;  %v9051_v48 = vld [vmem:[#allocation2 + $0x78] sm:$0xf]  ;;  %v990_v57 = vsel %vm8684_vm0, %v779_v38, %v989_v15  ;;  %v1331_v63 = vshll.u32 %v9055_v58, 16 }
  0x87   : > { %v1766_v52 = vunpack.c.l.b16 %v1358_v44  ;;  %v1322_v0 = vshrl.u32 %v9051_v48, 16  ;;  %v1325_v18 = vshll.u32 %v9051_v48, 16  ;;  %v788_v4 = vsel %vm8678_vm15, %v780_v42, %v787_v30  ;;  %991 = vst [vmem:[#allocation2 + $0x90] sm:$0xf] %v990_v57  ;;  %v9061_v13 = vld [vmem:[#allocation2 + $0x80] sm:$0x1] }
  0x88   : > { %v1363_v11 = vrot.slane %v1362_v20, 4  ;;  %v1335_v17 = vshrl.u32 %v9055_v58, 16  ;;  %v994_v19 = vsel %vm8691_vm1, %v789_v43, %v993_v39  ;;  %v1341_v62 = vshll.u32 %v9061_v13, 16  ;;  %992 = vst.msk [vmem:[#allocation2 + $0x94] sm:$0xf] %vm907_vm11, %v788_v4  ;;  %v544_v43 = vld [vmem:[%s8647_s17 + $0xc0] sm:$0xff] }
  0x89   : > { %v1324_v22 = vrot.slane %v1322_v0, 4  ;;  %v1327_v23 = vrot.slane %v1325_v18, 5  ;;  %v1333_v15 = vrot.slane %v1331_v63, 5  ;;  %995 = vst [vmem:[#allocation2 + $0x98] sm:$0x1] %v994_v19  ;;  %v811_v33 = vshll.u32 %v578_v28, 16 }
  0x8a   : > { %v1368_v26 = vsel %vm8698_vm2, %v1363_v11, %v1367_v40  ;;  %v1337_v21 = vrot.slane %v1335_v17, 4  ;;  %v1343_v42 = vrot.slane %v1341_v62, 5  ;;  %v810_v30 = vrot.slane %v808_v16, 7  ;;  %v385_v39 = vld [vmem:[#allocation2 + $0xa4] sm:$0x1] }
  0x8b   : > { %v1767_v35 = vunpack.c.l.b16 %v1368_v26  ;;  %v1328_v38 = vor.u32 %v1327_v23, %v1324_v22  ;;  %v816_v20 = vshrl.u32 %v579_v51, 16  ;;  %v819_v57 = vshll.u32 %v579_v51, 16  ;;  %v1003_v0 = vld [vmem:[#allocation2 + $0xa8] sm:$0xf]  ;;  %v1007_v16 = vld [vmem:[#allocation2 + $0xb0] sm:$0x1] }
  0x8c   : > { %v1338_v44 = vor.u32 %v1337_v21, %v1333_v15  ;;  %v330_v18 = vsel %vm8627_vm7, 0, %v329_v56  ;;  %v813_v11 = vor.u32 %v811_v33, %v810_v30  ;;  %v814_v63 = vrot.slane %v810_v30, 4 }
  0x8d   : > { %v9074_v4 = vpack.c.b16 %v1767_v35, %v1766_v52  ;;  %v1329_v40 = vrot.slane %v1328_v38, 4  ;;  %331 = vst [vmem:[#allocation2 + $0x9c] sm:$0x1] %v330_v18  ;;  %v818_v19 = vrot.slane %v816_v20, 7  ;;  %v386_v22 = vsel %vm8636_vm10, 0, %v385_v39 }
  0x8e   : > { %v1339_v28 = vrot.slane %v1338_v44, 4  ;;  %v9076_v17 = vld [vmem:[#allocation2 + $0x90] sm:$0xf]  ;;  %v576_v23 = vpack.c.bf16 %v544_v43, %v544_v43  ;;  %v1004_v62 = vsel %vm8684_vm0, %v813_v11, %v1003_v0  ;;  %387 = vst [vmem:[#allocation2 + $0xa4] sm:$0x1] %v386_v22  ;;  %v548_v11 = vld [vmem:[%s8647_s17 + $0xe0] sm:$0xff] }
  0x8f   : > { %13176 = vst [vmem:[#allocation20_spill] sm:$0xff] %v9074_v4  ;;  %1814 = vrot.lane.b32.xlu2 %v9074_v4, %s8504_s18  ;;  %v1334_v51 = vsel %vm8698_vm2, %v1329_v40, %v1333_v15  ;;  %v1370_v52 = vshrl.u32 %v9076_v17, 16  ;;  %v1373_v56 = vshll.u32 %v9076_v17, 16  ;;  %v9090_v33 = vld [vmem:[#allocation2 + $0x94] sm:$0xf]  ;;  %v821_v35 = vor.u32 %v819_v57, %v818_v19  ;;  %v545_v15 = vld [vmem:[%s8647_s17 + $0xc8] sm:$0xff] }
  0x90   : > { %v1344_v26 = vsel %vm8698_vm2, %v1339_v28, %v1343_v42  ;;  %v1764_v21 = vunpack.c.l.b16 %v1334_v51  ;;  %v823_v38 = vrot.slane %v818_v19, 4  ;;  %1005 = vst [vmem:[#allocation2 + $0xa8] sm:$0xf] %v1004_v62  ;;  %v9093_v39 = vld [vmem:[#allocation2 + $0x98] sm:$0x1]  ;;  %v1379_v20 = vshll.u32 %v9090_v33, 16 }
  0x91   : > { %v1765_v30 = vunpack.c.l.b16 %v1344_v26  ;;  %v1372_v43 = vrot.slane %v1370_v52, 4  ;;  %v1375_v44 = vrot.slane %v1373_v56, 5  ;;  %v1383_v0 = vshrl.u32 %v9090_v33, 16  ;;  %v335_v40 = vld [vmem:[#allocation2 + $0xb4] sm:$0x1]  ;;  %v549_v56 = vld [vmem:[%s8647_s17 + $0xe8] sm:$0xff] }
  0x92   : > { %v1389_v42 = vshll.u32 %v9093_v39, 16  ;;  %v822_v18 = vsel %vm8678_vm15, %v814_v63, %v821_v35  ;;  %v1008_v57 = vsel %vm8691_vm1, %v823_v38, %v1007_v16  ;;  %v1381_v22 = vrot.slane %v1379_v20, 5  ;;  %v391_v52 = vld [vmem:[#allocation2 + $0xbc] sm:$0x1] }
  0x93   : > { %v9103_v28 = vpack.c.b16 %v1765_v30, %v1764_v21  ;;  %v1376_v19 = vor.u32 %v1375_v44, %v1372_v43  ;;  %1006 = vst.msk [vmem:[#allocation2 + $0xac] sm:$0xf] %vm907_vm11, %v822_v18  ;;  %v577_v51 = vpack.c.bf16 %v545_v15, %v545_v15  ;;  %v1385_v62 = vrot.slane %v1383_v0, 4 }
  0x94   : > { %v1391_v26 = vrot.slane %v1389_v42, 5  ;;  %1009 = vst [vmem:[#allocation2 + $0xb0] sm:$0x1] %v1008_v57  ;;  %v791_v2 = vshrl.u32 %v576_v23, 16  ;;  %v794_v1 = vshll.u32 %v576_v23, 16  ;;  %v336_v21 = vsel %vm8627_vm7, 0, %v335_v40 }
  0x95   : > { %13177 = vst [vmem:[#allocation21_spill] sm:$0xff] %v9103_v28  ;;  %1812 = vrot.lane.b32.xlu1 %v9103_v28, %s8504_s18  ;;  %v1377_v63 = vrot.slane %v1376_v19, 4  ;;  %v799_v16 = vshrl.u32 %v577_v51, 16  ;;  %v802_v35 = vshll.u32 %v577_v51, 16  ;;  %v1386_v38 = vor.u32 %v1385_v62, %v1381_v22 }
  0x96   : > { %v793_v30 = vrot.slane %v791_v2, 7  ;;  %337 = vst [vmem:[#allocation2 + $0xb4] sm:$0x1] %v336_v21  ;;  %v392_v15 = vsel %vm8636_vm10, 0, %v391_v52  ;;  %v580_v43 = vpack.c.bf16 %v548_v11, %v548_v11  ;;  %v581_v0 = vpack.c.bf16 %v549_v56, %v549_v56  ;;  %v996_v52 = vld [vmem:[#allocation2 + $0x9c] sm:$0xf] }
  0x97   : > { %v1382_v44 = vsel %vm8698_vm2, %v1377_v63, %v1381_v22  ;;  %v9115_v23 = vld [vmem:[#allocation2 + $0xa8] sm:$0xf]  ;;  %v801_v20 = vrot.slane %v799_v16, 7  ;;  %393 = vst [vmem:[#allocation2 + $0xbc] sm:$0x1] %v392_v15  ;;  %v1387_v42 = vrot.slane %v1386_v38, 4 }
  0x98   : > { %v1768_v18 = vunpack.c.l.b16 %v1382_v44  ;;  %v1418_v57 = vshrl.u32 %v9115_v23, 16  ;;  %v1421_v40 = vshll.u32 %v9115_v23, 16  ;;  %v796_v2 = vor.u32 %v794_v1, %v793_v30  ;;  %v1000_v11 = vld [vmem:[#allocation2 + $0xa4] sm:$0x1] }
  0x99   : > { %v797_v19 = vrot.slane %v793_v30, 4  ;;  %v804_v51 = vor.u32 %v802_v35, %v801_v20  ;;  %v806_v62 = vrot.slane %v801_v20, 4  ;;  %v1392_v22 = vsel %vm8698_vm2, %v1387_v42, %v1391_v26 }
  0x9a   : > { %v9121_v63 = vld [vmem:[#allocation2 + $0xac] sm:$0xf]  ;;  %v1420_v16 = vrot.slane %v1418_v57, 4  ;;  %v1423_v21 = vrot.slane %v1421_v40, 5  ;;  %v825_v56 = vshrl.u32 %v580_v43, 16  ;;  %v1769_v38 = vunpack.c.l.b16 %v1392_v22 }
  0x9b   : > { %v9123_v15 = vld [vmem:[#allocation2 + $0xb0] sm:$0x1]  ;;  %v1427_v44 = vshll.u32 %v9121_v63, 16  ;;  %v1431_v1 = vshrl.u32 %v9121_v63, 16  ;;  %v805_v35 = vsel %vm8678_vm15, %v797_v19, %v804_v51  ;;  %v997_v26 = vsel %vm8684_vm0, %v796_v2, %v996_v52 }
  0x9c   : > { %v1424_v30 = vor.u32 %v1423_v21, %v1420_v16  ;;  %v1437_v20 = vshll.u32 %v9123_v15, 16  ;;  %999 = vst.msk [vmem:[#allocation2 + $0xa0] sm:$0xf] %vm907_vm11, %v805_v35  ;;  %v1001_v42 = vsel %vm8691_vm1, %v806_v62, %v1000_v11  ;;  %v9135_v57 = vpack.c.b16 %v1769_v38, %v1768_v18 }
  0x9d   : > { %v1429_v40 = vrot.slane %v1427_v44, 5  ;;  %v1433_v22 = vrot.slane %v1431_v1, 4  ;;  %998 = vst [vmem:[#allocation2 + $0x9c] sm:$0xf] %v997_v26  ;;  %v827_v28 = vrot.slane %v825_v56, 7  ;;  %v828_v19 = vshll.u32 %v580_v43, 16 }
  0x9e   : > { %13178 = vst [vmem:[#allocation22_spill] sm:$0xff] %v9135_v57  ;;  %v1425_v4 = vrot.slane %v1424_v30, 4  ;;  %v833_v51 = vshrl.u32 %v581_v0, 16  ;;  %1816 = vrot.lane.b32.xlu0 %v9135_v57, %s8504_s18  ;;  %v1439_v2 = vrot.slane %v1437_v20, 5  ;;  %v836_v52 = vshll.u32 %v581_v0, 16 }
  0x9f   : > { %1002 = vst [vmem:[#allocation2 + $0xa4] sm:$0x1] %v1001_v42  ;;  %v1434_v16 = vor.u32 %v1433_v22, %v1429_v40  ;;  %v1010_v21 = vld [vmem:[#allocation2 + $0xb4] sm:$0xf]  ;;  %v830_v18 = vor.u32 %v828_v19, %v827_v28  ;;  %v831_v11 = vrot.slane %v827_v28, 4  ;;  %vm1513_vm9 = vcmask 1042432  }
  0xa0   : > { %v1430_v62 = vsel %vm8698_vm2, %v1425_v4, %v1429_v40  ;;  %v835_v38 = vrot.slane %v833_v51, 7  ;;  %vm1514_vm12 = vcmask 1046532   ;;  %v1014_v30 = vld [vmem:[#allocation2 + $0xbc] sm:$0x1]  ;;  %v8396_v26 = vld [vmem:[#allocation2] sm:$0xf] }
  0xa1   : > { %v1435_v44 = vrot.slane %v1434_v16, 4  ;;  %v1772_v1 = vunpack.c.l.b16 %v1430_v62  ;;  %v1011_v35 = vsel %vm8684_vm0, %v830_v18, %v1010_v21  ;;  %v7877_v20 = vrot.slane %v8396_v26, 9  ;;  %v8397_v4 = vld [vmem:[#allocation2 + $0x4] sm:$0xf]  ;;  %v8398_v40 = vld [vmem:[#allocation2 + $0xc] sm:$0xf]  ;;  %vm9165_vm13 = vmor %vm1513_vm9, %vm1514_vm12 }
  0xa2   : > { %v838_v56 = vor.u32 %v836_v52, %v835_v38  ;;  %v840_v43 = vrot.slane %v835_v38, 4  ;;  %1012 = vst [vmem:[#allocation2 + $0xb4] sm:$0xf] %v1011_v35  ;;  %v1518_v28 = vrot.slane %v8397_v4, 5  ;;  %v7878_v22 = vrot.slane %v8398_v40, 9 }
  0xa3   : > { %v1440_v0 = vsel %vm8698_vm2, %v1435_v44, %v1439_v2  ;;  %v9145_v42 = vld [vmem:[#allocation2 + $0xa0] sm:$0xf]  ;;  %vm13144_vm14 = vcmask 64512   ;;  %vm2262_vm9 = vcmask 162816   ;;  %vm2328_vm12 = vcmask 228352  }
  0xa4   : > { %v1773_v19 = vunpack.c.l.b16 %v1440_v0  ;;  %v9147_v51 = vld [vmem:[#allocation2 + $0x9c] sm:$0xf]  ;;  %v1403_v16 = vshll.u32 %v9145_v42, 16  ;;  %v1407_v52 = vshrl.u32 %v9145_v42, 16  ;;  %v839_v21 = vsel %vm8678_vm15, %v831_v11, %v838_v56 }
  0xa5   : > { %v1394_v2 = vshrl.u32 %v9147_v51, 16  ;;  %v1397_v18 = vshll.u32 %v9147_v51, 16  ;;  %1013 = vst.msk [vmem:[#allocation2 + $0xb8] sm:$0xf] %vm907_vm11, %v839_v21  ;;  %v1015_v38 = vsel %vm8691_vm1, %v840_v43, %v1014_v30  ;;  %v13180_v56 = vmov 0 }
  0xa6   : > { %v9153_v62 = vld [vmem:[#allocation2 + $0xa4] sm:$0x1]  ;;  %v9160_v44 = vpack.c.b16 %v1773_v19, %v1772_v1  ;;  %v1405_v35 = vrot.slane %v1403_v16, 5  ;;  %v1409_v26 = vrot.slane %v1407_v52, 4  ;;  %1016 = vst [vmem:[#allocation2 + $0xbc] sm:$0x1] %v1015_v38  ;;  %v1519_v59 = vsel %vm9165_vm13, %v7877_v20, %v1518_v28 }
  0xa7   : > { %v1413_v0 = vshll.u32 %v9153_v62, 16  ;;  %v1396_v4 = vrot.slane %v1394_v2, 4  ;;  %v1399_v11 = vrot.slane %v1397_v18, 5  ;;  %v13181_v56 = vsel %vm9165_vm13, 4294967295, %v13180_v56  ;;  %v8399_v21 = vld [vmem:[#allocation2 + $0x8] sm:$0x1] }
  0xa8   : > { %13179 = vst [vmem:[#allocation23_spill] sm:$0xff] %v9160_v44  ;;  %v1520_v40 = vrot.slane %v1518_v28, 4  ;;  %v1521_v57 = vrot.slane %v8399_v21, 5  ;;  %1820 = vrot.lane.b32.xlu2 %v9160_v44, %s8504_s18  ;;  %v1410_v1 = vor.u32 %v1409_v26, %v1405_v35  ;;  %v8400_v30 = vld [vmem:[#allocation2 + $0x10] sm:$0xf]  ;;  %vm13135_vm3 = vcmask 261120  }
  0xa9   : > { %13182 = vst [vmem:[#allocation24_spill] sm:$0xff] %v13181_v56  ;;  %v1415_v43 = vrot.slane %v1413_v0, 5  ;;  %v1525_v19 = vrot.slane %v8400_v30, 5  ;;  %v8401_v16 = vld [vmem:[#allocation2 + $0x14] sm:$0x1]  ;;  %v1400_v2 = vor.u32 %v1399_v11, %v1396_v4 }
  0xaa   : > { %v1528_v52 = vrot.slane %v8401_v16, 5  ;;  %v1411_v18 = vrot.slane %v1410_v1, 4  ;;  %v9171_v38 = vld [vmem:[#allocation2 + $0xb4] sm:$0xf]  ;;  %v1522_v0 = vsel %vm9165_vm13, %v1520_v40, %v1521_v57  ;;  %v8402_v1 = vld [vmem:[#allocation2 + $0x1c] sm:$0xf] }
  0xab   : > { %v1526_v47 = vsel %vm9165_vm13, %v7878_v22, %v1525_v19  ;;  %v1527_v21 = vrot.slane %v1525_v19, 4  ;;  %v1401_v31 = vrot.slane %v1400_v2, 4  ;;  %v1442_v44 = vshrl.u32 %v9171_v38, 16 }
  0xac   : > { %v1445_v26 = vshll.u32 %v9171_v38, 16  ;;  %v1416_v4 = vsel %vm8698_vm2, %v1411_v18, %v1415_v43  ;;  %v9183_v11 = vld [vmem:[#allocation2 + $0xb8] sm:$0xf]  ;;  %v1826_v28 = vunpack.c.l.b16 %v1526_v47  ;;  %v1532_v22 = vrot.slane %v8402_v1, 5 }
  0xad   : > { %v1529_v20 = vsel %vm9165_vm13, %v1527_v21, %v1528_v52  ;;  %v1406_v30 = vsel %vm8698_vm2, %v1401_v31, %v1405_v35  ;;  %v1771_v19 = vunpack.c.l.b16 %v1416_v4  ;;  %v9189_v16 = vld [vmem:[#allocation2 + $0xbc] sm:$0x1]  ;;  %v1444_v2 = vrot.slane %v1442_v44, 4  ;;  %v8403_v21 = vld [vmem:[#allocation2 + $0x18] sm:$0xf] }
  0xae   : > { %v1447_v9 = vrot.slane %v1445_v26, 5  ;;  %v1770_v57 = vunpack.c.l.b16 %v1406_v30  ;;  %v1451_v40 = vshll.u32 %v9183_v11, 16  ;;  %v1455_v43 = vshrl.u32 %v9183_v11, 16  ;;  %v8404_v30 = vld [vmem:[#allocation2 + $0x20] sm:$0x1] }
  0xaf   : > { %v1461_v18 = vshll.u32 %v9189_v16, 16  ;;  %v1824_v52 = vunpack.c.l.b16 %v1519_v59  ;;  %v1827_v47 = vunpack.c.l.b16 %v1529_v20  ;;  %v7879_v1 = vrot.slane %v8403_v21, 9  ;;  %v8405_v59 = vld [vmem:[#allocation2 + $0x24] sm:$0xf] }
  0xb0   : > { %v1448_v8 = vor.u32 %v1447_v9, %v1444_v2  ;;  %v9194_v50 = vpack.c.b16 %v1771_v19, %v1770_v57  ;;  %v1453_v31 = vrot.slane %v1451_v40, 5  ;;  %v1457_v35 = vrot.slane %v1455_v43, 4  ;;  %v8406_v2 = vld [vmem:[#allocation2 + $0x28] sm:$0xf]  ;;  %v8409_v40 = vld [vmem:[#allocation2 + $0x34] sm:$0xf] }
  0xb1   : > { %v1825_v4 = vunpack.c.l.b16 %v1522_v0  ;;  %v9196_v44 = vpack.c.b16 %v1827_v47, %v1826_v28  ;;  %v1534_v26 = vrot.slane %v1532_v22, 4  ;;  %v1535_v25 = vrot.slane %v8404_v30, 5  ;;  %v8408_v28 = vld [vmem:[#allocation2 + $0x30] sm:$0xf] }
  0xb2   : > { %v1449_v55 = vrot.slane %v1448_v8, 4  ;;  %1818 = vrot.lane.b32.xlu1 %v9194_v50, %s8504_s18  ;;  %v1458_v5 = vor.u32 %v1457_v35, %v1453_v31  ;;  %v1463_v9 = vrot.slane %v1461_v18, 5  ;;  %v7880_v20 = vrot.slane %v8405_v59, 9  ;;  %v8407_v8 = vld [vmem:[#allocation2 + $0x2c] sm:$0x1] }
  0xb3   : > { %13183 = vst [vmem:[#allocation25_spill] sm:$0xff] %v9196_v44  ;;  %v1539_v21 = vrot.slane %v8406_v2, 5  ;;  %1874 = vrot.lane.b32.xlu2 %v9196_v44, %s13133_s19  ;;  %v1542_v0 = vrot.slane %v8407_v8, 5  ;;  %v7881_v57 = vrot.slane %v8408_v28, 9  ;;  %v1546_v43 = vrot.slane %v8409_v40, 5 }
  0xb4   : > { %v1454_v19 = vsel %vm8698_vm2, %v1449_v55, %v1453_v31  ;;  %v1459_v47 = vrot.slane %v1458_v5, 4  ;;  %v1856_v35 = vpack.c.b16 %v1825_v4, %v1824_v52  ;;  %v1533_v18 = vsel %vm9165_vm13, %v7879_v1, %v1532_v22  ;;  %v8410_v5 = vld [vmem:[#allocation2 + $0x38] sm:$0x1] }
  0xb5   : > { %v1774_v30 = vunpack.c.l.b16 %v1454_v19  ;;  %v1541_v59 = vrot.slane %v1539_v21, 4  ;;  %v1547_v55 = vsel %vm9165_vm13, %v7881_v57, %v1546_v43  ;;  %v1548_v31 = vrot.slane %v1546_v43, 4  ;;  %v8411_v19 = vld [vmem:[#allocation2 + $0x40] sm:$0xf]  ;;  %v8412_v43 = vld [vmem:[#allocation2 + $0x3c] sm:$0xf] }
  0xb6   : > { %v1464_v2 = vsel %vm8698_vm2, %v1459_v47, %v1463_v9  ;;  %v1536_v8 = vsel %vm9165_vm13, %v1534_v26, %v1535_v25  ;;  %v1540_v28 = vsel %vm9165_vm13, %v7880_v20, %v1539_v21  ;;  %v1549_v52 = vrot.slane %v8410_v5, 5  ;;  %v8413_v47 = vld [vmem:[#allocation2 + $0x44] sm:$0x1] }
  0xb7   : > { %v1775_v4 = vunpack.c.l.b16 %v1464_v2  ;;  %v1543_v22 = vsel %vm9165_vm13, %v1541_v59, %v1542_v0  ;;  %v1832_v1 = vunpack.c.l.b16 %v1547_v55  ;;  %v1553_v40 = vrot.slane %v8411_v19, 5 }
  0xb8   : > { %v1550_v57 = vsel %vm9165_vm13, %v1548_v31, %v1549_v52  ;;  %v7882_v9 = vrot.slane %v8412_v43, 9  ;;  %v1556_v44 = vrot.slane %v8413_v47, 5  ;;  %v1560_v25 = vrot.slane %v8876_v37, 5 }
  0xb9   : > { %v9219_v26 = vpack.c.b16 %v1775_v4, %v1774_v30  ;;  %v1833_v20 = vunpack.c.l.b16 %v1550_v57  ;;  %v1555_v21 = vrot.slane %v1553_v40, 4  ;;  %v7883_v2 = vrot.slane %v8873_v32, 9 }
  0xba   : > { %1872 = vrot.lane.b32.xlu1 %v1856_v35, %s13133_s19  ;;  %v1828_v0 = vunpack.c.l.b16 %v1533_v18  ;;  %v1830_v59 = vunpack.c.l.b16 %v1540_v28  ;;  %v1831_v55 = vunpack.c.l.b16 %v1543_v22  ;;  %v1829_v31 = vunpack.c.l.b16 %v1536_v8 }
  0xbb   : > { %1822 = vrot.lane.b32.xlu0 %v9219_v26, %s8504_s18  ;;  %v9225_v5 = vpack.c.b16 %v1833_v20, %v1832_v1  ;;  %v1562_v52 = vrot.slane %v1560_v25, 4  ;;  %v1563_v37 = vrot.slane %v8882_v41, 5  ;;  %v1554_v30 = vsel %vm9165_vm13, %v7882_v9, %v1553_v40 }
  0xbc   : > { %v7884_v4 = vrot.slane %v8944_v14, 9  ;;  %v1567_v32 = vrot.slane %v8960_v29, 5  ;;  %v1570_v35 = vrot.slane %v8962_v36, 5  ;;  %v1557_v18 = vsel %vm9165_vm13, %v1555_v21, %v1556_v44 }
  0xbd   : > { %1880 = vrot.lane.b32.xlu2 %v9225_v5, %s13133_s19  ;;  %v1561_v8 = vsel %vm9165_vm13, %v7883_v2, %v1560_v25  ;;  %v9239_v28 = vpack.c.b16 %v1831_v55, %v1830_v59  ;;  %v1574_v14 = vrot.slane %v8919_v34, 5  ;;  %v9244_v29 = vpack.c.b16 %v1829_v31, %v1828_v0 }
  0xbe   : > { %v1568_v41 = vsel %vm9165_vm13, %v7884_v4, %v1567_v32  ;;  %v1569_v22 = vrot.slane %v1567_v32, 4  ;;  %v1834_v36 = vunpack.c.l.b16 %v1554_v30  ;;  %v1564_v1 = vsel %vm9165_vm13, %v1562_v52, %v1563_v37 }
  0xbf   : > { %v1838_v19 = vunpack.c.l.b16 %v1568_v41  ;;  %v1835_v40 = vunpack.c.l.b16 %v1557_v18  ;;  %v1836_v44 = vunpack.c.l.b16 %v1561_v8  ;;  %v1581_v43 = vrot.slane %v8995_v45, 5 }
  0xc0   : > { %v1571_v57 = vsel %vm9165_vm13, %v1569_v22, %v1570_v35  ;;  %v7885_v47 = vrot.slane %v8911_v27, 9  ;;  %v1577_v25 = vrot.slane %v8933_v46, 5  ;;  %v7887_v34 = vrot.slane %v9051_v48, 9 }
  0xc1   : > { %v1839_v9 = vunpack.c.l.b16 %v1571_v57  ;;  %v1837_v20 = vunpack.c.l.b16 %v1564_v1  ;;  %v1576_v21 = vrot.slane %v1574_v14, 4  ;;  %v7886_v2 = vrot.slane %v8977_v12, 9 }
  0xc2   : > { %1878 = vrot.lane.b32.xlu1 %v9239_v28, %s13133_s19  ;;  %v1588_v0 = vrot.slane %v9055_v58, 5  ;;  %v1583_v59 = vrot.slane %v1581_v43, 4  ;;  %v1584_v27 = vrot.slane %v9003_v60, 5  ;;  %v1591_v46 = vrot.slane %v9061_v13, 5 }
  0xc3   : > { %1876 = vrot.lane.b32.xlu0 %v9244_v29, %s13133_s19  ;;  %v9260_v45 = vpack.c.b16 %v1839_v9, %v1838_v19  ;;  %v1575_v12 = vsel %vm9165_vm13, %v7885_v47, %v1574_v14  ;;  %v9270_v31 = vpack.c.b16 %v1837_v20, %v1836_v44  ;;  %v1578_v52 = vsel %vm9165_vm13, %v1576_v21, %v1577_v25 }
  0xc4   : > { %v1589_v48 = vsel %vm9165_vm13, %v7887_v34, %v1588_v0  ;;  %v1590_v55 = vrot.slane %v1588_v0, 4  ;;  %v1582_v60 = vsel %vm9165_vm13, %v7886_v2, %v1581_v43  ;;  %v9278_v37 = vpack.c.b16 %v1835_v40, %v1834_v36 }
  0xc5   : > { %1886 = vrot.lane.b32.xlu2 %v9260_v45, %s13133_s19  ;;  %v1844_v58 = vunpack.c.l.b16 %v1589_v48  ;;  %v1585_v30 = vsel %vm9165_vm13, %v1583_v59, %v1584_v27  ;;  %v1602_v32 = vrot.slane %v9090_v33, 5  ;;  %v1840_v35 = vunpack.c.l.b16 %v1575_v12 }
  0xc6   : > { %v1592_v13 = vsel %vm9165_vm13, %v1590_v55, %v1591_v46  ;;  %v1595_v18 = vrot.slane %v9033_v10, 5  ;;  %v7890_v8 = vrot.slane %v9147_v51, 9  ;;  %v1841_v41 = vunpack.c.l.b16 %v1578_v52 }
  0xc7   : > { %v1845_v4 = vunpack.c.l.b16 %v1592_v13  ;;  %v1842_v22 = vunpack.c.l.b16 %v1582_v60  ;;  %v1609_v1 = vrot.slane %v9145_v42, 5  ;;  %v1843_v36 = vunpack.c.l.b16 %v1585_v30 }
  0xc8   : > { %v7888_v19 = vrot.slane %v9017_v24, 9  ;;  %v7889_v40 = vrot.slane %v9076_v17, 9  ;;  %v1612_v33 = vrot.slane %v9153_v62, 5  ;;  %v1604_v10 = vrot.slane %v1602_v32, 4 }
  0xc9   : > { %v9285_v14 = vpack.c.b16 %v1845_v4, %v1844_v58  ;;  %v1605_v51 = vrot.slane %v9093_v39, 5  ;;  %v1610_v44 = vsel %vm9165_vm13, %v7890_v8, %v1609_v1  ;;  %v1611_v42 = vrot.slane %v1609_v1, 4  ;;  %v338_v8 = vld [vmem:[#allocation2 + $0xc0] sm:$0x1]  ;;  %v550_v1 = vld [vmem:[%s8647_s17 + $0xf0] sm:$0xff] }
  0xca   : > { %1884 = vrot.lane.b32.xlu1 %v9270_v31, %s13133_s19  ;;  %v1597_v57 = vrot.slane %v1595_v18, 4  ;;  %v1598_v43 = vrot.slane %v9039_v53, 5  ;;  %v1850_v17 = vunpack.c.l.b16 %v1610_v44  ;;  %v9303_v62 = vpack.c.b16 %v1841_v41, %v1840_v35 }
  0xcb   : > { %1882 = vrot.lane.b32.xlu0 %v9278_v37, %s13133_s19  ;;  %v1613_v24 = vsel %vm9165_vm13, %v1611_v42, %v1612_v33  ;;  %v9305_v9 = vpack.c.b16 %v1843_v36, %v1842_v22  ;;  %v1596_v39 = vsel %vm9165_vm13, %v7888_v19, %v1595_v18  ;;  %v1603_v25 = vsel %vm9165_vm13, %v7889_v40, %v1602_v32  ;;  %v9347_v18 = vpop.permute.xlu2 %1800  ;;  %v551_v36 = vld [vmem:[%s8647_s17 + $0xf8] sm:$0xff]  ;;  %s8515_s17 = smov 48  }
  0xcc   : > { %v1851_v47 = vunpack.c.l.b16 %v1613_v24  ;;  %v1606_v53 = vsel %vm9165_vm13, %v1604_v10, %v1605_v51  ;;  %v1623_v34 = vrot.slane %v9183_v11, 5  ;;  %v1599_v20 = vsel %vm9165_vm13, %v1597_v57, %v1598_v43  ;;  %13185 = vst [vmem:[#allocation27_spill] sm:$0xff] %v9347_v18  ;;  %v9359_v10 = vld [vmem:[#allocation2 + $0x30] sm:$0xff] }
  0xcd   : > { %1892 = vrot.lane.b32.xlu2 %v9285_v14, %s13133_s19  ;;  %v1616_v21 = vrot.slane %v9121_v63, 5  ;;  %v1846_v0 = vunpack.c.l.b16 %v1596_v39  ;;  %v1848_v59 = vunpack.c.l.b16 %v1603_v25  ;;  %v1849_v27 = vunpack.c.l.b16 %v1606_v53  ;;  %v9369_v25 = vld [vmem:[#allocation2 + $0x24] sm:$0xff] }
  0xce   : > { %v9317_v2 = vpack.c.b16 %v1851_v47, %v1850_v17  ;;  %v1847_v46 = vunpack.c.l.b16 %v1599_v20  ;;  %v7892_v48 = vrot.slane %v9171_v38, 9  ;;  %v1625_v11 = vrot.slane %v1623_v34, 4  ;;  %v9371_v20 = vld [vmem:[#allocation2 + $0x18] sm:$0xff] }
  0xcf   : > { %v1626_v55 = vrot.slane %v9189_v16, 5  ;;  %v7891_v12 = vrot.slane %v9115_v23, 9  ;;  %v1618_v63 = vrot.slane %v1616_v21, 4  ;;  %v1619_v58 = vrot.slane %v9123_v15, 5  ;;  %v9341_v16 = vld [vmem:[#allocation2 + $0xc] sm:$0xff] }
  0xd0   : > { %v9329_v52 = vpack.c.b16 %v1849_v27, %v1848_v59  ;;  %v9331_v60 = vpack.c.b16 %v1847_v46, %v1846_v0  ;;  %v1624_v13 = vsel %vm9165_vm13, %v7892_v48, %v1623_v34  ;;  %13184 = vst [vmem:[#allocation26_spill] sm:$0xff] %v9341_v16  ;;  %v339_v22 = vsel %vm8627_vm7, 0, %v338_v8  ;;  %v9377_v59 = vld [vmem:[#allocation2 + $0x54] sm:$0xff]  ;;  %v9386_v27 = vld [vmem:[#allocation2 + $0x48] sm:$0xff] }
  0xd1   : > { %v1627_v38 = vsel %vm9165_vm13, %v1625_v11, %v1626_v55  ;;  %v1617_v23 = vsel %vm9165_vm13, %v7891_v12, %v1616_v21  ;;  %v1620_v15 = vsel %vm9165_vm13, %v1618_v63, %v1619_v58  ;;  %v1854_v30 = vunpack.c.l.b16 %v1624_v13  ;;  %340 = vst [vmem:[#allocation2 + $0xc0] sm:$0x1] %v339_v22  ;;  %v9392_v48 = vld [vmem:[#allocation2 + $0x78] sm:$0xff]  ;;  %v9400_v11 = vld [vmem:[#allocation2 + $0x6c] sm:$0xff]  ;;  %v9402_v55 = vld [vmem:[#allocation2 + $0x60] sm:$0xff]  ;;  %v9412_v58 = vpop.permute.xlu0 %1792  ;;  %v9414_v13 = vpop.permute.xlu1 %1796 }
  0xd2   : > { %1890 = vrot.lane.b32.xlu1 %v9305_v9, %s13133_s19  ;;  %v1855_v4 = vunpack.c.l.b16 %v1627_v38  ;;  %v1852_v32 = vunpack.c.l.b16 %v1617_v23  ;;  %v1853_v35 = vunpack.c.l.b16 %v1620_v15  ;;  %v582_v40 = vpack.c.bf16 %v550_v1, %v550_v1  ;;  %13187 = vst [vmem:[#allocation29_spill] sm:$0xff] %v9377_v59  ;;  %v9404_v12 = vld [vmem:[#allocation2 + $0x9c] sm:$0xff]  ;;  %v9418_v38 = vld [vmem:[#allocation2 + $0x90] sm:$0xff]  ;;  %v9420_v23 = vld [vmem:[#allocation2 + $0x84] sm:$0xff] }
  0xd3   : > { %1888 = vrot.lane.b32.xlu0 %v9303_v62, %s13133_s19  ;;  %v583_v33 = vpack.c.bf16 %v551_v36, %v551_v36  ;;  %v9367_v17 = vpop.permute.xlu2 %1802  ;;  %13188 = vst [vmem:[#allocation30_spill] sm:$0xff] %v9386_v27  ;;  %v394_v15 = vld [vmem:[#allocation2 + $0xc8] sm:$0x1]  ;;  %v9436_v22 = vld [vmem:[#allocation2 + $0xb4] sm:$0xff] }
  0xd4   : > { %v9351_v41 = vpack.c.b16 %v1855_v4, %v1854_v30  ;;  %v9357_v19 = vpack.c.b16 %v1853_v35, %v1852_v32  ;;  %v842_v51 = vshrl.u32 %v582_v40, 16  ;;  %v845_v57 = vshll.u32 %v582_v40, 16  ;;  %13186 = vst [vmem:[#allocation28_spill] sm:$0xff] %v9367_v17  ;;  %v9440_v36 = vld [vmem:[#allocation2 + $0xa8] sm:$0xff] }
  0xd5   : > { %1898 = vrot.lane.b32.xlu2 %v9317_v2, %s13133_s19  ;;  %v850_v44 = vshrl.u32 %v583_v33, 16  ;;  %v853_v24 = vshll.u32 %v583_v33, 16  ;;  %13191 = vst [vmem:[#allocation33_spill] sm:$0xff] %v9392_v48  ;;  %v395_v30 = vsel %vm8636_vm10, 0, %v394_v15 }
  0xd6   : > { %v844_v42 = vrot.slane %v842_v51, 7  ;;  %13192 = vst [vmem:[#allocation34_spill] sm:$0xff] %v9400_v11  ;;  %v13201_v51 = vld [vmem:[#allocation15_spill] sm:$0xff] }
  0xd7   : > { %v852_v43 = vrot.slane %v850_v44, 7  ;;  %13193 = vst [vmem:[#allocation35_spill] sm:$0xff] %v9402_v55 }
  0xd8   : > { %v847_v47 = vor.u32 %v845_v57, %v844_v42  ;;  %v848_v39 = vrot.slane %v844_v42, 4  ;;  %v1017_v34 = vld [vmem:[#allocation2 + $0xc0] sm:$0xf]  ;;  %13195 = vst [vmem:[#allocation37_spill] sm:$0xff] %v9414_v13 }
  0xd9   : > { %v855_v53 = vor.u32 %v853_v24, %v852_v43  ;;  %13196 = vst [vmem:[#allocation38_spill] sm:$0xff] %v9418_v38  ;;  %v9432_v35 = vpop.permute.xlu0 %1794  ;;  %v857_v8 = vrot.slane %v852_v43, 4  ;;  %v9438_v1 = vpop.permute.xlu1 %1798  ;;  %v13206_v43 = vld [vmem:[#allocation13_spill] sm:$0xff]  ;;  %v13207_v24 = vld [vmem:[#allocation16_spill] sm:$0xff] }
  0xda   : > { %1896 = vrot.lane.b32.xlu1 %v9329_v52, %s13133_s19  ;;  %v1018_v21 = vsel %vm8684_vm0, %v847_v47, %v1017_v34  ;;  %13197 = vst [vmem:[#allocation39_spill] sm:$0xff] %v9420_v23  ;;  %vm13136_vm0 = vcmask 130048  }
  0xdb   : > { %1894 = vrot.lane.b32.xlu0 %v9331_v60, %s13133_s19  ;;  %v856_v0 = vsel %vm8678_vm15, %v848_v39, %v855_v53  ;;  %1019 = vst [vmem:[#allocation2 + $0xc0] sm:$0xf] %v1018_v21  ;;  %v9390_v46 = vpop.permute.xlu2 %1808  ;;  %v13210_v53 = vld [vmem:[#allocation14_spill] sm:$0xff]  ;;  %v13212_v21 = vld [vmem:[#allocation11_spill] sm:$0xff] }
  0xdc   : > { %1020 = vst.msk [vmem:[#allocation2 + $0xc4] sm:$0xf] %vm907_vm11, %v856_v0  ;;  %v13213_v0 = vld [vmem:[#allocation19_spill] sm:$0xff]  ;;  %vm13138_vm11 = vcmask 97280  }
  0xdd   : > { %1907 = vrot.lane.b32.xlu2 %v9341_v16, %s8506_s20  ;;  %13190 = vst [vmem:[#allocation32_spill] sm:$0xff] %v9390_v46  ;;  %v13220_v16 = vld [vmem:[#allocation20_spill] sm:$0xff] }
  0xde   : > { %396 = vst [vmem:[#allocation2 + $0xc8] sm:$0x1] %v395_v30 }
  0xdf   : > { %13199 = vst [vmem:[#allocation41_spill] sm:$0xff] %v9432_v35 }
  0xe0   : > { %13200 = vst [vmem:[#allocation42_spill] sm:$0xff] %v9438_v1 }
  0xe1   : > { %v9452_v42 = vpop.permute.xlu0 %1804 }
  0xe2   : > { %1902 = vrot.lane.b32.xlu1 %v9351_v41, %s13133_s19  ;;  %13203 = vst [vmem:[#allocation43_spill] sm:$0xff] %v9452_v42  ;;  %v9474_v15 = vld [vmem:[#allocation2 + $0xc0] sm:$0xf] }
  0xe3   : > { %1900 = vrot.lane.b32.xlu0 %v9357_v19, %s13133_s19  ;;  %v9424_v4 = vld [vmem:[#allocation2 + $0xc0] sm:$0xff] }
  0xe4   : > { %v9476_v30 = vld [vmem:[#allocation2 + $0xc4] sm:$0xf] }
  0xe5   : > { %1913 = vrot.lane.b32.xlu2 %v9359_v10, %s8506_s20  ;;  %v1021_v40 = vld [vmem:[#allocation2 + $0xc8] sm:$0x1]  ;;  %v1642_v49 = vshrl.u32 %v9476_v30, 16 }
  0xe6   : > { %v1022_v33 = vsel %vm8691_vm1, %v857_v8, %v1021_v40  ;;  %v1629_v40 = vshrl.u32 %v9474_v15, 16  ;;  %vm13137_vm1 = vcmask 195584  }
  0xe7   : > { %1023 = vst [vmem:[#allocation2 + $0xc8] sm:$0x1] %v1022_v33  ;;  %v1632_v33 = vshll.u32 %v9474_v15, 16  ;;  %v1644_v17 = vrot.slane %v1642_v49, 4 }
  0xe9   : > { %v9406_v63 = vpop.permute.xlu2 %1814 }
  0xea   : > { %1911 = vrot.lane.b32.xlu1 %v9369_v25, %s8506_s20  ;;  %13194 = vst [vmem:[#allocation36_spill] sm:$0xff] %v9406_v63  ;;  %v13215_v63 = vld [vmem:[#allocation17_spill] sm:$0xff] }
  0xeb   : > { %1909 = vrot.lane.b32.xlu0 %v9371_v20, %s8506_s20 }
  0xed   : > { %1919 = vrot.lane.b32.xlu2 %v9377_v59, %s8506_s20  ;;  %v9454_v57 = vpop.permute.xlu1 %1806 }
  0xee   : > { %13204 = vst [vmem:[#allocation44_spill] sm:$0xff] %v9454_v57  ;;  %v1631_v57 = vrot.slane %v1629_v40, 4  ;;  %v1074_v18 = vld [vmem:[#allocation2 + $0xc8] sm:$0x1] }
  0xf2   : > { %1917 = vrot.lane.b32.xlu1 %v9386_v27, %s8506_s20 }
  0xf3   : > { %1915 = vrot.lane.b32.xlu0 %v9388_v54, %s8506_s20 }
  0xf5   : > { %1925 = vrot.lane.b32.xlu2 %v9392_v48, %s8506_s20 }
  0xf7   : > { %v9464_v39 = vpop.permute.xlu0 %1810 }
  0xf8   : > { %13209 = vst [vmem:[#allocation13_spill] sm:$0xff] %v9464_v39 }
  0xfa   : > { %1923 = vrot.lane.b32.xlu1 %v9400_v11, %s8506_s20 }
  0xfb   : > { %1921 = vrot.lane.b32.xlu0 %v9402_v55, %s8506_s20 }
  0xfd   : > { %1931 = vrot.lane.b32.xlu2 %v9404_v12, %s8506_s20 }
 0x102   : > { %1929 = vrot.lane.b32.xlu1 %v9418_v38, %s8506_s20  ;;  %v9430_v32 = vpop.permute.xlu2 %1820 }
 0x103   : > { %1927 = vrot.lane.b32.xlu0 %v9420_v23, %s8506_s20  ;;  %13198 = vst [vmem:[#allocation40_spill] sm:$0xff] %v9430_v32 }
 0x105   : > { %1937 = vrot.lane.b32.xlu2 %v9424_v4, %s8506_s20 }
 0x107   : > { %v9468_v34 = vpop.permute.xlu1 %1812 }
 0x108   : > { %13211 = vst [vmem:[#allocation16_spill] sm:$0xff] %v9468_v34  ;;  %v13216_v34 = vld [vmem:[#allocation18_spill] sm:$0xff] }
 0x10a   : > { %1935 = vrot.lane.b32.xlu1 %v9436_v22, %s8506_s20 }
 0x10b   : > { %1933 = vrot.lane.b32.xlu0 %v9440_v36, %s8506_s20 }
 0x10d   : > { %1946 = vrot.lane.b32.xlu2 %v13201_v51, %s8507_s21  ;;  %v9450_v44 = vpop.permute.xlu2 %1874 }
 0x10e   : > { %13202 = vst [vmem:[#allocation15_spill] sm:$0xff] %v9450_v44  ;;  %v1648_v44 = vshll.u32 %v1074_v18, 16 }
 0x110   : > { %v9488_v39 = vpop.permute.xlu0 %1816  ;;  %v1650_v49 = vrot.slane %v1648_v44, 5 }
 0x111   : > { %13217 = vst [vmem:[#allocation11_spill] sm:$0xff] %v9488_v39  ;;  %v13221_v39 = vld [vmem:[#allocation21_spill] sm:$0xff] }
 0x112   : > { %1944 = vrot.lane.b32.xlu1 %v13205_v61, %s8507_s21 }
 0x113   : > { %1942 = vrot.lane.b32.xlu0 %v13206_v43, %s8507_s21  ;;  %v1638_v43 = vshll.u32 %v9476_v30, 16 }
 0x115   : > { %1952 = vrot.lane.b32.xlu2 %v13207_v24, %s8507_s21  ;;  %v1640_v42 = vrot.slane %v1638_v43, 5 }
 0x117   : > { %v9462_v47 = vpop.permute.xlu2 %1880  ;;  %v1645_v13 = vor.u32 %v1644_v17, %v1640_v42 }
 0x118   : > { %13208 = vst [vmem:[#allocation12_spill] sm:$0xff] %v9462_v47  ;;  %v13218_v47 = vld [vmem:[#allocation22_spill] sm:$0xff] }
 0x11a   : > { %1950 = vrot.lane.b32.xlu1 %v13210_v53, %s8507_s21 }
 0x11b   : > { %1948 = vrot.lane.b32.xlu0 %v13212_v21, %s8507_s21 }
 0x11d   : > { %1958 = vrot.lane.b32.xlu2 %v13213_v0, %s8507_s21 }
 0x11f   : > { %v9478_v8 = vpop.permute.xlu2 %1886 }
 0x120   : > { %13214 = vst [vmem:[#allocation14_spill] sm:$0xff] %v9478_v8  ;;  %v1634_v8 = vrot.slane %v1632_v33, 5  ;;  %v1646_v33 = vrot.slane %v1645_v13, 4 }
 0x122   : > { %1956 = vrot.lane.b32.xlu1 %v13215_v63, %s8507_s21  ;;  %v1635_v1 = vor.u32 %v1634_v8, %v1631_v57  ;;  %v1651_v57 = vsel %vm8698_vm2, %v1646_v33, %v1650_v49  ;;  %v13223_v8 = vld [vmem:[#allocation23_spill] sm:$0xff]  ;;  %v13226_v33 = vld [vmem:[#allocation25_spill] sm:$0xff] }
 0x123   : > { %1954 = vrot.lane.b32.xlu0 %v13216_v34, %s8507_s21 }
 0x124   : > { %v9490_v46 = vpop.permute.xlu1 %1818  ;;  %v1636_v40 = vrot.slane %v1635_v1, 4  ;;  %v1940_v1 = vunpack.c.l.b16 %v1651_v57 }
 0x125   : > { %1964 = vrot.lane.b32.xlu2 %v13218_v47, %s8507_s21 }
 0x126   : > { %v1641_v17 = vsel %vm8698_vm2, %v1636_v40, %v1640_v42 }
 0x127   : > { %v9494_v32 = vpop.permute.xlu2 %1892  ;;  %v1939_v13 = vunpack.c.l.b16 %v1641_v17 }
 0x128   : > { %13219 = vst [vmem:[#allocation19_spill] sm:$0xff] %v9494_v32 }
 0x129   : > { %v9522_v42 = vpack.c.b16 %v1940_v1, %v1939_v13 }
 0x12a   : > { %1962 = vrot.lane.b32.xlu1 %v13220_v16, %s8507_s21 }
 0x12b   : > { %1960 = vrot.lane.b32.xlu0 %v13221_v39, %s8507_s21 }
 0x12c   : > { %v9500_v35 = vpop.permute.xlu1 %1872 }
 0x12d   : > { %v9502_v43 = vpop.permute.xlu0 %1822  ;;  %1970 = vrot.lane.b32.xlu2 %v9219_v26, %s8507_s21 }
 0x12e   : > { %13222 = vst [vmem:[#allocation17_spill] sm:$0xff] %v9502_v43 }
 0x12f   : > { %v9506_v32 = vpop.permute.xlu2 %1898 }
 0x132   : > { %1968 = vrot.lane.b32.xlu1 %v13223_v8, %s8507_s21 }
 0x133   : > { %1966 = vrot.lane.b32.xlu0 %v9194_v50, %s8507_s21 }
 0x134   : > { %v9516_v44 = vpop.permute.xlu1 %1878 }
 0x135   : > { %13224 = vst [vmem:[#allocation18_spill] sm:$0xff] %v9516_v44  ;;  %v9518_v43 = vpop.permute.xlu0 %1876  ;;  %1979 = vrot.lane.b32.xlu2 %v9244_v29, %s8508_s22  ;;  %v1660_v44 = vrot.slane %v1074_v18, 5 }
 0x136   : > { %13225 = vst [vmem:[#allocation22_spill] sm:$0xff] %v9518_v43 }
 0x137   : > { %v9524_v40 = vpop.permute.xlu2 %1907 }
 0x13a   : > { %1977 = vrot.lane.b32.xlu1 %v13226_v33, %s8508_s22 }
 0x13b   : > { %1972 = vrot.lane.b32.xlu0 %v9522_v42, %s8507_s21 }
 0x13c   : > { %v9530_v49 = vpop.permute.xlu1 %1884 }
 0x13d   : > { %13227 = vst [vmem:[#allocation20_spill] sm:$0xff] %v9530_v49  ;;  %v9532_v17 = vpop.permute.xlu0 %1882  ;;  %1985 = vrot.lane.b32.xlu2 %v9278_v37, %s8508_s22 }
 0x13e   : > { %13228 = vst [vmem:[#allocation21_spill] sm:$0xff] %v9532_v17 }
 0x13f   : > { %v9536_v57 = vpop.permute.xlu2 %1913 }
 0x140   : > { %13229 = vst [vmem:[#allocation23_spill] sm:$0xff] %v9536_v57 }
 0x142   : > { %1983 = vrot.lane.b32.xlu1 %v9225_v5, %s8508_s22 }
 0x143   : > { %1981 = vrot.lane.b32.xlu0 %v9239_v28, %s8508_s22 }
 0x144   : > { %v9542_v13 = vpop.permute.xlu1 %1890 }
 0x145   : > { %13230 = vst [vmem:[#allocation25_spill] sm:$0xff] %v9542_v13  ;;  %v9544_v1 = vpop.permute.xlu0 %1888  ;;  %1991 = vrot.lane.b32.xlu2 %v9303_v62, %s8508_s22 }
 0x146   : > { %13231 = vst [vmem:[#allocation45_spill] sm:$0xff] %v9544_v1  ;;  %v1657_v1 = vrot.slane %v9476_v30, 5 }
 0x147   : > { %v9548_v33 = vpop.permute.xlu2 %1919 }
 0x148   : > { %13232 = vst [vmem:[#allocation46_spill] sm:$0xff] %v9548_v33  ;;  %v7893_v33 = vrot.slane %v9474_v15, 9  ;;  %v1659_v57 = vrot.slane %v1657_v1, 4 }
 0x14a   : > { %1989 = vrot.lane.b32.xlu1 %v9260_v45, %s8508_s22  ;;  %v1658_v30 = vsel %vm9165_vm13, %v7893_v33, %v1657_v1  ;;  %v1661_v43 = vsel %vm9165_vm13, %v1659_v57, %v1660_v44  ;;  %v341_v57 = vld [vmem:[#allocation2 + $0xcc] sm:$0x1] }
 0x14b   : > { %1987 = vrot.lane.b32.xlu0 %v9270_v31, %s8508_s22  ;;  %v1974_v15 = vunpack.c.l.b16 %v1658_v30  ;;  %v1975_v18 = vunpack.c.l.b16 %v1661_v43 }
 0x14c   : > { %v9554_v49 = vpop.permute.xlu1 %1896 }
 0x14d   : > { %13233 = vst [vmem:[#allocation47_spill] sm:$0xff] %v9554_v49  ;;  %v9556_v17 = vpop.permute.xlu0 %1894  ;;  %1997 = vrot.lane.b32.xlu2 %v9331_v60, %s8508_s22  ;;  %v9590_v1 = vpack.c.b16 %v1975_v18, %v1974_v15  ;;  %v342_v15 = vsel %vm8627_vm7, 0, %v341_v57  ;;  %vm2451_vm7 = vcmask 1041408  }
 0x14e   : > { %13234 = vst [vmem:[#allocation48_spill] sm:$0xff] %v9556_v17 }
 0x14f   : > { %v9560_v13 = vpop.permute.xlu2 %1925  ;;  %343 = vst [vmem:[#allocation2 + $0xcc] sm:$0x1] %v342_v15 }
 0x150   : > { %13235 = vst [vmem:[#allocation49_spill] sm:$0xff] %v9560_v13 }
 0x152   : > { %1995 = vrot.lane.b32.xlu1 %v9285_v14, %s8508_s22 }
 0x153   : > { %1993 = vrot.lane.b32.xlu0 %v9305_v9, %s8508_s22 }
 0x154   : > { %v9568_v49 = vpop.permute.xlu1 %1902 }
 0x155   : > { %13236 = vst [vmem:[#allocation50_spill] sm:$0xff] %v9568_v49  ;;  %v9570_v17 = vpop.permute.xlu0 %1900  ;;  %2003 = vrot.lane.b32.xlu2 %v9357_v19, %s8508_s22 }
 0x156   : > { %13237 = vst [vmem:[#allocation51_spill] sm:$0xff] %v9570_v17 }
 0x157   : > { %v9574_v13 = vpop.permute.xlu2 %1931 }
 0x158   : > { %13238 = vst [vmem:[#allocation52_spill] sm:$0xff] %v9574_v13 }
 0x15a   : > { %2001 = vrot.lane.b32.xlu1 %v9317_v2, %s8508_s22 }
 0x15b   : > { %1999 = vrot.lane.b32.xlu0 %v9329_v52, %s8508_s22 }
 0x15c   : > { %v9584_v49 = vpop.permute.xlu1 %1911 }
 0x15d   : > { %v9586_v17 = vpop.permute.xlu0 %1909  ;;  %2012 = vrot.lane.b32.xlu2 %v9371_v20, %s8509_s23 }
 0x15f   : > { %v9592_v33 = vpop.permute.xlu2 %1937 }
 0x162   : > { %2007 = vrot.lane.b32.xlu1 %v9590_v1, %s8508_s22 }
 0x163   : > { %2005 = vrot.lane.b32.xlu0 %v9351_v41, %s8508_s22  ;;  %s8517_s22 = smov 72  }
 0x164   : > { %v9598_v43 = vpop.permute.xlu1 %1917 }
 0x165   : > { %13239 = vst [vmem:[#allocation53_spill] sm:$0xff] %v9598_v43  ;;  %v9600_v44 = vpop.permute.xlu0 %1915  ;;  %2018 = vrot.lane.b32.xlu2 %v9388_v54, %s8509_s23 }
 0x167   : > { %v9604_v30 = vpop.permute.xlu2 %1946 }
 0x16a   : > { %2016 = vrot.lane.b32.xlu1 %v9359_v10, %s8509_s23 }
 0x16b   : > { %2014 = vrot.lane.b32.xlu0 %v9369_v25, %s8509_s23 }
 0x16c   : > { %v9612_v18 = vpop.permute.xlu1 %1923 }
 0x16d   : > { %13240 = vst [vmem:[#allocation54_spill] sm:$0xff] %v9612_v18  ;;  %v9614_v13 = vpop.permute.xlu0 %1921  ;;  %2024 = vrot.lane.b32.xlu2 %v9402_v55, %s8509_s23 }
 0x16e   : > { %13241 = vst [vmem:[#allocation55_spill] sm:$0xff] %v9614_v13 }
 0x16f   : > { %v9618_v43 = vpop.permute.xlu2 %1952 }
 0x170   : > { %13242 = vst [vmem:[#allocation56_spill] sm:$0xff] %v9618_v43 }
 0x172   : > { %2022 = vrot.lane.b32.xlu1 %v9377_v59, %s8509_s23 }
 0x173   : > { %2020 = vrot.lane.b32.xlu0 %v9386_v27, %s8509_s23 }
 0x174   : > { %v9624_v3 = vpop.permute.xlu1 %1929 }
 0x175   : > { %13243 = vst [vmem:[#allocation57_spill] sm:$0xff] %v9624_v3  ;;  %v9626_v57 = vpop.permute.xlu0 %1927  ;;  %2030 = vrot.lane.b32.xlu2 %v9420_v23, %s8509_s23 }
 0x176   : > { %13244 = vst [vmem:[#allocation58_spill] sm:$0xff] %v9626_v57  ;;  %v8269_v57 = vld [vmem:[#allocation2 + $0xcc] sm:$0xff] }
 0x177   : > { %v9630_v15 = vpop.permute.xlu2 %1958 }
 0x178   : > { %13245 = vst [vmem:[#allocation59_spill] sm:$0xff] %v9630_v15 }
 0x17a   : > { %2028 = vrot.lane.b32.xlu1 %v9392_v48, %s8509_s23 }
 0x17b   : > { %2026 = vrot.lane.b32.xlu0 %v9400_v11, %s8509_s23 }
 0x17c   : > { %v9636_v18 = vpop.permute.xlu1 %1935 }
 0x17d   : > { %v9638_v55 = vpop.permute.xlu0 %1933  ;;  %2036 = vrot.lane.b32.xlu2 %v9440_v36, %s8509_s23 }
 0x17f   : > { %v9642_v3 = vpop.permute.xlu2 %1964 }
 0x180   : > { %13246 = vst [vmem:[#allocation60_spill] sm:$0xff] %v9642_v3 }
 0x182   : > { %2034 = vrot.lane.b32.xlu1 %v9404_v12, %s8509_s23 }
 0x183   : > { %2032 = vrot.lane.b32.xlu0 %v9418_v38, %s8509_s23  ;;  %v397_v38 = vld [vmem:[#allocation2 + $0xd4] sm:$0x1] }
 0x184   : > { %v9648_v23 = vpop.permute.xlu1 %1944 }
 0x185   : > { %v9650_v48 = vpop.permute.xlu0 %1942  ;;  %2042 = vrot.lane.b32.xlu2 %v8269_v57, %s8509_s23  ;;  %v398_v57 = vsel %vm8636_vm10, 0, %v397_v38  ;;  %v9687_v38 = vld [vmem:[#allocation2 + $0xcc] sm:$0xf]  ;;  %vm2114_vm10 = vcmask 31744  }
 0x186   : > { %399 = vst [vmem:[#allocation2 + $0xd4] sm:$0x1] %v398_v57  ;;  %v1663_v57 = vshrl.u32 %v9687_v38, 16 }
 0x187   : > { %v9653_v11 = vpop.permute.xlu2 %1970 }
 0x18a   : > { %2040 = vrot.lane.b32.xlu1 %v9424_v4, %s8509_s23 }
 0x18b   : > { %2038 = vrot.lane.b32.xlu0 %v9436_v22, %s8509_s23 }
 0x18c   : > { %v9659_v3 = vpop.permute.xlu1 %1950 }
 0x18d   : > { %13247 = vst [vmem:[#allocation61_spill] sm:$0xff] %v9659_v3  ;;  %v9661_v15 = vpop.permute.xlu0 %1948  ;;  %2051 = vrot.lane.b32.xlu2 %v13212_v21, %s8510_s29 }
 0x18f   : > { %v9665_v13 = vpop.permute.xlu2 %1979 }
 0x192   : > { %2049 = vrot.lane.b32.xlu1 %v13201_v51, %s8510_s29  ;;  %v9689_v51 = vld [vmem:[#allocation2 + $0xd0] sm:$0xf] }
 0x193   : > { %2047 = vrot.lane.b32.xlu0 %v13205_v61, %s8510_s29 }
 0x194   : > { %v9673_v4 = vpop.permute.xlu1 %1956 }
 0x195   : > { %13248 = vst [vmem:[#allocation62_spill] sm:$0xff] %v9673_v4  ;;  %v9675_v59 = vpop.permute.xlu0 %1954  ;;  %2057 = vrot.lane.b32.xlu2 %v13216_v34, %s8510_s29  ;;  %v1672_v4 = vshll.u32 %v9689_v51, 16 }
 0x196   : > { %13249 = vst [vmem:[#allocation63_spill] sm:$0xff] %v9675_v59 }
 0x197   : > { %v9679_v21 = vpop.permute.xlu2 %1985  ;;  %v1674_v59 = vrot.slane %v1672_v4, 5 }
 0x198   : > { %13250 = vst [vmem:[#allocation64_spill] sm:$0xff] %v9679_v21 }
 0x19a   : > { %2055 = vrot.lane.b32.xlu1 %v13207_v24, %s8510_s29  ;;  %v1666_v24 = vshll.u32 %v9687_v38, 16 }
 0x19b   : > { %2053 = vrot.lane.b32.xlu0 %v13210_v53, %s8510_s29  ;;  %v1676_v53 = vshrl.u32 %v9689_v51, 16 }
 0x19c   : > { %v9685_v7 = vpop.permute.xlu1 %1962 }
 0x19d   : > { %13251 = vst [vmem:[#allocation65_spill] sm:$0xff] %v9685_v7  ;;  %v9691_v61 = vpop.permute.xlu0 %1960  ;;  %2063 = vrot.lane.b32.xlu2 %v13221_v39, %s8510_s29  ;;  %v1665_v7 = vrot.slane %v1663_v57, 4  ;;  %v1678_v39 = vrot.slane %v1676_v53, 4 }
 0x19e   : > { %13252 = vst [vmem:[#allocation66_spill] sm:$0xff] %v9691_v61  ;;  %v1668_v61 = vrot.slane %v1666_v24, 5 }
 0x19f   : > { %v9695_v34 = vpop.permute.xlu2 %1991  ;;  %v1679_v3 = vor.u32 %v1678_v39, %v1674_v59 }
 0x1a0   : > { %13253 = vst [vmem:[#allocation67_spill] sm:$0xff] %v9695_v34  ;;  %v1077_v34 = vld [vmem:[#allocation2 + $0xd4] sm:$0x1]  ;;  %v1669_v21 = vor.u32 %v1668_v61, %v1665_v7 }
 0x1a1   : > { %v1680_v4 = vrot.slane %v1679_v3, 4 }
 0x1a2   : > { %2061 = vrot.lane.b32.xlu1 %v13213_v0, %s8510_s29  ;;  %v1682_v0 = vshll.u32 %v1077_v34, 16 }
 0x1a3   : > { %2059 = vrot.lane.b32.xlu0 %v13215_v63, %s8510_s29  ;;  %v1670_v63 = vrot.slane %v1669_v21, 4 }
 0x1a4   : > { %v9705_v27 = vpop.permute.xlu1 %1968  ;;  %v1684_v57 = vrot.slane %v1682_v0, 5 }
 0x1a5   : > { %v9707_v43 = vpop.permute.xlu0 %1966  ;;  %2069 = vrot.lane.b32.xlu2 %v9194_v50, %s8510_s29  ;;  %v1675_v7 = vsel %vm8698_vm2, %v1670_v63, %v1674_v59  ;;  %v1691_v63 = vrot.slane %v9689_v51, 5 }
 0x1a6   : > { %13254 = vst [vmem:[#allocation68_spill] sm:$0xff] %v9707_v43 }
 0x1a7   : > { %v9711_v54 = vpop.permute.xlu2 %1997 }
 0x1a8   : > { %13255 = vst [vmem:[#allocation69_spill] sm:$0xff] %v9711_v54  ;;  %v8252_v54 = vld [vmem:[#allocation2] sm:$0xff] }
 0x1aa   : > { %2067 = vrot.lane.b32.xlu1 %v13218_v47, %s8510_s29  ;;  %v1685_v47 = vsel %vm8698_vm2, %v1680_v4, %v1684_v57 }
 0x1ab   : > { %2065 = vrot.lane.b32.xlu0 %v13220_v16, %s8510_s29  ;;  %v2044_v16 = vunpack.c.l.b16 %v1675_v7  ;;  %v2045_v3 = vunpack.c.l.b16 %v1685_v47 }
 0x1ac   : > { %v9717_v24 = vpop.permute.xlu1 %1977 }
 0x1ad   : > { %v9719_v53 = vpop.permute.xlu0 %1972  ;;  %2073 = vrot.lane.b32.xlu2 %v9219_v26, %s8510_s29  ;;  %v2046_v59 = vpack.c.b16 %v2045_v3, %v2044_v16 }
 0x1af   : > { %v9723_v50 = vpop.permute.xlu2 %2003 }
 0x1b2   : > { %2082 = vrot.lane.b32.xlu1 %v9244_v29, %s13131_s8 }
 0x1b3   : > { %2071 = vrot.lane.b32.xlu0 %v13223_v8, %s8510_s29 }
 0x1b4   : > { %v9733_v21 = vpop.permute.xlu1 %1983 }
 0x1b5   : > { %v9735_v26 = vpop.permute.xlu0 %1981  ;;  %2084 = vrot.lane.b32.xlu2 %v9239_v28, %s13131_s8 }
 0x1b7   : > { %v9739_v61 = vpop.permute.xlu2 %2012 }
 0x1ba   : > { %2077 = vrot.lane.b32.xlu1 %v2046_v59, %s8510_s29 }
 0x1bb   : > { %2075 = vrot.lane.b32.xlu0 %v9522_v42, %s8510_s29  ;;  %s8518_s29 = smov 60  }
 0x1bc   : > { %v9744_v29 = vpop.permute.xlu1 %1989 }
 0x1bd   : > { %v9746_v39 = vpop.permute.xlu0 %1987  ;;  %2090 = vrot.lane.b32.xlu2 %v9270_v31, %s13131_s8 }
 0x1bf   : > { %v9750_v8 = vpop.permute.xlu2 %2018 }
 0x1c2   : > { %2088 = vrot.lane.b32.xlu1 %v9278_v37, %s13131_s8 }
 0x1c3   : > { %2086 = vrot.lane.b32.xlu0 %v9225_v5, %s13131_s8 }
 0x1c4   : > { %v9756_v28 = vpop.permute.xlu1 %1995 }
 0x1c5   : > { %13256 = vst [vmem:[#allocation70_spill] sm:$0xff] %v9756_v28  ;;  %v9758_v0 = vpop.permute.xlu0 %1993  ;;  %2096 = vrot.lane.b32.xlu2 %v9305_v9, %s13131_s8  ;;  %v1694_v9 = vrot.slane %v1077_v34, 5 }
 0x1c7   : > { %v9762_v42 = vpop.permute.xlu2 %2024 }
 0x1ca   : > { %2094 = vrot.lane.b32.xlu1 %v9303_v62, %s13131_s8  ;;  %v7894_v62 = vrot.slane %v9687_v38, 9 }
 0x1cb   : > { %2092 = vrot.lane.b32.xlu0 %v9260_v45, %s13131_s8  ;;  %v1693_v45 = vrot.slane %v1691_v63, 4 }
 0x1cc   : > { %v9768_v31 = vpop.permute.xlu1 %2001  ;;  %v1692_v51 = vsel %vm9165_vm13, %v7894_v62, %v1691_v63 }
 0x1cd   : > { %13257 = vst [vmem:[#allocation71_spill] sm:$0xff] %v9768_v31  ;;  %v9770_v37 = vpop.permute.xlu0 %1999  ;;  %2102 = vrot.lane.b32.xlu2 %v9329_v52, %s13131_s8 }
 0x1ce   : > { %13258 = vst [vmem:[#allocation72_spill] sm:$0xff] %v9770_v37 }
 0x1cf   : > { %v9774_v5 = vpop.permute.xlu2 %2030 }
 0x1d0   : > { %13259 = vst [vmem:[#allocation73_spill] sm:$0xff] %v9774_v5 }
 0x1d2   : > { %2100 = vrot.lane.b32.xlu1 %v9331_v60, %s13131_s8  ;;  %v1695_v60 = vsel %vm9165_vm13, %v1693_v45, %v1694_v9 }
 0x1d3   : > { %2098 = vrot.lane.b32.xlu0 %v9285_v14, %s13131_s8  ;;  %v2079_v14 = vunpack.c.l.b16 %v1692_v51  ;;  %v2080_v38 = vunpack.c.l.b16 %v1695_v60 }
 0x1d4   : > { %v9782_v4 = vpop.permute.xlu1 %2007 }
 0x1d5   : > { %v9784_v57 = vpop.permute.xlu0 %2005  ;;  %2108 = vrot.lane.b32.xlu2 %v9351_v41, %s13131_s8  ;;  %v2081_v41 = vpack.c.b16 %v2080_v38, %v2079_v14 }
 0x1d7   : > { %v9788_v52 = vpop.permute.xlu2 %2036 }
 0x1d8   : > { %13260 = vst [vmem:[#allocation74_spill] sm:$0xff] %v9788_v52  ;;  %v8270_v52 = vld [vmem:[%s13063_s1] sm:$0xff] }
 0x1da   : > { %2106 = vrot.lane.b32.xlu1 %v9357_v19, %s13131_s8 }
 0x1db   : > { %2104 = vrot.lane.b32.xlu0 %v9317_v2, %s13131_s8 }
 0x1dc   : > { %v9798_v34 = vpop.permute.xlu1 %2016 }
 0x1dd   : > { %v9800_v7 = vpop.permute.xlu0 %2014 }
 0x1df   : > { %v9802_v47 = vpop.permute.xlu2 %2042 }
 0x1e2   : > { %2112 = vrot.lane.b32.xlu1 %v2081_v41, %s13131_s8 }
 0x1e3   : > { %2110 = vrot.lane.b32.xlu0 %v9590_v1, %s13131_s8  ;;  %v2398_v1 = vld [vmem:[%s13063_s1 + $0x10] sm:$0x3] }
 0x1e4   : > { %v9807_v16 = vpop.permute.xlu1 %2022  ;;  %v2412_v14 = vunpack.c.l.b16 %v2398_v1 }
 0x1e5   : > { %v9809_v19 = vpop.permute.xlu0 %2020 }
 0x1e6   : > { %v2415_v41 = vpack.c.b16 %v2412_v14, %v2412_v14 }
 0x1e7   : > { %v9811_v3 = vpop.permute.xlu2 %2051 }
 0x1e8   : > { %v2453_v56 = vsel %vm2451_vm7, %v2415_v41, 0  ;;  %vm13116_vm7 = vcmask 293888  }
 0x1e9   : > { %2460 = vmatpush.bf16.msra.mxu0 %v2453_v56  ;;  %8319 = vmatpush.bf16.msra.mxu3 %v2453_v56 }
 0x1ec   : > { %v9813_v59 = vpop.permute.xlu1 %2028 }
 0x1ed   : > { %v9815_v2 = vpop.permute.xlu0 %2026 }
 0x1ef   : > { %v9817_v63 = vpop.permute.xlu2 %2057 }
 0x1f4   : > { %v9819_v62 = vpop.permute.xlu1 %2034 }
 0x1f5   : > { %13261 = vst [vmem:[#allocation75_spill] sm:$0xff] %v9819_v62  ;;  %v9821_v45 = vpop.permute.xlu0 %2032  ;;  %v8271_v62 = vld [vmem:[%s13063_s1 + $0x8] sm:$0xff] }
 0x1f6   : > { %13262 = vst [vmem:[#allocation76_spill] sm:$0xff] %v9821_v45  ;;  %2461 = vmatpush.bf16.msra.mxu0 %v8271_v62  ;;  %8320 = vmatpush.bf16.msra.mxu3 %v8271_v62 }
 0x1f7   : > { %v9823_v9 = vpop.permute.xlu2 %2063 }
 0x1f8   : > { %13263 = vst [vmem:[#allocation77_spill] sm:$0xff] %v9823_v9 }
 0x1fa   : > { %2462 = vmatpush.bf16.msra.mxu0 %v8270_v52  ;;  %8321 = vmatpush.bf16.msra.mxu3 %v8270_v52  ;;  %v2117_v52 = vsel %vm2114_vm10, %v8252_v54, %v9412_v58 }
 0x1fb   : > { %v2165_v5 = vsel %vm13144_vm14, %v2117_v52, %v9500_v35 }
 0x1fc   : > { %v9825_v51 = vpop.permute.xlu1 %2040  ;;  %v2198_v9 = vsel %vm13138_vm11, %v2165_v5, %v9524_v40 }
 0x1fd   : > { %v2039_v60 = vpop.permute.xlu0 %2038 }
 0x1ff   : > { %v9830_v38 = vpop.permute.xlu2 %2069 }
 0x200   : > { %13264 = vst [vmem:[#allocation78_spill] sm:$0xff] %v9830_v38 }
 0x204   : > { %v2050_v6 = vpop.permute.xlu1 %2049 }
 0x205   : > { %v2048_v45 = vpop.permute.xlu0 %2047 }
 0x207   : > { %v2074_v1 = vpop.permute.xlu2 %2073 }
 0x20c   : > { %v9838_v38 = vpop.permute.xlu1 %2055 }
 0x20d   : > { %v9840_v14 = vpop.permute.xlu0 %2053 }
 0x20f   : > { %v2085_v56 = vpop.permute.xlu2 %2084 }
 0x214   : > { %v9842_v41 = vpop.permute.xlu1 %2061 }
 0x215   : > { %v9844_v37 = vpop.permute.xlu0 %2059 }
 0x217   : > { %v9846_v31 = vpop.permute.xlu2 %2090 }
 0x21c   : > { %v9848_v43 = vpop.permute.xlu1 %2067 }
 0x21d   : > { %13265 = vst [vmem:[#allocation79_spill] sm:$0xff] %v9848_v43  ;;  %v9850_v62 = vpop.permute.xlu0 %2065  ;;  %v2231_v43 = vsel %vm13136_vm0, %v2198_v9, %v9650_v48 }
 0x21e   : > { %13266 = vst [vmem:[#allocation80_spill] sm:$0xff] %v9850_v62  ;;  %v2264_v62 = vsel %vm2262_vm9, %v2231_v43, %v9717_v24  ;;  %v2156_v43 = vsel %vm2114_vm10, %v9404_v12, %v9490_v46  ;;  %v13269_v46 = vld [vmem:[#allocation15_spill] sm:$0xff] }
 0x21f   : > { %v9856_v28 = vpop.permute.xlu2 %2096  ;;  %v2297_v54 = vsel %vm13137_vm1, %v2264_v62, %v9739_v61  ;;  %v2191_v24 = vsel %vm13144_vm14, %v2156_v43, %v9506_v32  ;;  %v13267_v62 = vld [vmem:[#allocation41_spill] sm:$0xff] }
 0x220   : > { %v2330_v58 = vsel %vm2328_vm12, %v2297_v54, %v2048_v45  ;;  %v2224_v61 = vsel %vm13138_vm11, %v2191_v24, %v9638_v55  ;;  %v13268_v54 = vld [vmem:[#allocation26_spill] sm:$0xff] }
 0x221   : > { %v2257_v5 = vsel %vm13136_vm0, %v2224_v61, %v9705_v27 }
 0x222   : > { %v2290_v45 = vsel %vm2262_vm9, %v2257_v5, %v9723_v50 }
 0x224   : > { %v2083_v35 = vpop.permute.xlu1 %2082 }
 0x225   : > { %v9867_v52 = vpop.permute.xlu0 %2071  ;;  %v2363_v40 = vsel %vm13135_vm3, %v2330_v58, %v2083_v35  ;;  %v2120_v58 = vsel %vm2114_vm10, %v13268_v54, %v13267_v62  ;;  %v2323_v35 = vsel %vm13137_vm1, %v2290_v45, %v2039_v60  ;;  %v13270_v62 = vld [vmem:[#allocation37_spill] sm:$0xff]  ;;  %v13271_v54 = vld [vmem:[#allocation22_spill] sm:$0xff] }
 0x226   : > { %7975 = vmatmul.msk.bf16.vlgmr.msra.gmra.mxu0 %vm13116_vm7, %v2363_v40  ;;  %v2167_v12 = vsel %vm13144_vm14, %v2120_v58, %v13269_v46  ;;  %v2356_v32 = vsel %vm2328_vm12, %v2323_v35, %v2074_v1 }
 0x227   : > { %v9871_v48 = vpop.permute.xlu2 %2102  ;;  %v2200_v55 = vsel %vm13138_vm11, %v2167_v12, %v9586_v17 }
 0x228   : > { %v2233_v50 = vsel %vm13136_vm0, %v2200_v55, %v9648_v23  ;;  %v2123_v23 = vsel %vm2114_vm10, %v9371_v20, %v13270_v62 }
 0x229   : > { %v2266_v60 = vsel %vm2262_vm9, %v2233_v50, %v9665_v13  ;;  %v2169_v58 = vsel %vm13144_vm14, %v2123_v23, %v13271_v54 }
 0x22a   : > { %v2299_v24 = vsel %vm13137_vm1, %v2266_v60, %v9800_v7  ;;  %v2202_v13 = vsel %vm13138_vm11, %v2169_v58, %v9584_v49  ;;  %v13276_v60 = vld [vmem:[#allocation51_spill] sm:$0xff] }
 0x22b   : > { %v2332_v1 = vsel %vm2328_vm12, %v2299_v24, %v2050_v6  ;;  %v2235_v6 = vsel %vm13136_vm0, %v2202_v13, %v9604_v30  ;;  %v13272_v30 = vld [vmem:[#allocation42_spill] sm:$0xff]  ;;  %v13279_v13 = vld [vmem:[#allocation17_spill] sm:$0xff] }
 0x22c   : > { %v2078_v43 = vpop.permute.xlu1 %2077  ;;  %v2365_v5 = vsel %vm13135_vm3, %v2332_v1, %v2085_v56  ;;  %v2268_v7 = vsel %vm2262_vm9, %v2235_v6, %v9735_v26  ;;  %v2126_v26 = vsel %vm2114_vm10, %v9369_v25, %v13272_v30 }
 0x22d   : > { %v2076_v9 = vpop.permute.xlu0 %2075  ;;  %v2301_v56 = vsel %vm13137_vm1, %v2268_v7, %v9798_v34 }
 0x22e   : > { %v2334_v35 = vsel %vm2328_vm12, %v2301_v56, %v9811_v3 }
 0x22f   : > { %v2109_v40 = vpop.permute.xlu2 %2108 }
 0x230   : > { %v2389_v27 = vsel %vm13135_vm3, %v2356_v32, %v2109_v40  ;;  %v13273_v32 = vld [vmem:[#allocation40_spill] sm:$0xff]  ;;  %v13274_v40 = vld [vmem:[#allocation18_spill] sm:$0xff] }
 0x231   : > { %7988 = vmatmul.msk.bf16.vlgmr.msra.gmra.mxu3 %vm13116_vm7, %v2389_v27  ;;  %v2159_v34 = vsel %vm2114_vm10, %v9440_v36, %v13273_v32  ;;  %v2171_v3 = vsel %vm13144_vm14, %v2126_v26, %v13274_v40  ;;  %v13275_v27 = vld [vmem:[#allocation23_spill] sm:$0xff] }
 0x232   : > { %v2204_v50 = vsel %vm13138_vm11, %v2171_v3, %v13275_v27  ;;  %v2193_v24 = vsel %vm13144_vm14, %v2159_v34, %v13276_v60  ;;  %v13286_v60 = vld [vmem:[#allocation53_spill] sm:$0xff] }
 0x233   : > { %v2226_v1 = vsel %vm13138_vm11, %v2193_v24, %v9636_v18  ;;  %v2237_v25 = vsel %vm13136_vm0, %v2204_v50, %v9661_v15  ;;  %v13285_v50 = vld [vmem:[#allocation21_spill] sm:$0xff] }
 0x234   : > { %v2089_v17 = vpop.permute.xlu1 %2088  ;;  %v2259_v36 = vsel %vm13136_vm0, %v2226_v1, %v9653_v11 }
 0x235   : > { %v2087_v61 = vpop.permute.xlu0 %2086  ;;  %v2292_v62 = vsel %vm2262_vm9, %v2259_v36, %v9784_v57 }
 0x236   : > { %7976 = vmatmul.msk.bf16.gmra.mxu0 %vm13116_vm7, %v2365_v5  ;;  %v2367_v12 = vsel %vm13135_vm3, %v2334_v35, %v2087_v61  ;;  %v2270_v61 = vsel %vm2262_vm9, %v2237_v25, %v9733_v21  ;;  %v2325_v23 = vsel %vm13137_vm1, %v2292_v62, %v9825_v51  ;;  %v13278_v51 = vld [vmem:[#allocation12_spill] sm:$0xff]  ;;  %v13281_v35 = vld [vmem:[#allocation61_spill] sm:$0xff] }
 0x237   : > { %v2303_v5 = vsel %vm13137_vm1, %v2270_v61, %v9750_v8  ;;  %v2358_v15 = vsel %vm2328_vm12, %v2325_v23, %v2076_v9  ;;  %v13277_v8 = vld [vmem:[#allocation27_spill] sm:$0xff]  ;;  %v2162_v9 = vsel %vm2114_vm10, %v9436_v22, %v13279_v13  ;;  %v13295_v13 = vld [vmem:[#allocation29_spill] sm:$0xff] }
 0x238   : > { %v2336_v18 = vsel %vm2328_vm12, %v2303_v5, %v9840_v14  ;;  %v2129_v57 = vsel %vm2114_vm10, %v9359_v10, %v13277_v8  ;;  %v13282_v10 = vld [vmem:[#allocation64_spill] sm:$0xff]  ;;  %v414_v61 = vld [vmem:[#allocation3 + $0xc] sm:$0x1] }
 0x239   : > { %v2369_v11 = vsel %vm13135_vm3, %v2336_v18, %v2089_v17  ;;  %v2173_v14 = vsel %vm13144_vm14, %v2129_v57, %v13278_v51  ;;  %v13280_v17 = vld [vmem:[#allocation50_spill] sm:$0xff]  ;;  %v415_v62 = vsel %vm8614_vm5, 0, %v414_v61  ;;  %v13289_v23 = vld [vmem:[#allocation43_spill] sm:$0xff] }
 0x23a   : > { %v2195_v6 = vsel %vm13144_vm14, %v2162_v9, %v13280_v17  ;;  %v2206_v7 = vsel %vm13138_vm11, %v2173_v14, %v9600_v44  ;;  %416 = vst [vmem:[#allocation3 + $0xc] sm:$0x1] %v415_v62  ;;  %v13290_v18 = vld [vmem:[#allocation30_spill] sm:$0xff]  ;;  %v13294_v14 = vld [vmem:[#allocation44_spill] sm:$0xff] }
 0x23b   : > { %v2228_v56 = vsel %vm13138_vm11, %v2195_v6, %v9592_v33  ;;  %v2138_v9 = vsel %vm2114_vm10, %v13295_v13, %v13294_v14  ;;  %v13296_v17 = vld [vmem:[#allocation14_spill] sm:$0xff]  ;;  %v13312_v13 = vld [vmem:[#allocation49_spill] sm:$0xff] }
 0x23c   : > { %v9919_v46 = vpop.permute.xlu1 %2094  ;;  %v2261_v26 = vsel %vm13136_vm0, %v2228_v56, %v9719_v53  ;;  %v2179_v6 = vsel %vm13144_vm14, %v2138_v9, %v13296_v17  ;;  %v13298_v56 = vld [vmem:[#allocation62_spill] sm:$0xff] }
 0x23d   : > { %v2093_v45 = vpop.permute.xlu0 %2092  ;;  %v2294_v22 = vsel %vm2262_vm9, %v2261_v26, %v9782_v4  ;;  %v13283_v4 = vld [vmem:[#allocation28_spill] sm:$0xff]  ;;  %v420_v14 = vld [vmem:[#allocation3 + $0x24] sm:$0x1] }
 0x23e   : > { %v2327_v44 = vsel %vm13137_vm1, %v2294_v22, %v9802_v47 }
 0x23f   : > { %v2360_v40 = vsel %vm2328_vm12, %v2327_v44, %v2078_v43  ;;  %v13287_v43 = vld [vmem:[#allocation56_spill] sm:$0xff] }
 0x240   : > { %v13301_v44 = vld [vmem:[#allocation32_spill] sm:$0xff] }
 0x244   : > { %v9935_v55 = vpop.permute.xlu1 %2100 }
 0x245   : > { %v9921_v20 = vpop.permute.xlu0 %2098 }
 0x246   : > { %7977 = vmatmul.msk.bf16.gmra.mxu0 %vm13116_vm7, %v2367_v12  ;;  %v2239_v12 = vsel %vm13136_vm0, %v2206_v7, %v13281_v35  ;;  %v13297_v7 = vld [vmem:[#allocation55_spill] sm:$0xff] }
 0x247   : > { %v2272_v30 = vsel %vm2262_vm9, %v2239_v12, %v13282_v10  ;;  %v13299_v35 = vld [vmem:[#allocation67_spill] sm:$0xff]  ;;  %v469_v12 = vld [vmem:[#allocation3 + $0x14] sm:$0x1] }
 0x248   : > { %v2305_v32 = vsel %vm13137_vm1, %v2272_v30, %v9809_v19  ;;  %v13284_v19 = vld [vmem:[#allocation31_spill] sm:$0xff]  ;;  %v470_v26 = vsel %vm8620_vm6, 0, %v469_v12  ;;  %v13317_v12 = vld [vmem:[#allocation38_spill] sm:$0xff] }
 0x249   : > { %v2338_v33 = vsel %vm2328_vm12, %v2305_v32, %v9838_v38  ;;  %v2132_v27 = vsel %vm2114_vm10, %v13284_v19, %v13283_v4  ;;  %471 = vst [vmem:[#allocation3 + $0x14] sm:$0x1] %v470_v26  ;;  %v417_v32 = vld [vmem:[#allocation3 + $0x18] sm:$0x1]  ;;  %v13305_v4 = vld [vmem:[#allocation59_spill] sm:$0xff]  ;;  %v13318_v26 = vld [vmem:[#allocation70_spill] sm:$0xff] }
 0x24a   : > { %v2371_v3 = vsel %vm13135_vm3, %v2338_v33, %v9846_v31  ;;  %v2175_v47 = vsel %vm13144_vm14, %v2132_v27, %v13285_v50  ;;  %v13302_v33 = vld [vmem:[#allocation35_spill] sm:$0xff] }
 0x24b   : > { %v2208_v38 = vsel %vm13138_vm11, %v2175_v47, %v13286_v60  ;;  %v453_v60 = vld [vmem:[#allocation3 + $0xa8] sm:$0x1] }
 0x24c   : > { %v9962_v21 = vpop.permute.xlu1 %2106  ;;  %v2241_v24 = vsel %vm13136_vm0, %v2208_v38, %v13287_v43  ;;  %v13306_v38 = vld [vmem:[#allocation77_spill] sm:$0xff] }
 0x24d   : > { %v9925_v49 = vpop.permute.xlu0 %2104  ;;  %v2274_v31 = vsel %vm2262_vm9, %v2241_v24, %v9746_v39  ;;  %v13291_v39 = vld [vmem:[#allocation20_spill] sm:$0xff] }
 0x24e   : > { %v2307_v1 = vsel %vm13137_vm1, %v2274_v31, %v9807_v16  ;;  %v13292_v16 = vld [vmem:[#allocation46_spill] sm:$0xff]  ;;  %v454_v31 = vsel %vm8614_vm5, 0, %v453_v60 }
 0x24f   : > { %v2340_v25 = vsel %vm2328_vm12, %v2307_v1, %v9817_v63  ;;  %v13293_v63 = vld [vmem:[#allocation63_spill] sm:$0xff]  ;;  %v472_v1 = vld [vmem:[#allocation3 + $0x20] sm:$0x1]  ;;  %455 = vst [vmem:[#allocation3 + $0xa8] sm:$0x1] %v454_v31 }
 0x250   : > { %v2373_v36 = vsel %vm13135_vm3, %v2340_v25, %v2093_v45 }
 0x254   : > { %v2113_v34 = vpop.permute.xlu1 %2112 }
 0x255   : > { %v2111_v54 = vpop.permute.xlu0 %2110  ;;  %v2393_v53 = vsel %vm13135_vm3, %v2360_v40, %v2113_v34  ;;  %v418_v34 = vsel %vm8614_vm5, 0, %v417_v32  ;;  %v13303_v40 = vld [vmem:[#allocation45_spill] sm:$0xff] }
 0x256   : > { %v2391_v58 = vsel %vm13135_vm3, %v2358_v15, %v2111_v54  ;;  %7978 = vmatmul.msk.bf16.gmra.mxu0 %vm13116_vm7, %v2369_v11  ;;  %v2135_v15 = vsel %vm2114_vm10, %v13290_v18, %v13289_v23  ;;  %419 = vst [vmem:[#allocation3 + $0x18] sm:$0x1] %v418_v34 }
 0x257   : > { %7989 = vmatmul.msk.bf16.gmra.mxu3 %vm13116_vm7, %v2391_v58  ;;  %v2177_v54 = vsel %vm13144_vm14, %v2135_v15, %v13291_v39  ;;  %v508_v15 = vld [vmem:[#allocation3 + $0xb0] sm:$0x1] }
 0x258   : > { %v2210_v11 = vsel %vm13138_vm11, %v2177_v54, %v13292_v16  ;;  %v509_v39 = vsel %vm8620_vm6, 0, %v508_v15  ;;  %v13307_v54 = vld [vmem:[#allocation13_spill] sm:$0xff] }
 0x259   : > { %v2243_v45 = vsel %vm13136_vm0, %v2210_v11, %v13293_v63  ;;  %510 = vst [vmem:[#allocation3 + $0xb0] sm:$0x1] %v509_v39 }
 0x25a   : > { %v2276_v58 = vsel %vm2262_vm9, %v2243_v45, %v9744_v29  ;;  %v2212_v29 = vsel %vm13138_vm11, %v2179_v6, %v13297_v7  ;;  %v421_v7 = vsel %vm8614_vm5, 0, %v420_v14 }
 0x25b   : > { %v2309_v8 = vsel %vm13137_vm1, %v2276_v58, %v9762_v42  ;;  %v2245_v42 = vsel %vm13136_vm0, %v2212_v29, %v13298_v56  ;;  %v13313_v29 = vld [vmem:[#allocation16_spill] sm:$0xff]  ;;  %v13314_v56 = vld [vmem:[#allocation33_spill] sm:$0xff]  ;;  %422 = vst [vmem:[#allocation3 + $0x24] sm:$0x1] %v421_v7 }
 0x25c   : > { %v2342_v57 = vsel %vm2328_vm12, %v2309_v8, %v9844_v37  ;;  %v2278_v37 = vsel %vm2262_vm9, %v2245_v42, %v13299_v35  ;;  %v13311_v8 = vld [vmem:[#allocation25_spill] sm:$0xff]  ;;  %v2147_v42 = vsel %vm2114_vm10, %v13314_v56, %v13313_v29  ;;  %v13315_v35 = vld [vmem:[#allocation66_spill] sm:$0xff]  ;;  %v13334_v56 = vld [vmem:[#allocation71_spill] sm:$0xff] }
 0x25d   : > { %v2375_v51 = vsel %vm13135_vm3, %v2342_v57, %v9919_v46  ;;  %v2311_v46 = vsel %vm13137_vm1, %v2278_v37, %v9815_v2  ;;  %v2141_v2 = vsel %vm2114_vm10, %v13302_v33, %v13301_v44  ;;  %v13319_v44 = vld [vmem:[#allocation36_spill] sm:$0xff]  ;;  %v13320_v33 = vld [vmem:[#allocation39_spill] sm:$0xff]  ;;  %v13333_v7 = vld [vmem:[#allocation69_spill] sm:$0xff] }
 0x25e   : > { %v2344_v10 = vsel %vm2328_vm12, %v2311_v46, %v9842_v41  ;;  %v2181_v41 = vsel %vm13144_vm14, %v2141_v2, %v13303_v40  ;;  %v13316_v46 = vld [vmem:[#allocation11_spill] sm:$0xff]  ;;  %v2150_v2 = vsel %vm2114_vm10, %v13320_v33, %v13319_v44 }
 0x25f   : > { %v2377_v22 = vsel %vm13135_vm3, %v2344_v10, %v9856_v28  ;;  %v10067_v28 = vld [vmem:[%s13064_s2] ss:$0 sm:$0xff]  ;;  %v2153_v10 = vsel %vm2114_vm10, %v13317_v12, %v13316_v46 }
 0x260   : > { %v13321_v40 = vld [vmem:[#allocation19_spill] sm:$0xff] }
 0x266   : > { %7979 = vmatmul.msk.bf16.gmra.mxu0 %vm13116_vm7, %v2371_v3  ;;  %v13304_v3 = vld [vmem:[#allocation54_spill] sm:$0xff] }
 0x267   : > { %7990 = vmatmul.msk.bf16.gmra.mxu3 %vm13116_vm7, %v2393_v53  ;;  %v2214_v53 = vsel %vm13138_vm11, %v2181_v41, %v13304_v3  ;;  %v2185_v41 = vsel %vm13144_vm14, %v2147_v42, %v13321_v40  ;;  %v13322_v3 = vld [vmem:[#allocation47_spill] sm:$0xff] }
 0x268   : > { %v2247_v19 = vsel %vm13136_vm0, %v2214_v53, %v13305_v4  ;;  %v2189_v53 = vsel %vm13144_vm14, %v2153_v10, %v13322_v3  ;;  %v13323_v4 = vld [vmem:[#allocation73_spill] sm:$0xff] }
 0x269   : > { %v2280_v27 = vsel %vm2262_vm9, %v2247_v19, %v9758_v0  ;;  %v473_v0 = vsel %vm8620_vm6, 0, %v472_v1  ;;  %v13325_v1 = vld [vmem:[#allocation48_spill] sm:$0xff] }
 0x26a   : > { %v2313_v50 = vsel %vm13137_vm1, %v2280_v27, %v9813_v59  ;;  %474 = vst [vmem:[#allocation3 + $0x20] sm:$0x1] %v473_v0  ;;  %v13326_v0 = vld [vmem:[#allocation52_spill] sm:$0xff] }
 0x26b   : > { %v2346_v43 = vsel %vm2328_vm12, %v2313_v50, %v13306_v38  ;;  %v475_v50 = vld [vmem:[#allocation3 + $0x2c] sm:$0x1] }
 0x26c   : > { %v2379_v25 = vsel %vm13135_vm3, %v2346_v43, %v9921_v20  ;;  %v13308_v20 = vld [vmem:[#allocation34_spill] sm:$0xff]  ;;  %v476_v31 = vsel %vm8620_vm6, 0, %v475_v50 }
 0x26d   : > { %v2144_v16 = vsel %vm2114_vm10, %v13308_v20, %v13307_v54  ;;  %477 = vst [vmem:[#allocation3 + $0x2c] sm:$0x1] %v476_v31  ;;  %vm13328_vm10 = vcmask 293888   ;;  %v13329_v54 = vld [vmem:[#allocation57_spill] sm:$0xff]  ;;  %v411_v50 = vld [vmem:[#allocation3] sm:$0x1] }
 0x26e   : > { %v2183_v57 = vsel %vm13144_vm14, %v2144_v16, %v13311_v8  ;;  %v13330_v16 = vld [vmem:[#allocation65_spill] sm:$0xff]  ;;  %v2967_v8 = vld [vmem:[#allocation3 + $0x14] sm:$0x1]  ;;  %v423_v31 = vld [vmem:[#allocation3 + $0x30] sm:$0x1] }
 0x26f   : > { %v2216_v9 = vsel %vm13138_vm11, %v2183_v57, %v13312_v13 }
 0x270   : > { %v2249_v37 = vsel %vm13136_vm0, %v2216_v9, %v13315_v35 }
 0x276   : > { %7980 = vmatmul.msk.bf16.gmra.mxu0 %vm13116_vm7, %v2373_v36 }
 0x286   : > { %7981 = vmatmul.msk.bf16.gmra.mxu0 %vm13116_vm7, %v2375_v51  ;;  %v2963_v51 = vld [vmem:[#allocation3 + $0xc] sm:$0xf] }
 0x296   : > { %7982 = vmatmul.msk.bf16.gmra.mxu0 %vm13116_vm7, %v2377_v22  ;;  %v2282_v22 = vsel %vm2262_vm9, %v2249_v37, %v13318_v26  ;;  %v13335_v37 = vld [vmem:[#allocation72_spill] sm:$0xff] }
 0x297   : > { %v2315_v19 = vsel %vm13137_vm1, %v2282_v22, %v13323_v4 }
 0x2a3   : > { %v2464_v47 = vpop.f32.mrf.mxu0 }
 0x2a4   : > { %v2465_v24 = vadd.f32 %v10067_v28, %v2464_v47  ;;  %v13324_v47 = vld [vmem:[#allocation80_spill] sm:$0xff] }
 0x2a5   : > { %v2348_v60 = vsel %vm2328_vm12, %v2315_v19, %v13324_v47  ;;  %v2970_v47 = vld [vmem:[#allocation3 + $0x18] sm:$0xf] }
 0x2a6   : > { %v2544_v36 = vmul.f32 0.01, %v2465_v24  ;;  %7983 = vmatmul.msk.bf16.gmra.mxu0 %vm13116_vm7, %v2379_v25  ;;  %vm10093_vm7 = vmand %vm400_vm8, %vm344_vm4  ;;  %v2187_v25 = vsel %vm13144_vm14, %v2150_v2, %v13325_v1 }
 0x2a7   : > { %v2220_v20 = vsel %vm13138_vm11, %v2187_v25, %v13329_v54 }
 0x2a8   : > { %v2576_v59 = vmax.f32 %v2465_v24, %v2544_v36  ;;  %v2222_v36 = vsel %vm13138_vm11, %v2189_v53, %v13326_v0 }
 0x2aa   : > { %v2608_v61 = vpack.c.bf16 %v2576_v59, %v2576_v59  ;;  %v2381_v59 = vsel %vm13135_vm3, %v2348_v60, %v9935_v55 }
 0x2ab   : > { %v2466_v62 = vpop.f32.mrf.mxu0 }
 0x2ac   : > { %v2641_v23 = vshrl.u32 %v2608_v61, 16  ;;  %v2467_v18 = vadd.f32 %v10067_v28, %v2466_v62  ;;  %v2644_v63 = vshll.u32 %v2608_v61, 16  ;;  %v13327_v62 = vld [vmem:[#allocation58_spill] sm:$0xff] }
 0x2ae   : > { %v2643_v11 = vrot.slane %v2641_v23, 7  ;;  %v2545_v45 = vmul.f32 0.01, %v2467_v18  ;;  %v2218_v23 = vsel %vm13138_vm11, %v2185_v41, %v13327_v62  ;;  %v13338_v41 = vld [vmem:[#allocation76_spill] sm:$0xff] }
 0x2b0   : > { %v2646_v17 = vor.u32 %v2644_v63, %v2643_v11  ;;  %v2577_v6 = vmax.f32 %v2467_v18, %v2545_v45  ;;  %v2251_v63 = vsel %vm13136_vm0, %v2218_v23, %v13330_v16  ;;  %v13331_v45 = vld [vmem:[#allocation68_spill] sm:$0xff] }
 0x2b1   : > { %v2255_v55 = vsel %vm13136_vm0, %v2222_v36, %v13331_v45  ;;  %v2284_v29 = vsel %vm2262_vm9, %v2251_v63, %v13333_v7  ;;  %v424_v36 = vsel %vm8614_vm5, 0, %v423_v31  ;;  %v456_v45 = vld [vmem:[#allocation3 + $0xb4] sm:$0x1] }
 0x2b2   : > { %v2964_v32 = vsel %vm10093_vm7, %v2646_v17, %v2963_v51  ;;  %v2609_v34 = vpack.c.bf16 %v2577_v6, %v2577_v6  ;;  %v2647_v51 = vrot.slane %v2643_v11, 4  ;;  %v13332_v17 = vld [vmem:[#allocation60_spill] sm:$0xff]  ;;  %v2288_v42 = vsel %vm2262_vm9, %v2255_v55, %v13334_v56  ;;  %425 = vst [vmem:[#allocation3 + $0x30] sm:$0x1] %v424_v36 }
 0x2b3   : > { %2965 = vst [vmem:[#allocation3 + $0xc] sm:$0xf] %v2964_v32  ;;  %v2469_v27 = vpop.f32.mrf.mxu0  ;;  %v2253_v6 = vsel %vm13136_vm0, %v2220_v20, %v13332_v17  ;;  %v13337_v32 = vld [vmem:[#allocation74_spill] sm:$0xff]  ;;  %v2317_v3 = vsel %vm13137_vm1, %v2284_v29, %v13338_v41  ;;  %v3054_v20 = vld [vmem:[#allocation3 + $0xa8] sm:$0xf] }
 0x2b4   : > { %v2649_v38 = vshrl.u32 %v2609_v34, 16  ;;  %v2470_v43 = vadd.f32 %v10067_v28, %v2469_v27  ;;  %v2529_v24 = vpop.f32.mrf.mxu3  ;;  %v2652_v15 = vshll.u32 %v2609_v34, 16  ;;  %v2286_v46 = vsel %vm2262_vm9, %v2253_v6, %v13335_v37  ;;  %vm13341_vm9 = vmmov %vm13328_vm10 }
 0x2b5   : > { %v2530_v61 = vadd.f32 %v10067_v28, %v2529_v24  ;;  %v10161_v34 = vsel %vm13137_vm1, %v2288_v42, %v13337_v32  ;;  %v2974_v32 = vld [vmem:[#allocation3 + $0x20] sm:$0x1] }
 0x2b6   : > { %v2651_v18 = vrot.slane %v2649_v38, 7  ;;  %v2546_v39 = vmul.f32 0.01, %v2470_v43  ;;  %7984 = vmatmul.msk.bf16.gmra.mxu0 %vm13328_vm10, %v2381_v59  ;;  %v13339_v59 = vld [vmem:[#allocation79_spill] sm:$0xff]  ;;  %vm13347_vm10 = vmmov %vm13341_vm9 }
 0x2b7   : > { %v2570_v57 = vmul.f32 0.01, %v2530_v61 }
 0x2b8   : > { %v2654_v14 = vor.u32 %v2652_v15, %v2651_v18  ;;  %v2656_v13 = vrot.slane %v2651_v18, 4  ;;  %v2578_v9 = vmax.f32 %v2470_v43, %v2546_v39  ;;  %v412_v18 = vsel %vm8614_vm5, 0, %v411_v50  ;;  %v13340_v15 = vld [vmem:[#allocation75_spill] sm:$0xff] }
 0x2b9   : > { %v2602_v35 = vmax.f32 %v2530_v61, %v2570_v57  ;;  %v2350_v61 = vsel %vm2328_vm12, %v2317_v3, %v13339_v59  ;;  %v10182_v39 = vsel %vm13137_vm1, %v2286_v46, %v13340_v15  ;;  %413 = vst [vmem:[#allocation3] sm:$0x1] %v412_v18  ;;  %v10213_v18 = vld [vmem:[#allocation3 + $0x4] sm:$0xf] }
 0x2ba   : > { %v2655_v10 = vsel %vm8678_vm15, %v2647_v51, %v2654_v14  ;;  %v2968_v11 = vsel %vm8614_vm5, %v2656_v13, %v2967_v8  ;;  %v2610_v26 = vpack.c.bf16 %v2578_v9, %v2578_v9  ;;  %v10157_v22 = vld [vmem:[#allocation3 + $0xc] sm:$0xf]  ;;  %v2383_v63 = vsel %vm13135_vm3, %v2350_v61, %v9871_v48  ;;  %v466_v14 = vld [vmem:[#allocation3 + $0x8] sm:$0x1] }
 0x2bb   : > { %2966 = vst.msk [vmem:[#allocation3 + $0x10] sm:$0xf] %vm400_vm8, %v2655_v10  ;;  %v2634_v44 = vpack.c.bf16 %v2602_v35, %v2602_v35  ;;  %v2471_v33 = vpop.f32.mrf.mxu0  ;;  %v3154_v2 = vshrl.u32 %v10157_v22, 16  ;;  %v3157_v40 = vshll.u32 %v10157_v22, 16  ;;  %v457_v51 = vsel %vm8614_vm5, 0, %v456_v45 }
 0x2bc   : > { %2969 = vst [vmem:[#allocation3 + $0x14] sm:$0x1] %v2968_v11  ;;  %v2658_v53 = vshrl.u32 %v2610_v26, 16  ;;  %v2661_v4 = vshll.u32 %v2610_v26, 16  ;;  %v2472_v19 = vadd.f32 %v10067_v28, %v2471_v33  ;;  %v2531_v27 = vpop.f32.mrf.mxu3  ;;  %v467_v48 = vsel %vm8620_vm6, 0, %v466_v14 }
 0x2bd   : > { %v2862_v60 = vshrl.u32 %v2634_v44, 16  ;;  %v2865_v38 = vshll.u32 %v2634_v44, 16  ;;  %v2532_v43 = vadd.f32 %v10067_v28, %v2531_v27  ;;  %v3156_v24 = vrot.slane %v3154_v2, 4  ;;  %458 = vst [vmem:[#allocation3 + $0xb4] sm:$0x1] %v457_v51 }
 0x2be   : > { %v10170_v1 = vrot.slane %v2658_v53, 7  ;;  %v2547_v25 = vmul.f32 0.01, %v2472_v19  ;;  %v3159_v0 = vrot.slane %v3157_v40, 5  ;;  %468 = vst [vmem:[#allocation3 + $0x8] sm:$0x1] %v467_v48 }
 0x2bf   : > { %v10176_v62 = vrot.slane %v2862_v60, 7  ;;  %v2571_v23 = vmul.f32 0.01, %v2532_v43 }
 0x2c0   : > { %v2663_v54 = vor.u32 %v2661_v4, %v10170_v1  ;;  %v2579_v16 = vmax.f32 %v2472_v19, %v2547_v25  ;;  %v3160_v57 = vor.u32 %v3159_v0, %v3156_v24  ;;  %v2664_v13 = vrot.slane %v10170_v1, 4  ;;  %v3058_v1 = vld [vmem:[#allocation3 + $0xb0] sm:$0x1]  ;;  %v10209_v36 = vld [vmem:[#allocation3] sm:$0xf] }
 0x2c1   : > { %v2867_v55 = vor.u32 %v2865_v38, %v10176_v62  ;;  %v2603_v8 = vmax.f32 %v2532_v43, %v2571_v23  ;;  %v2868_v46 = vrot.slane %v10176_v62, 4  ;;  %v478_v38 = vld [vmem:[#allocation3 + $0x38] sm:$0x1]  ;;  %v511_v43 = vld [vmem:[#allocation3 + $0xbc] sm:$0x1] }
 0x2c2   : > { %v2971_v9 = vsel %vm10093_vm7, %v2663_v54, %v2970_v47  ;;  %v2611_v17 = vpack.c.bf16 %v2579_v16, %v2579_v16  ;;  %v10193_v6 = vld [vmem:[#allocation3 + $0x10] sm:$0xf]  ;;  %v3161_v33 = vrot.slane %v3160_v57, 4  ;;  %v479_v23 = vsel %vm8620_vm6, 0, %v478_v38 }
 0x2c3   : > { %2972 = vst [vmem:[#allocation3 + $0x18] sm:$0xf] %v2971_v9  ;;  %v3055_v7 = vsel %vm10093_vm7, %v2867_v55, %v3054_v20  ;;  %v2635_v29 = vpack.c.bf16 %v2603_v8, %v2603_v8  ;;  %v2474_v56 = vpop.f32.mrf.mxu0  ;;  %v10199_v42 = vld [vmem:[#allocation3 + $0x14] sm:$0x1]  ;;  %v3163_v35 = vshll.u32 %v10193_v6, 16  ;;  %v3167_v37 = vshrl.u32 %v10193_v6, 16 }
 0x2c4   : > { %3056 = vst [vmem:[#allocation3 + $0xa8] sm:$0xf] %v3055_v7  ;;  %v2666_v10 = vshrl.u32 %v2611_v17, 16  ;;  %v2475_v11 = vadd.f32 %v10067_v28, %v2474_v56  ;;  %v3173_v26 = vshll.u32 %v10199_v42, 16  ;;  %v2669_v3 = vshll.u32 %v2611_v17, 16 }
 0x2c5   : > { %v2870_v44 = vshrl.u32 %v2635_v29, 16  ;;  %v3165_v2 = vrot.slane %v3163_v35, 5  ;;  %v3169_v40 = vrot.slane %v3167_v37, 4  ;;  %v2873_v53 = vshll.u32 %v2635_v29, 16  ;;  %480 = vst [vmem:[#allocation3 + $0x38] sm:$0x1] %v479_v23 }
 0x2c6   : > { %v2668_v41 = vrot.slane %v2666_v10, 7  ;;  %v2548_v4 = vmul.f32 0.01, %v2475_v11  ;;  %7985 = vmatmul.msk.bf16.gmra.mxu0 %vm13341_vm9, %v2383_v63  ;;  %v3175_v60 = vrot.slane %v3173_v26, 5  ;;  %v512_v16 = vsel %vm8620_vm6, 0, %v511_v43 }
 0x2c7   : > { %v2872_v19 = vrot.slane %v2870_v44, 7  ;;  %v3166_v50 = vsel %vm8698_vm2, %v3161_v33, %v3165_v2  ;;  %v3170_v47 = vor.u32 %v3169_v40, %v3165_v2  ;;  %v10234_v7 = vld [vmem:[#allocation3 + $0x8] sm:$0x1]  ;;  %v7991_v35 = vrot.slane %v10209_v36, 9  ;;  %v2977_v33 = vld [vmem:[#allocation3 + $0x24] sm:$0xf] }
 0x2c8   : > { %v2671_v24 = vor.u32 %v2669_v3, %v2668_v41  ;;  %v2673_v31 = vrot.slane %v2668_v41, 4  ;;  %v2580_v25 = vmax.f32 %v2475_v11, %v2548_v4  ;;  %v3791_v0 = vunpack.c.l.b16 %v3166_v50  ;;  %513 = vst [vmem:[#allocation3 + $0xbc] sm:$0x1] %v512_v16  ;;  %v459_v50 = vld [vmem:[#allocation3 + $0xc0] sm:$0x1] }
 0x2c9   : > { %v2875_v59 = vor.u32 %v2873_v53, %v2872_v19  ;;  %v2877_v61 = vrot.slane %v2872_v19, 4  ;;  %v3171_v62 = vrot.slane %v3170_v47, 4  ;;  %v3563_v37 = vrot.slane %v10213_v18, 5  ;;  %v426_v19 = vld [vmem:[#allocation3 + $0x3c] sm:$0x1] }
 0x2ca   : > { %v2672_v15 = vsel %vm8678_vm15, %v2664_v13, %v2671_v24  ;;  %v2975_v54 = vsel %vm8614_vm5, %v2673_v31, %v2974_v32  ;;  %v2612_v20 = vpack.c.bf16 %v2580_v25, %v2580_v25  ;;  %v10221_v63 = vld [vmem:[#allocation3 + $0x18] sm:$0xf]  ;;  %v3566_v26 = vrot.slane %v10234_v7, 5  ;;  %v13343_v32 = vld [vmem:[#allocation78_spill] sm:$0xff] }
 0x2cb   : > { %2973 = vst.msk [vmem:[#allocation3 + $0x1c] sm:$0xf] %vm400_vm8, %v2672_v15  ;;  %v2876_v45 = vsel %vm8678_vm15, %v2868_v46, %v2875_v59  ;;  %v3059_v55 = vsel %vm8614_vm5, %v2877_v61, %v3058_v1  ;;  %v2476_v8 = vpop.f32.mrf.mxu0  ;;  %v3176_v57 = vsel %vm8698_vm2, %v3171_v62, %v3175_v60  ;;  %v3178_v51 = vshrl.u32 %v10221_v63, 16  ;;  %v10231_v14 = vld [vmem:[#allocation3 + $0xa8] sm:$0xf] }
 0x2cc   : > { %2976 = vst [vmem:[#allocation3 + $0x20] sm:$0x1] %v2975_v54  ;;  %v2675_v13 = vshrl.u32 %v2612_v20, 16  ;;  %v2678_v9 = vshll.u32 %v2612_v20, 16  ;;  %v2477_v17 = vadd.f32 %v10067_v28, %v2476_v8  ;;  %v3792_v48 = vunpack.c.l.b16 %v3176_v57 }
 0x2cd   : > { %3057 = vst.msk [vmem:[#allocation3 + $0xac] sm:$0xf] %vm400_vm8, %v2876_v45  ;;  %v3180_v29 = vrot.slane %v3178_v51, 4  ;;  %v3181_v56 = vshll.u32 %v10221_v63, 16  ;;  %v2352_v44 = vsel %vm2328_vm12, %v10182_v39, %v13343_v32  ;;  %v3564_v41 = vsel %vm9165_vm13, %v7991_v35, %v3563_v37 }
 0x2ce   : > { %3060 = vst [vmem:[#allocation3 + $0xb0] sm:$0x1] %v3059_v55  ;;  %v10240_v46 = vrot.slane %v2675_v13, 7  ;;  %v2549_v10 = vmul.f32 0.01, %v2477_v17  ;;  %v10242_v11 = vpack.c.b16 %v3792_v48, %v3791_v0  ;;  %v3565_v3 = vrot.slane %v3563_v37, 4 }
 0x2cf   : > { %v3183_v2 = vrot.slane %v3181_v56, 5  ;;  %v3869_v47 = vunpack.c.l.b16 %v3564_v41  ;;  %v3466_v60 = vshrl.u32 %v10231_v14, 16  ;;  %v427_v39 = vsel %vm8614_vm5, 0, %v426_v19 }
 0x2d0   : > { %v2680_v53 = vor.u32 %v2678_v9, %v10240_v46  ;;  %v2581_v4 = vmax.f32 %v2477_v17, %v2549_v10  ;;  %3839 = vrot.lane.b32.xlu0 %v10242_v11, %s13133_s19  ;;  %v460_v43 = vsel %vm8614_vm5, 0, %v459_v50  ;;  %v3567_v24 = vsel %vm9165_vm13, %v3565_v3, %v3566_v26  ;;  %428 = vst [vmem:[#allocation3 + $0x3c] sm:$0x1] %v427_v39 }
 0x2d1   : > { %v3184_v38 = vor.u32 %v3183_v2, %v3180_v29  ;;  %v3870_v0 = vunpack.c.l.b16 %v3567_v24  ;;  %v7992_v59 = vrot.slane %v10157_v22, 9  ;;  %v10268_v61 = vsel %vm2328_vm12, %v10161_v34, %v9867_v52  ;;  %461 = vst [vmem:[#allocation3 + $0xc0] sm:$0x1] %v460_v43  ;;  %vm13345_vm12 = vmmov %vm13341_vm9  ;;  %v2981_v29 = vld [vmem:[#allocation3 + $0x2c] sm:$0x1] }
 0x2d2   : > { %v2978_v31 = vsel %vm10093_vm7, %v2680_v53, %v2977_v33  ;;  %v2613_v1 = vpack.c.bf16 %v2581_v4, %v2581_v4  ;;  %v10262_v25 = vld [vmem:[#allocation3 + $0x1c] sm:$0xf]  ;;  %v2681_v62 = vrot.slane %v10240_v46, 4  ;;  %v2385_v15 = vsel %vm13135_vm3, %v2352_v44, %v9925_v49 }
 0x2d3   : > { %2979 = vst [vmem:[#allocation3 + $0x24] sm:$0xf] %v2978_v31  ;;  %v2479_v23 = vpop.f32.mrf.mxu0  ;;  %v10273_v54 = vld [vmem:[#allocation3 + $0x20] sm:$0x1]  ;;  %v3187_v20 = vshll.u32 %v10262_v25, 16  ;;  %v3191_v55 = vshrl.u32 %v10262_v25, 16  ;;  %v3901_v51 = vpack.c.b16 %v3870_v0, %v3869_v47 }
 0x2d4   : > { %v2683_v16 = vshrl.u32 %v2613_v1, 16  ;;  %v2480_v45 = vadd.f32 %v10067_v28, %v2479_v23  ;;  %v3468_v8 = vrot.slane %v3466_v60, 4  ;;  %v3185_v52 = vrot.slane %v3184_v38, 4  ;;  %v10279_v13 = vld [vmem:[#allocation3 + $0xac] sm:$0xf] }
 0x2d5   : > { %v3189_v34 = vrot.slane %v3187_v20, 5  ;;  %v3197_v57 = vshll.u32 %v10273_v54, 16  ;;  %v2686_v49 = vshll.u32 %v2613_v1, 16  ;;  %v3193_v48 = vrot.slane %v3191_v55, 4  ;;  %v10287_v33 = vld [vmem:[#allocation3 + $0xb0] sm:$0x1] }
 0x2d6   : > { %v2685_v9 = vrot.slane %v2683_v16, 7  ;;  %v2550_v17 = vmul.f32 0.01, %v2480_v45  ;;  %7986 = vmatmul.msk.bf16.gmra.mxu0 %vm13345_vm12, %v2385_v15  ;;  %v3469_v37 = vshll.u32 %v10231_v14, 16  ;;  %v3475_v46 = vshll.u32 %v10279_v13, 16 }
 0x2d7   : > { %v3190_v56 = vsel %vm8698_vm2, %v3185_v52, %v3189_v34  ;;  %v3199_v35 = vrot.slane %v3197_v57, 5  ;;  %v3194_v44 = vor.u32 %v3193_v48, %v3189_v34  ;;  %v3479_v53 = vshrl.u32 %v10279_v13, 16  ;;  %v481_v1 = vld [vmem:[#allocation3 + $0x44] sm:$0x1]  ;;  %v514_v20 = vld [vmem:[#allocation3 + $0xc8] sm:$0x1] }
 0x2d8   : > { %v2688_v10 = vor.u32 %v2686_v49, %v2685_v9  ;;  %v2690_v26 = vrot.slane %v2685_v9, 4  ;;  %v2582_v32 = vmax.f32 %v2480_v45, %v2550_v17  ;;  %3917 = vrot.lane.b32.xlu0 %v3901_v51, %s8507_s21  ;;  %v3793_v2 = vunpack.c.l.b16 %v3190_v56  ;;  %v2984_v49 = vld [vmem:[#allocation3 + $0x30] sm:$0xf] }
 0x2d9   : > { %v3471_v41 = vrot.slane %v3469_v37, 5  ;;  %v3477_v3 = vrot.slane %v3475_v46, 5  ;;  %v3195_v60 = vrot.slane %v3194_v44, 4  ;;  %v3481_v24 = vrot.slane %v3479_v53, 4 }
 0x2da   : > { %v2689_v4 = vsel %vm8678_vm15, %v2681_v62, %v2688_v10  ;;  %v2982_v19 = vsel %vm8614_vm5, %v2690_v26, %v2981_v29  ;;  %v2614_v50 = vpack.c.bf16 %v2582_v32, %v2582_v32  ;;  %v2534_v47 = vpop.f32.mrf.mxu3  ;;  %v3485_v31 = vshll.u32 %v10287_v33, 16  ;;  %v10300_v34 = vld [vmem:[#allocation3 + $0x24] sm:$0xf] }
 0x2db   : > { %2980 = vst.msk [vmem:[#allocation3 + $0x28] sm:$0xf] %vm400_vm8, %v2689_v4  ;;  %v2535_v38 = vadd.f32 %v10067_v28, %v2534_v47  ;;  %v2481_v39 = vpop.f32.mrf.mxu0  ;;  %v3472_v43 = vor.u32 %v3471_v41, %v3468_v8  ;;  %v3200_v15 = vsel %vm8698_vm2, %v3195_v60, %v3199_v35  ;;  %v3482_v52 = vor.u32 %v3481_v24, %v3477_v3 }
 0x2dc   : > { %2983 = vst [vmem:[#allocation3 + $0x2c] sm:$0x1] %v2982_v19  ;;  %v2692_v0 = vshrl.u32 %v2614_v50, 16  ;;  %v2695_v23 = vshll.u32 %v2614_v50, 16  ;;  %v2482_v62 = vadd.f32 %v10067_v28, %v2481_v39  ;;  %v3794_v45 = vunpack.c.l.b16 %v3200_v15 }
 0x2dd   : > { %v2572_v16 = vmul.f32 0.01, %v2535_v38  ;;  %v3473_v55 = vrot.slane %v3472_v43, 4  ;;  %v3487_v51 = vrot.slane %v3485_v31, 5  ;;  %v482_v9 = vsel %vm8620_vm6, 0, %v481_v1 }
 0x2de   : > { %v10302_v8 = vrot.slane %v2692_v0, 7  ;;  %v2551_v57 = vmul.f32 0.01, %v2482_v62  ;;  %v10306_v48 = vpack.c.b16 %v3794_v45, %v3793_v2  ;;  %v3483_v56 = vrot.slane %v3482_v52, 4  ;;  %483 = vst [vmem:[#allocation3 + $0x44] sm:$0x1] %v482_v9 }
 0x2df   : > { %v2604_v17 = vmax.f32 %v2535_v38, %v2572_v16  ;;  %v3478_v29 = vsel %vm8698_vm2, %v3473_v55, %v3477_v3  ;;  %v515_v44 = vsel %vm8620_vm6, 0, %v514_v20  ;;  %v7994_v2 = vrot.slane %v10300_v34, 9 }
 0x2e0   : > { %v2697_v35 = vor.u32 %v2695_v23, %v10302_v8  ;;  %v2698_v37 = vrot.slane %v10302_v8, 4  ;;  %v2583_v46 = vmax.f32 %v2482_v62, %v2551_v57  ;;  %v3817_v10 = vunpack.c.l.b16 %v3478_v29  ;;  %3841 = vrot.lane.b32.xlu1 %v10306_v48, %s13133_s19  ;;  %516 = vst [vmem:[#allocation3 + $0xc8] sm:$0x1] %v515_v44  ;;  %v2988_v57 = vld [vmem:[#allocation3 + $0x38] sm:$0x1] }
 0x2e1   : > { %v2636_v26 = vpack.c.bf16 %v2604_v17, %v2604_v17  ;;  %v3488_v32 = vsel %vm8698_vm2, %v3483_v56, %v3487_v51  ;;  %v3570_v50 = vrot.slane %v10193_v6, 5  ;;  %v2387_v47 = vsel %vm13135_vm3, %v10268_v61, %v9962_v21  ;;  %v3061_v61 = vld [vmem:[#allocation3 + $0xb4] sm:$0xf] }
 0x2e2   : > { %v2985_v41 = vsel %vm10093_vm7, %v2697_v35, %v2984_v49  ;;  %v2615_v3 = vpack.c.bf16 %v2583_v46, %v2583_v46  ;;  %v2536_v53 = vpop.f32.mrf.mxu3  ;;  %v3818_v4 = vunpack.c.l.b16 %v3488_v32  ;;  %v10321_v19 = vld [vmem:[#allocation3 + $0x28] sm:$0xf]  ;;  %v3573_v46 = vrot.slane %v10199_v42, 5 }
 0x2e3   : > { %2986 = vst [vmem:[#allocation3 + $0x30] sm:$0xf] %v2985_v41  ;;  %v2879_v60 = vshrl.u32 %v2636_v26, 16  ;;  %v2882_v38 = vshll.u32 %v2636_v26, 16  ;;  %v2537_v39 = vadd.f32 %v10067_v28, %v2536_v53  ;;  %v2484_v43 = vpop.f32.mrf.mxu0  ;;  %v10328_v24 = vld [vmem:[#allocation3 + $0x2c] sm:$0x1]  ;;  %v3571_v45 = vsel %vm9165_vm13, %v7992_v59, %v3570_v50 }
 0x2e4   : > { %v2700_v31 = vshrl.u32 %v2615_v3, 16  ;;  %v2703_v1 = vshll.u32 %v2615_v3, 16  ;;  %v2485_v0 = vadd.f32 %v10067_v28, %v2484_v43  ;;  %v10331_v23 = vpack.c.b16 %v3818_v4, %v3817_v10 }
 0x2e5   : > { %v10333_v62 = vrot.slane %v2879_v60, 7  ;;  %v2573_v6 = vmul.f32 0.01, %v2537_v39  ;;  %v3584_v15 = vrot.slane %v10321_v19, 5  ;;  %v3587_v21 = vrot.slane %v10328_v24, 5 }
 0x2e6   : > { %13346 = vst [vmem:[#allocation41_spill] sm:$0xff] %v10331_v23  ;;  %v2702_v20 = vrot.slane %v2700_v31, 7  ;;  %v2552_v16 = vmul.f32 0.01, %v2485_v0  ;;  %7987 = vmatmul.msk.bf16.gmra.mxu0 %vm13347_vm10, %v2387_v47  ;;  %v3572_v55 = vrot.slane %v3570_v50, 4  ;;  %vm4336_vm9 = vcmask 392192  }
 0x2e7   : > { %v2884_v52 = vor.u32 %v2882_v38, %v10333_v62  ;;  %v2885_v8 = vrot.slane %v10333_v62, 4  ;;  %v2605_v51 = vmax.f32 %v2537_v39, %v2573_v6  ;;  %v3585_v9 = vsel %vm9165_vm13, %v7994_v2, %v3584_v15  ;;  %v429_v50 = vld [vmem:[#allocation3 + $0x48] sm:$0x1] }
 0x2e8   : > { %v2705_v49 = vor.u32 %v2703_v1, %v2702_v20  ;;  %v2707_v17 = vrot.slane %v2702_v20, 4  ;;  %v2584_v29 = vmax.f32 %v2485_v0, %v2552_v16  ;;  %v3586_v56 = vrot.slane %v3584_v15, 4  ;;  %3865 = vrot.lane.b32.xlu1 %v10331_v23, %s13133_s19  ;;  %v3065_v0 = vld [vmem:[#allocation3 + $0xbc] sm:$0x1] }
 0x2e9   : > { %v3062_v22 = vsel %vm10093_vm7, %v2884_v52, %v3061_v61  ;;  %v2637_v35 = vpack.c.bf16 %v2605_v51, %v2605_v51  ;;  %v3875_v59 = vunpack.c.l.b16 %v3585_v9  ;;  %v3574_v38 = vsel %vm9165_vm13, %v3572_v55, %v3573_v46  ;;  %v2991_v16 = vld [vmem:[#allocation3 + $0x3c] sm:$0xf] }
 0x2ea   : > { %3063 = vst [vmem:[#allocation3 + $0xb4] sm:$0xf] %v3062_v22  ;;  %v2706_v10 = vsel %vm8678_vm15, %v2698_v37, %v2705_v49  ;;  %v2989_v26 = vsel %vm8614_vm5, %v2707_v17, %v2988_v57  ;;  %v2616_v32 = vpack.c.bf16 %v2584_v29, %v2584_v29  ;;  %v2539_v44 = vpop.f32.mrf.mxu3  ;;  %v3588_v2 = vsel %vm9165_vm13, %v3586_v56, %v3587_v21 }
 0x2eb   : > { %2987 = vst.msk [vmem:[#allocation3 + $0x34] sm:$0xf] %vm400_vm8, %v2706_v10  ;;  %v2887_v41 = vshrl.u32 %v2637_v35, 16  ;;  %v2890_v3 = vshll.u32 %v2637_v35, 16  ;;  %v2540_v53 = vadd.f32 %v10067_v28, %v2539_v44  ;;  %v2486_v4 = vpop.f32.mrf.mxu0  ;;  %v3876_v42 = vunpack.c.l.b16 %v3588_v2 }
 0x2ec   : > { %2990 = vst [vmem:[#allocation3 + $0x38] sm:$0x1] %v2989_v26  ;;  %v2709_v47 = vshrl.u32 %v2616_v32, 16  ;;  %v2712_v37 = vshll.u32 %v2616_v32, 16  ;;  %v2487_v60 = vadd.f32 %v10067_v28, %v2486_v4  ;;  %v3871_v1 = vunpack.c.l.b16 %v3571_v45 }
 0x2ed   : > { %v2889_v39 = vrot.slane %v2887_v41, 7  ;;  %v2574_v43 = vmul.f32 0.01, %v2540_v53  ;;  %v10362_v31 = vpack.c.b16 %v3876_v42, %v3875_v59  ;;  %v3872_v15 = vunpack.c.l.b16 %v3574_v38 }
 0x2ee   : > { %v2711_v62 = vrot.slane %v2709_v47, 7  ;;  %v2553_v6 = vmul.f32 0.01, %v2487_v60  ;;  %v430_v21 = vsel %vm8614_vm5, 0, %v429_v50  ;;  %v3130_v55 = vshrl.u32 %v10209_v36, 16 }
 0x2ef   : > { %v2892_v61 = vor.u32 %v2890_v3, %v2889_v39  ;;  %v2894_v20 = vrot.slane %v2889_v39, 4  ;;  %v2606_v52 = vmax.f32 %v2540_v53, %v2574_v43  ;;  %3923 = vrot.lane.b32.xlu0 %v10362_v31, %s8507_s21  ;;  %431 = vst [vmem:[#allocation3 + $0x48] sm:$0x1] %v430_v21  ;;  %v10369_v45 = vpack.c.b16 %v3872_v15, %v3871_v1  ;;  %v3068_v47 = vld [vmem:[#allocation3 + $0xc0] sm:$0xf] }
 0x2f0   : > { %v2714_v57 = vor.u32 %v2712_v37, %v2711_v62  ;;  %v2585_v51 = vmax.f32 %v2487_v60, %v2553_v6  ;;  %v3132_v29 = vrot.slane %v3130_v55, 4  ;;  %v3133_v59 = vshll.u32 %v10209_v36, 16  ;;  %v2995_v1 = vld [vmem:[#allocation3 + $0x44] sm:$0x1] }
 0x2f1   : > { %v2893_v9 = vsel %vm8678_vm15, %v2885_v8, %v2892_v61  ;;  %v3066_v49 = vsel %vm8614_vm5, %v2894_v20, %v3065_v0  ;;  %v2638_v17 = vpack.c.bf16 %v2606_v52, %v2606_v52  ;;  %3919 = vrot.lane.b32.xlu1 %v10369_v45, %s8507_s21  ;;  %v3139_v46 = vshll.u32 %v10213_v18, 16 }
 0x2f2   : > { %3064 = vst.msk [vmem:[#allocation3 + $0xb8] sm:$0xf] %vm400_vm8, %v2893_v9  ;;  %v2992_v56 = vsel %vm10093_vm7, %v2714_v57, %v2991_v16  ;;  %v2617_v22 = vpack.c.bf16 %v2585_v51, %v2585_v51  ;;  %v2541_v35 = vpop.f32.mrf.mxu3  ;;  %v3143_v44 = vshrl.u32 %v10213_v18, 16  ;;  %v3135_v53 = vrot.slane %v3133_v59, 5  ;;  %v484_v51 = vld [vmem:[#allocation3 + $0x50] sm:$0x1] }
 0x2f3   : > { %3067 = vst [vmem:[#allocation3 + $0xbc] sm:$0x1] %v3066_v49  ;;  %v2896_v8 = vshrl.u32 %v2638_v17, 16  ;;  %v2899_v10 = vshll.u32 %v2638_v17, 16  ;;  %v2542_v26 = vadd.f32 %v10067_v28, %v2541_v35  ;;  %v2489_v32 = vpop.f32.mrf.mxu0  ;;  %v3141_v36 = vrot.slane %v3139_v46, 5 }
 0x2f4   : > { %2993 = vst [vmem:[#allocation3 + $0x3c] sm:$0xf] %v2992_v56  ;;  %v2717_v2 = vshrl.u32 %v2617_v22, 16  ;;  %v2720_v41 = vshll.u32 %v2617_v22, 16  ;;  %v2490_v3 = vadd.f32 %v10067_v28, %v2489_v32  ;;  %v3145_v50 = vrot.slane %v3143_v44, 4 }
 0x2f5   : > { %v10385_v4 = vrot.slane %v2896_v8, 7  ;;  %v2575_v42 = vmul.f32 0.01, %v2542_v26  ;;  %v3136_v38 = vor.u32 %v3135_v53, %v3132_v29  ;;  %v3149_v39 = vshll.u32 %v10234_v7, 16  ;;  %v3087_v17 = vld [vmem:[#allocation3 + $0x30] sm:$0xf] }
 0x2f6   : > { %v2719_v37 = vrot.slane %v2717_v2, 7  ;;  %v2554_v60 = vmul.f32 0.01, %v2490_v3  ;;  %v2715_v43 = vrot.slane %v2711_v62, 4  ;;  %v3146_v6 = vor.u32 %v3145_v50, %v3141_v36  ;;  %v3088_v29 = vld [vmem:[#allocation3 + $0x34] sm:$0xf] }
 0x2f7   : > { %v2901_v18 = vor.u32 %v2899_v10, %v10385_v4  ;;  %v2607_v0 = vmax.f32 %v2542_v26, %v2575_v42  ;;  %v3137_v20 = vrot.slane %v3136_v38, 4  ;;  %v3151_v57 = vrot.slane %v3149_v39, 5  ;;  %v3089_v8 = vld [vmem:[#allocation3 + $0x38] sm:$0x1]  ;;  %v2998_v38 = vld [vmem:[#allocation3 + $0x48] sm:$0xf] }
 0x2f8   : > { %v2722_v15 = vor.u32 %v2720_v41, %v2719_v37  ;;  %v2724_v21 = vrot.slane %v2719_v37, 4  ;;  %v2586_v61 = vmax.f32 %v2490_v3, %v2554_v60  ;;  %v3147_v55 = vrot.slane %v3146_v6, 4 }
 0x2f9   : > { %v3069_v16 = vsel %vm10093_vm7, %v2901_v18, %v3068_v47  ;;  %v2639_v52 = vpack.c.bf16 %v2607_v0, %v2607_v0  ;;  %v3142_v49 = vsel %vm8698_vm2, %v3137_v20, %v3141_v36  ;;  %v2902_v56 = vrot.slane %v10385_v4, 4  ;;  %v3072_v4 = vld [vmem:[#allocation3 + $0xc8] sm:$0x1] }
 0x2fa   : > { %3070 = vst [vmem:[#allocation3 + $0xc0] sm:$0xf] %v3069_v16  ;;  %v2723_v7 = vsel %vm8678_vm15, %v2715_v43, %v2722_v15  ;;  %v2996_v62 = vsel %vm8614_vm5, %v2724_v21, %v2995_v1  ;;  %v2618_v9 = vpack.c.bf16 %v2586_v61, %v2586_v61  ;;  %v3152_v35 = vsel %vm8698_vm2, %v3147_v55, %v3151_v57 }
 0x2fb   : > { %2994 = vst.msk [vmem:[#allocation3 + $0x40] sm:$0xf] %vm400_vm8, %v2723_v7  ;;  %v2904_v22 = vshrl.u32 %v2639_v52, 16  ;;  %v3789_v59 = vunpack.c.l.b16 %v3142_v49  ;;  %v2491_v46 = vpop.f32.mrf.mxu0  ;;  %v2907_v10 = vshll.u32 %v2639_v52, 16  ;;  %v3790_v32 = vunpack.c.l.b16 %v3152_v35 }
 0x2fc   : > { %2997 = vst [vmem:[#allocation3 + $0x44] sm:$0x1] %v2996_v62  ;;  %v2726_v26 = vshrl.u32 %v2618_v9, 16  ;;  %v485_v44 = vsel %vm8620_vm6, 0, %v484_v51  ;;  %v2492_v41 = vadd.f32 %v10067_v28, %v2491_v46  ;;  %v7995_v3 = vrot.slane %v3087_v17, 9 }
 0x2fd   : > { %v2906_v2 = vrot.slane %v2904_v22, 7  ;;  %486 = vst [vmem:[#allocation3 + $0x50] sm:$0x1] %v485_v44  ;;  %v3591_v53 = vrot.slane %v3088_v29, 5  ;;  %v2729_v36 = vshll.u32 %v2618_v9, 16  ;;  %v3821_v50 = vpack.c.b16 %v3790_v32, %v3789_v59 }
 0x2fe   : > { %v10404_v42 = vrot.slane %v2726_v26, 7  ;;  %v3226_v47 = vshrl.u32 %v3087_v17, 16  ;;  %v2555_v39 = vmul.f32 0.01, %v2492_v41  ;;  %v3594_v0 = vrot.slane %v3089_v8, 5 }
 0x2ff   : > { %v2909_v37 = vor.u32 %v2907_v10, %v2906_v2  ;;  %v2911_v60 = vrot.slane %v2906_v2, 4  ;;  %v3592_v43 = vsel %vm9165_vm13, %v7995_v3, %v3591_v53  ;;  %3837 = vrot.lane.b32.xlu2 %v3821_v50, %s13133_s19  ;;  %v3593_v1 = vrot.slane %v3591_v53, 4  ;;  %v10419_v51 = vld [vmem:[#allocation3 + $0xb4] sm:$0xf]  ;;  %v3122_v2 = vld [vmem:[#allocation3 + $0xbc] sm:$0x1] }
 0x300   : > { %v2731_v18 = vor.u32 %v2729_v36, %v10404_v42  ;;  %v3877_v6 = vunpack.c.l.b16 %v3592_v43  ;;  %v2587_v61 = vmax.f32 %v2492_v41, %v2555_v39  ;;  %v3228_v20 = vrot.slane %v3226_v47, 4 }
 0x301   : > { %v2910_v15 = vsel %vm8678_vm15, %v2902_v56, %v2909_v37  ;;  %v3073_v21 = vsel %vm8614_vm5, %v2911_v60, %v3072_v4  ;;  %v3595_v52 = vsel %vm9165_vm13, %v3593_v1, %v3594_v0  ;;  %v3229_v55 = vshll.u32 %v3087_v17, 16  ;;  %v10421_v56 = vld [vmem:[#allocation3 + $0xb8] sm:$0xf]  ;;  %v432_v1 = vld [vmem:[#allocation3 + $0x54] sm:$0x1] }
 0x302   : > { %3071 = vst.msk [vmem:[#allocation3 + $0xc4] sm:$0xf] %vm400_vm8, %v2910_v15  ;;  %v2999_v16 = vsel %vm10093_vm7, %v2731_v18, %v2998_v38  ;;  %v3235_v57 = vshll.u32 %v3088_v29, 16  ;;  %v2619_v7 = vpack.c.bf16 %v2587_v61, %v2587_v61  ;;  %v3878_v62 = vunpack.c.l.b16 %v3595_v52 }
 0x303   : > { %3074 = vst [vmem:[#allocation3 + $0xc8] sm:$0x1] %v3073_v21  ;;  %v3239_v9 = vshrl.u32 %v3088_v29, 16  ;;  %v3245_v49 = vshll.u32 %v3089_v8, 16  ;;  %v2494_v22 = vpop.f32.mrf.mxu0  ;;  %v2732_v35 = vrot.slane %v10404_v42, 4  ;;  %v3231_v59 = vrot.slane %v3229_v55, 5 }
 0x304   : > { %3000 = vst [vmem:[#allocation3 + $0x48] sm:$0xf] %v2999_v16  ;;  %v3237_v46 = vrot.slane %v3235_v57, 5  ;;  %v2495_v10 = vadd.f32 %v10067_v28, %v2494_v22  ;;  %v2734_v26 = vshrl.u32 %v2619_v7, 16  ;;  %v2737_v17 = vshll.u32 %v2619_v7, 16 }
 0x305   : > { %v10425_v32 = vpack.c.b16 %v3878_v62, %v3877_v6  ;;  %v3241_v44 = vrot.slane %v3239_v9, 4  ;;  %v3232_v41 = vor.u32 %v3231_v59, %v3228_v20  ;;  %v3247_v3 = vrot.slane %v3245_v49, 5  ;;  %v3002_v36 = vld [vmem:[#allocation3 + $0x50] sm:$0x1] }
 0x306   : > { %v3490_v29 = vshrl.u32 %v10419_v51, 16  ;;  %v3493_v8 = vshll.u32 %v10419_v51, 16  ;;  %v2736_v53 = vrot.slane %v2734_v26, 7  ;;  %v3499_v42 = vshll.u32 %v10421_v56, 16  ;;  %v8273_v49 = vld [vmem:[#allocation3 + $0xc] sm:$0xff] }
 0x307   : > { %3925 = vrot.lane.b32.xlu1 %v10425_v32, %s8507_s21  ;;  %v3242_v4 = vor.u32 %v3241_v44, %v3237_v46  ;;  %v3503_v28 = vshrl.u32 %v10421_v56, 16  ;;  %v3233_v50 = vrot.slane %v3232_v41, 4  ;;  %v3509_v60 = vshll.u32 %v3122_v2, 16  ;;  %v10453_v44 = vld [vmem:[%s13064_s2] ss:$0 sm:$0xff] }
 0x308   : > { %v3492_v47 = vrot.slane %v3490_v29, 4  ;;  %v3495_v37 = vrot.slane %v3493_v8, 5  ;;  %v2739_v38 = vor.u32 %v2737_v17, %v2736_v53  ;;  %v2741_v39 = vrot.slane %v2736_v53, 4 }
 0x309   : > { %v3243_v43 = vrot.slane %v3242_v4, 4  ;;  %v3501_v18 = vrot.slane %v3499_v42, 5  ;;  %v3238_v0 = vsel %vm8698_vm2, %v3233_v50, %v3237_v46  ;;  %v3505_v15 = vrot.slane %v3503_v28, 4 }
 0x30a   : > { %v3496_v6 = vor.u32 %v3495_v37, %v3492_v47  ;;  %v3511_v21 = vrot.slane %v3509_v60, 5  ;;  %v2740_v61 = vsel %vm8678_vm15, %v2732_v35, %v2739_v38  ;;  %v3003_v20 = vsel %vm8614_vm5, %v2741_v39, %v3002_v36  ;;  %v487_v38 = vld [vmem:[#allocation3 + $0x5c] sm:$0x1] }
 0x30b   : > { %v3248_v16 = vsel %vm8698_vm2, %v3243_v43, %v3247_v3  ;;  %v3797_v52 = vunpack.c.l.b16 %v3238_v0  ;;  %v2496_v55 = vpop.f32.mrf.mxu0  ;;  %3001 = vst.msk [vmem:[#allocation3 + $0x4c] sm:$0xf] %vm400_vm8, %v2740_v61  ;;  %v3506_v62 = vor.u32 %v3505_v15, %v3501_v18  ;;  %v433_v9 = vsel %vm8614_vm5, 0, %v432_v1  ;;  %v10471_v0 = vld [vmem:[#allocation3 + $0x3c] sm:$0xf] }
 0x30c   : > { %v3798_v57 = vunpack.c.l.b16 %v3248_v16  ;;  %v3497_v7 = vrot.slane %v3496_v6, 4  ;;  %3004 = vst [vmem:[#allocation3 + $0x50] sm:$0x1] %v3003_v20  ;;  %v2556_v22 = vmul.f32 0.01, %v2495_v10  ;;  %v8006_v35 = vrot.slane %v10419_v51, 9 }
 0x30d   : > { %v3668_v59 = vrot.slane %v10421_v56, 5  ;;  %v3507_v17 = vrot.slane %v3506_v62, 4  ;;  %434 = vst [vmem:[#allocation3 + $0x54] sm:$0x1] %v433_v9  ;;  %v2497_v41 = vadd.f32 %v10453_v44, %v2496_v55  ;;  %v3671_v56 = vrot.slane %v3122_v2, 5 }
 0x30e   : > { %v10446_v46 = vpack.c.b16 %v3798_v57, %v3797_v52  ;;  %v3502_v26 = vsel %vm8698_vm2, %v3497_v7, %v3501_v18  ;;  %v2588_v29 = vmax.f32 %v2495_v10, %v2556_v22  ;;  %v3202_v4 = vshrl.u32 %v10300_v34, 16  ;;  %v10482_v55 = vld [vmem:[#allocation3 + $0x40] sm:$0xf] }
 0x30f   : > { %v3819_v3 = vunpack.c.l.b16 %v3502_v26  ;;  %3952 = vrot.lane.b32.xlu1 %v8273_v49, %s8509_s23  ;;  %v3670_v51 = vrot.slane %v3668_v59, 4  ;;  %v3512_v8 = vsel %vm8698_vm2, %v3507_v17, %v3511_v21  ;;  %v3669_v53 = vsel %vm9165_vm13, %v8006_v35, %v3668_v59 }
 0x310   : > { %3845 = vrot.lane.b32.xlu0 %v10446_v46, %s13133_s19  ;;  %v3205_v42 = vshll.u32 %v10300_v34, 16  ;;  %v3820_v28 = vunpack.c.l.b16 %v3512_v8  ;;  %v2620_v36 = vpack.c.bf16 %v2588_v29, %v2588_v29  ;;  %v3211_v2 = vshll.u32 %v10321_v19, 16 }
 0x311   : > { %v3672_v10 = vsel %vm9165_vm13, %v3670_v51, %v3671_v56  ;;  %v3204_v47 = vrot.slane %v3202_v4, 4  ;;  %v3215_v60 = vshrl.u32 %v10321_v19, 16  ;;  %v3899_v18 = vunpack.c.l.b16 %v3669_v53 }
 0x312   : > { %v3900_v50 = vunpack.c.l.b16 %v3672_v10  ;;  %v3207_v37 = vrot.slane %v3205_v42, 5  ;;  %v10469_v39 = vpack.c.b16 %v3820_v28, %v3819_v3  ;;  %v2743_v43 = vshrl.u32 %v2620_v36, 16  ;;  %v10492_v3 = vld [vmem:[#allocation3 + $0x44] sm:$0x1] }
 0x313   : > { %v3213_v1 = vrot.slane %v3211_v2, 5  ;;  %v2499_v34 = vpop.f32.mrf.mxu0  ;;  %v2746_v6 = vshll.u32 %v2620_v36, 16  ;;  %v3217_v21 = vrot.slane %v3215_v60, 4  ;;  %v3221_v61 = vshll.u32 %v10328_v24, 16 }
 0x314   : > { %v3208_v15 = vor.u32 %v3207_v37, %v3204_v47  ;;  %3867 = vrot.lane.b32.xlu2 %v10469_v39, %s13133_s19  ;;  %v10476_v20 = vrot.slane %v2743_v43, 7  ;;  %v10478_v19 = vpack.c.b16 %v3900_v50, %v3899_v18  ;;  %v488_v16 = vsel %vm8620_vm6, 0, %v487_v38  ;;  %v3005_v57 = vld [vmem:[#allocation3 + $0x54] sm:$0xf]  ;;  %v435_v37 = vld [vmem:[#allocation3 + $0x60] sm:$0x1] }
 0x315   : > { %v2557_v52 = vmul.f32 0.01, %v2497_v41  ;;  %v3218_v62 = vor.u32 %v3217_v21, %v3213_v1  ;;  %489 = vst [vmem:[#allocation3 + $0x5c] sm:$0x1] %v488_v16  ;;  %v3250_v9 = vshrl.u32 %v10471_v0, 16  ;;  %v2500_v24 = vadd.f32 %v10453_v44, %v2499_v34  ;;  %v8275_v16 = vld [vmem:[#allocation3 + $0x24] sm:$0xff] }
 0x316   : > { %v3209_v7 = vrot.slane %v3208_v15, 4  ;;  %v2748_v49 = vor.u32 %v2746_v6, %v10476_v20  ;;  %v3223_v22 = vrot.slane %v3221_v61, 5  ;;  %v3253_v59 = vshll.u32 %v10471_v0, 16 }
 0x317   : > { %v2589_v35 = vmax.f32 %v2497_v41, %v2557_v52  ;;  %v3219_v17 = vrot.slane %v3218_v62, 4  ;;  %v3252_v29 = vrot.slane %v3250_v9, 4  ;;  %v3259_v51 = vshll.u32 %v10482_v55, 16 }
 0x318   : > { %3947 = vrot.lane.b32.xlu0 %v10478_v19, %s8507_s21  ;;  %v3214_v26 = vsel %vm8698_vm2, %v3209_v7, %v3213_v1  ;;  %v2749_v56 = vrot.slane %v10476_v20, 4  ;;  %v3006_v8 = vsel %vm10093_vm7, %v2748_v49, %v3005_v57  ;;  %v3255_v53 = vrot.slane %v3253_v59, 5  ;;  %v490_v59 = vld [vmem:[#allocation3 + $0x68] sm:$0x1] }
 0x319   : > { %v2621_v41 = vpack.c.bf16 %v2589_v35, %v2589_v35  ;;  %3007 = vst [vmem:[#allocation3 + $0x54] sm:$0xf] %v3006_v8  ;;  %v3224_v4 = vsel %vm8698_vm2, %v3219_v17, %v3223_v22  ;;  %v3795_v42 = vunpack.c.l.b16 %v3214_v26  ;;  %v3261_v28 = vrot.slane %v3259_v51, 5  ;;  %v10522_v8 = vld [vmem:[#allocation3 + $0x48] sm:$0xf] }
 0x31a   : > { %v3263_v36 = vshrl.u32 %v10482_v55, 16  ;;  %v3796_v10 = vunpack.c.l.b16 %v3224_v4  ;;  %v3256_v50 = vor.u32 %v3255_v53, %v3252_v29  ;;  %v3269_v47 = vshll.u32 %v10492_v3, 16 }
 0x31b   : > { %v2751_v2 = vshrl.u32 %v2621_v41, 16  ;;  %v2501_v60 = vpop.f32.mrf.mxu0  ;;  %v2754_v38 = vshll.u32 %v2621_v41, 16  ;;  %v7993_v18 = vrot.slane %v10221_v63, 9  ;;  %v3577_v1 = vrot.slane %v10262_v25, 5 }
 0x31c   : > { %v3265_v43 = vrot.slane %v3263_v36, 4  ;;  %v10504_v34 = vpack.c.b16 %v3796_v10, %v3795_v42  ;;  %v3257_v15 = vrot.slane %v3256_v50, 4  ;;  %v3580_v21 = vrot.slane %v10273_v54, 5  ;;  %v3009_v61 = vld [vmem:[#allocation3 + $0x5c] sm:$0x1] }
 0x31d   : > { %v2753_v6 = vrot.slane %v2751_v2, 7  ;;  %v3578_v52 = vsel %vm9165_vm13, %v7993_v18, %v3577_v1  ;;  %v3579_v57 = vrot.slane %v3577_v1, 4  ;;  %v436_v7 = vsel %vm8614_vm5, 0, %v435_v37  ;;  %v10535_v50 = vld [vmem:[#allocation3 + $0x50] sm:$0x1] }
 0x31e   : > { %v3266_v20 = vor.u32 %v3265_v43, %v3261_v28  ;;  %3843 = vrot.lane.b32.xlu2 %v10504_v34, %s13133_s19  ;;  %v3262_v62 = vsel %vm8698_vm2, %v3257_v15, %v3261_v28  ;;  %v3271_v9 = vrot.slane %v3269_v47, 5  ;;  %437 = vst [vmem:[#allocation3 + $0x60] sm:$0x1] %v436_v7  ;;  %v3873_v22 = vunpack.c.l.b16 %v3578_v52  ;;  %v10529_v28 = vld [vmem:[#allocation3 + $0x4c] sm:$0xf] }
 0x31f   : > { %v2756_v63 = vor.u32 %v2754_v38, %v2753_v6  ;;  %v2758_v25 = vrot.slane %v2753_v6, 4  ;;  %v3581_v49 = vsel %vm9165_vm13, %v3579_v57, %v3580_v21  ;;  %v2558_v35 = vmul.f32 0.01, %v2500_v24  ;;  %v438_v1 = vld [vmem:[#allocation3 + $0x6c] sm:$0x1] }
 0x320   : > { %v3267_v54 = vrot.slane %v3266_v20, 4  ;;  %3956 = vrot.lane.b32.xlu0 %v8275_v16, %s8509_s23  ;;  %v3799_v29 = vunpack.c.l.b16 %v3262_v62  ;;  %v3874_v51 = vunpack.c.l.b16 %v3581_v49  ;;  %v8005_v4 = vrot.slane %v10231_v14, 9  ;;  %v8278_v6 = vld [vmem:[#allocation3 + $0x48] sm:$0xff] }
 0x321   : > { %v2757_v26 = vsel %vm8678_vm15, %v2749_v56, %v2756_v63  ;;  %v3010_v17 = vsel %vm8614_vm5, %v2758_v25, %v3009_v61  ;;  %v2590_v53 = vmax.f32 %v2500_v24, %v2558_v35  ;;  %v3661_v42 = vrot.slane %v10279_v13, 5  ;;  %v493_v35 = vld [vmem:[#allocation3 + $0x74] sm:$0x1] }
 0x322   : > { %3008 = vst.msk [vmem:[#allocation3 + $0x58] sm:$0xf] %vm400_vm8, %v2757_v26  ;;  %v3272_v41 = vsel %vm8698_vm2, %v3267_v54, %v3271_v9  ;;  %v3664_v36 = vrot.slane %v10287_v33, 5  ;;  %v491_v10 = vsel %vm8620_vm6, 0, %v490_v59  ;;  %v2502_v2 = vadd.f32 %v10453_v44, %v2501_v60 }
 0x323   : > { %3011 = vst [vmem:[#allocation3 + $0x5c] sm:$0x1] %v3010_v17  ;;  %v3800_v56 = vunpack.c.l.b16 %v3272_v41  ;;  %v2504_v47 = vpop.f32.mrf.mxu0  ;;  %v10537_v37 = vpack.c.b16 %v3874_v51, %v3873_v22  ;;  %v2622_v24 = vpack.c.bf16 %v2590_v53, %v2590_v53  ;;  %v3662_v14 = vsel %vm9165_vm13, %v8005_v4, %v3661_v42 }
 0x324   : > { %v3663_v13 = vrot.slane %v3661_v42, 4  ;;  %492 = vst [vmem:[#allocation3 + $0x68] sm:$0x1] %v491_v10  ;;  %v2559_v43 = vmul.f32 0.01, %v2502_v2  ;;  %v7997_v33 = vrot.slane %v10522_v8, 9  ;;  %v3897_v21 = vunpack.c.l.b16 %v3662_v14 }
 0x325   : > { %v10541_v38 = vpack.c.b16 %v3800_v56, %v3799_v29  ;;  %v3605_v18 = vrot.slane %v10529_v28, 5  ;;  %v2760_v60 = vshrl.u32 %v2622_v24, 16  ;;  %v3608_v61 = vrot.slane %v10535_v50, 5  ;;  %v3012_v9 = vld [vmem:[#allocation3 + $0x60] sm:$0xf]  ;;  %v8276_v14 = vld [vmem:[#allocation3 + $0x30] sm:$0xff] }
 0x326   : > { %v3665_v15 = vsel %vm9165_vm13, %v3663_v13, %v3664_v36  ;;  %3921 = vrot.lane.b32.xlu2 %v10537_v37, %s8507_s21  ;;  %v2591_v16 = vmax.f32 %v2502_v2, %v2559_v43  ;;  %v2763_v63 = vshll.u32 %v2622_v24, 16  ;;  %v439_v25 = vsel %vm8614_vm5, 0, %v438_v1  ;;  %v3096_v24 = vld [vmem:[#allocation3 + $0x54] sm:$0xf] }
 0x327   : > { %3847 = vrot.lane.b32.xlu1 %v10541_v38, %s13133_s19  ;;  %v3898_v20 = vunpack.c.l.b16 %v3665_v15  ;;  %v3606_v52 = vsel %vm9165_vm13, %v7997_v33, %v3605_v18  ;;  %v3607_v57 = vrot.slane %v3605_v18, 4  ;;  %v2762_v7 = vrot.slane %v2760_v60, 7  ;;  %440 = vst [vmem:[#allocation3 + $0x6c] sm:$0x1] %v439_v25 }
 0x328   : > { %3962 = vrot.lane.b32.xlu0 %v8278_v6, %s8509_s23  ;;  %v2505_v62 = vadd.f32 %v10453_v44, %v2504_v47  ;;  %v2623_v54 = vpack.c.bf16 %v2591_v16, %v2591_v16  ;;  %v3881_v22 = vunpack.c.l.b16 %v3606_v52  ;;  %v7996_v53 = vrot.slane %v10471_v0, 9 }
 0x329   : > { %v3609_v49 = vsel %vm9165_vm13, %v3607_v57, %v3608_v61  ;;  %v2765_v59 = vor.u32 %v2763_v63, %v2762_v7  ;;  %v10560_v26 = vpack.c.b16 %v3898_v20, %v3897_v21  ;;  %v2766_v51 = vrot.slane %v2762_v7, 4  ;;  %v3097_v56 = vld [vmem:[#allocation3 + $0x58] sm:$0xf] }
 0x32a   : > { %v3882_v17 = vunpack.c.l.b16 %v3609_v49  ;;  %v2560_v29 = vmul.f32 0.01, %v2505_v62  ;;  %v2768_v41 = vshrl.u32 %v2623_v54, 16  ;;  %v3598_v4 = vrot.slane %v10482_v55, 5  ;;  %v3098_v20 = vld [vmem:[#allocation3 + $0x5c] sm:$0x1] }
 0x32b   : > { %v2506_v42 = vpop.f32.mrf.mxu0  ;;  %v3013_v36 = vsel %vm10093_vm7, %v2765_v59, %v3012_v9  ;;  %v2771_v10 = vshll.u32 %v2623_v54, 16  ;;  %v494_v47 = vsel %vm8620_vm6, 0, %v493_v35  ;;  %v3601_v33 = vrot.slane %v10492_v3, 5  ;;  %v3016_v55 = vld [vmem:[#allocation3 + $0x68] sm:$0x1] }
 0x32c   : > { %v2592_v2 = vmax.f32 %v2505_v62, %v2560_v29  ;;  %3014 = vst [vmem:[#allocation3 + $0x60] sm:$0xf] %v3013_v36  ;;  %v2770_v13 = vrot.slane %v2768_v41, 7  ;;  %v3600_v43 = vrot.slane %v3598_v4, 4  ;;  %v2507_v0 = vadd.f32 %v10453_v44, %v2506_v42 }
 0x32d   : > { %v10570_v18 = vpack.c.b16 %v3882_v17, %v3881_v22  ;;  %v3599_v60 = vsel %vm9165_vm13, %v7996_v53, %v3598_v4  ;;  %495 = vst [vmem:[#allocation3 + $0x74] sm:$0x1] %v494_v47  ;;  %v3612_v6 = vrot.slane %v3097_v56, 5  ;;  %v7998_v7 = vrot.slane %v3096_v24, 9  ;;  %v10592_v47 = vld [vmem:[#allocation3 + $0x18] sm:$0xff] }
 0x32e   : > { %v2624_v1 = vpack.c.bf16 %v2592_v2, %v2592_v2  ;;  %3945 = vrot.lane.b32.xlu2 %v10560_v26, %s8507_s21  ;;  %v2773_v15 = vor.u32 %v2771_v10, %v2770_v13  ;;  %v2775_v21 = vrot.slane %v2770_v13, 4  ;;  %v3602_v3 = vsel %vm9165_vm13, %v3600_v43, %v3601_v33  ;;  %v3019_v49 = vld [vmem:[#allocation3 + $0x6c] sm:$0xf]  ;;  %v441_v10 = vld [vmem:[#allocation3 + $0x78] sm:$0x1]  ;;  %v8288_v2 = vld [vmem:[#allocation3 + $0xc0] sm:$0xff] }
 0x32f   : > { %3958 = vrot.lane.b32.xlu1 %v8276_v14, %s8509_s23  ;;  %v2561_v61 = vmul.f32 0.01, %v2507_v0  ;;  %v3880_v57 = vunpack.c.l.b16 %v3602_v3  ;;  %v3614_v9 = vrot.slane %v3612_v6, 4  ;;  %v3879_v22 = vunpack.c.l.b16 %v3599_v60 }
 0x330   : > { %3929 = vrot.lane.b32.xlu0 %v10570_v18, %s8507_s21  ;;  %v2777_v16 = vshrl.u32 %v2624_v1, 16  ;;  %v2780_v52 = vshll.u32 %v2624_v1, 16  ;;  %v2774_v63 = vsel %vm8678_vm15, %v2766_v51, %v2773_v15  ;;  %v3017_v25 = vsel %vm8614_vm5, %v2775_v21, %v3016_v55 }
 0x331   : > { %v2593_v62 = vmax.f32 %v2507_v0, %v2561_v61  ;;  %3015 = vst.msk [vmem:[#allocation3 + $0x64] sm:$0xf] %vm400_vm8, %v2774_v63  ;;  %v3615_v35 = vrot.slane %v3098_v20, 5  ;;  %v3298_v17 = vshrl.u32 %v3096_v24, 16  ;;  %v3301_v29 = vshll.u32 %v3096_v24, 16  ;;  %v8287_v0 = vld [vmem:[#allocation3 + $0xb4] sm:$0xff] }
 0x332   : > { %v2779_v54 = vrot.slane %v2777_v16, 7  ;;  %3018 = vst [vmem:[#allocation3 + $0x68] sm:$0x1] %v3017_v25  ;;  %v3307_v41 = vshll.u32 %v3097_v56, 16  ;;  %v10586_v42 = vpack.c.b16 %v3880_v57, %v3879_v22  ;;  %v10590_v51 = vsel %vm9165_vm13, %v7998_v7, %v3612_v6 }
 0x333   : > { %v2625_v59 = vpack.c.bf16 %v2593_v62, %v2593_v62  ;;  %v2509_v53 = vpop.f32.mrf.mxu0  ;;  %v3311_v36 = vshrl.u32 %v3097_v56, 16  ;;  %v10596_v43 = vsel %vm9165_vm13, %v3614_v9, %v3615_v35  ;;  %v3300_v24 = vrot.slane %v3298_v17, 4 }
 0x334   : > { %v2782_v4 = vor.u32 %v2780_v52, %v2779_v54  ;;  %v2783_v14 = vrot.slane %v2779_v54, 4  ;;  %v3303_v55 = vrot.slane %v3301_v29, 5  ;;  %v3309_v1 = vrot.slane %v3307_v41, 5  ;;  %v3023_v3 = vld [vmem:[#allocation3 + $0x74] sm:$0x1] }
 0x335   : > { %v2785_v13 = vshrl.u32 %v2625_v59, 16  ;;  %v3313_v60 = vrot.slane %v3311_v36, 4  ;;  %v2788_v6 = vshll.u32 %v2625_v59, 16  ;;  %v3317_v15 = vshll.u32 %v3098_v20, 16  ;;  %v496_v29 = vld [vmem:[#allocation3 + $0x80] sm:$0x1] }
 0x336   : > { %v3020_v33 = vsel %vm10093_vm7, %v2782_v4, %v3019_v49  ;;  %3954 = vrot.lane.b32.xlu2 %v10592_v47, %s8509_s23  ;;  %v442_v21 = vsel %vm8614_vm5, 0, %v441_v10  ;;  %v3304_v61 = vor.u32 %v3303_v55, %v3300_v24  ;;  %v2510_v52 = vadd.f32 %v10453_v44, %v2509_v53  ;;  %v10620_v10 = vld [vmem:[#allocation3 + $0x60] sm:$0xf] }
 0x337   : > { %3982 = vrot.lane.b32.xlu1 %v8288_v2, %s8509_s23  ;;  %3021 = vst [vmem:[#allocation3 + $0x6c] sm:$0xf] %v3020_v33  ;;  %v2787_v56 = vrot.slane %v2785_v13, 7  ;;  %v3314_v16 = vor.u32 %v3313_v60, %v3309_v1  ;;  %v3274_v57 = vshrl.u32 %v10522_v8, 16  ;;  %v3319_v25 = vrot.slane %v3317_v15, 5  ;;  %v10622_v2 = vld [vmem:[#allocation3 + $0x54] sm:$0xff] }
 0x338   : > { %3980 = vrot.lane.b32.xlu0 %v8287_v0, %s8509_s23  ;;  %443 = vst [vmem:[#allocation3 + $0x78] sm:$0x1] %v442_v21  ;;  %v3277_v62 = vshll.u32 %v10522_v8, 16  ;;  %v3305_v9 = vrot.slane %v3304_v61, 4  ;;  %v2562_v54 = vmul.f32 0.01, %v2510_v52  ;;  %v3884_v21 = vunpack.c.l.b16 %v10596_v43 }
 0x339   : > { %v2790_v7 = vor.u32 %v2788_v6, %v2787_v56  ;;  %v2792_v63 = vrot.slane %v2787_v56, 4  ;;  %v3315_v20 = vrot.slane %v3314_v16, 4  ;;  %v3276_v49 = vrot.slane %v3274_v57, 4  ;;  %v10634_v6 = vld [vmem:[#allocation3 + $0x64] sm:$0xf] }
 0x33a   : > { %v3279_v59 = vrot.slane %v3277_v62, 5  ;;  %v3283_v17 = vshll.u32 %v10529_v28, 16  ;;  %v3310_v8 = vsel %vm8698_vm2, %v3305_v9, %v3309_v1  ;;  %v2594_v4 = vmax.f32 %v2510_v52, %v2562_v54 }
 0x33b   : > { %v2791_v22 = vsel %vm8678_vm15, %v2783_v14, %v2790_v7  ;;  %v3024_v35 = vsel %vm8614_vm5, %v2792_v63, %v3023_v3  ;;  %v2511_v41 = vpop.f32.mrf.mxu0  ;;  %v3320_v53 = vsel %vm8698_vm2, %v3315_v20, %v3319_v25  ;;  %v3287_v36 = vshrl.u32 %v10529_v28, 16  ;;  %v444_v63 = vld [vmem:[#allocation3 + $0x84] sm:$0x1]  ;;  %v10642_v20 = vld [vmem:[#allocation3 + $0x68] sm:$0x1] }
 0x33c   : > { %3022 = vst.msk [vmem:[#allocation3 + $0x70] sm:$0xf] %vm400_vm8, %v2791_v22  ;;  %v3803_v14 = vunpack.c.l.b16 %v3310_v8  ;;  %v3804_v13 = vunpack.c.l.b16 %v3320_v53  ;;  %v3280_v24 = vor.u32 %v3279_v59, %v3276_v49  ;;  %v3285_v33 = vrot.slane %v3283_v17, 5 }
 0x33d   : > { %3025 = vst [vmem:[#allocation3 + $0x74] sm:$0x1] %v3024_v35  ;;  %v2626_v0 = vpack.c.bf16 %v2594_v4, %v2594_v4  ;;  %v3289_v55 = vrot.slane %v3287_v36, 4  ;;  %v3293_v60 = vshll.u32 %v10535_v50, 16  ;;  %v497_v1 = vsel %vm8620_vm6, 0, %v496_v29  ;;  %v10654_v4 = vld [vmem:[#allocation3 + $0x3c] sm:$0xff] }
 0x33e   : > { %3927 = vrot.lane.b32.xlu2 %v10586_v42, %s8507_s21  ;;  %v10631_v28 = vpack.c.b16 %v3804_v13, %v3803_v14  ;;  %498 = vst [vmem:[#allocation3 + $0x80] sm:$0x1] %v497_v1  ;;  %v2512_v56 = vadd.f32 %v10453_v44, %v2511_v41  ;;  %v3322_v15 = vshrl.u32 %v10620_v10, 16  ;;  %v3883_v50 = vunpack.c.l.b16 %v10590_v51  ;;  %v499_v13 = vld [vmem:[#allocation3 + $0x8c] sm:$0x1] }
 0x33f   : > { %3964 = vrot.lane.b32.xlu1 %v10622_v2, %s8509_s23  ;;  %v2794_v3 = vshrl.u32 %v2626_v0, 16  ;;  %v3290_v61 = vor.u32 %v3289_v55, %v3285_v33  ;;  %v2797_v16 = vshll.u32 %v2626_v0, 16  ;;  %v3281_v52 = vrot.slane %v3280_v24, 4  ;;  %v3026_v54 = vld [vmem:[#allocation3 + $0x78] sm:$0xf] }
 0x340   : > { %3851 = vrot.lane.b32.xlu0 %v10631_v28, %s13133_s19  ;;  %v2563_v57 = vmul.f32 0.01, %v2512_v56  ;;  %v3325_v7 = vshll.u32 %v10620_v10, 16  ;;  %v3295_v9 = vrot.slane %v3293_v60, 5  ;;  %v3331_v51 = vshll.u32 %v10634_v6, 16 }
 0x341   : > { %v2796_v25 = vrot.slane %v2794_v3, 7  ;;  %v3291_v62 = vrot.slane %v3290_v61, 4  ;;  %v3324_v49 = vrot.slane %v3322_v15, 4  ;;  %v3335_v35 = vshrl.u32 %v10634_v6, 16  ;;  %v10661_v60 = vld [vmem:[#allocation3 + $0x6c] sm:$0xf] }
 0x342   : > { %v2595_v43 = vmax.f32 %v2512_v56, %v2563_v57  ;;  %v3327_v22 = vrot.slane %v3325_v7, 5  ;;  %v3286_v29 = vsel %vm8698_vm2, %v3281_v52, %v3285_v33  ;;  %v10650_v8 = vrot.slane %v3331_v51, 5 }
 0x343   : > { %v2514_v59 = vpop.f32.mrf.mxu0  ;;  %v2799_v17 = vor.u32 %v2797_v16, %v2796_v25  ;;  %v3296_v41 = vsel %vm8698_vm2, %v3291_v62, %v3295_v9  ;;  %v10652_v53 = vpack.c.b16 %v3884_v21, %v3883_v50  ;;  %v3337_v14 = vrot.slane %v3335_v35, 4  ;;  %v10663_v1 = vld [vmem:[#allocation3 + $0x70] sm:$0xf] }
 0x344   : > { %v2627_v36 = vpack.c.bf16 %v2595_v43, %v2595_v43  ;;  %v3802_v0 = vunpack.c.l.b16 %v3296_v41  ;;  %v3341_v55 = vshll.u32 %v10642_v20, 16  ;;  %v445_v33 = vsel %vm8614_vm5, 0, %v444_v63 }
 0x345   : > { %v3027_v24 = vsel %vm10093_vm7, %v2799_v17, %v3026_v54  ;;  %v2800_v56 = vrot.slane %v2796_v25, 4  ;;  %v3801_v15 = vunpack.c.l.b16 %v3286_v29  ;;  %v3328_v21 = vor.u32 %v3327_v22, %v3324_v49  ;;  %446 = vst [vmem:[#allocation3 + $0x84] sm:$0x1] %v445_v33  ;;  %v3030_v9 = vld [vmem:[#allocation3 + $0x80] sm:$0x1] }
 0x346   : > { %3960 = vrot.lane.b32.xlu2 %v10654_v4, %s8509_s23  ;;  %3028 = vst [vmem:[#allocation3 + $0x78] sm:$0xf] %v3027_v24  ;;  %v2802_v50 = vshrl.u32 %v2627_v36, 16  ;;  %v2805_v3 = vshll.u32 %v2627_v36, 16  ;;  %v3338_v61 = vor.u32 %v3337_v14, %v10650_v8  ;;  %v2515_v16 = vadd.f32 %v10453_v44, %v2514_v59 }
 0x347   : > { %3931 = vrot.lane.b32.xlu1 %v10652_v53, %s8507_s21  ;;  %v500_v52 = vsel %vm8620_vm6, 0, %v499_v13  ;;  %v3346_v7 = vshrl.u32 %v10661_v60, 16  ;;  %v3349_v63 = vshll.u32 %v10661_v60, 16  ;;  %v3355_v25 = vshll.u32 %v10663_v1, 16 }
 0x348   : > { %3989 = vrot.lane.b32.xlu0 %v10306_v48, %s13131_s8  ;;  %v2804_v57 = vrot.slane %v2802_v50, 7  ;;  %501 = vst [vmem:[#allocation3 + $0x8c] sm:$0x1] %v500_v52  ;;  %v10678_v62 = vpack.c.b16 %v3802_v0, %v3801_v15  ;;  %v3339_v51 = vrot.slane %v3338_v61, 4  ;;  %v3343_v54 = vrot.slane %v3341_v55, 5 }
 0x349   : > { %v2564_v43 = vmul.f32 0.01, %v2515_v16  ;;  %v3329_v35 = vrot.slane %v3328_v21, 4  ;;  %v10680_v17 = vrot.slane %v3355_v25, 5  ;;  %v3359_v14 = vshrl.u32 %v10663_v1, 16 }
 0x34a   : > { %v2807_v49 = vor.u32 %v2805_v3, %v2804_v57  ;;  %v2809_v22 = vrot.slane %v2804_v57, 4  ;;  %v3344_v29 = vsel %vm8698_vm2, %v3339_v51, %v3343_v54  ;;  %v3104_v0 = vld [vmem:[#allocation3 + $0x74] sm:$0x1]  ;;  %v3348_v55 = vrot.slane %v3346_v7, 4  ;;  %v447_v7 = vld [vmem:[#allocation3 + $0x90] sm:$0x1] }
 0x34b   : > { %v2516_v59 = vpop.f32.mrf.mxu0  ;;  %v2596_v41 = vmax.f32 %v2515_v16, %v2564_v43  ;;  %v3351_v33 = vrot.slane %v3349_v63, 5  ;;  %v3334_v15 = vsel %vm8698_vm2, %v3329_v35, %v10650_v8  ;;  %v3361_v3 = vrot.slane %v3359_v14, 4 }
 0x34c   : > { %v2517_v36 = vadd.f32 %v10453_v44, %v2516_v59  ;;  %v2808_v13 = vsel %vm8678_vm15, %v2800_v56, %v2807_v49  ;;  %v3031_v24 = vsel %vm8614_vm5, %v2809_v22, %v3030_v9  ;;  %v3806_v56 = vunpack.c.l.b16 %v3344_v29  ;;  %v3033_v22 = vld [vmem:[#allocation3 + $0x84] sm:$0xf] }
 0x34d   : > { %3029 = vst.msk [vmem:[#allocation3 + $0x7c] sm:$0xf] %vm400_vm8, %v2808_v13  ;;  %v2628_v50 = vpack.c.bf16 %v2596_v41, %v2596_v41  ;;  %v3362_v52 = vor.u32 %v3361_v3, %v10680_v17  ;;  %v3365_v57 = vshll.u32 %v3104_v0, 16  ;;  %v3805_v63 = vunpack.c.l.b16 %v3334_v15  ;;  %v502_v13 = vld [vmem:[#allocation3 + $0x98] sm:$0x1]  ;;  %v10710_v15 = vld [vmem:[#allocation3 + $0x6c] sm:$0xff] }
 0x34e   : > { %v2565_v21 = vmul.f32 0.01, %v2517_v36  ;;  %3849 = vrot.lane.b32.xlu2 %v10678_v62, %s13133_s19  ;;  %3032 = vst [vmem:[#allocation3 + $0x80] sm:$0x1] %v3031_v24  ;;  %v3352_v8 = vor.u32 %v3351_v33, %v3348_v55  ;;  %v3626_v25 = vrot.slane %v10663_v1, 5  ;;  %v448_v59 = vsel %vm8614_vm5, 0, %v447_v7 }
 0x34f   : > { %3991 = vrot.lane.b32.xlu1 %v10504_v34, %s13131_s8  ;;  %v2811_v61 = vshrl.u32 %v2628_v50, 16  ;;  %v2814_v51 = vshll.u32 %v2628_v50, 16  ;;  %v3363_v43 = vrot.slane %v3362_v52, 4  ;;  %v10702_v49 = vpack.c.b16 %v3806_v56, %v3805_v63  ;;  %449 = vst [vmem:[#allocation3 + $0x90] sm:$0x1] %v448_v59  ;;  %v10706_v24 = vld [vmem:[#allocation3 + $0xa8] sm:$0xff] }
 0x350   : > { %v2597_v16 = vmax.f32 %v2517_v36, %v2565_v21  ;;  %3995 = vrot.lane.b32.xlu0 %v10541_v38, %s13131_s8  ;;  %v3628_v35 = vrot.slane %v3626_v25, 4  ;;  %v3367_v14 = vrot.slane %v3365_v57, 5  ;;  %13348 = vst [vmem:[#allocation26_spill] sm:$0xff] %v10706_v24  ;;  %v3353_v1 = vrot.slane %v3352_v8, 4  ;;  %v3037_v56 = vld [vmem:[#allocation3 + $0x8c] sm:$0x1] }
 0x351   : > { %v2813_v9 = vrot.slane %v2811_v61, 7  ;;  %v3629_v55 = vrot.slane %v3104_v0, 5  ;;  %v8000_v0 = vrot.slane %v10661_v60, 9  ;;  %v503_v52 = vsel %vm8620_vm6, 0, %v502_v13 }
 0x352   : > { %v2629_v54 = vpack.c.bf16 %v2597_v16, %v2597_v16  ;;  %v3368_v3 = vsel %vm8698_vm2, %v3363_v43, %v3367_v14  ;;  %504 = vst [vmem:[#allocation3 + $0x98] sm:$0x1] %v503_v52  ;;  %v3358_v8 = vsel %vm8698_vm2, %v3353_v1, %v10680_v17  ;;  %v7999_v13 = vrot.slane %v10620_v10, 9 }
 0x353   : > { %v2519_v29 = vpop.f32.mrf.mxu0  ;;  %v2816_v41 = vor.u32 %v2814_v51, %v2813_v9  ;;  %v3630_v61 = vsel %vm9165_vm13, %v3628_v35, %v3629_v55  ;;  %v2817_v57 = vrot.slane %v2813_v9, 4  ;;  %v3627_v60 = vsel %vm9165_vm13, %v8000_v0, %v3626_v25  ;;  %v10735_v35 = vld [vmem:[#allocation3 + $0x78] sm:$0xf] }
 0x354   : > { %v2819_v36 = vshrl.u32 %v2629_v54, 16  ;;  %v2822_v21 = vshll.u32 %v2629_v54, 16  ;;  %v2520_v16 = vadd.f32 %v10453_v44, %v2519_v29  ;;  %v3808_v43 = vunpack.c.l.b16 %v3368_v3  ;;  %v10742_v55 = vld [vmem:[#allocation3 + $0x7c] sm:$0xf] }
 0x355   : > { %v3034_v33 = vsel %vm10093_vm7, %v2816_v41, %v3033_v22  ;;  %v3888_v22 = vunpack.c.l.b16 %v3630_v61  ;;  %v3619_v29 = vrot.slane %v10634_v6, 5  ;;  %v3807_v41 = vunpack.c.l.b16 %v3358_v8  ;;  %v10758_v52 = vld [vmem:[#allocation3 + $0x80] sm:$0x1] }
 0x356   : > { %v2821_v50 = vrot.slane %v2819_v36, 7  ;;  %3978 = vrot.lane.b32.xlu2 %v10706_v24, %s8509_s23  ;;  %3035 = vst [vmem:[#allocation3 + $0x84] sm:$0xf] %v3034_v33  ;;  %v2566_v51 = vmul.f32 0.01, %v2520_v16  ;;  %v3887_v25 = vunpack.c.l.b16 %v3627_v60  ;;  %v3622_v1 = vrot.slane %v10642_v20, 5 }
 0x357   : > { %3853 = vrot.lane.b32.xlu1 %v10702_v49, %s13133_s19  ;;  %v3370_v33 = vshrl.u32 %v10735_v35, 16  ;;  %v3373_v3 = vshll.u32 %v10735_v35, 16  ;;  %v10756_v20 = vsel %vm9165_vm13, %v7999_v13, %v3619_v29  ;;  %v3621_v0 = vrot.slane %v3619_v29, 4  ;;  %v3040_v60 = vld [vmem:[#allocation3 + $0x90] sm:$0xf]  ;;  %v10771_v13 = vld [vmem:[#allocation3 + $0x60] sm:$0xff] }
 0x358   : > { %v2824_v7 = vor.u32 %v2822_v21, %v2821_v50  ;;  %v2826_v63 = vrot.slane %v2821_v50, 4  ;;  %3968 = vrot.lane.b32.xlu0 %v10710_v15, %s8509_s23  ;;  %v2598_v59 = vmax.f32 %v2520_v16, %v2566_v51  ;;  %v10745_v50 = vpack.c.b16 %v3808_v43, %v3807_v41  ;;  %v505_v29 = vld [vmem:[#allocation3 + $0xa4] sm:$0x1] }
 0x359   : > { %v10747_v21 = vpack.c.b16 %v3888_v22, %v3887_v25  ;;  %v3372_v61 = vrot.slane %v3370_v33, 4  ;;  %v3383_v51 = vshrl.u32 %v10742_v55, 16  ;;  %v3623_v41 = vsel %vm9165_vm13, %v3621_v0, %v3622_v1  ;;  %v3044_v0 = vld [vmem:[#allocation3 + $0x98] sm:$0x1] }
 0x35a   : > { %v2825_v54 = vsel %vm8678_vm15, %v2817_v57, %v2824_v7  ;;  %v3038_v9 = vsel %vm8614_vm5, %v2826_v63, %v3037_v56  ;;  %v2630_v14 = vpack.c.bf16 %v2598_v59, %v2598_v59  ;;  %v450_v56 = vld [vmem:[#allocation3 + $0x9c] sm:$0x1]  ;;  %v13117_v57 = vrot.slane %v10742_v55, 5 }
 0x35b   : > { %3036 = vst.msk [vmem:[#allocation3 + $0x88] sm:$0xf] %vm400_vm8, %v2825_v54  ;;  %v2521_v17 = vpop.f32.mrf.mxu0  ;;  %v3375_v7 = vrot.slane %v3373_v3, 5  ;;  %v3379_v63 = vshll.u32 %v10742_v55, 16  ;;  %v451_v54 = vsel %vm8614_vm5, 0, %v450_v56  ;;  %v3385_v25 = vrot.slane %v3383_v51, 4 }
 0x35c   : > { %3039 = vst [vmem:[#allocation3 + $0x8c] sm:$0x1] %v3038_v9  ;;  %v2522_v36 = vadd.f32 %v10453_v44, %v2521_v17  ;;  %v2828_v10 = vshrl.u32 %v2630_v14, 16  ;;  %v3885_v9 = vunpack.c.l.b16 %v10756_v20  ;;  %v3635_v3 = vrot.slane %v13117_v57, 4  ;;  %v10778_v20 = vpop.permute.xlu2 %3837 }
 0x35d   : > { %v3376_v22 = vor.u32 %v3375_v7, %v3372_v61  ;;  %v3381_v59 = vrot.slane %v3379_v63, 5  ;;  %452 = vst [vmem:[#allocation3 + $0x9c] sm:$0x1] %v451_v54  ;;  %v506_v7 = vsel %vm8620_vm6, 0, %v505_v29  ;;  %v10784_v63 = vld [vmem:[#allocation3 + $0x84] sm:$0xf] }
 0x35e   : > { %v2567_v6 = vmul.f32 0.01, %v2522_v36  ;;  %3987 = vrot.lane.b32.xlu2 %v10242_v11, %s13131_s8  ;;  %v2830_v8 = vrot.slane %v2828_v10, 7  ;;  %v2831_v11 = vshll.u32 %v2630_v14, 16  ;;  %507 = vst [vmem:[#allocation3 + $0xa4] sm:$0x1] %v506_v7 }
 0x35f   : > { %3997 = vrot.lane.b32.xlu1 %v10678_v62, %s13131_s8  ;;  %v3377_v61 = vrot.slane %v3376_v22, 4  ;;  %v8001_v30 = vrot.slane %v10735_v35, 9  ;;  %vm13129_vm12 = vcmask 457728   ;;  %vm13128_vm10 = vcmask 523264  }
 0x360   : > { %v2599_v16 = vmax.f32 %v2522_v36, %v2567_v6  ;;  %3935 = vrot.lane.b32.xlu0 %v10747_v21, %s8507_s21  ;;  %v2833_v17 = vor.u32 %v2831_v11, %v2830_v8  ;;  %v3389_v36 = vshll.u32 %v10758_v52, 16  ;;  %v2834_v33 = vrot.slane %v2830_v8, 4 }
 0x361   : > { %v3886_v8 = vunpack.c.l.b16 %v3623_v41 }
 0x362   : > { %v2631_v43 = vpack.c.bf16 %v2599_v16, %v2599_v16  ;;  %v10776_v10 = vld [vmem:[#allocation3 + $0x88] sm:$0xf]  ;;  %v3041_v1 = vsel %vm10093_vm7, %v2833_v17, %v3040_v60  ;;  %v3386_v16 = vor.u32 %v3385_v25, %v3381_v59  ;;  %v3382_v60 = vsel %vm8698_vm2, %v3377_v61, %v3381_v59  ;;  %v10793_v25 = vpop.permute.xlu0 %3839 }
 0x363   : > { %v2524_v14 = vpop.f32.mrf.mxu0  ;;  %3042 = vst [vmem:[#allocation3 + $0x90] sm:$0xf] %v3041_v1  ;;  %v3391_v17 = vrot.slane %v3389_v36, 5  ;;  %v3403_v29 = vshll.u32 %v10776_v10, 16  ;;  %v3397_v59 = vshll.u32 %v10784_v63, 16  ;;  %v3407_v36 = vshrl.u32 %v10776_v10, 16 }
 0x364   : > { %v2836_v6 = vshrl.u32 %v2631_v43, 16  ;;  %v2525_v56 = vadd.f32 %v10453_v44, %v2524_v14  ;;  %v2839_v51 = vshll.u32 %v2631_v43, 16  ;;  %v3387_v22 = vrot.slane %v3386_v16, 4  ;;  %v3047_v35 = vld [vmem:[#allocation3 + $0x9c] sm:$0xf] }
 0x365   : > { %v10801_v61 = vrot.slane %v3403_v29, 5  ;;  %v3409_v29 = vrot.slane %v3407_v36, 4  ;;  %v10812_v57 = vpack.c.b16 %v3886_v8, %v3885_v9  ;;  %v3051_v58 = vld [vmem:[#allocation3 + $0xa4] sm:$0x1] }
 0x366   : > { %v2838_v11 = vrot.slane %v2836_v6, 7  ;;  %v2568_v54 = vmul.f32 0.01, %v2525_v56  ;;  %3966 = vrot.lane.b32.xlu2 %v10771_v13, %s8509_s23  ;;  %v3394_v6 = vshrl.u32 %v10784_v63, 16  ;;  %v3392_v1 = vsel %vm8698_vm2, %v3387_v22, %v3391_v17 }
 0x367   : > { %4003 = vrot.lane.b32.xlu1 %v10745_v50, %s13131_s8  ;;  %v3810_v7 = vunpack.c.l.b16 %v3392_v1  ;;  %v3809_v22 = vunpack.c.l.b16 %v3382_v60  ;;  %v10822_v1 = vld [vmem:[#allocation3 + $0x8c] sm:$0x1]  ;;  %v3399_v60 = vrot.slane %v3397_v59, 5 }
 0x368   : > { %v2841_v41 = vor.u32 %v2839_v51, %v2838_v11  ;;  %v2843_v14 = vrot.slane %v2838_v11, 4  ;;  %v2600_v43 = vmax.f32 %v2525_v56, %v2568_v54  ;;  %4001 = vrot.lane.b32.xlu0 %v10702_v49, %s13131_s8  ;;  %v10808_v51 = vpop.permute.xlu1 %3841  ;;  %v3636_v54 = vrot.slane %v10758_v52, 5 }
 0x369   : > { %13349 = vst [vmem:[#allocation15_spill] sm:$0xff] %v10808_v51  ;;  %v3396_v52 = vrot.slane %v3394_v6, 4 }
 0x36a   : > { %v2842_v16 = vsel %vm8678_vm15, %v2834_v33, %v2841_v41  ;;  %v3045_v56 = vsel %vm8614_vm5, %v2843_v14, %v3044_v0  ;;  %v2632_v11 = vpack.c.bf16 %v2600_v43, %v2600_v43  ;;  %v10816_v0 = vld [vmem:[#allocation3 + $0x78] sm:$0xff]  ;;  %v3637_v14 = vsel %vm9165_vm13, %v3635_v3, %v3636_v54  ;;  %v10831_v3 = vpop.permute.xlu0 %3917 }
 0x36b   : > { %3043 = vst.msk [vmem:[#allocation3 + $0x94] sm:$0xf] %vm400_vm8, %v2842_v16  ;;  %v2526_v17 = vpop.f32.mrf.mxu0  ;;  %v10820_v43 = vpack.c.b16 %v3810_v7, %v3809_v22  ;;  %v3410_v16 = vor.u32 %v3409_v29, %v10801_v61  ;;  %v3890_v54 = vunpack.c.l.b16 %v3637_v14  ;;  %v3400_v29 = vor.u32 %v3399_v60, %v3396_v52 }
 0x36c   : > { %3046 = vst [vmem:[#allocation3 + $0x98] sm:$0x1] %v3045_v56  ;;  %v2845_v33 = vshrl.u32 %v2632_v11, 16  ;;  %v2527_v41 = vadd.f32 %v10453_v44, %v2526_v17  ;;  %v2848_v9 = vshll.u32 %v2632_v11, 16  ;;  %v13352_v56 = vrot.slane %v10742_v55, 5 }
 0x36d   : > { %13350 = vst [vmem:[#allocation37_spill] sm:$0xff] %v10820_v43  ;;  %v3413_v11 = vshll.u32 %v10822_v1, 16  ;;  %v3401_v14 = vrot.slane %v3400_v29, 4 }
 0x36e   : > { %v2847_v36 = vrot.slane %v2845_v33, 7  ;;  %v2569_v8 = vmul.f32 0.01, %v2527_v41  ;;  %3933 = vrot.lane.b32.xlu2 %v10812_v57, %s8507_s21  ;;  %v10829_v44 = vpop.permute.xlu2 %3867  ;;  %v3634_v6 = vsel %vm9165_vm13, %v8001_v30, %v13352_v56  ;;  %v3411_v33 = vrot.slane %v3410_v16, 4 }
 0x36f   : > { %3970 = vrot.lane.b32.xlu1 %v10816_v0, %s8509_s23  ;;  %13351 = vst [vmem:[#allocation22_spill] sm:$0xff] %v10829_v44  ;;  %v3889_v44 = vunpack.c.l.b16 %v3634_v6  ;;  %v3415_v51 = vrot.slane %v3413_v11, 5  ;;  %v10867_v11 = vld [vmem:[#allocation3 + $0xc4] sm:$0xf] }
 0x370   : > { %v2850_v59 = vor.u32 %v2848_v9, %v2847_v36  ;;  %v2601_v7 = vmax.f32 %v2527_v41, %v2569_v8  ;;  %3857 = vrot.lane.b32.xlu0 %v10820_v43, %s13133_s19  ;;  %v10842_v24 = vpop.permute.xlu1 %3865  ;;  %v2851_v52 = vrot.slane %v2847_v36, 4 }
 0x371   : > { %13353 = vst [vmem:[#allocation42_spill] sm:$0xff] %v10842_v24  ;;  %v10844_v30 = vpack.c.b16 %v3890_v54, %v3889_v44  ;;  %v3416_v8 = vsel %vm8698_vm2, %v3411_v33, %v3415_v51  ;;  %v3406_v44 = vsel %vm8698_vm2, %v3401_v14, %v10801_v61  ;;  %v10872_v33 = vld [vmem:[#allocation3 + $0xc8] sm:$0x1] }
 0x372   : > { %v3048_v22 = vsel %vm10093_vm7, %v2850_v59, %v3047_v35  ;;  %v2633_v17 = vpack.c.bf16 %v2601_v7, %v2601_v7  ;;  %v3112_v35 = vld [vmem:[#allocation3 + $0x94] sm:$0xf]  ;;  %v3812_v51 = vunpack.c.l.b16 %v3416_v8  ;;  %v10859_v6 = vpop.permute.xlu0 %3923  ;;  %v10865_v7 = vld [vmem:[#allocation3 + $0xc0] sm:$0xf]  ;;  %v3811_v61 = vunpack.c.l.b16 %v3406_v44 }
 0x373   : > { %3049 = vst [vmem:[#allocation3 + $0x9c] sm:$0xf] %v3048_v22  ;;  %v3427_v54 = vshll.u32 %v3112_v35, 16  ;;  %v3111_v22 = vld [vmem:[#allocation3 + $0x90] sm:$0xf]  ;;  %vm13134_vm7 = vcmask 326656  }
 0x374   : > { %v2853_v55 = vshrl.u32 %v2633_v17, 16  ;;  %v2856_v9 = vshll.u32 %v2633_v17, 16  ;;  %13355 = vst [vmem:[#allocation18_spill] sm:$0xff] %v10859_v6  ;;  %v3431_v17 = vshrl.u32 %v3112_v35, 16  ;;  %v10870_v29 = vpack.c.b16 %v3812_v51, %v3811_v61 }
 0x375   : > { %v3418_v14 = vshrl.u32 %v3111_v22, 16  ;;  %v3421_v8 = vshll.u32 %v3111_v22, 16  ;;  %v3705_v51 = vrot.slane %v10872_v33, 5 }
 0x376   : > { %v2855_v41 = vrot.slane %v2853_v55, 7  ;;  %3993 = vrot.lane.b32.xlu2 %v10446_v46, %s13131_s8  ;;  %13356 = vst [vmem:[#allocation23_spill] sm:$0xff] %v10870_v29  ;;  %v8007_v55 = vrot.slane %v10865_v7, 9 }
 0x377   : > { %3937 = vrot.lane.b32.xlu1 %v10844_v30, %s8507_s21  ;;  %v3423_v24 = vrot.slane %v3421_v8, 5  ;;  %v8003_v8 = vrot.slane %v3111_v22, 9 }
 0x378   : > { %v2858_v60 = vor.u32 %v2856_v9, %v2855_v41  ;;  %v2860_v16 = vrot.slane %v2855_v41, 4  ;;  %v10855_v56 = vpop.permute.xlu2 %3843  ;;  %4013 = vrot.lane.b32.xlu0 %v10331_v23, %s13131_s8  ;;  %v3702_v41 = vrot.slane %v10867_v11, 5  ;;  %v10876_v9 = vpop.permute.xlu1 %3919 }
 0x379   : > { %13354 = vst [vmem:[#allocation40_spill] sm:$0xff] %v10855_v56 }
 0x37a   : > { %v2859_v59 = vsel %vm8678_vm15, %v2851_v52, %v2858_v60  ;;  %v3052_v36 = vsel %vm8614_vm5, %v2860_v16, %v3051_v58  ;;  %13357 = vst [vmem:[#allocation51_spill] sm:$0xff] %v10876_v9  ;;  %v3429_v58 = vrot.slane %v3427_v54, 5  ;;  %v3703_v52 = vsel %vm9165_vm13, %v8007_v55, %v3702_v41 }
 0x37b   : > { %3050 = vst.msk [vmem:[#allocation3 + $0xa0] sm:$0xf] %vm400_vm8, %v2859_v59  ;;  %v3433_v60 = vrot.slane %v3431_v17, 4  ;;  %v3647_v16 = vrot.slane %v3112_v35, 5  ;;  %v3704_v44 = vrot.slane %v3702_v41, 4  ;;  %v3420_v54 = vrot.slane %v3418_v14, 4 }
 0x37c   : > { %3053 = vst [vmem:[#allocation3 + $0xa4] sm:$0x1] %v3052_v36  ;;  %v3113_v36 = vld [vmem:[#allocation3 + $0x98] sm:$0x1]  ;;  %v4019_v6 = vunpack.c.l.b16 %v3703_v52  ;;  %vm4508_vm8 = vcmask 1043456  }
 0x37d   : > { %v3706_v61 = vsel %vm9165_vm13, %v3704_v44, %v3705_v51  ;;  %v3434_v12 = vor.u32 %v3433_v60, %v3429_v58  ;;  %v3649_v55 = vrot.slane %v3647_v16, 4  ;;  %v3437_v35 = vshll.u32 %v3113_v36, 16  ;;  %v10903_v60 = vld [vmem:[#allocation3 + $0x9c] sm:$0xf] }
 0x37e   : > { %3855 = vrot.lane.b32.xlu2 %v10745_v50, %s13133_s19  ;;  %v4020_v41 = vunpack.c.l.b16 %v3706_v61  ;;  %v3650_v23 = vrot.slane %v3113_v36, 5  ;;  %v3424_v14 = vor.u32 %v3423_v24, %v3420_v54  ;;  %v3648_v24 = vsel %vm9165_vm13, %v8003_v8, %v3647_v16 }
 0x37f   : > { %4022 = vrot.lane.b32.xlu1 %v10369_v45, %s13132_s14  ;;  %v3435_v51 = vrot.slane %v3434_v12, 4  ;;  %v3442_v12 = vshrl.u32 %v10903_v60, 16  ;;  %v3445_v54 = vshll.u32 %v10903_v60, 16  ;;  %v3640_v16 = vrot.slane %v10776_v10, 5 }
 0x380   : > { %v10885_v59 = vpop.permute.xlu2 %3921  ;;  %4007 = vrot.lane.b32.xlu0 %v10870_v29, %s13131_s8  ;;  %v10895_v56 = vpop.permute.xlu1 %3925  ;;  %v3651_v52 = vsel %vm9165_vm13, %v3649_v55, %v3650_v23  ;;  %v10909_v61 = vpack.c.b16 %v4020_v41, %v4019_v6 }
 0x381   : > { %13358 = vst [vmem:[#allocation27_spill] sm:$0xff] %v10885_v59  ;;  %v3425_v59 = vrot.slane %v3424_v14, 4  ;;  %v3894_v6 = vunpack.c.l.b16 %v3651_v52  ;;  %v3444_v8 = vrot.slane %v3442_v12, 4  ;;  %v3642_v52 = vrot.slane %v3640_v16, 4 }
 0x382   : > { %v10889_v45 = vpop.permute.xlu0 %3845  ;;  %v10893_v17 = vld [vmem:[#allocation3 + $0xa0] sm:$0xf]  ;;  %13360 = vst [vmem:[#allocation17_spill] sm:$0xff] %v10895_v56 }
 0x383   : > { %13359 = vst [vmem:[#allocation12_spill] sm:$0xff] %v10889_v45  ;;  %v10901_v45 = vld [vmem:[#allocation3 + $0x90] sm:$0xff]  ;;  %v3451_v44 = vshll.u32 %v10893_v17, 16  ;;  %v3455_v36 = vshrl.u32 %v10893_v17, 16 }
 0x384   : > { %13361 = vst [vmem:[#allocation50_spill] sm:$0xff] %v10901_v45 }
 0x385   : > { %v3453_v23 = vrot.slane %v3451_v44, 5  ;;  %v3457_v55 = vrot.slane %v3455_v36, 4 }
 0x386   : > { %3999 = vrot.lane.b32.xlu2 %v10631_v28, %s13131_s8 }
 0x387   : > { %3859 = vrot.lane.b32.xlu1 %v10870_v29, %s13133_s19  ;;  %v3439_v29 = vrot.slane %v3437_v35, 5  ;;  %v3893_v35 = vunpack.c.l.b16 %v3648_v24  ;;  %v3458_v9 = vor.u32 %v3457_v55, %v3453_v23 }
 0x388   : > { %v10911_v56 = vpop.permute.xlu2 %3945  ;;  %3974 = vrot.lane.b32.xlu0 %v10901_v45, %s8509_s23  ;;  %v3116_v45 = vld [vmem:[#allocation3 + $0xa4] sm:$0x1] }
 0x389   : > { %13362 = vst [vmem:[#allocation61_spill] sm:$0xff] %v10911_v56  ;;  %v3440_v41 = vsel %vm8698_vm2, %v3435_v51, %v3439_v29  ;;  %v3430_v56 = vsel %vm8698_vm2, %v3425_v59, %v3429_v58  ;;  %v10930_v44 = vpack.c.b16 %v3894_v6, %v3893_v35  ;;  %v3461_v29 = vshll.u32 %v3116_v45, 16  ;;  %v10932_v51 = vpop.permute.xlu1 %3952  ;;  %v10943_v6 = vld [vmem:[#allocation3 + $0x84] sm:$0xff] }
 0x38a   : > { %v10917_v22 = vpop.permute.xlu0 %3947  ;;  %v3814_v14 = vunpack.c.l.b16 %v3440_v41  ;;  %v3813_v59 = vunpack.c.l.b16 %v3430_v56  ;;  %v3459_v24 = vrot.slane %v3458_v9, 4  ;;  %13365 = vst [vmem:[#allocation31_spill] sm:$0xff] %v10943_v6  ;;  %v8002_v41 = vrot.slane %v10784_v63, 9 }
 0x38b   : > { %13363 = vst [vmem:[#allocation64_spill] sm:$0xff] %v10917_v22  ;;  %v3447_v22 = vrot.slane %v3445_v54, 5  ;;  %v3643_v54 = vrot.slane %v10822_v1, 5  ;;  %v3463_v55 = vrot.slane %v3461_v29, 5  ;;  %v3654_v35 = vrot.slane %v10893_v17, 5 }
 0x38c   : > { %v10940_v12 = vpack.c.b16 %v3814_v14, %v3813_v59  ;;  %v3641_v1 = vsel %vm9165_vm13, %v8002_v41, %v3640_v16  ;;  %v10967_v16 = vld [vmem:[#allocation3 + $0x9c] sm:$0xff] }
 0x38d   : > { %v3448_v36 = vor.u32 %v3447_v22, %v3444_v8  ;;  %v3644_v56 = vsel %vm9165_vm13, %v3642_v52, %v3643_v54  ;;  %v3656_v29 = vrot.slane %v3654_v35, 4  ;;  %v3891_v59 = vunpack.c.l.b16 %v3641_v1 }
 0x38e   : > { %4005 = vrot.lane.b32.xlu2 %v10820_v43, %s13131_s8  ;;  %v3892_v17 = vunpack.c.l.b16 %v3644_v56  ;;  %v3677_v1 = vshll.u32 %v10865_v7, 16 }
 0x38f   : > { %4127 = vrot.lane.b32.xlu1 %v10537_v37, %s8513_s15  ;;  %v3449_v43 = vrot.slane %v3448_v36, 4  ;;  %v3657_v36 = vrot.slane %v3116_v45, 5 }
 0x390   : > { %v10934_v58 = vpop.permute.xlu2 %3954  ;;  %3941 = vrot.lane.b32.xlu0 %v10930_v44, %s8507_s21 }
 0x391   : > { %v3454_v63 = vsel %vm8698_vm2, %v3449_v43, %v3453_v23  ;;  %v8004_v23 = vrot.slane %v10903_v60, 9  ;;  %v3658_v54 = vsel %vm9165_vm13, %v3656_v29, %v3657_v36  ;;  %v3693_v36 = vshll.u32 %v10872_v33, 16 }
 0x392   : > { %v10938_v10 = vpop.permute.xlu0 %3956  ;;  %v3815_v52 = vunpack.c.l.b16 %v3454_v63  ;;  %v3896_v60 = vunpack.c.l.b16 %v3658_v54 }
 0x393   : > { %13364 = vst [vmem:[#allocation28_spill] sm:$0xff] %v10938_v10  ;;  %v3464_v10 = vsel %vm8698_vm2, %v3459_v24, %v3463_v55  ;;  %v10969_v24 = vpack.c.b16 %v3892_v17, %v3891_v59  ;;  %v3655_v45 = vsel %vm9165_vm13, %v8004_v23, %v3654_v35  ;;  %v3679_v59 = vrot.slane %v3677_v1, 5  ;;  %v11011_v1 = vld [vmem:[#allocation3 + $0x24] sm:$0xff] }
 0x394   : > { %v3816_v8 = vunpack.c.l.b16 %v3464_v10  ;;  %v3687_v10 = vshrl.u32 %v10867_v11, 16 }
 0x396   : > { %3972 = vrot.lane.b32.xlu2 %v10943_v6, %s8509_s23  ;;  %v10971_v43 = vpack.c.b16 %v3816_v8, %v3815_v52  ;;  %v3689_v17 = vrot.slane %v3687_v10, 4  ;;  %v3895_v8 = vunpack.c.l.b16 %v3655_v45  ;;  %v3695_v45 = vrot.slane %v3693_v36, 5  ;;  %v11037_v36 = vld [vmem:[#allocation3 + $0x30] sm:$0xff] }
 0x397   : > { %4009 = vrot.lane.b32.xlu1 %v10940_v12, %s13131_s8 }
 0x398   : > { %v10961_v22 = vpop.permute.xlu2 %3927  ;;  %4092 = vrot.lane.b32.xlu0 %v10306_v48, %s13130_s16  ;;  %v3683_v48 = vshll.u32 %v10867_v11, 16  ;;  %v3674_v11 = vshrl.u32 %v10865_v7, 16  ;;  %v10994_v29 = vpack.c.b16 %v3896_v60, %v3895_v8 }
 0x399   : > { %v10959_v9 = vpop.permute.xlu1 %3847 }
 0x39a   : > { %v10965_v14 = vpop.permute.xlu0 %3962  ;;  %v3685_v63 = vrot.slane %v3683_v48, 5  ;;  %v3676_v35 = vrot.slane %v3674_v11, 4 }
 0x39c   : > { %v3690_v52 = vor.u32 %v3689_v17, %v3685_v63  ;;  %v3680_v48 = vor.u32 %v3679_v59, %v3676_v35 }
 0x39e   : > { %3939 = vrot.lane.b32.xlu2 %v10969_v24, %s8507_s21  ;;  %v3691_v10 = vrot.slane %v3690_v52, 4  ;;  %v3681_v60 = vrot.slane %v3680_v48, 4 }
 0x39f   : > { %3976 = vrot.lane.b32.xlu1 %v10967_v16, %s8509_s23 }
 0x3a0   : > { %v10986_v41 = vpop.permute.xlu2 %3960  ;;  %3863 = vrot.lane.b32.xlu0 %v10971_v43, %s13133_s19  ;;  %v3696_v11 = vsel %vm8698_vm2, %v3691_v10, %v3695_v45 }
 0x3a1   : > { %v10984_v55 = vpop.permute.xlu1 %3958  ;;  %v3985_v17 = vunpack.c.l.b16 %v3696_v11 }
 0x3a2   : > { %v10990_v56 = vpop.permute.xlu0 %3929 }
 0x3a6   : > { %4057 = vrot.lane.b32.xlu2 %v10592_v47, %s8515_s17 }
 0x3a7   : > { %3943 = vrot.lane.b32.xlu1 %v10994_v29, %s8507_s21 }
 0x3a8   : > { %v11003_v7 = vpop.permute.xlu2 %3849  ;;  %4024 = vrot.lane.b32.xlu0 %v10537_v37, %s13132_s14  ;;  %v3686_v37 = vsel %vm8698_vm2, %v3681_v60, %v3685_v63 }
 0x3a9   : > { %v11001_v23 = vpop.permute.xlu1 %3982  ;;  %v3984_v8 = vunpack.c.l.b16 %v3686_v37 }
 0x3aa   : > { %13366 = vst [vmem:[#allocation21_spill] sm:$0xff] %v11001_v23  ;;  %v11007_v54 = vpop.permute.xlu0 %3980  ;;  %v4443_v23 = vld [vmem:[%s13065_s3 + $0x20] sm:$0xf] }
 0x3ab   : > { %13367 = vst [vmem:[#allocation53_spill] sm:$0xff] %v11007_v54  ;;  %v11027_v59 = vpack.c.b16 %v3985_v17, %v3984_v8 }
 0x3ae   : > { %3861 = vrot.lane.b32.xlu2 %v10940_v12, %s13133_s19 }
 0x3af   : > { %4059 = vrot.lane.b32.xlu1 %v11011_v1, %s8515_s17 }
 0x3b0   : > { %v11021_v33 = vpop.permute.xlu2 %3978  ;;  %4129 = vrot.lane.b32.xlu0 %v10362_v31, %s8513_s15 }
 0x3b1   : > { %v11019_v47 = vpop.permute.xlu1 %3964  ;;  %13368 = vst [vmem:[#allocation56_spill] sm:$0xff] %v11021_v33 }
 0x3b2   : > { %v11025_v35 = vpop.permute.xlu0 %3851 }
 0x3b6   : > { %4015 = vrot.lane.b32.xlu2 %v10469_v39, %s13131_s8 }
 0x3b7   : > { %4017 = vrot.lane.b32.xlu1 %v11027_v59, %s13131_s8 }
 0x3b8   : > { %v11035_v52 = vpop.permute.xlu2 %3987  ;;  %4061 = vrot.lane.b32.xlu0 %v11037_v36, %s8515_s17 }
 0x3b9   : > { %v11033_v63 = vpop.permute.xlu1 %3931 }
 0x3ba   : > { %v11041_v48 = vpop.permute.xlu0 %3989 }
 0x3be   : > { %4011 = vrot.lane.b32.xlu2 %v10971_v43, %s13131_s8 }
 0x3bf   : > { %4096 = vrot.lane.b32.xlu1 %v10446_v46, %s13130_s16 }
 0x3c0   : > { %v11049_v45 = vpop.permute.xlu2 %3966  ;;  %4028 = vrot.lane.b32.xlu0 %v10425_v32, %s13132_s14 }
 0x3c1   : > { %v11047_v10 = vpop.permute.xlu1 %3991 }
 0x3c2   : > { %v11053_v60 = vpop.permute.xlu0 %3995 }
 0x3c6   : > { %4094 = vrot.lane.b32.xlu2 %v10504_v34, %s13130_s16 }
 0x3c7   : > { %4030 = vrot.lane.b32.xlu1 %v10586_v42, %s13132_s14 }
 0x3c8   : > { %v11061_v46 = vpop.permute.xlu2 %3933  ;;  %4098 = vrot.lane.b32.xlu0 %v10541_v38, %s13130_s16 }
 0x3c9   : > { %v11059_v11 = vpop.permute.xlu1 %3853 }
 0x3ca   : > { %v11065_v37 = vpop.permute.xlu0 %3968 }
 0x3ce   : > { %4026 = vrot.lane.b32.xlu2 %v10362_v31, %s13132_s14 }
 0x3cf   : > { %4133 = vrot.lane.b32.xlu1 %v10586_v42, %s8513_s15 }
 0x3d0   : > { %v11073_v8 = vpop.permute.xlu2 %3993  ;;  %4034 = vrot.lane.b32.xlu0 %v10652_v53, %s13132_s14 }
 0x3d1   : > { %v11071_v17 = vpop.permute.xlu1 %3997 }
 0x3d2   : > { %v11077_v34 = vpop.permute.xlu0 %3935 }
 0x3d3   : > { %13369 = vst [vmem:[#allocation7_spill] sm:$0xff] %v11077_v34 }
 0x3d6   : > { %4131 = vrot.lane.b32.xlu2 %v10425_v32, %s8513_s15  ;;  %v4465_v32 = vunpack.c.l.b16 %v4443_v23 }
 0x3d7   : > { %4036 = vrot.lane.b32.xlu1 %v10812_v57, %s13132_s14 }
 0x3d8   : > { %v11085_v42 = vpop.permute.xlu2 %3855  ;;  %4100 = vrot.lane.b32.xlu0 %v10678_v62, %s13130_s16  ;;  %v4470_v62 = vpack.c.b16 %v4465_v32, %v4465_v32  ;;  %v8292_v32 = vld [vmem:[%s13065_s3 + $0x10] sm:$0xff] }
 0x3d9   : > { %v11083_v38 = vpop.permute.xlu1 %4003  ;;  %13370 = vst [vmem:[#allocation43_spill] sm:$0xff] %v11085_v42 }
 0x3da   : > { %v11089_v31 = vpop.permute.xlu0 %4001  ;;  %v4510_v42 = vsel %vm4508_vm8, %v4470_v62, 0  ;;  %vm4475_vm8 = vcmask 588800  }
 0x3db   : > { %4515 = vmatpush.bf16.msra.mxu1 %v4510_v42  ;;  %8322 = vmatpush.bf16.msrb.mxu3 %v4510_v42 }
 0x3de   : > { %4063 = vrot.lane.b32.xlu2 %v10654_v4, %s8515_s17  ;;  %v8293_v4 = vld [vmem:[%s13065_s3 + $0x18] sm:$0xff] }
 0x3df   : > { %4135 = vrot.lane.b32.xlu1 %v10570_v18, %s8513_s15  ;;  %4516 = vmatpush.bf16.msra.mxu1 %v8293_v4 }
 0x3e0   : > { %v11100_v33 = vpop.permute.xlu2 %3999  ;;  %4040 = vrot.lane.b32.xlu0 %v10844_v30, %s13132_s14  ;;  %8323 = vmatpush.bf16.msrb.mxu3 %v8293_v4  ;;  %v8290_v4 = vld [vmem:[%s13065_s3] sm:$0xff] }
 0x3e1   : > { %v11098_v54 = vpop.permute.xlu1 %3970 }
 0x3e2   : > { %13371 = vst [vmem:[#allocation30_spill] sm:$0xff] %v11098_v54  ;;  %v11104_v34 = vpop.permute.xlu0 %3857 }
 0x3e3   : > { %4517 = vmatpush.bf16.msra.mxu1 %v8292_v32 }
 0x3e4   : > { %8324 = vmatpush.bf16.msrb.mxu3 %v8292_v32 }
 0x3e6   : > { %4032 = vrot.lane.b32.xlu2 %v10570_v18, %s13132_s14  ;;  %v8291_v18 = vld [vmem:[%s13065_s3 + $0x8] sm:$0xff] }
 0x3e7   : > { %4067 = vrot.lane.b32.xlu1 %v10622_v2, %s8515_s17  ;;  %v11129_v2 = vld [vmem:[#allocation3 + $0x48] sm:$0xff]  ;;  %4518 = vmatpush.bf16.msra.mxu1 %v8291_v18 }
 0x3e8   : > { %v11115_v54 = vpop.permute.xlu2 %4005  ;;  %4137 = vrot.lane.b32.xlu0 %v10652_v53, %s8513_s15  ;;  %8325 = vmatpush.bf16.msrb.mxu3 %v8291_v18  ;;  %v8272_v18 = vld [vmem:[#allocation3] sm:$0xff] }
 0x3e9   : > { %v11113_v23 = vpop.permute.xlu1 %3937 }
 0x3ea   : > { %13372 = vst [vmem:[#allocation20_spill] sm:$0xff] %v11113_v23  ;;  %v11122_v42 = vpop.permute.xlu0 %4013 }
 0x3eb   : > { %13373 = vst [vmem:[#allocation46_spill] sm:$0xff] %v11122_v42  ;;  %4519 = vmatpush.bf16.msra.mxu1 %v8290_v4 }
 0x3ec   : > { %8326 = vmatpush.bf16.msrb.mxu3 %v8290_v4 }
 0x3ee   : > { %4065 = vrot.lane.b32.xlu2 %v11129_v2, %s8515_s17 }
 0x3ef   : > { %4042 = vrot.lane.b32.xlu1 %v10969_v24, %s13132_s14 }
 0x3f0   : > { %v11133_v62 = vpop.permute.xlu2 %3972  ;;  %4069 = vrot.lane.b32.xlu0 %v10771_v13, %s8515_s17 }
 0x3f1   : > { %v4023_v53 = vpop.permute.xlu1 %4022  ;;  %13374 = vst [vmem:[#allocation63_spill] sm:$0xff] %v11133_v62 }
 0x3f2   : > { %v11140_v32 = vpop.permute.xlu0 %4007 }
 0x3f3   : > { %13375 = vst [vmem:[#allocation44_spill] sm:$0xff] %v11140_v32 }
 0x3f6   : > { %4038 = vrot.lane.b32.xlu2 %v10747_v21, %s13132_s14 }
 0x3f7   : > { %4104 = vrot.lane.b32.xlu1 %v10702_v49, %s13130_s16 }
 0x3f8   : > { %v11148_v62 = vpop.permute.xlu2 %3939  ;;  %4046 = vrot.lane.b32.xlu0 %v10994_v29, %s13132_s14 }
 0x3f9   : > { %v11146_v42 = vpop.permute.xlu1 %3859  ;;  %13377 = vst [vmem:[#allocation14_spill] sm:$0xff] %v11148_v62  ;;  %v4161_v62 = vsel %vm13144_vm14, %v8272_v18, %v10778_v20 }
 0x3fa   : > { %13376 = vst [vmem:[#allocation29_spill] sm:$0xff] %v11146_v42  ;;  %v11152_v13 = vpop.permute.xlu0 %3974 }
 0x3fb   : > { %13378 = vst [vmem:[#allocation55_spill] sm:$0xff] %v11152_v13  ;;  %v4208_v13 = vsel %vm13136_vm0, %v4161_v62, %v10831_v3 }
 0x3fe   : > { %4102 = vrot.lane.b32.xlu2 %v10631_v28, %s13130_s16  ;;  %v4240_v28 = vsel %vm13137_vm1, %v4208_v13, %v10932_v51 }
 0x3ff   : > { %4048 = vrot.lane.b32.xlu1 %v10560_v26, %s13132_s14 }
 0x400   : > { %v4058_v4 = vpop.permute.xlu2 %4057  ;;  %4071 = vrot.lane.b32.xlu0 %v10710_v15, %s8515_s17  ;;  %v4272_v15 = vsel %vm13135_vm3, %v4240_v28, %v11035_v52  ;;  %v462_v52 = vld [vmem:[#allocation3 + $0xcc] sm:$0x1] }
 0x401   : > { %v4128_v49 = vpop.permute.xlu1 %4127 }
 0x402   : > { %v11160_v42 = vpop.permute.xlu0 %3941 }
 0x406   : > { %4044 = vrot.lane.b32.xlu2 %v10930_v44, %s13132_s14 }
 0x407   : > { %4106 = vrot.lane.b32.xlu1 %v10745_v50, %s13130_s16  ;;  %v4305_v50 = vsel %vm13134_vm7, %v4272_v15, %v4023_v53  ;;  %v463_v53 = vsel %vm8614_vm5, 0, %v462_v52  ;;  %v13382_v15 = vld [vmem:[#allocation51_spill] sm:$0xff]  ;;  %vm5113_vm5 = vcmask 93216  }
 0x408   : > { %v11176_v20 = vpop.permute.xlu2 %3861  ;;  %4052 = vrot.lane.b32.xlu0 %v10909_v61, %s13132_s14  ;;  %v4338_v3 = vsel %vm4336_vm9, %v4305_v50, %v4058_v4  ;;  %464 = vst [vmem:[#allocation3 + $0xcc] sm:$0x1] %v463_v53 }
 0x409   : > { %v11174_v32 = vpop.permute.xlu1 %4009 }
 0x40a   : > { %13379 = vst [vmem:[#allocation62_spill] sm:$0xff] %v11174_v32  ;;  %v4093_v62 = vpop.permute.xlu0 %4092 }
 0x40b   : > { %v4371_v51 = vsel %vm13129_vm12, %v4338_v3, %v4093_v62 }
 0x40c   : > { %v4404_v13 = vsel %vm13128_vm10, %v4371_v51, %v4128_v49  ;;  %v13383_v51 = vld [vmem:[#allocation26_spill] sm:$0xff] }
 0x40d   : > { %8097 = vmatmul.msk.bf16.vlgmr.msra.gmra.mxu1 %vm4475_vm8, %v4404_v13 }
 0x40e   : > { %4139 = vrot.lane.b32.xlu2 %v10812_v57, %s8513_s15 }
 0x40f   : > { %4073 = vrot.lane.b32.xlu1 %v10816_v0, %s8515_s17  ;;  %v8418_v0 = vld [vmem:[#allocation3 + $0xc] sm:$0xff] }
 0x410   : > { %v11193_v4 = vpop.permute.xlu2 %4015  ;;  %4143 = vrot.lane.b32.xlu0 %v10844_v30, %s8513_s15  ;;  %v4164_v30 = vsel %vm13144_vm14, %v8418_v0, %v10793_v25  ;;  %v517_v0 = vld [vmem:[#allocation3 + $0xd4] sm:$0x1] }
 0x411   : > { %v11191_v18 = vpop.permute.xlu1 %3976  ;;  %13380 = vst [vmem:[#allocation67_spill] sm:$0xff] %v11193_v4  ;;  %v4210_v50 = vsel %vm13136_vm0, %v4164_v30, %v13382_v15  ;;  %v518_v15 = vsel %vm8620_vm6, 0, %v517_v0  ;;  %v13389_v0 = vld [vmem:[#allocation27_spill] sm:$0xff]  ;;  %vm11559_vm6 = vmand %vm5113_vm5, %vm344_vm4  ;;  %vm13424_vm4 = vsmask.f32 256 }
 0x412   : > { %v11197_v49 = vpop.permute.xlu0 %3863  ;;  %v4242_v3 = vsel %vm13137_vm1, %v4210_v50, %v10934_v58  ;;  %519 = vst [vmem:[#allocation3 + $0xd4] sm:$0x1] %v518_v15 }
 0x413   : > { %v4274_v62 = vsel %vm13135_vm3, %v4242_v3, %v11041_v48  ;;  %v8420_v3 = vld [vmem:[#allocation3 + $0x18] sm:$0xff] }
 0x416   : > { %4050 = vrot.lane.b32.xlu2 %v10478_v19, %s13132_s14 }
 0x417   : > { %4075 = vrot.lane.b32.xlu1 %v10943_v6, %s8515_s17 }
 0x418   : > { %v11205_v5 = vpop.permute.xlu2 %4011  ;;  %4079 = vrot.lane.b32.xlu0 %v10967_v16, %s8515_s17 }
 0x419   : > { %v11203_v57 = vpop.permute.xlu1 %3943 }
 0x41a   : > { %13381 = vst [vmem:[#allocation32_spill] sm:$0xff] %v11203_v57  ;;  %v4025_v28 = vpop.permute.xlu0 %4024 }
 0x41b   : > { %v4307_v13 = vsel %vm13134_vm7, %v4274_v62, %v4025_v28  ;;  %v11230_v28 = vld [vmem:[#allocation3 + $0xb4] sm:$0xff]  ;;  %v13387_v62 = vld [vmem:[#allocation15_spill] sm:$0xff] }
 0x41c   : > { %13385 = vst [vmem:[#allocation35_spill] sm:$0xff] %v11230_v28 }
 0x41e   : > { %4141 = vrot.lane.b32.xlu2 %v10747_v21, %s8513_s15  ;;  %v8289_v21 = vld [vmem:[#allocation3 + $0xcc] sm:$0xff] }
 0x41f   : > { %4081 = vrot.lane.b32.xlu1 %v13383_v51, %s8515_s17  ;;  %v4167_v51 = vsel %vm13144_vm14, %v8420_v3, %v13387_v62 }
 0x420   : > { %v4095_v25 = vpop.permute.xlu2 %4094  ;;  %4145 = vrot.lane.b32.xlu0 %v10969_v24, %s8513_s15  ;;  %v13386_v24 = vld [vmem:[#allocation37_spill] sm:$0xff] }
 0x421   : > { %v4060_v52 = vpop.permute.xlu1 %4059 }
 0x422   : > { %v4340_v53 = vsel %vm4336_vm9, %v4307_v13, %v4060_v52  ;;  %v4130_v58 = vpop.permute.xlu0 %4129 }
 0x423   : > { %v4373_v30 = vsel %vm13129_vm12, %v4340_v53, %v4095_v25  ;;  %v3126_v25 = vld [vmem:[#allocation3 + $0xcc] sm:$0xf]  ;;  %v3127_v53 = vld [vmem:[#allocation3 + $0xd0] sm:$0xf] }
 0x424   : > { %v4406_v50 = vsel %vm13128_vm10, %v4373_v30, %v4130_v58  ;;  %v4212_v58 = vsel %vm13136_vm0, %v4167_v51, %v13389_v0  ;;  %v13390_v30 = vld [vmem:[#allocation28_spill] sm:$0xff]  ;;  %v3721_v4 = vshrl.u32 %v3127_v53, 16 }
 0x425   : > { %8098 = vmatmul.msk.bf16.gmra.mxu1 %vm4475_vm8, %v4406_v50  ;;  %v4244_v48 = vsel %vm13137_vm1, %v4212_v58, %v13390_v30  ;;  %v3708_v50 = vshrl.u32 %v3126_v25, 16 }
 0x426   : > { %4108 = vrot.lane.b32.xlu2 %v13386_v24, %s13130_s16  ;;  %v3711_v24 = vshll.u32 %v3126_v25, 16  ;;  %v4276_v3 = vsel %vm13135_vm3, %v4244_v48, %v11047_v10  ;;  %v3128_v10 = vld [vmem:[#allocation3 + $0xd4] sm:$0x1] }
 0x427   : > { %4083 = vrot.lane.b32.xlu1 %v11230_v28, %s8515_s17  ;;  %v3717_v28 = vshll.u32 %v3127_v53, 16  ;;  %v3710_v0 = vrot.slane %v3708_v50, 4  ;;  %v3727_v57 = vshll.u32 %v3128_v10, 16  ;;  %v13392_v50 = vld [vmem:[#allocation40_spill] sm:$0xff] }
 0x428   : > { %v4027_v52 = vpop.permute.xlu2 %4026  ;;  %4087 = vrot.lane.b32.xlu0 %v8289_v21, %s8515_s17  ;;  %v13391_v21 = vld [vmem:[#allocation50_spill] sm:$0xff]  ;;  %v3713_v58 = vrot.slane %v3711_v24, 5 }
 0x429   : > { %v11238_v13 = vpop.permute.xlu1 %4017  ;;  %v4309_v62 = vsel %vm13134_vm7, %v4276_v3, %v4027_v52  ;;  %v3719_v30 = vrot.slane %v3717_v28, 5  ;;  %v3729_v24 = vrot.slane %v3727_v57, 5 }
 0x42a   : > { %13388 = vst [vmem:[#allocation45_spill] sm:$0xff] %v11238_v13  ;;  %v4062_v15 = vpop.permute.xlu0 %4061  ;;  %v3723_v13 = vrot.slane %v3721_v4, 4  ;;  %v3714_v3 = vor.u32 %v3713_v58, %v3710_v0  ;;  %v4170_v4 = vsel %vm13144_vm14, %v11011_v1, %v13392_v50  ;;  %v3739_v1 = vrot.slane %v3128_v10, 5 }
 0x42b   : > { %v4342_v51 = vsel %vm4336_vm9, %v4309_v62, %v4062_v15  ;;  %v3736_v15 = vrot.slane %v3127_v53, 5 }
 0x42c   : > { %v3724_v23 = vor.u32 %v3723_v13, %v3719_v30  ;;  %v13394_v13 = vld [vmem:[#allocation18_spill] sm:$0xff] }
 0x42d   : > { %v4214_v53 = vsel %vm13136_vm0, %v4170_v4, %v13394_v13  ;;  %v3738_v0 = vrot.slane %v3736_v15, 4 }
 0x42e   : > { %4077 = vrot.lane.b32.xlu2 %v13391_v21, %s8515_s17  ;;  %v3725_v28 = vrot.slane %v3724_v23, 4 }
 0x42f   : > { %4112 = vrot.lane.b32.xlu1 %v10940_v12, %s13130_s16  ;;  %v3740_v10 = vsel %vm9165_vm13, %v3738_v0, %v3739_v1  ;;  %v13397_v0 = vld [vmem:[#allocation17_spill] sm:$0xff] }
 0x430   : > { %v4132_v6 = vpop.permute.xlu2 %4131  ;;  %4147 = vrot.lane.b32.xlu0 %v10930_v44, %s8513_s15  ;;  %v13393_v44 = vld [vmem:[#allocation23_spill] sm:$0xff]  ;;  %v3730_v57 = vsel %vm8698_vm2, %v3725_v28, %v3729_v24  ;;  %v4125_v4 = vunpack.c.l.b16 %v3740_v10  ;;  %v13395_v24 = vld [vmem:[#allocation41_spill] sm:$0xff] }
 0x431   : > { %v4097_v32 = vpop.permute.xlu1 %4096 }
 0x432   : > { %v4375_v52 = vsel %vm13129_vm12, %v4342_v51, %v4097_v32  ;;  %v4029_v48 = vpop.permute.xlu0 %4028  ;;  %v3715_v32 = vrot.slane %v3714_v3, 4  ;;  %v8008_v51 = vrot.slane %v3126_v25, 9 }
 0x433   : > { %v4408_v12 = vsel %vm13128_vm10, %v4375_v52, %v4132_v6 }
 0x434   : > { %v3720_v23 = vsel %vm8698_vm2, %v3715_v32, %v3719_v30  ;;  %v3737_v25 = vsel %vm9165_vm13, %v8008_v51, %v3736_v15 }
 0x435   : > { %8099 = vmatmul.msk.bf16.gmra.mxu1 %vm4475_vm8, %v4408_v12  ;;  %v4090_v12 = vunpack.c.l.b16 %v3730_v57  ;;  %v4124_v15 = vunpack.c.l.b16 %v3737_v25 }
 0x436   : > { %4110 = vrot.lane.b32.xlu2 %v13393_v44, %s13130_s16 }
 0x437   : > { %4151 = vrot.lane.b32.xlu1 %v10560_v26, %s8513_s15  ;;  %v4246_v26 = vsel %vm13137_vm1, %v4214_v53, %v10984_v55  ;;  %v8421_v55 = vld [vmem:[#allocation3 + $0xc0] sm:$0xff]  ;;  %v4126_v28 = vpack.c.b16 %v4125_v4, %v4124_v15 }
 0x438   : > { %v4064_v62 = vpop.permute.xlu2 %4063  ;;  %4118 = vrot.lane.b32.xlu0 %v10469_v39, %s13130_s16  ;;  %v4278_v52 = vsel %vm13135_vm3, %v4246_v26, %v11073_v8  ;;  %v4089_v8 = vunpack.c.l.b16 %v3720_v23 }
 0x439   : > { %v4031_v6 = vpop.permute.xlu1 %4030  ;;  %v4311_v39 = vsel %vm13134_vm7, %v4278_v52, %v4029_v48 }
 0x43a   : > { %v4099_v58 = vpop.permute.xlu0 %4098  ;;  %v4344_v30 = vsel %vm4336_vm9, %v4311_v39, %v4064_v62  ;;  %v4091_v44 = vpack.c.b16 %v4090_v12, %v4089_v8  ;;  %v13396_v62 = vld [vmem:[#allocation12_spill] sm:$0xff] }
 0x43b   : > { %v4377_v48 = vsel %vm13129_vm12, %v4344_v30, %v4099_v58  ;;  %v4173_v13 = vsel %vm13144_vm14, %v11037_v36, %v13396_v62 }
 0x43c   : > { %v4216_v1 = vsel %vm13136_vm0, %v4173_v13, %v13397_v0 }
 0x43d   : > { %v4248_v26 = vsel %vm13137_vm1, %v4216_v1, %v10986_v41  ;;  %v8422_v41 = vld [vmem:[#allocation3 + $0x3c] sm:$0xff] }
 0x43e   : > { %4085 = vrot.lane.b32.xlu2 %v8421_v55, %s8515_s17  ;;  %v4280_v58 = vsel %vm13135_vm3, %v4248_v26, %v11053_v60 }
 0x43f   : > { %4149 = vrot.lane.b32.xlu1 %v10994_v29, %s8513_s15  ;;  %v4313_v52 = vsel %vm13134_vm7, %v4280_v58, %v4031_v6 }
 0x440   : > { %v4033_v50 = vpop.permute.xlu2 %4032  ;;  %4120 = vrot.lane.b32.xlu0 %v11027_v59, %s13130_s16 }
 0x441   : > { %v4134_v3 = vpop.permute.xlu1 %4133 }
 0x442   : > { %v4035_v32 = vpop.permute.xlu0 %4034  ;;  %v4410_v29 = vsel %vm13128_vm10, %v4377_v48, %v4134_v3 }
 0x445   : > { %8100 = vmatmul.msk.bf16.gmra.mxu1 %vm4475_vm8, %v4410_v29 }
 0x446   : > { %4116 = vrot.lane.b32.xlu2 %v13395_v24, %s13130_s16 }
 0x447   : > { %4122 = vrot.lane.b32.xlu1 %v4091_v44, %s13130_s16 }
 0x448   : > { %v4066_v59 = vpop.permute.xlu2 %4065  ;;  %4157 = vrot.lane.b32.xlu0 %v4126_v28, %s8513_s15 }
 0x449   : > { %v4037_v53 = vpop.permute.xlu1 %4036  ;;  %v4346_v36 = vsel %vm4336_vm9, %v4313_v52, %v4066_v59 }
 0x44a   : > { %v4101_v51 = vpop.permute.xlu0 %4100 }
 0x44b   : > { %v4379_v39 = vsel %vm13129_vm12, %v4346_v36, %v4101_v51 }
 0x44e   : > { %4114 = vrot.lane.b32.xlu2 %v10971_v43, %s13130_s16  ;;  %v4176_v43 = vsel %vm13144_vm14, %v8422_v41, %v10959_v9 }
 0x44f   : > { %v4218_v8 = vsel %vm13136_vm0, %v4176_v43, %v10961_v22 }
 0x450   : > { %v11308_v57 = vpop.permute.xlu2 %4038  ;;  %v4250_v12 = vsel %vm13137_vm1, %v4218_v8, %v10965_v14  ;;  %v4179_v14 = vsel %vm13144_vm14, %v11129_v2, %v11003_v7 }
 0x451   : > { %v4136_v23 = vpop.permute.xlu1 %4135  ;;  %v4282_v30 = vsel %vm13135_vm3, %v4250_v12, %v11071_v17 }
 0x452   : > { %v11311_v25 = vpop.permute.xlu0 %4040  ;;  %v4412_v10 = vsel %vm13128_vm10, %v4379_v39, %v4136_v23  ;;  %v4315_v3 = vsel %vm13134_vm7, %v4282_v30, %v4033_v50 }
 0x455   : > { %8101 = vmatmul.msk.bf16.gmra.mxu1 %vm4475_vm8, %v4412_v10 }
 0x456   : > { %4153 = vrot.lane.b32.xlu2 %v10478_v19, %s8513_s15 }
 0x458   : > { %v4103_v6 = vpop.permute.xlu2 %4102 }
 0x459   : > { %v4068_v60 = vpop.permute.xlu1 %4067 }
 0x45a   : > { %v4138_v55 = vpop.permute.xlu0 %4137  ;;  %v4348_v19 = vsel %vm4336_vm9, %v4315_v3, %v4068_v60 }
 0x45b   : > { %v4381_v15 = vsel %vm13129_vm12, %v4348_v19, %v4103_v6 }
 0x45c   : > { %v4414_v4 = vsel %vm13128_vm10, %v4381_v15, %v4138_v55 }
 0x45e   : > { %4155 = vrot.lane.b32.xlu2 %v10909_v61, %s8513_s15  ;;  %v4220_v61 = vsel %vm13136_vm0, %v4179_v14, %v10990_v56  ;;  %s8519_s15 = smov 84  }
 0x45f   : > { %v4252_v44 = vsel %vm13137_vm1, %v4220_v61, %v11019_v47  ;;  %v8423_v47 = vld [vmem:[#allocation3 + $0x54] sm:$0xff] }
 0x460   : > { %v11331_v48 = vpop.permute.xlu2 %4044  ;;  %v4284_v28 = vsel %vm13135_vm3, %v4252_v44, %v11100_v33  ;;  %v4182_v51 = vsel %vm13144_vm14, %v8423_v47, %v11025_v35  ;;  %v8425_v47 = vld [vmem:[#allocation3 + $0x6c] sm:$0xff] }
 0x461   : > { %v11329_v9 = vpop.permute.xlu1 %4042  ;;  %v4317_v24 = vsel %vm13134_vm7, %v4284_v28, %v4035_v32  ;;  %v4222_v32 = vsel %vm13136_vm0, %v4182_v51, %v11033_v63  ;;  %v11374_v63 = vld [vmem:[%s13066_s4] ss:$0 sm:$0xff] }
 0x462   : > { %v4070_v22 = vpop.permute.xlu0 %4069  ;;  %v4254_v1 = vsel %vm13137_vm1, %v4222_v32, %v11049_v45  ;;  %v8424_v45 = vld [vmem:[#allocation3 + $0x60] sm:$0xff]  ;;  %v13398_v51 = vld [vmem:[#allocation43_spill] sm:$0xff] }
 0x463   : > { %v4350_v62 = vsel %vm4336_vm9, %v4317_v24, %v4070_v22  ;;  %v4286_v58 = vsel %vm13135_vm3, %v4254_v1, %v11089_v31  ;;  %v4185_v31 = vsel %vm13144_vm14, %v8424_v45, %v11059_v11  ;;  %v13399_v32 = vld [vmem:[#allocation7_spill] sm:$0xff] }
 0x464   : > { %v4319_v52 = vsel %vm13134_vm7, %v4286_v58, %v4037_v53  ;;  %v4224_v55 = vsel %vm13136_vm0, %v4185_v31, %v11061_v46  ;;  %v4197_v31 = vsel %vm13144_vm14, %v13391_v21, %v11176_v20 }
 0x465   : > { %8102 = vmatmul.msk.bf16.gmra.mxu1 %vm4475_vm8, %v4414_v4  ;;  %v4256_v12 = vsel %vm13137_vm1, %v4224_v55, %v11065_v37  ;;  %v4232_v20 = vsel %vm13136_vm0, %v4197_v31, %v11160_v42 }
 0x466   : > { %v4288_v30 = vsel %vm13135_vm3, %v4256_v12, %v11083_v38 }
 0x467   : > { %v4321_v11 = vsel %vm13134_vm7, %v4288_v30, %v11308_v57 }
 0x468   : > { %v4140_v50 = vpop.permute.xlu2 %4139 }
 0x469   : > { %v4105_v17 = vpop.permute.xlu1 %4104 }
 0x46a   : > { %v11343_v29 = vpop.permute.xlu0 %4046  ;;  %v4383_v2 = vsel %vm13129_vm12, %v4350_v62, %v4105_v17 }
 0x46b   : > { %v4416_v56 = vsel %vm13128_vm10, %v4383_v2, %v4140_v50 }
 0x470   : > { %v11351_v7 = vpop.permute.xlu2 %4050 }
 0x471   : > { %v11349_v13 = vpop.permute.xlu1 %4048 }
 0x472   : > { %v4072_v59 = vpop.permute.xlu0 %4071 }
 0x473   : > { %v4352_v36 = vsel %vm4336_vm9, %v4319_v52, %v4072_v59 }
 0x475   : > { %8103 = vmatmul.msk.bf16.gmra.mxu1 %vm4475_vm8, %v4416_v56 }
 0x478   : > { %v4142_v0 = vpop.permute.xlu2 %4141 }
 0x479   : > { %v4107_v33 = vpop.permute.xlu1 %4106 }
 0x47a   : > { %v11362_v26 = vpop.permute.xlu0 %4052  ;;  %v4385_v35 = vsel %vm13129_vm12, %v4352_v36, %v4107_v33  ;;  %v4188_v33 = vsel %vm13144_vm14, %v8425_v47, %v13398_v51  ;;  %v13400_v36 = vld [vmem:[#allocation30_spill] sm:$0xff]  ;;  %v13404_v51 = vld [vmem:[#allocation63_spill] sm:$0xff] }
 0x47b   : > { %v4418_v41 = vsel %vm13128_vm10, %v4385_v35, %v4142_v0  ;;  %v4226_v1 = vsel %vm13136_vm0, %v4188_v33, %v13399_v32  ;;  %v13405_v32 = vld [vmem:[#allocation44_spill] sm:$0xff] }
 0x480   : > { %v4109_v39 = vpop.permute.xlu2 %4108 }
 0x481   : > { %v4074_v23 = vpop.permute.xlu1 %4073 }
 0x482   : > { %v4144_v10 = vpop.permute.xlu0 %4143  ;;  %v4354_v19 = vsel %vm4336_vm9, %v4321_v11, %v4074_v23  ;;  %v4258_v23 = vsel %vm13137_vm1, %v4226_v1, %v13400_v36 }
 0x483   : > { %v4387_v46 = vsel %vm13129_vm12, %v4354_v19, %v4109_v39  ;;  %v4290_v35 = vsel %vm13135_vm3, %v4258_v23, %v11115_v54 }
 0x484   : > { %v4420_v37 = vsel %vm13128_vm10, %v4387_v46, %v4144_v10 }
 0x485   : > { %8104 = vmatmul.msk.bf16.gmra.mxu1 %vm4475_vm8, %v4418_v41 }
 0x488   : > { %v11378_v43 = vpop.permute.xlu2 %4077 }
 0x489   : > { %v4076_v53 = vpop.permute.xlu1 %4075 }
 0x48a   : > { %v4521_v60 = vpop.f32.mrf.mxu1  ;;  %v11380_v6 = vpop.permute.xlu0 %4079 }
 0x48b   : > { %v4522_v8 = vadd.f32 %v11374_v63, %v4521_v60  ;;  %v4323_v60 = vsel %vm13134_vm7, %v4290_v35, %v11311_v25  ;;  %v4264_v25 = vsel %vm13137_vm1, %v4232_v20, %v11191_v18  ;;  %v4200_v18 = vsel %vm13144_vm14, %v10967_v16, %v11197_v49  ;;  %v13403_v16 = vld [vmem:[#allocation20_spill] sm:$0xff] }
 0x48d   : > { %v4601_v3 = vmul.f32 0.01, %v4522_v8 }
 0x48f   : > { %v4633_v15 = vmax.f32 %v4522_v8, %v4601_v3  ;;  %v4356_v8 = vsel %vm4336_vm9, %v4323_v60, %v4076_v53 }
 0x490   : > { %v4111_v4 = vpop.permute.xlu2 %4110 }
 0x491   : > { %v4082_v22 = vpop.permute.xlu1 %4081  ;;  %v4665_v14 = vpack.c.bf16 %v4633_v15, %v4633_v15  ;;  %v4389_v54 = vsel %vm13129_vm12, %v4356_v8, %v4111_v4  ;;  %v4296_v15 = vsel %vm13135_vm3, %v4264_v25, %v11205_v5 }
 0x492   : > { %v4523_v17 = vpop.f32.mrf.mxu1  ;;  %v4146_v44 = vpop.permute.xlu0 %4145  ;;  %v4329_v4 = vsel %vm13134_vm7, %v4296_v15, %v11343_v29 }
 0x493   : > { %v4698_v50 = vshrl.u32 %v4665_v14, 16  ;;  %v4524_v61 = vadd.f32 %v11374_v63, %v4523_v17  ;;  %v4701_v28 = vshll.u32 %v4665_v14, 16  ;;  %v4422_v21 = vsel %vm13128_vm10, %v4389_v54, %v4146_v44 }
 0x494   : > { %v4362_v46 = vsel %vm4336_vm9, %v4329_v4, %v4082_v22 }
 0x495   : > { %8105 = vmatmul.msk.bf16.gmra.mxu1 %vm4475_vm8, %v4420_v37  ;;  %v4700_v38 = vrot.slane %v4698_v50, 7  ;;  %v4602_v57 = vmul.f32 0.01, %v4524_v61 }
 0x497   : > { %v4703_v24 = vor.u32 %v4701_v28, %v4700_v38  ;;  %v4634_v62 = vmax.f32 %v4524_v61, %v4602_v57  ;;  %v4704_v10 = vrot.slane %v4700_v38, 4  ;;  %v8426_v38 = vld [vmem:[#allocation3 + $0x78] sm:$0xff]  ;;  %v13402_v28 = vld [vmem:[#allocation32_spill] sm:$0xff] }
 0x498   : > { %v11398_v59 = vpop.permute.xlu2 %4085  ;;  %v4191_v5 = vsel %vm13144_vm14, %v8426_v38, %v11104_v34  ;;  %v4234_v57 = vsel %vm13136_vm0, %v4200_v18, %v13402_v28  ;;  %v13410_v38 = vld [vmem:[#allocation14_spill] sm:$0xff] }
 0x499   : > { %v11396_v2 = vpop.permute.xlu1 %4083  ;;  %v4666_v56 = vpack.c.bf16 %v4634_v62, %v4634_v62  ;;  %4969 = vrot.lane.b32.xlu1 %v4703_v24, %s8504_s18  ;;  %v4228_v49 = vsel %vm13136_vm0, %v4191_v5, %v13403_v16  ;;  %v13413_v16 = vld [vmem:[#allocation62_spill] sm:$0xff] }
 0x49a   : > { %v11407_v39 = vpop.permute.xlu0 %4087  ;;  %v4260_v33 = vsel %vm13137_vm1, %v4228_v49, %v13404_v51  ;;  %v13414_v51 = vld [vmem:[#allocation61_spill] sm:$0xff] }
 0x49b   : > { %v4706_v0 = vshrl.u32 %v4666_v56, 16  ;;  %v4709_v52 = vshll.u32 %v4666_v56, 16  ;;  %v4292_v1 = vsel %vm13135_vm3, %v4260_v33, %v13405_v32 }
 0x49c   : > { %v4325_v36 = vsel %vm13134_vm7, %v4292_v1, %v11329_v9  ;;  %v13415_v1 = vld [vmem:[#allocation53_spill] sm:$0xff] }
 0x49d   : > { %v4708_v58 = vrot.slane %v4706_v0, 7  ;;  %v4358_v35 = vsel %vm4336_vm9, %v4325_v36, %v11378_v43 }
 0x49f   : > { %v4711_v41 = vor.u32 %v4709_v52, %v4708_v58  ;;  %v4713_v45 = vrot.slane %v4708_v58, 4  ;;  %v13406_v58 = vld [vmem:[#allocation56_spill] sm:$0xff] }
 0x4a0   : > { %v4117_v11 = vpop.permute.xlu2 %4116  ;;  %v4266_v52 = vsel %vm13137_vm1, %v4234_v57, %v13406_v58 }
 0x4a1   : > { %v4113_v55 = vpop.permute.xlu1 %4112  ;;  %4973 = vrot.lane.b32.xlu0 %v4713_v45, %s8504_s18  ;;  %v4712_v3 = vsel %vm8678_vm15, %v4704_v10, %v4711_v41  ;;  %v4395_v17 = vsel %vm13129_vm12, %v4362_v46, %v4117_v11  ;;  %v13407_v41 = vld [vmem:[#allocation46_spill] sm:$0xff]  ;;  %v13408_v46 = vld [vmem:[#allocation29_spill] sm:$0xff] }
 0x4a2   : > { %v4526_v12 = vpop.f32.mrf.mxu1  ;;  %4971 = vrot.lane.b32.xlu2 %v4712_v3, %s8504_s18  ;;  %v4148_v61 = vpop.permute.xlu0 %4147  ;;  %v4298_v45 = vsel %vm13135_vm3, %v4266_v52, %v13407_v41  ;;  %v4391_v31 = vsel %vm13129_vm12, %v4358_v35, %v4113_v55 }
 0x4a3   : > { %v4527_v19 = vadd.f32 %v11374_v63, %v4526_v12  ;;  %v4331_v3 = vsel %vm13134_vm7, %v4298_v45, %v11349_v13  ;;  %v4424_v9 = vsel %vm13128_vm10, %v4391_v31, %v4148_v61 }
 0x4a4   : > { %v4364_v54 = vsel %vm4336_vm9, %v4331_v3, %v11396_v2 }
 0x4a5   : > { %v4603_v53 = vmul.f32 0.01, %v4527_v19  ;;  %8106 = vmatmul.msk.bf16.gmra.mxu1 %vm4475_vm8, %v4422_v21 }
 0x4a7   : > { %v4635_v14 = vmax.f32 %v4527_v19, %v4603_v53 }
 0x4a8   : > { %v4115_v56 = vpop.permute.xlu2 %4114 }
 0x4a9   : > { %v4667_v42 = vpack.c.bf16 %v4635_v14, %v4635_v14  ;;  %v4152_v50 = vpop.permute.xlu1 %4151 }
 0x4aa   : > { %v4428_v37 = vsel %vm13128_vm10, %v4395_v17, %v4152_v50  ;;  %v4528_v44 = vpop.f32.mrf.mxu1  ;;  %v4119_v8 = vpop.permute.xlu0 %4118  ;;  %v13409_v17 = vld [vmem:[#allocation31_spill] sm:$0xff] }
 0x4ab   : > { %v4715_v29 = vshrl.u32 %v4667_v42, 16  ;;  %8109 = vmatmul.msk.bf16.vlgmr.msrb.gmra.mxu3 %vm4475_vm8, %v4428_v37  ;;  %v4529_v22 = vadd.f32 %v11374_v63, %v4528_v44  ;;  %v4718_v62 = vshll.u32 %v4667_v42, 16  ;;  %v4397_v20 = vsel %vm13129_vm12, %v4364_v54, %v4119_v8 }
 0x4ac   : > { %v4194_v42 = vsel %vm13144_vm14, %v13409_v17, %v13408_v46  ;;  %v13417_v46 = vld [vmem:[#allocation22_spill] sm:$0xff]  ;;  %v13418_v17 = vld [vmem:[#allocation35_spill] sm:$0xff] }
 0x4ad   : > { %v4717_v24 = vrot.slane %v4715_v29, 7  ;;  %v4604_v47 = vmul.f32 0.01, %v4529_v22  ;;  %v4230_v5 = vsel %vm13136_vm0, %v4194_v42, %v13410_v38  ;;  %v13411_v29 = vld [vmem:[#allocation55_spill] sm:$0xff]  ;;  %v4206_v42 = vsel %vm13144_vm14, %v13418_v17, %v13417_v46  ;;  %v13420_v38 = vld [vmem:[#allocation21_spill] sm:$0xff] }
 0x4af   : > { %v4720_v0 = vor.u32 %v4718_v62, %v4717_v24  ;;  %v4636_v34 = vmax.f32 %v4529_v22, %v4604_v47  ;;  %v4721_v55 = vrot.slane %v4717_v24, 4  ;;  %v4262_v22 = vsel %vm13137_vm1, %v4230_v5, %v13411_v29  ;;  %v8427_v24 = vld [vmem:[#allocation3 + $0xa8] sm:$0xff]  ;;  %v13412_v62 = vld [vmem:[#allocation42_spill] sm:$0xff]  ;;  %v13421_v29 = vld [vmem:[#allocation45_spill] sm:$0xff] }
 0x4b0   : > { %v4154_v25 = vpop.permute.xlu2 %4153  ;;  %v4203_v47 = vsel %vm13144_vm14, %v8427_v24, %v13412_v62  ;;  %v4294_v49 = vsel %vm13135_vm3, %v4262_v22, %v13413_v16 }
 0x4b1   : > { %v4668_v23 = vpack.c.bf16 %v4636_v34, %v4636_v34  ;;  %4975 = vrot.lane.b32.xlu1 %v4720_v0, %s8504_s18  ;;  %v4430_v2 = vsel %vm13128_vm10, %v4397_v20, %v4154_v25  ;;  %v4236_v33 = vsel %vm13136_vm0, %v4203_v47, %v13414_v51  ;;  %v4327_v0 = vsel %vm13134_vm7, %v4294_v49, %v11331_v48  ;;  %v4150_v34 = vpop.permute.xlu1 %4149 }
 0x4b2   : > { %v4531_v10 = vpop.f32.mrf.mxu1  ;;  %v4268_v58 = vsel %vm13137_vm1, %v4236_v33, %v13415_v1  ;;  %v4360_v52 = vsel %vm4336_vm9, %v4327_v0, %v11380_v6  ;;  %v4121_v41 = vpop.permute.xlu0 %4120 }
 0x4b3   : > { %v4723_v60 = vshrl.u32 %v4668_v23, 16  ;;  %v4532_v12 = vadd.f32 %v11374_v63, %v4531_v10  ;;  %v4726_v43 = vshll.u32 %v4668_v23, 16  ;;  %v13416_v23 = vld [vmem:[#allocation67_spill] sm:$0xff]  ;;  %v4393_v10 = vsel %vm13129_vm12, %v4360_v52, %v4115_v56 }
 0x4b4   : > { %v4300_v35 = vsel %vm13135_vm3, %v4268_v58, %v13416_v23 }
 0x4b5   : > { %v4725_v11 = vrot.slane %v4723_v60, 7  ;;  %v4605_v19 = vmul.f32 0.01, %v4532_v12  ;;  %8107 = vmatmul.msk.bf16.gmra.mxu1 %vm4475_vm8, %v4424_v9  ;;  %v4333_v31 = vsel %vm13134_vm7, %v4300_v35, %v11351_v7  ;;  %v4426_v60 = vsel %vm13128_vm10, %v4393_v10, %v4150_v34 }
 0x4b6   : > { %v4366_v8 = vsel %vm4336_vm9, %v4333_v31, %v11398_v59 }
 0x4b7   : > { %v4728_v21 = vor.u32 %v4726_v43, %v4725_v11  ;;  %v4637_v53 = vmax.f32 %v4532_v12, %v4605_v19  ;;  %v4730_v15 = vrot.slane %v4725_v11, 4  ;;  %v4399_v9 = vsel %vm13129_vm12, %v4366_v8, %v4121_v41 }
 0x4b8   : > { %v4156_v54 = vpop.permute.xlu2 %4155 }
 0x4b9   : > { %v4669_v4 = vpack.c.bf16 %v4637_v53, %v4637_v53  ;;  %4979 = vrot.lane.b32.xlu0 %v4730_v15, %s8504_s18  ;;  %v4729_v13 = vsel %vm8678_vm15, %v4721_v55, %v4728_v21  ;;  %v4432_v59 = vsel %vm13128_vm10, %v4399_v9, %v4156_v54  ;;  %v4123_v47 = vpop.permute.xlu1 %4122 }
 0x4ba   : > { %4977 = vrot.lane.b32.xlu2 %v4729_v13, %s8504_s18  ;;  %v4533_v14 = vpop.f32.mrf.mxu1  ;;  %v4158_v16 = vpop.permute.xlu0 %4157 }
 0x4bb   : > { %v4732_v50 = vshrl.u32 %v4669_v4, 16  ;;  %8110 = vmatmul.msk.bf16.gmra.mxu3 %vm4475_vm8, %v4430_v2  ;;  %v4534_v61 = vadd.f32 %v11374_v63, %v4533_v14  ;;  %v4735_v37 = vshll.u32 %v4669_v4, 16 }
 0x4bd   : > { %v4734_v18 = vrot.slane %v4732_v50, 7  ;;  %v4606_v44 = vmul.f32 0.01, %v4534_v61 }
 0x4bf   : > { %v4737_v28 = vor.u32 %v4735_v37, %v4734_v18  ;;  %v4638_v57 = vmax.f32 %v4534_v61, %v4606_v44  ;;  %v4738_v56 = vrot.slane %v4734_v18, 4  ;;  %v13419_v61 = vld [vmem:[#allocation64_spill] sm:$0xff] }
 0x4c0   : > { %v4238_v18 = vsel %vm13136_vm0, %v4206_v42, %v13419_v61  ;;  %vm13428_vm0 = vcmask 293888  }
 0x4c1   : > { %v4670_v32 = vpack.c.bf16 %v4638_v57, %v4638_v57  ;;  %4981 = vrot.lane.b32.xlu1 %v4737_v28, %s8504_s18  ;;  %v4270_v5 = vsel %vm13137_vm1, %v4238_v18, %v13420_v38 }
 0x4c2   : > { %v4536_v36 = vpop.f32.mrf.mxu1  ;;  %v4302_v22 = vsel %vm13135_vm3, %v4270_v5, %v13421_v29  ;;  %vm6648_vm3 = vcmask 883712  }
 0x4c3   : > { %v4740_v45 = vshrl.u32 %v4670_v32, 16  ;;  %v4537_v48 = vadd.f32 %v11374_v63, %v4536_v36  ;;  %v4743_v6 = vshll.u32 %v4670_v32, 16  ;;  %v4335_v62 = vsel %vm13134_vm7, %v4302_v22, %v11362_v26 }
 0x4c4   : > { %v4368_v34 = vsel %vm4336_vm9, %v4335_v62, %v11407_v39  ;;  %vm6556_vm7 = vcmask 785408  }
 0x4c5   : > { %v4742_v12 = vrot.slane %v4740_v45, 7  ;;  %v4607_v3 = vmul.f32 0.01, %v4537_v48  ;;  %8108 = vmatmul.msk.bf16.gmra.mxu1 %vm4475_vm8, %v4426_v60  ;;  %v4401_v32 = vsel %vm13129_vm12, %v4368_v34, %v4123_v47 }
 0x4c6   : > { %v4434_v52 = vsel %vm13128_vm10, %v4401_v32, %v4158_v16  ;;  %vm5120_vm10 = vcmask 90144  }
 0x4c7   : > { %v4745_v11 = vor.u32 %v4743_v6, %v4742_v12  ;;  %v4639_v43 = vmax.f32 %v4537_v48, %v4607_v3  ;;  %v4747_v19 = vrot.slane %v4742_v12, 4  ;;  %vm11569_vm12 = vmand %vm5120_vm10, %vm13424_vm4  ;;  %vm6681_vm10 = vcmask 1045504  }
 0x4c8   : > { %vm13427_vm4 = vcmask 293888  }
 0x4c9   : > { %v4671_v20 = vpack.c.bf16 %v4639_v43, %v4639_v43  ;;  %4985 = vrot.lane.b32.xlu0 %v4747_v19, %s8504_s18  ;;  %v4746_v7 = vsel %vm8678_vm15, %v4738_v56, %v4745_v11 }
 0x4ca   : > { %4983 = vrot.lane.b32.xlu2 %v4746_v7, %s8504_s18  ;;  %v4538_v55 = vpop.f32.mrf.mxu1 }
 0x4cb   : > { %v4749_v21 = vshrl.u32 %v4671_v20, 16  ;;  %8111 = vmatmul.msk.bf16.gmra.mxu3 %vm4475_vm8, %v4432_v59  ;;  %v4539_v25 = vadd.f32 %v11374_v63, %v4538_v55  ;;  %v4752_v15 = vshll.u32 %v4671_v20, 16 }
 0x4cd   : > { %v4751_v53 = vrot.slane %v4749_v21, 7  ;;  %v4608_v4 = vmul.f32 0.01, %v4539_v25 }
 0x4cf   : > { %v4754_v13 = vor.u32 %v4752_v15, %v4751_v53  ;;  %v4640_v2 = vmax.f32 %v4539_v25, %v4608_v4  ;;  %v4755_v49 = vrot.slane %v4751_v53, 4 }
 0x4d1   : > { %v4672_v14 = vpack.c.bf16 %v4640_v2, %v4640_v2  ;;  %4987 = vrot.lane.b32.xlu1 %v4754_v13, %s8504_s18 }
 0x4d2   : > { %v4541_v50 = vpop.f32.mrf.mxu1 }
 0x4d3   : > { %v4757_v37 = vshrl.u32 %v4672_v14, 16  ;;  %v4542_v44 = vadd.f32 %v11374_v63, %v4541_v50  ;;  %v4760_v57 = vshll.u32 %v4672_v14, 16 }
 0x4d5   : > { %v4759_v28 = vrot.slane %v4757_v37, 7  ;;  %v4609_v24 = vmul.f32 0.01, %v4542_v44 }
 0x4d7   : > { %v4762_v51 = vor.u32 %v4760_v57, %v4759_v28  ;;  %v4641_v33 = vmax.f32 %v4542_v44, %v4609_v24  ;;  %v4764_v0 = vrot.slane %v4759_v28, 4 }
 0x4d9   : > { %v4673_v1 = vpack.c.bf16 %v4641_v33, %v4641_v33  ;;  %4991 = vrot.lane.b32.xlu0 %v4764_v0, %s8504_s18  ;;  %v4763_v58 = vsel %vm8678_vm15, %v4755_v49, %v4762_v51 }
 0x4da   : > { %4989 = vrot.lane.b32.xlu2 %v4763_v58, %s8504_s18  ;;  %v4543_v26 = vpop.f32.mrf.mxu1 }
 0x4db   : > { %v4766_v36 = vshrl.u32 %v4673_v1, 16  ;;  %8112 = vmatmul.msk.bf16.gmra.mxu3 %vm4475_vm8, %v4434_v52  ;;  %v4544_v23 = vadd.f32 %v11374_v63, %v4543_v26  ;;  %v4769_v39 = vshll.u32 %v4673_v1, 16 }
 0x4dd   : > { %v4768_v35 = vrot.slane %v4766_v36, 7  ;;  %v4610_v10 = vmul.f32 0.01, %v4544_v23 }
 0x4df   : > { %v4771_v41 = vor.u32 %v4769_v39, %v4768_v35  ;;  %v4642_v45 = vmax.f32 %v4544_v23, %v4610_v10  ;;  %v4772_v9 = vrot.slane %v4768_v35, 4 }
 0x4e1   : > { %v4674_v48 = vpack.c.bf16 %v4642_v45, %v4642_v45  ;;  %4993 = vrot.lane.b32.xlu1 %v4771_v41, %s8504_s18  ;;  %v5115_v41 = vld [vmem:[#allocation2 + $0xc] sm:$0xf] }
 0x4e2   : > { %v4546_v31 = vpop.f32.mrf.mxu1 }
 0x4e3   : > { %v4774_v60 = vshrl.u32 %v4674_v48, 16  ;;  %v4547_v8 = vadd.f32 %v11374_v63, %v4546_v31  ;;  %v4777_v6 = vshll.u32 %v4674_v48, 16 }
 0x4e5   : > { %v4776_v12 = vrot.slane %v4774_v60, 7  ;;  %v4611_v3 = vmul.f32 0.01, %v4547_v8 }
 0x4e7   : > { %v4779_v56 = vor.u32 %v4777_v6, %v4776_v12  ;;  %v4643_v54 = vmax.f32 %v4547_v8, %v4611_v3  ;;  %v4781_v11 = vrot.slane %v4776_v12, 4 }
 0x4e9   : > { %v4675_v43 = vpack.c.bf16 %v4643_v54, %v4643_v54  ;;  %4997 = vrot.lane.b32.xlu0 %v4781_v11, %s8504_s18  ;;  %v4780_v19 = vsel %vm8678_vm15, %v4772_v9, %v4779_v56 }
 0x4ea   : > { %4995 = vrot.lane.b32.xlu2 %v4780_v19, %s8504_s18  ;;  %v4548_v20 = vpop.f32.mrf.mxu1 }
 0x4eb   : > { %v4783_v7 = vshrl.u32 %v4675_v43, 16  ;;  %v4549_v59 = vadd.f32 %v11374_v63, %v4548_v20  ;;  %v4786_v21 = vshll.u32 %v4675_v43, 16  ;;  %v5122_v43 = vld [vmem:[#allocation2 + $0x14] sm:$0x1] }
 0x4ed   : > { %v4785_v55 = vrot.slane %v4783_v7, 7  ;;  %v4612_v25 = vmul.f32 0.01, %v4549_v59 }
 0x4ef   : > { %v4788_v53 = vor.u32 %v4786_v21, %v4785_v55  ;;  %v4644_v15 = vmax.f32 %v4549_v59, %v4612_v25  ;;  %v4789_v50 = vrot.slane %v4785_v55, 4 }
 0x4f1   : > { %v4676_v4 = vpack.c.bf16 %v4644_v15, %v4644_v15  ;;  %4999 = vrot.lane.b32.xlu1 %v4788_v53, %s8504_s18 }
 0x4f2   : > { %v4551_v13 = vpop.f32.mrf.mxu1 }
 0x4f3   : > { %v4791_v2 = vshrl.u32 %v4676_v4, 16  ;;  %v4552_v14 = vadd.f32 %v11374_v63, %v4551_v13  ;;  %v4794_v17 = vshll.u32 %v4676_v4, 16 }
 0x4f5   : > { %v4793_v46 = vrot.slane %v4791_v2, 7  ;;  %v4613_v42 = vmul.f32 0.01, %v4552_v14 }
 0x4f7   : > { %v4796_v61 = vor.u32 %v4794_v17, %v4793_v46  ;;  %v4645_v18 = vmax.f32 %v4552_v14, %v4613_v42  ;;  %v4798_v37 = vrot.slane %v4793_v46, 4 }
 0x4f9   : > { %v4677_v44 = vpack.c.bf16 %v4645_v18, %v4645_v18  ;;  %5003 = vrot.lane.b32.xlu0 %v4798_v37, %s8504_s18  ;;  %v4797_v38 = vsel %vm8678_vm15, %v4789_v50, %v4796_v61 }
 0x4fa   : > { %5001 = vrot.lane.b32.xlu2 %v4797_v38, %s8504_s18  ;;  %v4553_v5 = vpop.f32.mrf.mxu1 }
 0x4fb   : > { %v4800_v29 = vshrl.u32 %v4677_v44, 16  ;;  %v4554_v22 = vadd.f32 %v11374_v63, %v4553_v5  ;;  %v4803_v57 = vshll.u32 %v4677_v44, 16 }
 0x4fc   : > { %v4972_v62 = vpop.permute.xlu2 %4971 }
 0x4fd   : > { %v4802_v28 = vrot.slane %v4800_v29, 7  ;;  %v4614_v24 = vmul.f32 0.01, %v4554_v22  ;;  %5119 = vst.msk [vmem:[#allocation2 + $0x10] sm:$0xf] %vm5113_vm5, %v4972_v62 }
 0x4fe   : > { %v5125_v29 = vld [vmem:[#allocation2 + $0x18] sm:$0xf] }
 0x4ff   : > { %v4805_v47 = vor.u32 %v4803_v57, %v4802_v28  ;;  %v4646_v16 = vmax.f32 %v4554_v22, %v4614_v24  ;;  %v4806_v58 = vrot.slane %v4802_v28, 4 }
 0x501   : > { %v4678_v49 = vpack.c.bf16 %v4646_v16, %v4646_v16  ;;  %5005 = vrot.lane.b32.xlu1 %v4805_v47, %s8504_s18 }
 0x502   : > { %v4556_v51 = vpop.f32.mrf.mxu1 }
 0x503   : > { %v4808_v33 = vshrl.u32 %v4678_v49, 16  ;;  %v4557_v0 = vadd.f32 %v11374_v63, %v4556_v51  ;;  %v4811_v32 = vshll.u32 %v4678_v49, 16 }
 0x505   : > { %v4810_v34 = vrot.slane %v4808_v33, 7  ;;  %v4615_v1 = vmul.f32 0.01, %v4557_v0 }
 0x507   : > { %v4813_v52 = vor.u32 %v4811_v32, %v4810_v34  ;;  %v4647_v26 = vmax.f32 %v4557_v0, %v4615_v1  ;;  %v4815_v36 = vrot.slane %v4810_v34, 4 }
 0x509   : > { %v4679_v23 = vpack.c.bf16 %v4647_v26, %v4647_v26  ;;  %5009 = vrot.lane.b32.xlu0 %v4815_v36, %s8504_s18  ;;  %v4814_v35 = vsel %vm8678_vm15, %v4806_v58, %v4813_v52  ;;  %v5129_v52 = vld [vmem:[#allocation2 + $0x20] sm:$0x1] }
 0x50a   : > { %5007 = vrot.lane.b32.xlu2 %v4814_v35, %s8504_s18  ;;  %v4558_v10 = vpop.f32.mrf.mxu1 }
 0x50b   : > { %v4817_v45 = vshrl.u32 %v4679_v23, 16  ;;  %v4559_v48 = vadd.f32 %v11374_v63, %v4558_v10  ;;  %v4970_v31 = vpop.permute.xlu1 %4969  ;;  %v4820_v8 = vshll.u32 %v4679_v23, 16 }
 0x50c   : > { %v5116_v6 = vsel %vm11559_vm6, %v4970_v31, %v5115_v41 }
 0x50d   : > { %v4819_v60 = vrot.slane %v4817_v45, 7  ;;  %v4616_v12 = vmul.f32 0.01, %v4559_v48  ;;  %5117 = vst [vmem:[#allocation2 + $0xc] sm:$0xf] %v5116_v6 }
 0x50f   : > { %v4822_v3 = vor.u32 %v4820_v8, %v4819_v60  ;;  %v4648_v9 = vmax.f32 %v4559_v48, %v4616_v12  ;;  %v4823_v15 = vrot.slane %v4819_v60, 4  ;;  %v5132_v12 = vld [vmem:[#allocation2 + $0x24] sm:$0xf] }
 0x511   : > { %v4680_v56 = vpack.c.bf16 %v4648_v9, %v4648_v9  ;;  %5011 = vrot.lane.b32.xlu1 %v4822_v3, %s8504_s18 }
 0x512   : > { %v4561_v11 = vpop.f32.mrf.mxu1 }
 0x513   : > { %v4825_v19 = vshrl.u32 %v4680_v56, 16  ;;  %v4562_v20 = vadd.f32 %v11374_v63, %v4561_v11  ;;  %v4974_v59 = vpop.permute.xlu0 %4973  ;;  %v4828_v21 = vshll.u32 %v4680_v56, 16 }
 0x514   : > { %v4978_v7 = vpop.permute.xlu2 %4977  ;;  %v5123_v53 = vsel %vm11569_vm12, %v4974_v59, %v5122_v43  ;;  %v11596_v43 = vld [vmem:[#allocation2] sm:$0xf]  ;;  %v11602_v59 = vld [vmem:[#allocation2 + $0x8] sm:$0x1] }
 0x515   : > { %v4827_v55 = vrot.slane %v4825_v19, 7  ;;  %v4617_v25 = vmul.f32 0.01, %v4562_v20  ;;  %5128 = vst.msk [vmem:[#allocation2 + $0x1c] sm:$0xf] %vm5113_vm5, %v4978_v7 }
 0x516   : > { %5124 = vst [vmem:[#allocation2 + $0x14] sm:$0x1] %v5123_v53  ;;  %v11598_v19 = vld [vmem:[#allocation2 + $0x4] sm:$0xf] }
 0x517   : > { %v4830_v4 = vor.u32 %v4828_v21, %v4827_v55  ;;  %v4649_v13 = vmax.f32 %v4562_v20, %v4617_v25  ;;  %v4832_v2 = vrot.slane %v4827_v55, 4  ;;  %v5285_v55 = vshrl.u32 %v11596_v43, 16 }
 0x518   : > { %v5288_v21 = vshll.u32 %v11596_v43, 16  ;;  %v5294_v25 = vshll.u32 %v11598_v19, 16 }
 0x519   : > { %v4681_v14 = vpack.c.bf16 %v4649_v13, %v4649_v13  ;;  %5015 = vrot.lane.b32.xlu0 %v4832_v2, %s8504_s18  ;;  %v4831_v46 = vsel %vm8678_vm15, %v4823_v15, %v4830_v4  ;;  %v5298_v4 = vshrl.u32 %v11598_v19, 16  ;;  %v5287_v13 = vrot.slane %v5285_v55, 4 }
 0x51a   : > { %5013 = vrot.lane.b32.xlu2 %v4831_v46, %s8504_s18  ;;  %v4563_v17 = vpop.f32.mrf.mxu1  ;;  %v5290_v2 = vrot.slane %v5288_v21, 5 }
 0x51b   : > { %v4834_v42 = vshrl.u32 %v4681_v14, 16  ;;  %v4564_v50 = vadd.f32 %v11374_v63, %v4563_v17  ;;  %v4837_v18 = vshll.u32 %v4681_v14, 16  ;;  %v5296_v14 = vrot.slane %v5294_v25, 5 }
 0x51d   : > { %v4836_v61 = vrot.slane %v4834_v42, 7  ;;  %v4618_v37 = vmul.f32 0.01, %v4564_v50  ;;  %v5304_v42 = vshll.u32 %v11602_v59, 16 }
 0x51f   : > { %v4839_v44 = vor.u32 %v4837_v18, %v4836_v61  ;;  %v4650_v38 = vmax.f32 %v4564_v50, %v4618_v37  ;;  %v4840_v33 = vrot.slane %v4836_v61, 4  ;;  %v5291_v18 = vor.u32 %v5290_v2, %v5287_v13  ;;  %v5234_v2 = vld [vmem:[#allocation2 + $0x10] sm:$0xf] }
 0x520   : > { %v5300_v37 = vrot.slane %v5298_v4, 4 }
 0x521   : > { %v4682_v5 = vpack.c.bf16 %v4650_v38, %v4650_v38  ;;  %5017 = vrot.lane.b32.xlu1 %v4839_v44, %s8504_s18  ;;  %v5136_v38 = vld [vmem:[#allocation2 + $0x2c] sm:$0x1] }
 0x522   : > { %v4566_v22 = vpop.f32.mrf.mxu1 }
 0x523   : > { %v4842_v28 = vshrl.u32 %v4682_v5, 16  ;;  %v4567_v57 = vadd.f32 %v11374_v63, %v4566_v22  ;;  %v4976_v24 = vpop.permute.xlu1 %4975  ;;  %v4845_v49 = vshll.u32 %v4682_v5, 16  ;;  %v5292_v22 = vrot.slane %v5291_v18, 4 }
 0x524   : > { %v5126_v62 = vsel %vm11559_vm6, %v4976_v24, %v5125_v29  ;;  %v4984_v47 = vpop.permute.xlu2 %4983 }
 0x525   : > { %v4844_v16 = vrot.slane %v4842_v28, 7  ;;  %v4619_v51 = vmul.f32 0.01, %v4567_v57  ;;  %5127 = vst [vmem:[#allocation2 + $0x18] sm:$0xf] %v5126_v62  ;;  %v5301_v28 = vor.u32 %v5300_v37, %v5296_v14 }
 0x526   : > { %5135 = vst.msk [vmem:[#allocation2 + $0x28] sm:$0xf] %vm5113_vm5, %v4984_v47  ;;  %v5235_v37 = vld [vmem:[#allocation2 + $0x14] sm:$0x1] }
 0x527   : > { %v4847_v0 = vor.u32 %v4845_v49, %v4844_v16  ;;  %v4651_v34 = vmax.f32 %v4567_v57, %v4619_v51  ;;  %v4849_v32 = vrot.slane %v4844_v16, 4  ;;  %v5306_v16 = vrot.slane %v5304_v42, 5 }
 0x528   : > { %v5297_v51 = vsel %vm8698_vm2, %v5292_v22, %v5296_v14 }
 0x529   : > { %v4683_v1 = vpack.c.bf16 %v4651_v34, %v4651_v34  ;;  %5021 = vrot.lane.b32.xlu0 %v4849_v32, %s8504_s18  ;;  %v4848_v58 = vsel %vm8678_vm15, %v4840_v33, %v4847_v0  ;;  %v5302_v33 = vrot.slane %v5301_v28, 4  ;;  %v5322_v28 = vshrl.u32 %v5234_v2, 16 }
 0x52a   : > { %5019 = vrot.lane.b32.xlu2 %v4848_v58, %s8504_s18  ;;  %v4568_v26 = vpop.f32.mrf.mxu1 }
 0x52b   : > { %v4851_v36 = vshrl.u32 %v4683_v1, 16  ;;  %v4569_v23 = vadd.f32 %v11374_v63, %v4568_v26  ;;  %v4980_v35 = vpop.permute.xlu0 %4979  ;;  %v4854_v45 = vshll.u32 %v4683_v1, 16  ;;  %v5307_v58 = vsel %vm8698_vm2, %v5302_v33, %v5306_v16 }
 0x52c   : > { %v5130_v10 = vsel %vm11569_vm12, %v4980_v35, %v5129_v52  ;;  %v5944_v52 = vunpack.c.l.b16 %v5297_v51  ;;  %v5324_v16 = vrot.slane %v5322_v28, 4  ;;  %v5725_v33 = vrot.slane %v5234_v2, 5  ;;  %v5153_v28 = vld [vmem:[#allocation2 + $0x48] sm:$0xf] }
 0x52d   : > { %v4853_v41 = vrot.slane %v4851_v36, 7  ;;  %v4620_v48 = vmul.f32 0.01, %v4569_v23  ;;  %5131 = vst [vmem:[#allocation2 + $0x20] sm:$0x1] %v5130_v10  ;;  %v5945_v36 = vunpack.c.l.b16 %v5307_v58 }
 0x52f   : > { %v4856_v31 = vor.u32 %v4854_v45, %v4853_v41  ;;  %v4652_v60 = vmax.f32 %v4569_v23, %v4620_v48  ;;  %v4857_v46 = vrot.slane %v4853_v41, 4  ;;  %v5139_v23 = vld [vmem:[#allocation2 + $0x30] sm:$0xf]  ;;  %v11622_v45 = vld [vmem:[#allocation2 + $0xc] sm:$0xf]  ;;  %v5976_v48 = vpack.c.b16 %v5945_v36, %v5944_v52 }
 0x530   : > { %v8114_v51 = vrot.slane %v11622_v45, 9 }
 0x531   : > { %v4684_v8 = vpack.c.bf16 %v4652_v60, %v4652_v60  ;;  %5023 = vrot.lane.b32.xlu1 %v4856_v31, %s8504_s18 }
 0x532   : > { %v4571_v6 = vpop.f32.mrf.mxu1  ;;  %v5726_v36 = vsel %vm9165_vm13, %v8114_v51, %v5725_v33 }
 0x533   : > { %v4859_v3 = vshrl.u32 %v4684_v8, 16  ;;  %v4862_v9 = vshll.u32 %v4684_v8, 16  ;;  %v4572_v56 = vadd.f32 %v11374_v63, %v4571_v6  ;;  %v4982_v11 = vpop.permute.xlu1 %4981 }
 0x534   : > { %v5133_v20 = vsel %vm11559_vm6, %v4982_v11, %v5132_v12  ;;  %v4990_v7 = vpop.permute.xlu2 %4989  ;;  %v8113_v12 = vrot.slane %v11596_v43, 9  ;;  %v11634_v43 = vld [vmem:[#allocation2 + $0xc] sm:$0xff] }
 0x535   : > { %v4861_v53 = vrot.slane %v4859_v3, 7  ;;  %v4621_v15 = vmul.f32 0.01, %v4572_v56  ;;  %5134 = vst [vmem:[#allocation2 + $0x24] sm:$0xf] %v5133_v20  ;;  %v5312_v20 = vshll.u32 %v11622_v45, 16 }
 0x536   : > { %5142 = vst.msk [vmem:[#allocation2 + $0x34] sm:$0xf] %vm5113_vm5, %v4990_v7 }
 0x537   : > { %v4864_v17 = vor.u32 %v4862_v9, %v4861_v53  ;;  %v4653_v50 = vmax.f32 %v4572_v56, %v4621_v15  ;;  %v4866_v61 = vrot.slane %v4861_v53, 4  ;;  %v5718_v9 = vrot.slane %v11598_v19, 5 }
 0x538   : > { %v5721_v56 = vrot.slane %v11602_v59, 5  ;;  %v5143_v59 = vld [vmem:[#allocation2 + $0x38] sm:$0x1] }
 0x539   : > { %v4865_v44 = vsel %vm8678_vm15, %v4857_v46, %v4864_v17  ;;  %v4685_v5 = vpack.c.bf16 %v4653_v50, %v4653_v50  ;;  %5027 = vrot.lane.b32.xlu0 %v4866_v61, %s8504_s18  ;;  %v5719_v25 = vsel %vm9165_vm13, %v8113_v12, %v5718_v9  ;;  %v5720_v19 = vrot.slane %v5718_v9, 4 }
 0x53a   : > { %5025 = vrot.lane.b32.xlu2 %v4865_v44, %s8504_s18  ;;  %v4573_v29 = vpop.f32.mrf.mxu1  ;;  %v6024_v15 = vunpack.c.l.b16 %v5719_v25  ;;  %v5314_v46 = vrot.slane %v5312_v20, 5  ;;  %v5150_v25 = vld [vmem:[#allocation2 + $0x44] sm:$0x1] }
 0x53b   : > { %v4574_v57 = vadd.f32 %v11374_v63, %v4573_v29  ;;  %v4986_v24 = vpop.permute.xlu0 %4985  ;;  %v4868_v62 = vshrl.u32 %v4685_v5, 16  ;;  %v4871_v34 = vshll.u32 %v4685_v5, 16  ;;  %v5722_v13 = vsel %vm9165_vm13, %v5720_v19, %v5721_v56 }
 0x53c   : > { %v5137_v47 = vsel %vm11569_vm12, %v4986_v24, %v5136_v38  ;;  %v6025_v18 = vunpack.c.l.b16 %v5722_v13  ;;  %v5318_v38 = vshll.u32 %v5234_v2, 16 }
 0x53d   : > { %v4622_v49 = vmul.f32 0.01, %v4574_v57  ;;  %5138 = vst [vmem:[#allocation2 + $0x2c] sm:$0x1] %v5137_v47  ;;  %v4870_v0 = vrot.slane %v4868_v62, 7  ;;  %v5328_v62 = vshll.u32 %v5235_v37, 16 }
 0x53e   : > { %v6056_v22 = vpack.c.b16 %v6025_v18, %v6024_v15  ;;  %v5320_v24 = vrot.slane %v5318_v38, 5 }
 0x53f   : > { %v4654_v32 = vmax.f32 %v4574_v57, %v4622_v49  ;;  %v4873_v1 = vor.u32 %v4871_v34, %v4870_v0  ;;  %v4874_v53 = vrot.slane %v4870_v0, 4  ;;  %v5146_v49 = vld [vmem:[#allocation2 + $0x3c] sm:$0xf]  ;;  %v5236_v34 = vld [vmem:[#allocation2 + $0x18] sm:$0xf] }
 0x541   : > { %v4686_v26 = vpack.c.bf16 %v4654_v32, %v4654_v32  ;;  %5029 = vrot.lane.b32.xlu1 %v4873_v1, %s8504_s18  ;;  %v5325_v32 = vor.u32 %v5324_v16, %v5320_v24  ;;  %v5330_v1 = vrot.slane %v5328_v62, 5 }
 0x542   : > { %v4576_v35 = vpop.f32.mrf.mxu1  ;;  %5992 = vrot.lane.b32.xlu2 %v5976_v48, %s8506_s20  ;;  %v5237_v48 = vld [vmem:[#allocation2 + $0x1c] sm:$0xf] }
 0x543   : > { %v4876_v10 = vshrl.u32 %v4686_v26, 16  ;;  %v4988_v41 = vpop.permute.xlu1 %4987  ;;  %v4577_v31 = vadd.f32 %v11374_v63, %v4576_v35  ;;  %v4879_v3 = vshll.u32 %v4686_v26, 16  ;;  %v5309_v63 = vshrl.u32 %v11622_v45, 16 }
 0x544   : > { %v5140_v60 = vsel %vm11559_vm6, %v4988_v41, %v5139_v23  ;;  %v4996_v8 = vpop.permute.xlu2 %4995  ;;  %v5728_v23 = vrot.slane %v5235_v37, 5  ;;  %v5326_v35 = vrot.slane %v5325_v32, 4  ;;  %v5333_v41 = vshrl.u32 %v5236_v34, 16  ;;  %v11677_v37 = vld [vmem:[#allocation2 + $0x28] sm:$0xf] }
 0x545   : > { %v4878_v6 = vrot.slane %v4876_v10, 7  ;;  %5141 = vst [vmem:[#allocation2 + $0x30] sm:$0xf] %v5140_v60  ;;  %v4623_v11 = vmul.f32 0.01, %v4577_v31  ;;  %v5311_v14 = vrot.slane %v5309_v63, 4 }
 0x546   : > { %5149 = vst.msk [vmem:[#allocation2 + $0x40] sm:$0xf] %vm5113_vm5, %v4996_v8  ;;  %v5727_v10 = vrot.slane %v5725_v33, 4  ;;  %v5336_v45 = vshll.u32 %v5236_v34, 16  ;;  %v5331_v60 = vsel %vm8698_vm2, %v5326_v35, %v5330_v1  ;;  %v11663_v8 = vld [vmem:[#allocation2 + $0x18] sm:$0xff] }
 0x547   : > { %v4881_v7 = vor.u32 %v4879_v3, %v4878_v6  ;;  %v4655_v55 = vmax.f32 %v4577_v31, %v4623_v11  ;;  %v4883_v21 = vrot.slane %v4878_v6, 4  ;;  %v5315_v44 = vor.u32 %v5314_v46, %v5311_v14  ;;  %v5238_v31 = vld [vmem:[#allocation2 + $0x20] sm:$0x1]  ;;  %v11672_v46 = vld [vmem:[#allocation2 + $0x24] sm:$0xf] }
 0x548   : > { %v5729_v12 = vsel %vm9165_vm13, %v5727_v10, %v5728_v23  ;;  %v5335_v6 = vrot.slane %v5333_v41, 4  ;;  %v5338_v3 = vrot.slane %v5336_v45, 5  ;;  %v5947_v56 = vunpack.c.l.b16 %v5331_v60 }
 0x549   : > { %v4687_v4 = vpack.c.bf16 %v4655_v55, %v4655_v55  ;;  %5033 = vrot.lane.b32.xlu0 %v4883_v21, %s8504_s18  ;;  %6107 = vrot.lane.b32.xlu1 %v11634_v43, %s8516_s13  ;;  %v4882_v17 = vsel %vm8678_vm15, %v4874_v53, %v4881_v7  ;;  %v5316_v47 = vrot.slane %v5315_v44, 4  ;;  %v6026_v11 = vunpack.c.l.b16 %v5726_v36 }
 0x54a   : > { %5031 = vrot.lane.b32.xlu2 %v4882_v17, %s8504_s18  ;;  %v6027_v63 = vunpack.c.l.b16 %v5729_v12  ;;  %v5339_v20 = vor.u32 %v5338_v3, %v5335_v6  ;;  %v5342_v7 = vshll.u32 %v5237_v48, 16  ;;  %v5346_v55 = vshrl.u32 %v5237_v48, 16  ;;  %v5157_v12 = vld [vmem:[#allocation2 + $0x50] sm:$0x1] }
 0x54b   : > { %v4992_v42 = vpop.permute.xlu0 %4991  ;;  %v4885_v50 = vshrl.u32 %v4687_v4, 16  ;;  %v4888_v29 = vshll.u32 %v4687_v4, 16  ;;  %v5321_v26 = vsel %vm8698_vm2, %v5316_v47, %v5320_v24  ;;  %v5352_v21 = vshll.u32 %v5238_v31, 16  ;;  %v5241_v47 = vld [vmem:[#allocation2 + $0x2c] sm:$0x1] }
 0x54c   : > { %v5144_v61 = vsel %vm11569_vm12, %v4992_v42, %v5143_v59  ;;  %v5946_v9 = vunpack.c.l.b16 %v5321_v26  ;;  %v6057_v59 = vpack.c.b16 %v6027_v63, %v6026_v11  ;;  %v5340_v15 = vrot.slane %v5339_v20, 4 }
 0x54d   : > { %5145 = vst [vmem:[#allocation2 + $0x38] sm:$0x1] %v5144_v61  ;;  %v11647_v5 = vrot.slane %v4885_v50, 7  ;;  %v5344_v4 = vrot.slane %v5342_v7, 5  ;;  %v5348_v13 = vrot.slane %v5346_v55, 4  ;;  %v8115_v14 = vrot.slane %v5236_v34, 9 }
 0x54e   : > { %v5977_v19 = vpack.c.b16 %v5947_v56, %v5946_v9  ;;  %v5354_v42 = vrot.slane %v5352_v21, 5  ;;  %v5732_v50 = vrot.slane %v5237_v48, 5  ;;  %v5735_v61 = vrot.slane %v5238_v31, 5  ;;  %v5160_v21 = vld [vmem:[#allocation2 + $0x54] sm:$0xf] }
 0x54f   : > { %v4890_v57 = vor.u32 %v4888_v29, %v11647_v5  ;;  %v5349_v17 = vor.u32 %v5348_v13, %v5344_v4  ;;  %v5345_v18 = vsel %vm8698_vm2, %v5340_v15, %v5344_v4  ;;  %v5370_v36 = vshrl.u32 %v11677_v37, 16  ;;  %v5242_v13 = vld [vmem:[#allocation2 + $0x30] sm:$0xf] }
 0x550   : > { %v5733_v38 = vsel %vm9165_vm13, %v8115_v14, %v5732_v50  ;;  %v5734_v29 = vrot.slane %v5732_v50, 4  ;;  %v5948_v51 = vunpack.c.l.b16 %v5345_v18  ;;  %v5376_v10 = vshll.u32 %v5241_v47, 16  ;;  %v5243_v14 = vld [vmem:[#allocation2 + $0x34] sm:$0xf] }
 0x551   : > { %6072 = vrot.lane.b32.xlu0 %v6056_v22, %s8509_s23  ;;  %5035 = vrot.lane.b32.xlu1 %v4890_v57, %s8504_s18  ;;  %v5350_v44 = vrot.slane %v5349_v17, 4  ;;  %v5357_v22 = vshrl.u32 %v11672_v46, 16  ;;  %v5360_v57 = vshll.u32 %v11672_v46, 16  ;;  %v5372_v45 = vrot.slane %v5370_v36, 4 }
 0x552   : > { %6142 = vrot.lane.b32.xlu2 %v5977_v19, %s8515_s17  ;;  %v5736_v62 = vsel %vm9165_vm13, %v5734_v29, %v5735_v61  ;;  %v5378_v60 = vrot.slane %v5376_v10, 5  ;;  %v5739_v55 = vrot.slane %v11677_v37, 5  ;;  %v5384_v50 = vshll.u32 %v5242_v13, 16 }
 0x553   : > { %v4994_v0 = vpop.permute.xlu1 %4993  ;;  %v5355_v24 = vsel %vm8698_vm2, %v5350_v44, %v5354_v42  ;;  %v5359_v16 = vrot.slane %v5357_v22, 4  ;;  %v6029_v34 = vunpack.c.l.b16 %v5736_v62  ;;  %v5390_v61 = vshll.u32 %v5243_v14, 16  ;;  %v5164_v44 = vld [vmem:[#allocation2 + $0x5c] sm:$0x1] }
 0x554   : > { %v5147_v58 = vsel %vm11559_vm6, %v4994_v0, %v5146_v49  ;;  %v5002_v52 = vpop.permute.xlu2 %5001  ;;  %v5366_v49 = vshll.u32 %v11677_v37, 16  ;;  %v5949_v33 = vunpack.c.l.b16 %v5355_v24  ;;  %v6028_v0 = vunpack.c.l.b16 %v5733_v38  ;;  %v5244_v38 = vld [vmem:[#allocation2 + $0x38] sm:$0x1] }
 0x555   : > { %5148 = vst [vmem:[#allocation2 + $0x3c] sm:$0xf] %v5147_v58  ;;  %v5741_v15 = vrot.slane %v5739_v55, 4  ;;  %v5394_v18 = vshrl.u32 %v5243_v14, 16  ;;  %v5386_v62 = vrot.slane %v5384_v50, 5 }
 0x556   : > { %5156 = vst.msk [vmem:[#allocation2 + $0x4c] sm:$0xf] %vm5113_vm5, %v5002_v52  ;;  %v5362_v52 = vrot.slane %v5360_v57, 5  ;;  %v5368_v26 = vrot.slane %v5366_v49, 5  ;;  %v11692_v23 = vpack.c.b16 %v5949_v33, %v5948_v51  ;;  %v6058_v35 = vpack.c.b16 %v6029_v34, %v6028_v0 }
 0x557   : > { %v5749_v51 = vrot.slane %v5244_v38, 5  ;;  %v5400_v33 = vshll.u32 %v5244_v38, 16  ;;  %v8117_v0 = vrot.slane %v5242_v13, 9 }
 0x558   : > { %v5363_v41 = vor.u32 %v5362_v52, %v5359_v16  ;;  %v5373_v31 = vor.u32 %v5372_v45, %v5368_v26  ;;  %v5396_v16 = vrot.slane %v5394_v18, 4 }
 0x559   : > { %6212 = vrot.lane.b32.xlu1 %v11663_v8, %s8517_s22  ;;  %6177 = vrot.lane.b32.xlu0 %v6057_v59, %s8518_s29 }
 0x55a   : > { %6247 = vrot.lane.b32.xlu2 %v11692_v23, %s8519_s15  ;;  %v5364_v48 = vrot.slane %v5363_v41, 4  ;;  %v5374_v6 = vrot.slane %v5373_v31, 4 }
 0x55b   : > { %v4998_v53 = vpop.permute.xlu0 %4997 }
 0x55c   : > { %v5151_v2 = vsel %vm11569_vm12, %v4998_v53, %v5150_v25  ;;  %v5369_v9 = vsel %vm8698_vm2, %v5364_v48, %v5368_v26  ;;  %v5379_v11 = vsel %vm8698_vm2, %v5374_v6, %v5378_v60  ;;  %v5742_v25 = vrot.slane %v5241_v47, 5 }
 0x55d   : > { %5152 = vst [vmem:[#allocation2 + $0x44] sm:$0x1] %v5151_v2  ;;  %v5951_v63 = vunpack.c.l.b16 %v5379_v11  ;;  %v5950_v20 = vunpack.c.l.b16 %v5369_v9  ;;  %v8116_v53 = vrot.slane %v11672_v46, 9  ;;  %v11717_v2 = vld [vmem:[#allocation2 + $0x24] sm:$0xff]  ;;  %v5381_v46 = vshrl.u32 %v5242_v13, 16 }
 0x55e   : > { %v5743_v17 = vsel %vm9165_vm13, %v5741_v15, %v5742_v25  ;;  %v5392_v47 = vrot.slane %v5390_v61, 5  ;;  %v5402_v26 = vrot.slane %v5400_v33, 5  ;;  %v5171_v9 = vld [vmem:[#allocation2 + $0x68] sm:$0x1]  ;;  %v5246_v15 = vld [vmem:[#allocation2 + $0x40] sm:$0xf] }
 0x55f   : > { %v11709_v7 = vpack.c.b16 %v5951_v63, %v5950_v20  ;;  %v5740_v42 = vsel %vm9165_vm13, %v8116_v53, %v5739_v55  ;;  %v6031_v37 = vunpack.c.l.b16 %v5743_v17  ;;  %v5383_v57 = vrot.slane %v5381_v46, 4  ;;  %v5245_v55 = vld [vmem:[#allocation2 + $0x3c] sm:$0xf] }
 0x560   : > { %v6030_v29 = vunpack.c.l.b16 %v5740_v42  ;;  %v5408_v13 = vshll.u32 %v5245_v55, 16  ;;  %v5418_v17 = vshrl.u32 %v5246_v15, 16  ;;  %v5174_v42 = vld [vmem:[#allocation2 + $0x6c] sm:$0xf]  ;;  %v5753_v33 = vrot.slane %v5246_v15, 5 }
 0x561   : > { %5994 = vrot.lane.b32.xlu1 %v5977_v19, %s8506_s20  ;;  %6282 = vrot.lane.b32.xlu0 %v6058_v35, %s8520_s9 }
 0x562   : > { %6074 = vrot.lane.b32.xlu2 %v6057_v59, %s8509_s23  ;;  %v11730_v49 = vpack.c.b16 %v6031_v37, %v6030_v29  ;;  %v5410_v37 = vrot.slane %v5408_v13, 5 }
 0x563   : > { %v5000_v32 = vpop.permute.xlu1 %4999 }
 0x564   : > { %v5154_v1 = vsel %vm11559_vm6, %v5000_v32, %v5153_v28  ;;  %v5008_v58 = vpop.permute.xlu2 %5007  ;;  %v5746_v28 = vrot.slane %v5243_v14, 5  ;;  %v5387_v32 = vor.u32 %v5386_v62, %v5383_v57  ;;  %v5414_v14 = vshll.u32 %v5246_v15, 16  ;;  %v5247_v61 = vld [vmem:[#allocation2 + $0x44] sm:$0x1] }
 0x565   : > { %5155 = vst [vmem:[#allocation2 + $0x48] sm:$0xf] %v5154_v1  ;;  %v5397_v1 = vor.u32 %v5396_v16, %v5392_v47  ;;  %v5424_v57 = vshll.u32 %v5247_v61, 16  ;;  %v11783_v16 = vld [vmem:[#allocation2 + $0x3c] sm:$0xff] }
 0x566   : > { %5163 = vst.msk [vmem:[#allocation2 + $0x58] sm:$0xf] %vm5113_vm5, %v5008_v58  ;;  %v5748_v34 = vrot.slane %v5746_v28, 4  ;;  %v5167_v58 = vld [vmem:[#allocation2 + $0x60] sm:$0xf]  ;;  %v5388_v45 = vrot.slane %v5387_v32, 4 }
 0x567   : > { %v5398_v48 = vrot.slane %v5397_v1, 4  ;;  %v5416_v29 = vrot.slane %v5414_v14, 5  ;;  %v5426_v32 = vrot.slane %v5424_v57, 5  ;;  %v5756_v1 = vrot.slane %v5247_v61, 5  ;;  %v8317_v57 = vld [vmem:[%s13067_s5 + $0x28] sm:$0xff] }
 0x568   : > { %v5750_v52 = vsel %vm9165_vm13, %v5748_v34, %v5749_v51  ;;  %v5393_v6 = vsel %vm8698_vm2, %v5388_v45, %v5392_v47  ;;  %v5178_v34 = vld [vmem:[#allocation2 + $0x74] sm:$0x1] }
 0x569   : > { %6144 = vrot.lane.b32.xlu1 %v11692_v23, %s8515_s17  ;;  %6109 = vrot.lane.b32.xlu0 %v11663_v8, %s8516_s13  ;;  %v6033_v41 = vunpack.c.l.b16 %v5750_v52  ;;  %v5403_v60 = vsel %vm8698_vm2, %v5398_v48, %v5402_v26  ;;  %v5952_v11 = vunpack.c.l.b16 %v5393_v6 }
 0x56a   : > { %6179 = vrot.lane.b32.xlu2 %v6058_v35, %s8518_s29 }
 0x56b   : > { %v5004_v3 = vpop.permute.xlu0 %5003 }
 0x56c   : > { %v5158_v56 = vsel %vm11569_vm12, %v5004_v3, %v5157_v12  ;;  %v5953_v3 = vunpack.c.l.b16 %v5403_v60 }
 0x56d   : > { %5159 = vst [vmem:[#allocation2 + $0x50] sm:$0x1] %v5158_v56  ;;  %v4578_v56 = vpop.f32.mrf.mxu1 }
 0x56e   : > { %v11767_v53 = vpack.c.b16 %v5953_v3, %v5952_v11 }
 0x571   : > { %6249 = vrot.lane.b32.xlu1 %v11709_v7, %s8519_s15  ;;  %6214 = vrot.lane.b32.xlu0 %v11717_v2, %s8517_s22 }
 0x572   : > { %6284 = vrot.lane.b32.xlu2 %v11730_v49, %s8520_s9 }
 0x573   : > { %v5006_v19 = vpop.permute.xlu1 %5005 }
 0x574   : > { %v5161_v4 = vsel %vm11559_vm6, %v5006_v19, %v5160_v21  ;;  %v5014_v59 = vpop.permute.xlu2 %5013  ;;  %v11762_v21 = vld [vmem:[%s13066_s4] ss:$0 sm:$0xff]  ;;  %v11765_v19 = vld [vmem:[#allocation2 + $0x30] sm:$0xff] }
 0x575   : > { %5162 = vst [vmem:[#allocation2 + $0x54] sm:$0xf] %v5161_v4  ;;  %v4579_v25 = vadd.f32 %v11762_v21, %v4578_v56  ;;  %v4581_v4 = vpop.f32.mrf.mxu3 }
 0x576   : > { %5170 = vst.msk [vmem:[#allocation2 + $0x64] sm:$0xf] %vm5113_vm5, %v5014_v59  ;;  %v5405_v59 = vshrl.u32 %v5245_v55, 16 }
 0x577   : > { %v4624_v46 = vmul.f32 0.01, %v4579_v25 }
 0x578   : > { %v5407_v18 = vrot.slane %v5405_v59, 4 }
 0x579   : > { %6076 = vrot.lane.b32.xlu1 %v6058_v35, %s8509_s23  ;;  %5996 = vrot.lane.b32.xlu0 %v11692_v23, %s8506_s20  ;;  %v5747_v35 = vsel %vm9165_vm13, %v8117_v0, %v5746_v28  ;;  %v4656_v28 = vmax.f32 %v4579_v25, %v4624_v46 }
 0x57a   : > { %v6032_v31 = vunpack.c.l.b16 %v5747_v35  ;;  %6111 = vrot.lane.b32.xlu2 %v11717_v2, %s8516_s13  ;;  %v5411_v62 = vor.u32 %v5410_v37, %v5407_v18  ;;  %v8118_v35 = vrot.slane %v5245_v55, 9  ;;  %v8318_v55 = vld [vmem:[%s13067_s5 + $0x30] sm:$0x30] }
 0x57b   : > { %v5010_v22 = vpop.permute.xlu0 %5009  ;;  %v4688_v0 = vpack.c.bf16 %v4656_v28, %v4656_v28 }
 0x57c   : > { %v5165_v24 = vsel %vm11569_vm12, %v5010_v22, %v5164_v44  ;;  %v11751_v12 = vpack.c.b16 %v6033_v41, %v6032_v31  ;;  %v5420_v22 = vrot.slane %v5418_v17, 4  ;;  %v5754_v3 = vsel %vm9165_vm13, %v8118_v35, %v5753_v33 }
 0x57d   : > { %5166 = vst [vmem:[#allocation2 + $0x5c] sm:$0x1] %v5165_v24  ;;  %v4582_v24 = vadd.f32 %v11762_v21, %v4581_v4  ;;  %v4583_v47 = vpop.f32.mrf.mxu3  ;;  %v4896_v59 = vshll.u32 %v4688_v0, 16  ;;  %v6034_v14 = vunpack.c.l.b16 %v5754_v3 }
 0x57e   : > { %v5421_v51 = vor.u32 %v5420_v22, %v5416_v29  ;;  %v4584_v52 = vadd.f32 %v11762_v21, %v4583_v47 }
 0x580   : > { %v4626_v31 = vmul.f32 0.01, %v4584_v52 }
 0x581   : > { %6181 = vrot.lane.b32.xlu1 %v11730_v49, %s8518_s29  ;;  %6146 = vrot.lane.b32.xlu0 %v11709_v7, %s8515_s17 }
 0x582   : > { %6216 = vrot.lane.b32.xlu2 %v11765_v19, %s8517_s22  ;;  %v4658_v46 = vmax.f32 %v4584_v52, %v4626_v31  ;;  %v5250_v31 = vld [vmem:[#allocation2 + $0x50] sm:$0x1] }
 0x583   : > { %v5012_v36 = vpop.permute.xlu1 %5011 }
 0x584   : > { %v5168_v10 = vsel %vm11559_vm6, %v5012_v36, %v5167_v58  ;;  %v5020_v23 = vpop.permute.xlu2 %5019  ;;  %v4625_v58 = vmul.f32 0.01, %v4582_v24  ;;  %v5422_v36 = vrot.slane %v5421_v51, 4  ;;  %v4690_v22 = vpack.c.bf16 %v4658_v46, %v4658_v46 }
 0x585   : > { %5169 = vst [vmem:[#allocation2 + $0x60] sm:$0xf] %v5168_v10  ;;  %v5755_v10 = vrot.slane %v5753_v33, 4  ;;  %v4586_v25 = vpop.f32.mrf.mxu3  ;;  %v8316_v33 = vld [vmem:[%s13067_s5 + $0x20] sm:$0xff] }
 0x586   : > { %5177 = vst.msk [vmem:[#allocation2 + $0x70] sm:$0xf] %vm5113_vm5, %v5020_v23  ;;  %v4893_v23 = vshrl.u32 %v4688_v0, 16  ;;  %v5427_v41 = vsel %vm8698_vm2, %v5422_v36, %v5426_v32  ;;  %v4657_v48 = vmax.f32 %v4582_v24, %v4625_v58  ;;  %v11841_v58 = vld [vmem:[#allocation2 + $0x4c] sm:$0xf] }
 0x587   : > { %v5757_v45 = vsel %vm9165_vm13, %v5755_v10, %v5756_v1  ;;  %v5955_v11 = vunpack.c.l.b16 %v5427_v41  ;;  %v11839_v1 = vld [vmem:[#allocation2 + $0x48] sm:$0xf]  ;;  %v5438_v35 = vshll.u32 %v11841_v58, 16  ;;  %v5442_v10 = vshrl.u32 %v11841_v58, 16  ;;  %v8315_v41 = vld [vmem:[%s13067_s5 + $0x18] sm:$0xff] }
 0x588   : > { %v11804_v56 = vrot.slane %v4893_v23, 7  ;;  %v4689_v4 = vpack.c.bf16 %v4657_v48, %v4657_v48  ;;  %v5429_v36 = vshrl.u32 %v11839_v1, 16 }
 0x589   : > { %6286 = vrot.lane.b32.xlu1 %v11751_v12, %s8520_s9  ;;  %6251 = vrot.lane.b32.xlu0 %v11767_v53, %s8519_s15 }
 0x58a   : > { %5998 = vrot.lane.b32.xlu2 %v11709_v7, %s8506_s20  ;;  %v5412_v7 = vrot.slane %v5411_v62, 4  ;;  %v4898_v61 = vor.u32 %v4896_v59, %v11804_v56  ;;  %v4905_v0 = vshll.u32 %v4689_v4, 16  ;;  %v5431_v3 = vrot.slane %v5429_v36, 4 }
 0x58b   : > { %v5016_v63 = vpop.permute.xlu0 %5015 }
 0x58c   : > { %v5172_v20 = vsel %vm11569_vm12, %v5016_v63, %v5171_v9  ;;  %v5417_v60 = vsel %vm8698_vm2, %v5412_v7, %v5416_v29  ;;  %v5181_v9 = vld [vmem:[#allocation2 + $0x78] sm:$0xf]  ;;  %v6035_v63 = vunpack.c.l.b16 %v5757_v45 }
 0x58d   : > { %5173 = vst [vmem:[#allocation2 + $0x68] sm:$0x1] %v5172_v20  ;;  %v8229_v20 = vld [vmem:[%s13067_s5 + $0x30] sm:$0xf]  ;;  %v5954_v13 = vunpack.c.l.b16 %v5417_v60  ;;  %v4588_v47 = vpop.f32.mrf.mxu3 }
 0x58e   : > { %v8230_v15 = vor.u32 %v8318_v55, %v8229_v20  ;;  %v11819_v37 = vpack.c.b16 %v6035_v63, %v6034_v14  ;;  %v5444_v63 = vrot.slane %v5442_v10, 4  ;;  %v8314_v20 = vld [vmem:[%s13067_s5 + $0x10] sm:$0xff] }
 0x58f   : > { %v11817_v18 = vpack.c.b16 %v5955_v11, %v5954_v13  ;;  %v5440_v11 = vrot.slane %v5438_v35, 5  ;;  %v5195_v10 = vld [vmem:[#allocation2 + $0x90] sm:$0xf] }
 0x591   : > { %6113 = vrot.lane.b32.xlu1 %v11765_v19, %s8516_s13  ;;  %6078 = vrot.lane.b32.xlu0 %v11730_v49, %s8509_s23  ;;  %v5445_v46 = vor.u32 %v5444_v63, %v5440_v11 }
 0x592   : > { %6148 = vrot.lane.b32.xlu2 %v11767_v53, %s8515_s17 }
 0x593   : > { %v5018_v50 = vpop.permute.xlu1 %5017 }
 0x594   : > { %v5175_v44 = vsel %vm11559_vm6, %v5018_v50, %v5174_v42  ;;  %v5026_v38 = vpop.permute.xlu2 %5025  ;;  %v6683_v50 = vsel %vm6681_vm10, %v8230_v15, 0  ;;  %v5448_v15 = vshll.u32 %v5250_v31, 16  ;;  %vm6458_vm10 = vcmask 490496  }
 0x595   : > { %5176 = vst [vmem:[#allocation2 + $0x6c] sm:$0xf] %v5175_v44  ;;  %6686 = vmatpush.bf16.msra.mxu2 %v6683_v50  ;;  %8327 = vmatpush.bf16.msra.mxu3 %v6683_v50  ;;  %v4587_v44 = vadd.f32 %v11762_v21, %v4586_v25 }
 0x596   : > { %5184 = vst.msk [vmem:[#allocation2 + $0x7c] sm:$0xf] %vm5113_vm5, %v5026_v38  ;;  %v4891_v38 = vrot.slane %v11647_v5, 4  ;;  %v5185_v5 = vld [vmem:[#allocation2 + $0x80] sm:$0x1] }
 0x597   : > { %v4627_v62 = vmul.f32 0.01, %v4587_v44 }
 0x598   : > { %v4899_v28 = vsel %vm8678_vm15, %v4891_v38, %v4898_v61  ;;  %v8313_v61 = vld [vmem:[%s13067_s5 + $0x8] sm:$0xff]  ;;  %v5763_v38 = vrot.slane %v5250_v31, 5 }
 0x599   : > { %6218 = vrot.lane.b32.xlu1 %v11783_v16, %s8517_s22  ;;  %6183 = vrot.lane.b32.xlu0 %v11751_v12, %s8518_s29  ;;  %v4659_v7 = vmax.f32 %v4587_v44, %v4627_v62  ;;  %v5192_v44 = vld [vmem:[#allocation2 + $0x8c] sm:$0x1]  ;;  %v8119_v62 = vrot.slane %v11839_v1, 9 }
 0x59a   : > { %6253 = vrot.lane.b32.xlu2 %v11817_v18, %s8519_s15  ;;  %6687 = vmatpush.bf16.msra.mxu2 %v8317_v57 }
 0x59b   : > { %v5022_v26 = vpop.permute.xlu0 %5021  ;;  %8328 = vmatpush.bf16.msra.mxu3 %v8317_v57  ;;  %v4691_v45 = vpack.c.bf16 %v4659_v7, %v4659_v7  ;;  %v5446_v57 = vrot.slane %v5445_v46, 4 }
 0x59c   : > { %v5179_v49 = vsel %vm11569_vm12, %v5022_v26, %v5178_v34  ;;  %v11800_v6 = vpop.permute.xlu2 %5992  ;;  %v4910_v34 = vshrl.u32 %v4690_v22, 16  ;;  %v4589_v26 = vadd.f32 %v11762_v21, %v4588_v47 }
 0x59d   : > { %5180 = vst [vmem:[#allocation2 + $0x74] sm:$0x1] %v5179_v49  ;;  %v5432_v49 = vshll.u32 %v11839_v1, 16  ;;  %v4919_v59 = vshrl.u32 %v4691_v45, 16 }
 0x59e   : > { %6688 = vmatpush.bf16.msra.mxu2 %v8316_v33  ;;  %v11852_v23 = vrot.slane %v4910_v34, 7  ;;  %v4628_v48 = vmul.f32 0.01, %v4589_v26 }
 0x59f   : > { %8329 = vmatpush.bf16.msra.mxu3 %v8316_v33  ;;  %v11881_v33 = vld [vmem:[#allocation2 + $0x48] sm:$0xff] }
 0x5a0   : > { %v4660_v13 = vmax.f32 %v4589_v26, %v4628_v48 }
 0x5a1   : > { %6000 = vrot.lane.b32.xlu1 %v11767_v53, %s8506_s20  ;;  %v4902_v53 = vshrl.u32 %v4689_v4, 16  ;;  %6288 = vrot.lane.b32.xlu0 %v11819_v37, %s8520_s9 }
 0x5a2   : > { %6080 = vrot.lane.b32.xlu2 %v11751_v12, %s8509_s23  ;;  %v5188_v12 = vld [vmem:[#allocation2 + $0x84] sm:$0xf]  ;;  %6689 = vmatpush.bf16.msra.mxu2 %v8315_v41 }
 0x5a3   : > { %v5024_v17 = vpop.permute.xlu1 %5023  ;;  %v4904_v24 = vrot.slane %v4902_v53, 7  ;;  %8330 = vmatpush.bf16.msra.mxu3 %v8315_v41  ;;  %v5450_v53 = vrot.slane %v5448_v15, 5 }
 0x5a4   : > { %v5182_v42 = vsel %vm11559_vm6, %v5024_v17, %v5181_v9  ;;  %v5032_v29 = vpop.permute.xlu2 %5031  ;;  %v5434_v9 = vrot.slane %v5432_v49, 5 }
 0x5a5   : > { %5183 = vst [vmem:[#allocation2 + $0x78] sm:$0xf] %v5182_v42  ;;  %v4907_v52 = vor.u32 %v4905_v0, %v4904_v24  ;;  %v4908_v4 = vrot.slane %v4904_v24, 4  ;;  %v5760_v42 = vrot.slane %v11841_v58, 5  ;;  %v4900_v0 = vrot.slane %v11804_v56, 4 }
 0x5a6   : > { %5191 = vst.msk [vmem:[#allocation2 + $0x88] sm:$0xf] %vm5113_vm5, %v5032_v29  ;;  %v5435_v17 = vor.u32 %v5434_v9, %v5431_v3  ;;  %6690 = vmatpush.bf16.msra.mxu2 %v8314_v20  ;;  %v4921_v29 = vrot.slane %v4919_v59, 7  ;;  %v5451_v58 = vsel %vm8698_vm2, %v5446_v57, %v5450_v53 }
 0x5a7   : > { %8331 = vmatpush.bf16.msra.mxu3 %v8314_v20  ;;  %v5762_v47 = vrot.slane %v5760_v42, 4  ;;  %v5761_v26 = vsel %vm9165_vm13, %v8119_v62, %v5760_v42  ;;  %v5957_v49 = vunpack.c.l.b16 %v5451_v58  ;;  %v11917_v42 = vld [vmem:[#allocation2 + $0x54] sm:$0xf] }
 0x5a8   : > { %v4925_v59 = vrot.slane %v4921_v29, 4 }
 0x5a9   : > { %5037 = vrot.lane.b32.xlu1 %v4899_v28, %s8504_s18  ;;  %6115 = vrot.lane.b32.xlu0 %v11783_v16, %s8516_s13  ;;  %v4913_v16 = vshll.u32 %v4690_v22, 16  ;;  %v4692_v22 = vpack.c.bf16 %v4660_v13, %v4660_v13  ;;  %v5436_v28 = vrot.slane %v5435_v17, 4  ;;  %v5764_v1 = vsel %vm9165_vm13, %v5762_v47, %v5763_v38 }
 0x5aa   : > { %6150 = vrot.lane.b32.xlu2 %v11817_v18, %s8515_s17  ;;  %6691 = vmatpush.bf16.msra.mxu2 %v8313_v61  ;;  %v6037_v35 = vunpack.c.l.b16 %v5764_v1 }
 0x5ab   : > { %v5028_v51 = vpop.permute.xlu0 %5027  ;;  %v4915_v55 = vor.u32 %v4913_v16, %v11852_v23  ;;  %8332 = vmatpush.bf16.msra.mxu3 %v8313_v61  ;;  %v4927_v7 = vshrl.u32 %v4692_v22, 16  ;;  %v5441_v56 = vsel %vm8698_vm2, %v5436_v28, %v5440_v11  ;;  %v8294_v11 = vld [vmem:[#allocation2] sm:$0xff]  ;;  %v4930_v63 = vshll.u32 %v4692_v22, 16  ;;  %v11920_v61 = vld [vmem:[#allocation2 + $0x58] sm:$0xf] }
 0x5ac   : > { %v5186_v32 = vsel %vm11569_vm12, %v5028_v51, %v5185_v5  ;;  %v11866_v14 = vpop.permute.xlu2 %6142  ;;  %v8312_v51 = vld [vmem:[%s13067_s5] sm:$0xff]  ;;  %v5956_v41 = vunpack.c.l.b16 %v5441_v56  ;;  %v5466_v57 = vshrl.u32 %v11920_v61, 16 }
 0x5ad   : > { %5187 = vst [vmem:[#allocation2 + $0x80] sm:$0x1] %v5186_v32  ;;  %v4916_v50 = vsel %vm8678_vm15, %v4908_v4, %v4915_v55  ;;  %v4922_v32 = vshll.u32 %v4691_v45, 16  ;;  %v4929_v16 = vrot.slane %v4927_v7, 7  ;;  %v4591_v45 = vpop.f32.mrf.mxu3  ;;  %v6316_v4 = vsel %vm13138_vm11, %v8294_v11, %v11800_v6 }
 0x5ae   : > { %6692 = vmatpush.bf16.msra.mxu2 %v8312_v51  ;;  %v11900_v31 = vpack.c.b16 %v5957_v49, %v5956_v41  ;;  %v4592_v20 = vadd.f32 %v11762_v21, %v4591_v45  ;;  %v5453_v6 = vshrl.u32 %v11917_v42, 16 }
 0x5af   : > { %8333 = vmatpush.bf16.msra.mxu3 %v8312_v51  ;;  %v4934_v55 = vrot.slane %v4929_v16, 4  ;;  %v4932_v15 = vor.u32 %v4930_v63, %v4929_v16  ;;  %v5253_v51 = vld [vmem:[#allocation2 + $0x5c] sm:$0x1]  ;;  %v8120_v63 = vrot.slane %v11917_v42, 9 }
 0x5b0   : > { %v4629_v13 = vmul.f32 0.01, %v4592_v20 }
 0x5b1   : > { %5041 = vrot.lane.b32.xlu1 %v4907_v52, %s8504_s18  ;;  %6185 = vrot.lane.b32.xlu0 %v11819_v37, %s8518_s29  ;;  %v4924_v52 = vor.u32 %v4922_v32, %v4921_v29  ;;  %v5456_v29 = vshll.u32 %v11917_v42, 16 }
 0x5b2   : > { %6220 = vrot.lane.b32.xlu2 %v11881_v33, %s8517_s22  ;;  %v4661_v22 = vmax.f32 %v4592_v20, %v4629_v13 }
 0x5b3   : > { %v5030_v60 = vpop.permute.xlu1 %5029 }
 0x5b4   : > { %v5189_v25 = vsel %vm11559_vm6, %v5030_v60, %v5188_v12  ;;  %v11897_v36 = vpop.permute.xlu2 %6247  ;;  %v6036_v12 = vunpack.c.l.b16 %v5761_v26  ;;  %v4693_v32 = vpack.c.bf16 %v4661_v22, %v4661_v22  ;;  %v5472_v26 = vshll.u32 %v5253_v51, 16 }
 0x5b5   : > { %5190 = vst [vmem:[#allocation2 + $0x84] sm:$0xf] %v5189_v25  ;;  %v4593_v53 = vpop.f32.mrf.mxu3 }
 0x5b6   : > { %v11902_v60 = vpack.c.b16 %v6037_v35, %v6036_v12  ;;  %v4936_v49 = vshrl.u32 %v4693_v32, 16  ;;  %v5767_v12 = vrot.slane %v11920_v61, 5  ;;  %v4939_v13 = vshll.u32 %v4693_v32, 16 }
 0x5b8   : > { %v11956_v20 = vrot.slane %v4936_v49, 7 }
 0x5b9   : > { %5043 = vrot.lane.b32.xlu1 %v4916_v50, %s8504_s18  ;;  %5039 = vrot.lane.b32.xlu0 %v4900_v0, %s8504_s18  ;;  %v4917_v50 = vrot.slane %v11852_v23, 4  ;;  %v5462_v23 = vshll.u32 %v11920_v61, 16  ;;  %v5455_v0 = vrot.slane %v5453_v6, 4  ;;  %v11972_v61 = vld [vmem:[#allocation2 + $0x64] sm:$0xf] }
 0x5ba   : > { %6255 = vrot.lane.b32.xlu2 %v11900_v31, %s8519_s15 }
 0x5bb   : > { %v6108_v5 = vpop.permute.xlu1 %6107  ;;  %v5034_v24 = vpop.permute.xlu0 %5033  ;;  %v5464_v1 = vrot.slane %v5462_v23, 5 }
 0x5bc   : > { %v5193_v34 = vsel %vm11569_vm12, %v5034_v24, %v5192_v44  ;;  %v11911_v25 = vpop.permute.xlu2 %6074  ;;  %v4933_v44 = vsel %vm8678_vm15, %v4925_v59, %v4932_v15  ;;  %v4594_v24 = vadd.f32 %v11762_v21, %v4593_v53  ;;  %v4941_v53 = vor.u32 %v4939_v13, %v11956_v20  ;;  %v12304_v54 = vld [vmem:[#allocation2 + $0x84] sm:$0xf] }
 0x5bd   : > { %5194 = vst [vmem:[#allocation2 + $0x8c] sm:$0x1] %v5193_v34  ;;  %v5458_v34 = vrot.slane %v5456_v29, 5  ;;  %v4596_v35 = vpop.f32.mrf.mxu3 }
 0x5be   : > { %v4630_v7 = vmul.f32 0.01, %v4594_v24 }
 0x5c0   : > { %v4662_v16 = vmax.f32 %v4594_v24, %v4630_v7  ;;  %v4597_v7 = vadd.f32 %v11762_v21, %v4596_v35 }
 0x5c1   : > { %5047 = vrot.lane.b32.xlu1 %v4924_v52, %s8504_s18  ;;  %6290 = vrot.lane.b32.xlu0 %v11902_v60, %s8520_s9  ;;  %v5468_v52 = vrot.slane %v5466_v57, 4 }
 0x5c2   : > { %5045 = vrot.lane.b32.xlu2 %v4917_v50, %s8504_s18  ;;  %v4694_v59 = vpack.c.bf16 %v4662_v16, %v4662_v16  ;;  %v5768_v50 = vsel %vm9165_vm13, %v8120_v63, %v5767_v12 }
 0x5c3   : > { %v5036_v48 = vpop.permute.xlu1 %5035  ;;  %v6073_v9 = vpop.permute.xlu0 %6072  ;;  %v5469_v41 = vor.u32 %v5468_v52, %v5464_v1  ;;  %v6038_v24 = vunpack.c.l.b16 %v5768_v50 }
 0x5c4   : > { %v5196_v3 = vsel %vm11559_vm6, %v5036_v48, %v5195_v10  ;;  %v6363_v17 = vsel %vm13137_vm1, %v6316_v4, %v6073_v9  ;;  %v11932_v62 = vpop.permute.xlu2 %6179  ;;  %v11944_v10 = vld [vmem:[#allocation2 + $0x54] sm:$0xff]  ;;  %v5770_v9 = vrot.slane %v5253_v51, 5  ;;  %v5769_v4 = vrot.slane %v5767_v12, 4 }
 0x5c5   : > { %5197 = vst [vmem:[#allocation2 + $0x90] sm:$0xf] %v5196_v3  ;;  %v6395_v38 = vsel %vm13427_vm4, %v6363_v17, %v6108_v5  ;;  %vm6523_vm4 = vcmask 687104   ;;  %v4947_v16 = vshll.u32 %v4694_v59, 16 }
 0x5c6   : > { %v6427_v5 = vsel %vm4336_vm9, %v6395_v38, %v11866_v14  ;;  %v5459_v14 = vor.u32 %v5458_v34, %v5455_v0  ;;  %v5771_v17 = vsel %vm9165_vm13, %v5769_v4, %v5770_v9  ;;  %v4944_v38 = vshrl.u32 %v4694_v59, 16 }
 0x5c7   : > { %v6039_v22 = vunpack.c.l.b16 %v5771_v17  ;;  %v5490_v34 = vshrl.u32 %v11972_v61, 16  ;;  %v4942_v4 = vrot.slane %v11956_v20, 4 }
 0x5c8   : > { %v5460_v11 = vrot.slane %v5459_v14, 4 }
 0x5c9   : > { %5051 = vrot.lane.b32.xlu1 %v4934_v55, %s8504_s18  ;;  %5049 = vrot.lane.b32.xlu0 %v4933_v44, %s8504_s18  ;;  %v5470_v55 = vrot.slane %v5469_v41, 4  ;;  %v11975_v44 = vld [vmem:[#allocation2 + $0x60] sm:$0xf]  ;;  %v11990_v52 = vpack.c.b16 %v6039_v22, %v6038_v24  ;;  %v5492_v12 = vrot.slane %v5490_v34, 4 }
 0x5ca   : > { %6002 = vrot.lane.b32.xlu2 %v11817_v18, %s8506_s20  ;;  %v5465_v42 = vsel %vm8698_vm2, %v5460_v11, %v5464_v1  ;;  %v5477_v51 = vshrl.u32 %v11975_v44, 16  ;;  %v5480_v0 = vshll.u32 %v11975_v44, 16  ;;  %v4631_v11 = vmul.f32 0.01, %v4597_v7 }
 0x5cb   : > { %v6213_v46 = vpop.permute.xlu1 %6212  ;;  %v6178_v28 = vpop.permute.xlu0 %6177  ;;  %v5958_v23 = vunpack.c.l.b16 %v5465_v42 }
 0x5cc   : > { %v6460_v47 = vsel %vm6458_vm10, %v6427_v5, %v6178_v28  ;;  %v11947_v45 = vpop.permute.xlu2 %6284  ;;  %v4598_v28 = vpop.f32.mrf.mxu3  ;;  %v5486_v5 = vshll.u32 %v11972_v61, 16  ;;  %v5479_v14 = vrot.slane %v5477_v51, 4  ;;  %v5482_v49 = vrot.slane %v5480_v0, 5 }
 0x5cd   : > { %v6492_v56 = vsel %vm4475_vm8, %v6460_v47, %v6213_v46  ;;  %v5774_v0 = vrot.slane %v11972_v61, 5 }
 0x5ce   : > { %v6525_v18 = vsel %vm6523_vm4, %v6492_v56, %v11897_v36  ;;  %v5488_v41 = vrot.slane %v5486_v5, 5 }
 0x5d1   : > { %6117 = vrot.lane.b32.xlu1 %v11881_v33, %s8516_s13  ;;  %6082 = vrot.lane.b32.xlu0 %v11819_v37, %s8509_s23  ;;  %v5474_v37 = vrot.slane %v5472_v26, 5  ;;  %v11994_v26 = vld [vmem:[#allocation2 + $0x68] sm:$0x1] }
 0x5d2   : > { %6152 = vrot.lane.b32.xlu2 %v11900_v31, %s8515_s17 }
 0x5d3   : > { %v5995_v58 = vpop.permute.xlu1 %5994  ;;  %v6283_v48 = vpop.permute.xlu0 %6282  ;;  %v5475_v36 = vsel %vm8698_vm2, %v5470_v55, %v5474_v37  ;;  %v5483_v55 = vor.u32 %v5482_v49, %v5479_v14  ;;  %v5776_v14 = vrot.slane %v5774_v0, 4 }
 0x5d4   : > { %v6558_v3 = vsel %vm6556_vm7, %v6525_v18, %v6283_v48  ;;  %v6319_v46 = vsel %vm13138_vm11, %v11634_v43, %v5995_v58  ;;  %v11977_v6 = vpop.permute.xlu2 %6111  ;;  %v5959_v29 = vunpack.c.l.b16 %v5475_v36  ;;  %v4599_v58 = vadd.f32 %v11762_v21, %v4598_v28 }
 0x5d5   : > { %8231 = vmatmul.msk.bf16.vlgmr.msra.gmra.mxu2 %vm6648_vm3, %v6558_v3  ;;  %v6365_v57 = vsel %vm13137_vm1, %v6319_v46, %v11911_v25  ;;  %v4946_v25 = vrot.slane %v4944_v38, 7  ;;  %v5496_v3 = vshll.u32 %v11994_v26, 16  ;;  %v5484_v42 = vrot.slane %v5483_v55, 4 }
 0x5d6   : > { %v11988_v1 = vpack.c.b16 %v5959_v29, %v5958_v23  ;;  %v4632_v48 = vmul.f32 0.01, %v4599_v58 }
 0x5d7   : > { %v4949_v37 = vor.u32 %v4947_v16, %v4946_v25  ;;  %v4951_v36 = vrot.slane %v4946_v25, 4  ;;  %v5498_v17 = vrot.slane %v5496_v3, 5 }
 0x5d8   : > { %v4664_v13 = vmax.f32 %v4599_v58, %v4632_v48 }
 0x5d9   : > { %6222 = vrot.lane.b32.xlu1 %v11944_v10, %s8517_s22  ;;  %6187 = vrot.lane.b32.xlu0 %v11902_v60, %s8518_s29  ;;  %v4950_v46 = vsel %vm8678_vm15, %v4942_v4, %v4949_v37 }
 0x5da   : > { %6257 = vrot.lane.b32.xlu2 %v11988_v1, %s8519_s15  ;;  %v4696_v20 = vpack.c.bf16 %v4664_v13, %v4664_v13 }
 0x5db   : > { %v6145_v15 = vpop.permute.xlu1 %6144  ;;  %v6110_v43 = vpop.permute.xlu0 %6109 }
 0x5dc   : > { %v6397_v47 = vsel %vm13428_vm0, %v6365_v57, %v6110_v43  ;;  %v12000_v18 = vpop.permute.xlu2 %6216  ;;  %v5489_v43 = vsel %vm8698_vm2, %v5484_v42, %v5488_v41  ;;  %v4961_v57 = vshrl.u32 %v4696_v20, 16 }
 0x5dd   : > { %v6429_v56 = vsel %vm4336_vm9, %v6397_v47, %v6145_v15  ;;  %v5493_v15 = vor.u32 %v5492_v12, %v5488_v41  ;;  %v5960_v24 = vunpack.c.l.b16 %v5489_v43  ;;  %v12044_v41 = vld [vmem:[#allocation2 + $0x60] sm:$0xff] }
 0x5de   : > { %v6462_v21 = vsel %vm6458_vm10, %v6429_v56, %v11932_v62  ;;  %v4963_v34 = vrot.slane %v4961_v57, 7  ;;  %v8121_v56 = vrot.slane %v11975_v44, 9 }
 0x5df   : > { %v5494_v50 = vrot.slane %v5493_v15, 4  ;;  %v5258_v15 = vld [vmem:[#allocation2 + $0x70] sm:$0xf] }
 0x5e0   : > { %v5775_v44 = vsel %vm9165_vm13, %v8121_v56, %v5774_v0  ;;  %v5510_v30 = vshll.u32 %v5258_v15, 16 }
 0x5e1   : > { %5053 = vrot.lane.b32.xlu1 %v4941_v53, %s8504_s18  ;;  %6292 = vrot.lane.b32.xlu0 %v11990_v52, %s8520_s9  ;;  %v5499_v38 = vsel %vm8698_vm2, %v5494_v50, %v5498_v17  ;;  %v5781_v50 = vrot.slane %v5258_v15, 5 }
 0x5e2   : > { %5055 = vrot.lane.b32.xlu2 %v4950_v46, %s8504_s18  ;;  %v5961_v23 = vunpack.c.l.b16 %v5499_v38 }
 0x5e3   : > { %v6250_v32 = vpop.permute.xlu1 %6249  ;;  %v6215_v35 = vpop.permute.xlu0 %6214 }
 0x5e4   : > { %v6494_v9 = vsel %vm4475_vm8, %v6462_v21, %v6215_v35  ;;  %v12017_v53 = vpop.permute.xlu2 %5998  ;;  %v12032_v51 = vpack.c.b16 %v5961_v23, %v5960_v24 }
 0x5e5   : > { %v6527_v63 = vsel %vm6523_vm4, %v6494_v9, %v6250_v32  ;;  %v6325_v42 = vsel %vm13138_vm11, %v11717_v2, %v12017_v53  ;;  %v5783_v2 = vrot.slane %v5781_v50, 4 }
 0x5e6   : > { %v6560_v59 = vsel %vm6556_vm7, %v6527_v63, %v11947_v45 }
 0x5e7   : > { %8232 = vmatmul.msk.bf16.gmra.mxu2 %vm6648_vm3, %v6560_v59 }
 0x5e9   : > { %6004 = vrot.lane.b32.xlu1 %v11900_v31, %s8506_s20  ;;  %v4663_v31 = vmax.f32 %v4597_v7, %v4631_v11  ;;  %5057 = vrot.lane.b32.xlu0 %v4951_v36, %s8504_s18  ;;  %v4964_v7 = vshll.u32 %v4696_v20, 16  ;;  %v6040_v11 = vunpack.c.l.b16 %v5775_v44  ;;  %v5514_v36 = vshrl.u32 %v5258_v15, 16  ;;  %v5206_v15 = vld [vmem:[#allocation2 + $0xa4] sm:$0x1] }
 0x5ea   : > { %6084 = vrot.lane.b32.xlu2 %v11902_v60, %s8509_s23  ;;  %v5777_v60 = vrot.slane %v11994_v26, 5  ;;  %v5512_v20 = vrot.slane %v5510_v30, 5 }
 0x5eb   : > { %v6077_v62 = vpop.permute.xlu1 %6076  ;;  %v5997_v45 = vpop.permute.xlu0 %5996  ;;  %v4695_v29 = vpack.c.bf16 %v4663_v31, %v4663_v31  ;;  %v4966_v49 = vor.u32 %v4964_v7, %v4963_v34  ;;  %v5259_v31 = vld [vmem:[#allocation2 + $0x74] sm:$0x1] }
 0x5ec   : > { %v6322_v22 = vsel %vm13138_vm11, %v11663_v8, %v5997_v45  ;;  %v12035_v32 = vpop.permute.xlu2 %6148  ;;  %v5784_v23 = vrot.slane %v5259_v31, 5  ;;  %v5520_v57 = vshll.u32 %v5259_v31, 16 }
 0x5ed   : > { %v4953_v5 = vshrl.u32 %v4695_v29, 16  ;;  %v6367_v47 = vsel %vm13137_vm1, %v6322_v22, %v6077_v62  ;;  %v4956_v9 = vshll.u32 %v4695_v29, 16  ;;  %v5516_v22 = vrot.slane %v5514_v36, 4 }
 0x5ee   : > { %v6399_v58 = vsel %vm13428_vm0, %v6367_v47, %v11977_v6  ;;  %v5778_v6 = vsel %vm9165_vm13, %v5776_v14, %v5777_v60 }
 0x5ef   : > { %v4955_v25 = vrot.slane %v4953_v5, 7  ;;  %v6041_v48 = vunpack.c.l.b16 %v5778_v6  ;;  %v5517_v5 = vor.u32 %v5516_v22, %v5512_v20 }
 0x5f1   : > { %6154 = vrot.lane.b32.xlu1 %v11988_v1, %s8515_s17  ;;  %6119 = vrot.lane.b32.xlu0 %v11944_v10, %s8516_s13  ;;  %v4959_v16 = vrot.slane %v4955_v25, 4  ;;  %v4958_v4 = vor.u32 %v4956_v9, %v4955_v25  ;;  %v12065_v59 = vpack.c.b16 %v6041_v48, %v6040_v11  ;;  %v5518_v56 = vrot.slane %v5517_v5, 4  ;;  %v5202_v11 = vld [vmem:[#allocation2 + $0x9c] sm:$0xf] }
 0x5f2   : > { %6189 = vrot.lane.b32.xlu2 %v11990_v52, %s8518_s29 }
 0x5f3   : > { %v6182_v28 = vpop.permute.xlu1 %6181  ;;  %v6147_v8 = vpop.permute.xlu0 %6146  ;;  %v4967_v3 = vsel %vm8678_vm15, %v4959_v16, %v4966_v49  ;;  %vm13429_vm15 = vmmov %vm13428_vm0 }
 0x5f4   : > { %v6431_v10 = vsel %vm4336_vm9, %v6399_v58, %v6147_v8  ;;  %v12055_v26 = vpop.permute.xlu2 %6253  ;;  %v5785_v8 = vsel %vm9165_vm13, %v5783_v2, %v5784_v23  ;;  %v5522_v58 = vrot.slane %v5520_v57, 5 }
 0x5f5   : > { %v6464_v12 = vsel %vm6458_vm10, %v6431_v10, %v6182_v28  ;;  %v4968_v28 = vrot.slane %v4963_v34, 4  ;;  %v6043_v7 = vunpack.c.l.b16 %v5785_v8  ;;  %v12139_v8 = vld [vmem:[#allocation2 + $0x78] sm:$0xf] }
 0x5f6   : > { %v6496_v21 = vsel %vm4475_vm8, %v6464_v12, %v12000_v18  ;;  %v5257_v18 = vld [vmem:[#allocation2 + $0x6c] sm:$0xf]  ;;  %v5523_v49 = vsel %vm8698_vm2, %v5518_v56, %v5522_v58 }
 0x5f7   : > { %v5501_v62 = vshrl.u32 %v5257_v18, 16  ;;  %v5504_v13 = vshll.u32 %v5257_v18, 16  ;;  %v8122_v24 = vrot.slane %v5257_v18, 9  ;;  %v5963_v48 = vunpack.c.l.b16 %v5523_v49 }
 0x5f9   : > { %6259 = vrot.lane.b32.xlu1 %v12032_v51, %s8519_s15  ;;  %6224 = vrot.lane.b32.xlu0 %v12044_v41, %s8517_s22  ;;  %v5503_v29 = vrot.slane %v5501_v62, 4  ;;  %v5506_v43 = vrot.slane %v5504_v13, 5  ;;  %v5266_v13 = vld [vmem:[#allocation2 + $0x90] sm:$0xf] }
 0x5fa   : > { %6294 = vrot.lane.b32.xlu2 %v12065_v59, %s8520_s9 }
 0x5fb   : > { %v6287_v61 = vpop.permute.xlu1 %6286  ;;  %v6252_v35 = vpop.permute.xlu0 %6251  ;;  %v5507_v53 = vor.u32 %v5506_v43, %v5503_v29 }
 0x5fc   : > { %v6529_v37 = vsel %vm6523_vm4, %v6496_v21, %v6252_v35  ;;  %v12070_v17 = vpop.permute.xlu2 %6080 }
 0x5fd   : > { %v6562_v63 = vsel %vm6556_vm7, %v6529_v37, %v6287_v61  ;;  %v5508_v10 = vrot.slane %v5507_v53, 4 }
 0x5fe   : > { %8233 = vmatmul.msk.bf16.gmra.mxu2 %vm6648_vm3, %v6562_v63 }
 0x5ff   : > { %v5513_v12 = vsel %vm8698_vm2, %v5508_v10, %v5512_v20  ;;  %v5199_v20 = vld [vmem:[#allocation2 + $0x98] sm:$0x1] }
 0x601   : > { %5061 = vrot.lane.b32.xlu1 %v4967_v3, %s8504_s18  ;;  %5059 = vrot.lane.b32.xlu0 %v4958_v4, %s8504_s18  ;;  %v12108_v3 = vld [vmem:[#allocation2 + $0x6c] sm:$0xff] }
 0x602   : > { %5063 = vrot.lane.b32.xlu2 %v4968_v28, %s8504_s18  ;;  %v5209_v28 = vld [vmem:[#allocation2 + $0xa8] sm:$0xf] }
 0x603   : > { %v6114_v55 = vpop.permute.xlu1 %6113  ;;  %v6079_v46 = vpop.permute.xlu0 %6078 }
 0x604   : > { %v6369_v45 = vsel %vm13137_vm1, %v6325_v42, %v6079_v46  ;;  %v6151_v47 = vpop.permute.xlu2 %6150  ;;  %v5573_v42 = vshrl.u32 %v5266_v13, 16 }
 0x606   : > { %v5575_v23 = vrot.slane %v5573_v42, 4 }
 0x609   : > { %6086 = vrot.lane.b32.xlu1 %v11990_v52, %s8509_s23  ;;  %v6401_v52 = vsel %vm13429_vm15, %v6369_v45, %v6114_v55  ;;  %6006 = vrot.lane.b32.xlu0 %v11988_v1, %s8506_s20  ;;  %v5782_v1 = vsel %vm9165_vm13, %v8122_v24, %v5781_v50  ;;  %v5576_v50 = vshll.u32 %v5266_v13, 16  ;;  %vm13430_vm15 = vmmov %vm13428_vm0 }
 0x60a   : > { %v6433_v34 = vsel %vm4336_vm9, %v6401_v52, %v12035_v32  ;;  %v6042_v61 = vunpack.c.l.b16 %v5782_v1  ;;  %6121 = vrot.lane.b32.xlu2 %v12044_v41, %s8516_s13  ;;  %v5962_v41 = vunpack.c.l.b16 %v5513_v12  ;;  %v5525_v1 = vshrl.u32 %v12139_v8, 16 }
 0x60b   : > { %v6219_v38 = vpop.permute.xlu1 %6218  ;;  %v6184_v0 = vpop.permute.xlu0 %6183  ;;  %v5578_v57 = vrot.slane %v5576_v50, 5 }
 0x60c   : > { %v6466_v60 = vsel %vm6458_vm10, %v6433_v34, %v6184_v0  ;;  %v12098_v32 = vpack.c.b16 %v6043_v7, %v6042_v61  ;;  %v6221_v6 = vpop.permute.xlu2 %6220  ;;  %v12110_v37 = vpack.c.b16 %v5963_v48, %v5962_v41 }
 0x60d   : > { %v6498_v14 = vsel %vm4475_vm8, %v6466_v60, %v6219_v38  ;;  %v5579_v58 = vor.u32 %v5578_v57, %v5575_v23 }
 0x60e   : > { %v6531_v44 = vsel %vm6523_vm4, %v6498_v14, %v12055_v26  ;;  %v8125_v14 = vrot.slane %v5266_v13, 9 }
 0x60f   : > { %v5580_v48 = vrot.slane %v5579_v58, 4 }
 0x611   : > { %6191 = vrot.lane.b32.xlu1 %v12065_v59, %s8518_s29  ;;  %6156 = vrot.lane.b32.xlu0 %v12032_v51, %s8515_s17 }
 0x612   : > { %6226 = vrot.lane.b32.xlu2 %v12108_v3, %s8517_s22 }
 0x613   : > { %v6001_v25 = vpop.permute.xlu1 %6000  ;;  %v6289_v16 = vpop.permute.xlu0 %6288 }
 0x614   : > { %v6564_v21 = vsel %vm6556_vm7, %v6531_v44, %v6289_v16  ;;  %v6256_v26 = vpop.permute.xlu2 %6255  ;;  %v6328_v62 = vsel %vm13138_vm11, %v11765_v19, %v6001_v25  ;;  %v5213_v16 = vld [vmem:[#allocation2 + $0xb0] sm:$0x1] }
 0x615   : > { %8234 = vmatmul.msk.bf16.gmra.mxu2 %vm6648_vm3, %v6564_v21  ;;  %v6371_v46 = vsel %vm13137_vm1, %v6328_v62, %v12070_v17  ;;  %v12134_v17 = vld [vmem:[#allocation2 + $0x7c] sm:$0xf]  ;;  %v5528_v21 = vshll.u32 %v12139_v8, 16 }
 0x616   : > { %v5538_v25 = vshrl.u32 %v12134_v17, 16 }
 0x617   : > { %v5530_v50 = vrot.slane %v5528_v21, 5 }
 0x618   : > { %v5540_v23 = vrot.slane %v5538_v25, 4 }
 0x619   : > { %6296 = vrot.lane.b32.xlu1 %v12098_v32, %s8520_s9  ;;  %6261 = vrot.lane.b32.xlu0 %v12110_v37, %s8519_s15 }
 0x61b   : > { %v5038_v35 = vpop.permute.xlu1 %5037  ;;  %v6116_v9 = vpop.permute.xlu0 %6115 }
 0x61c   : > { %5198 = vst.msk [vmem:[#allocation2 + $0x94] sm:$0xf] %vm5113_vm5, %v5038_v35  ;;  %v5046_v4 = vpop.permute.xlu2 %5045 }
 0x61d   : > { %v5207_v30 = vsel %vm11569_vm12, %v5046_v4, %v5206_v15 }
 0x61e   : > { %5208 = vst [vmem:[#allocation2 + $0xa4] sm:$0x1] %v5207_v30 }
 0x621   : > { %6008 = vrot.lane.b32.xlu0 %v12032_v51, %s8506_s20  ;;  %v6403_v51 = vsel %vm13428_vm0, %v6371_v46, %v6116_v9 }
 0x622   : > { %v6435_v19 = vsel %vm4336_vm9, %v6403_v51, %v6151_v47  ;;  %v5534_v47 = vshll.u32 %v12134_v17, 16 }
 0x623   : > { %v5042_v63 = vpop.permute.xlu1 %5041  ;;  %v6186_v18 = vpop.permute.xlu0 %6185  ;;  %v5267_v31 = vld [vmem:[#allocation2 + $0x94] sm:$0xf] }
 0x624   : > { %v5203_v55 = vsel %vm11559_vm6, %v5042_v63, %v5202_v11  ;;  %v12129_v45 = vpop.permute.xlu2 %6002  ;;  %v5582_v29 = vshll.u32 %v5267_v31, 16  ;;  %v5586_v43 = vshrl.u32 %v5267_v31, 16  ;;  %v6468_v52 = vsel %vm6458_vm10, %v6435_v19, %v6186_v18 }
 0x625   : > { %5204 = vst [vmem:[#allocation2 + $0x9c] sm:$0xf] %v5203_v55  ;;  %v6500_v34 = vsel %vm4475_vm8, %v6468_v52, %v6221_v6  ;;  %v5802_v60 = vrot.slane %v5267_v31, 5  ;;  %v12151_v12 = vrot.slane %v5534_v47, 5  ;;  %v5527_v18 = vrot.slane %v5525_v1, 4 }
 0x626   : > { %v5584_v5 = vrot.slane %v5582_v29, 5  ;;  %v5588_v0 = vrot.slane %v5586_v43, 4  ;;  %v6533_v56 = vsel %vm6523_vm4, %v6500_v34, %v6256_v26  ;;  %v12176_v43 = vld [vmem:[#allocation2 + $0x80] sm:$0x1] }
 0x627   : > { %v5803_v41 = vsel %vm9165_vm13, %v8125_v14, %v5802_v60  ;;  %v5804_v35 = vrot.slane %v5802_v60, 4  ;;  %v5541_v1 = vor.u32 %v5540_v23, %v12151_v12 }
 0x628   : > { %v5589_v61 = vor.u32 %v5588_v0, %v5584_v5  ;;  %v5585_v55 = vsel %vm8698_vm2, %v5580_v48, %v5584_v5  ;;  %v6048_v46 = vunpack.c.l.b16 %v5803_v41  ;;  %v5531_v5 = vor.u32 %v5530_v50, %v5527_v18 }
 0x629   : > { %v5544_v0 = vshll.u32 %v12176_v43, 16 }
 0x62a   : > { %v5590_v13 = vrot.slane %v5589_v61, 4 }
 0x62b   : > { %v5044_v36 = vpop.permute.xlu1 %5043  ;;  %v5040_v38 = vpop.permute.xlu0 %5039  ;;  %v5546_v14 = vrot.slane %v5544_v0, 5 }
 0x62c   : > { %5205 = vst.msk [vmem:[#allocation2 + $0xa0] sm:$0xf] %vm5113_vm5, %v5044_v36  ;;  %v5200_v22 = vsel %vm11569_vm12, %v5040_v38, %v5199_v20  ;;  %v12146_v7 = vpop.permute.xlu2 %6152  ;;  %v12158_v11 = vld [vmem:[#allocation2 + $0x9c] sm:$0xf] }
 0x62d   : > { %5201 = vst [vmem:[#allocation2 + $0x98] sm:$0x1] %v5200_v22  ;;  %v5597_v42 = vshrl.u32 %v12158_v11, 16  ;;  %v5600_v20 = vshll.u32 %v12158_v11, 16  ;;  %v5968_v22 = vunpack.c.l.b16 %v5585_v55  ;;  %v8126_v41 = vrot.slane %v12158_v11, 9  ;;  %v8429_v55 = vld [vmem:[#allocation2 + $0x3c] sm:$0xff] }
 0x62e   : > { %v6331_v11 = vsel %vm13138_vm11, %v8429_v55, %v12129_v45 }
 0x62f   : > { %v5599_v47 = vrot.slane %v5597_v42, 4  ;;  %v5602_v34 = vrot.slane %v5600_v20, 5 }
 0x633   : > { %v5048_v24 = vpop.permute.xlu1 %5047  ;;  %v8307_v2 = vld [vmem:[#allocation2 + $0x9c] sm:$0xff]  ;;  %v6291_v10 = vpop.permute.xlu0 %6290 }
 0x634   : > { %v5210_v53 = vsel %vm11559_vm6, %v5048_v24, %v5209_v28  ;;  %6131 = vrot.lane.b32.xlu0 %v8307_v2, %s8516_s13  ;;  %v12149_v49 = vld [vmem:[#allocation2 + $0xa0] sm:$0xf]  ;;  %v6566_v6 = vsel %vm6556_vm7, %v6533_v56, %v6291_v10  ;;  %v5268_v44 = vld [vmem:[#allocation2 + $0x98] sm:$0x1]  ;;  %v12180_v57 = vpop.permute.xlu2 %6257  ;;  %v5532_v56 = vrot.slane %v5531_v5, 4 }
 0x635   : > { %5211 = vst [vmem:[#allocation2 + $0xa8] sm:$0xf] %v5210_v53  ;;  %8235 = vmatmul.msk.bf16.gmra.mxu2 %vm6648_vm3, %v6566_v6  ;;  %v5805_v26 = vrot.slane %v5268_v44, 5  ;;  %v5592_v9 = vshll.u32 %v5268_v44, 16  ;;  %v5606_v15 = vshll.u32 %v12149_v49, 16  ;;  %v5610_v4 = vshrl.u32 %v12149_v49, 16 }
 0x636   : > { %v5809_v24 = vrot.slane %v12149_v49, 5  ;;  %v5271_v53 = vld [vmem:[#allocation2 + $0xa4] sm:$0x1]  ;;  %v5603_v49 = vor.u32 %v5602_v34, %v5599_v47  ;;  %v5216_v34 = vld [vmem:[#allocation2 + $0xb4] sm:$0xf]  ;;  %v8432_v40 = vld [vmem:[#allocation2 + $0x9c] sm:$0xff] }
 0x637   : > { %v5806_v62 = vsel %vm9165_vm13, %v5804_v35, %v5805_v26  ;;  %v5594_v36 = vrot.slane %v5592_v9, 5  ;;  %v12174_v38 = vrot.slane %v5606_v15, 5  ;;  %v5612_v29 = vrot.slane %v5610_v4, 4 }
 0x638   : > { %v6049_v31 = vunpack.c.l.b16 %v5806_v62  ;;  %v5811_v25 = vrot.slane %v5809_v24, 4  ;;  %v5616_v10 = vshll.u32 %v5271_v53, 16  ;;  %v5812_v61 = vrot.slane %v5271_v53, 5 }
 0x639   : > { %v5595_v51 = vsel %vm8698_vm2, %v5590_v13, %v5594_v36  ;;  %v5613_v58 = vor.u32 %v5612_v29, %v12174_v38  ;;  %v5537_v9 = vsel %vm8698_vm2, %v5532_v56, %v12151_v12  ;;  %v5810_v15 = vsel %vm9165_vm13, %v8126_v41, %v5809_v24 }
 0x63a   : > { %v12178_v19 = vpack.c.b16 %v6049_v31, %v6048_v46  ;;  %v5969_v28 = vunpack.c.l.b16 %v5595_v51  ;;  %v5813_v35 = vsel %vm9165_vm13, %v5811_v25, %v5812_v61  ;;  %v5618_v26 = vrot.slane %v5616_v10, 5 }
 0x63b   : > { %v5052_v63 = vpop.permute.xlu1 %5051  ;;  %v5050_v52 = vpop.permute.xlu0 %5049  ;;  %v5614_v6 = vrot.slane %v5613_v58, 4  ;;  %v5604_v4 = vrot.slane %v5603_v49, 4  ;;  %v6051_v62 = vunpack.c.l.b16 %v5813_v35  ;;  %v6050_v42 = vunpack.c.l.b16 %v5810_v15 }
 0x63c   : > { %v5214_v30 = vsel %vm11569_vm12, %v5052_v63, %v5213_v16  ;;  %6158 = vrot.lane.b32.xlu0 %v12110_v37, %s8515_s17  ;;  %5212 = vst.msk [vmem:[#allocation2 + $0xac] sm:$0xf] %vm5113_vm5, %v5050_v52  ;;  %6096 = vrot.lane.b32.xlu1 %v12178_v19, %s8509_s23  ;;  %v12186_v2 = vpack.c.b16 %v5969_v28, %v5968_v22  ;;  %v5542_v16 = vrot.slane %v5541_v1, 4  ;;  %v5056_v44 = vpop.permute.xlu2 %5055  ;;  %v5272_v13 = vld [vmem:[#allocation2 + $0xa8] sm:$0xf]  ;;  %v5964_v51 = vunpack.c.l.b16 %v5537_v9 }
 0x63d   : > { %5215 = vst [vmem:[#allocation2 + $0xb0] sm:$0x1] %v5214_v30  ;;  %v5609_v45 = vsel %vm8698_vm2, %v5604_v4, %v12174_v38  ;;  %v5621_v29 = vshrl.u32 %v5272_v13, 16  ;;  %v5624_v22 = vshll.u32 %v5272_v13, 16  ;;  %v12221_v23 = vpack.c.b16 %v6051_v62, %v6050_v42 }
 0x63e   : > { %6016 = vrot.lane.b32.xlu2 %v12186_v2, %s8506_s20  ;;  %5219 = vst.msk [vmem:[#allocation2 + $0xb8] sm:$0xf] %vm5113_vm5, %v5056_v44  ;;  %v5547_v63 = vsel %vm8698_vm2, %v5542_v16, %v5546_v14  ;;  %v8127_v9 = vrot.slane %v5272_v13, 9 }
 0x63f   : > { %v5965_v36 = vunpack.c.l.b16 %v5547_v63  ;;  %v5623_v1 = vrot.slane %v5621_v29, 4  ;;  %v5626_v25 = vrot.slane %v5624_v22, 5 }
 0x641   : > { %v12225_v5 = vpack.c.b16 %v5965_v36, %v5964_v51  ;;  %v5627_v16 = vor.u32 %v5626_v25, %v5623_v1  ;;  %v5220_v36 = vld [vmem:[#allocation2 + $0xbc] sm:$0x1] }
 0x643   : > { %v6118_v60 = vpop.permute.xlu1 %6117  ;;  %v6083_v48 = vpop.permute.xlu0 %6082  ;;  %v12193_v21 = vld [vmem:[#allocation2 + $0xa8] sm:$0xff]  ;;  %v5628_v4 = vrot.slane %v5627_v16, 4  ;;  %v5552_v16 = vshll.u32 %v12304_v54, 16 }
 0x644   : > { %6123 = vrot.lane.b32.xlu1 %v12108_v3, %s8516_s13  ;;  %6236 = vrot.lane.b32.xlu0 %v12193_v21, %s8517_s22  ;;  %v5619_v3 = vsel %vm8698_vm2, %v5614_v6, %v5618_v26  ;;  %v5273_v18 = vld [vmem:[#allocation2 + $0xac] sm:$0xf]  ;;  %v6373_v12 = vsel %vm13137_vm1, %v6331_v11, %v6083_v48  ;;  %v12223_v24 = vpop.permute.xlu2 %6084  ;;  %v5274_v58 = vld [vmem:[#allocation2 + $0xb0] sm:$0x1]  ;;  %v12241_v48 = vld [vmem:[#allocation2 + $0x78] sm:$0xff] }
 0x645   : > { %v5630_v46 = vshll.u32 %v5273_v18, 16  ;;  %v5634_v31 = vshrl.u32 %v5273_v18, 16  ;;  %v5971_v50 = vunpack.c.l.b16 %v5619_v3  ;;  %v6405_v20 = vsel %vm13430_vm15, %v6373_v12, %v6118_v60 }
 0x646   : > { %6088 = vrot.lane.b32.xlu2 %v12065_v59, %s8509_s23  ;;  %v5970_v59 = vunpack.c.l.b16 %v5609_v45  ;;  %v5816_v38 = vrot.slane %v5273_v18, 5  ;;  %v6437_v0 = vsel %vm4336_vm9, %v6405_v20, %v12146_v7  ;;  %v5819_v61 = vrot.slane %v5274_v58, 5 }
 0x647   : > { %v5632_v28 = vrot.slane %v5630_v46, 5  ;;  %v5636_v52 = vrot.slane %v5634_v31, 4  ;;  %v5640_v49 = vshll.u32 %v5274_v58, 16  ;;  %v5791_v46 = vrot.slane %v12176_v43, 5 }
 0x648   : > { %v12231_v47 = vpack.c.b16 %v5971_v50, %v5970_v59  ;;  %v5818_v14 = vrot.slane %v5816_v38, 4  ;;  %v5817_v15 = vsel %vm9165_vm13, %v8127_v9, %v5816_v38  ;;  %v8123_v20 = vrot.slane %v12139_v8, 9  ;;  %v5227_v38 = vld [vmem:[#allocation2 + $0xc8] sm:$0x1] }
 0x649   : > { %v5637_v10 = vor.u32 %v5636_v52, %v5632_v28  ;;  %v5642_v55 = vrot.slane %v5640_v49, 5  ;;  %v5633_v12 = vsel %vm8698_vm2, %v5628_v4, %v5632_v28  ;;  %v6052_v13 = vunpack.c.l.b16 %v5817_v15  ;;  %v12282_v52 = vld [vmem:[#allocation2 + $0x88] sm:$0xf]  ;;  %v12311_v49 = vld [vmem:[#allocation2 + $0x8c] sm:$0x1] }
 0x64a   : > { %v5820_v63 = vsel %vm9165_vm13, %v5818_v14, %v5819_v61  ;;  %v5972_v42 = vunpack.c.l.b16 %v5633_v12  ;;  %v5562_v1 = vshrl.u32 %v12282_v52, 16  ;;  %v5568_v15 = vshll.u32 %v12311_v49, 16 }
 0x64b   : > { %v6223_v30 = vpop.permute.xlu1 %6222  ;;  %v6188_v53 = vpop.permute.xlu0 %6187  ;;  %v5638_v44 = vrot.slane %v5637_v10, 4  ;;  %v6053_v18 = vunpack.c.l.b16 %v5820_v63  ;;  %vm13141_vm15 = vcmask 1043459  }
 0x64c   : > { %6201 = vrot.lane.b32.xlu1 %v12221_v23, %s8518_s29  ;;  %v6470_v60 = vsel %vm6458_vm10, %v6437_v0, %v6188_v53  ;;  %6263 = vrot.lane.b32.xlu0 %v12225_v5, %s8519_s15  ;;  %v12243_v41 = vpop.permute.xlu2 %6189  ;;  %v5564_v14 = vrot.slane %v5562_v1, 4 }
 0x64d   : > { %v6502_v6 = vsel %vm4475_vm8, %v6470_v60, %v6223_v30  ;;  %v5788_v30 = vrot.slane %v12134_v17, 5  ;;  %v12265_v31 = vpack.c.b16 %v6053_v18, %v6052_v13  ;;  %v5558_v60 = vshll.u32 %v12282_v52, 16 }
 0x64e   : > { %6166 = vrot.lane.b32.xlu2 %v12231_v47, %s8515_s17  ;;  %v6535_v26 = vsel %vm6523_vm4, %v6502_v6, %v12180_v57  ;;  %v5643_v57 = vsel %vm8698_vm2, %v5638_v44, %v5642_v55  ;;  %v5549_v6 = vshrl.u32 %v12304_v54, 16 }
 0x64f   : > { %v5973_v45 = vunpack.c.l.b16 %v5643_v57  ;;  %v5790_v29 = vrot.slane %v5788_v30, 4  ;;  %v5789_v28 = vsel %vm9165_vm13, %v8123_v20, %v5788_v30 }
 0x650   : > { %v5551_v57 = vrot.slane %v5549_v6, 4 }
 0x651   : > { %v12272_v17 = vpack.c.b16 %v5973_v45, %v5972_v42  ;;  %v5792_v43 = vsel %vm9165_vm13, %v5790_v29, %v5791_v46  ;;  %v12343_v46 = vrot.slane %v5568_v15, 5 }
 0x652   : > { %v6045_v59 = vunpack.c.l.b16 %v5792_v43  ;;  %v5223_v43 = vld [vmem:[#allocation2 + $0xc0] sm:$0xf] }
 0x653   : > { %v5054_v56 = vpop.permute.xlu1 %5053  ;;  %v6293_v35 = vpop.permute.xlu0 %6292 }
 0x654   : > { %v5217_v7 = vsel %vm11559_vm6, %v5054_v56, %v5216_v34  ;;  %6228 = vrot.lane.b32.xlu1 %v12241_v48, %s8517_s22  ;;  %v6568_v11 = vsel %vm6556_vm7, %v6535_v26, %v6293_v35  ;;  %6018 = vrot.lane.b32.xlu0 %v12231_v47, %s8506_s20  ;;  %v6295_v50 = vpop.permute.xlu2 %6294  ;;  %v6044_v34 = vunpack.c.l.b16 %v5789_v28  ;;  %v5795_v26 = vrot.slane %v12282_v52, 5 }
 0x655   : > { %5218 = vst [vmem:[#allocation2 + $0xb4] sm:$0xf] %v5217_v7  ;;  %8236 = vmatmul.msk.bf16.gmra.mxu2 %vm6648_vm3, %v6568_v11 }
 0x656   : > { %6193 = vrot.lane.b32.xlu2 %v12098_v32, %s8518_s29  ;;  %v12294_v56 = vpack.c.b16 %v6045_v59, %v6044_v34  ;;  %v12339_v45 = vrot.slane %v5795_v26, 4 }
 0x658   : > { %v6694_v62 = vpop.f32.mrf.mxu2 }
 0x65b   : > { %v6005_v3 = vpop.permute.xlu1 %6004  ;;  %v5058_v51 = vpop.permute.xlu0 %5057 }
 0x65c   : > { %v5221_v22 = vsel %vm11569_vm12, %v5058_v51, %v5220_v36  ;;  %6306 = vrot.lane.b32.xlu1 %v12265_v31, %s8520_s9  ;;  %6090 = vrot.lane.b32.xlu0 %v12098_v32, %s8509_s23  ;;  %v6334_v53 = vsel %vm13138_vm11, %v11881_v33, %v6005_v3  ;;  %v5064_v32 = vpop.permute.xlu2 %5063  ;;  %v12299_v33 = vld [vmem:[%s13068_s6] ss:$0 sm:$0xff]  ;;  %v5554_v3 = vrot.slane %v5552_v16, 5 }
 0x65d   : > { %5222 = vst [vmem:[#allocation2 + $0xbc] sm:$0x1] %v5221_v22  ;;  %v5228_v25 = vsel %vm11569_vm12, %v5064_v32, %v5227_v38  ;;  %v6375_v10 = vsel %vm13137_vm1, %v6334_v53, %v12223_v24  ;;  %v6695_v44 = vadd.f32 %v12299_v33, %v6694_v62  ;;  %vm6934_vm12 = vcmask 58368  }
 0x65e   : > { %6271 = vrot.lane.b32.xlu2 %v12272_v17, %s8519_s15  ;;  %5229 = vst [vmem:[#allocation2 + $0xc8] sm:$0x1] %v5228_v25  ;;  %v5555_v59 = vor.u32 %v5554_v3, %v5551_v57 }
 0x65f   : > { %v6774_v18 = vsel %vm13144_vm14, %v6695_v44, -inf }
 0x660   : > { %v6696_v0 = vpop.f32.mrf.mxu2 }
 0x661   : > { %v6697_v29 = vadd.f32 %v12299_v33, %v6696_v0 }
 0x663   : > { %v6155_v8 = vpop.permute.xlu1 %6154  ;;  %v6120_v58 = vpop.permute.xlu0 %6119 }
 0x664   : > { %6010 = vrot.lane.b32.xlu1 %v12110_v37, %s8506_s20  ;;  %v6407_v7 = vsel %vm13428_vm0, %v6375_v10, %v6120_v58  ;;  %6168 = vrot.lane.b32.xlu0 %v12272_v17, %s8515_s17  ;;  %v12308_v37 = vrot.slane %v5558_v60, 5  ;;  %vm13140_vm0 = vcmask 1044484  }
 0x665   : > { %v6439_v61 = vsel %vm4336_vm9, %v6407_v7, %v6155_v8  ;;  %v12347_v8 = vld [vmem:[#allocation2 + $0xb8] sm:$0xf] }
 0x666   : > { %6298 = vrot.lane.b32.xlu2 %v12294_v56, %s8520_s9  ;;  %v6472_v63 = vsel %vm6458_vm10, %v6439_v61, %v12243_v41  ;;  %v5565_v11 = vor.u32 %v5564_v14, %v12308_v37  ;;  %v5654_v14 = vshll.u32 %v12347_v8, 16  ;;  %v5658_v61 = vshrl.u32 %v12347_v8, 16 }
 0x668   : > { %v12341_v36 = vrot.slane %v5565_v11, 4 }
 0x66a   : > { %v6699_v35 = vpop.f32.mrf.mxu2 }
 0x66b   : > { %v6260_v24 = vpop.permute.xlu1 %6259  ;;  %v6700_v9 = vadd.f32 %v12299_v33, %v6699_v35  ;;  %v6225_v55 = vpop.permute.xlu0 %6224 }
 0x66c   : > { %v6504_v4 = vsel %vm4475_vm8, %v6472_v63, %v6225_v55  ;;  %6133 = vrot.lane.b32.xlu1 %v12193_v21, %s8516_s13  ;;  %6195 = vrot.lane.b32.xlu0 %v12294_v56, %s8518_s29  ;;  %v12333_v21 = vld [vmem:[#allocation2 + $0xb4] sm:$0xf] }
 0x66d   : > { %v6775_v12 = vsel %vm13144_vm14, %v6700_v9, -inf  ;;  %v6537_v41 = vsel %vm6523_vm4, %v6504_v4, %v6260_v24  ;;  %v5645_v28 = vshrl.u32 %v12333_v21, 16  ;;  %v5648_v58 = vshll.u32 %v12333_v21, 16 }
 0x66e   : > { %v6776_v30 = vmax.f32 %v6774_v18, %v6775_v12  ;;  %6098 = vrot.lane.b32.xlu2 %v12221_v23, %s8509_s23  ;;  %v6570_v62 = vsel %vm6556_vm7, %v6537_v41, %v6295_v50  ;;  %v6777_v9 = vsel %vm13144_vm14, %v6697_v29, -inf  ;;  %v12369_v12 = vld [vmem:[#allocation2 + $0xbc] sm:$0x1]  ;;  %v12371_v41 = vrot.slane %v5654_v14, 5 }
 0x66f   : > { %8237 = vmatmul.msk.bf16.gmra.mxu2 %vm6648_vm3, %v6570_v62  ;;  %v5647_v39 = vrot.slane %v5645_v28, 4  ;;  %v5650_v55 = vrot.slane %v5648_v58, 5  ;;  %v5556_v62 = vrot.slane %v5555_v59, 4  ;;  %v8124_v14 = vrot.slane %v12304_v54, 9 }
 0x670   : > { %v6838_v42 = vrot.slane %v6776_v30, 2  ;;  %v6839_v51 = vrot.slane %v6776_v30, 4  ;;  %v6840_v20 = vrot.slane %v6776_v30, 6  ;;  %v6935_v50 = vsel %vm6934_vm12, %v6776_v30, -inf }
 0x671   : > { %v6936_v22 = vrot.slane %v6935_v50, 4  ;;  %v5660_v30 = vrot.slane %v5658_v61, 4  ;;  %v5651_v29 = vor.u32 %v5650_v55, %v5647_v39 }
 0x672   : > { %v6942_v53 = vsel %vm6934_vm12, %v6838_v42, -inf  ;;  %v6949_v38 = vsel %vm6934_vm12, %v6839_v51, -inf  ;;  %v6956_v34 = vsel %vm6934_vm12, %v6840_v20, -inf  ;;  %v6701_v32 = vpop.f32.mrf.mxu2 }
 0x673   : > { %v5062_v13 = vpop.permute.xlu1 %5061  ;;  %v6937_v60 = vmax.f32 %v6935_v50, %v6936_v22  ;;  %v6943_v1 = vrot.slane %v6942_v53, 4  ;;  %v6950_v25 = vrot.slane %v6949_v38, 4  ;;  %v6957_v0 = vrot.slane %v6956_v34, 4  ;;  %v5060_v10 = vpop.permute.xlu0 %5059  ;;  %v12376_v22 = vld [vmem:[#allocation2 + $0xb4] sm:$0xff] }
 0x674   : > { %5226 = vst.msk [vmem:[#allocation2 + $0xc4] sm:$0xf] %vm5113_vm5, %v5062_v13  ;;  %v6702_v7 = vadd.f32 %v12299_v33, %v6701_v32  ;;  %v5224_v24 = vsel %vm11559_vm6, %v5060_v10, %v5223_v43  ;;  %6160 = vrot.lane.b32.xlu1 %v12225_v5, %s8515_s17  ;;  %v5571_v43 = vsel %vm8698_vm2, %v12341_v36, %v12343_v46  ;;  %vm13143_vm5 = vcmask 1041409  }
 0x675   : > { %v6938_v6 = vrot.slane %v6937_v60, 2  ;;  %v6944_v16 = vmax.f32 %v6942_v53, %v6943_v1  ;;  %v6951_v44 = vmax.f32 %v6949_v38, %v6950_v25  ;;  %v6958_v35 = vmax.f32 %v6956_v34, %v6957_v0  ;;  %5225 = vst [vmem:[#allocation2 + $0xc0] sm:$0xf] %v5224_v24 }
 0x676   : > { %v6778_v63 = vsel %vm13144_vm14, %v6702_v7, -inf  ;;  %6125 = vrot.lane.b32.xlu2 %v12241_v48, %s8516_s13  ;;  %v5664_v38 = vshll.u32 %v12369_v12, 16  ;;  %v5561_v1 = vsel %vm8698_vm2, %v5556_v62, %v12308_v37  ;;  %v5661_v36 = vor.u32 %v5660_v30, %v12371_v41 }
 0x677   : > { %v6939_v11 = vmax.f32 %v6937_v60, %v6938_v6  ;;  %v6945_v15 = vrot.slane %v6944_v16, 2  ;;  %v6952_v4 = vrot.slane %v6951_v44, 2  ;;  %v6959_v57 = vrot.slane %v6958_v35, 2 }
 0x678   : > { %v12367_v18 = vmax.f32 %v6777_v9, %v6778_v63  ;;  %v5967_v46 = vunpack.c.l.b16 %v5571_v43  ;;  %v5652_v24 = vrot.slane %v5651_v29, 4  ;;  %vm13142_vm6 = vcmask 1042434  }
 0x679   : > { %v6940_v13 = vrot.slane %v6939_v11, 1  ;;  %v6946_v42 = vmax.f32 %v6944_v16, %v6945_v15  ;;  %v6953_v51 = vmax.f32 %v6951_v44, %v6952_v4  ;;  %v6960_v48 = vmax.f32 %v6958_v35, %v6959_v57  ;;  %v6122_v35 = vpop.permute.xlu2 %6121 }
 0x67a   : > { %v6841_v20 = vrot.slane %v12367_v18, 2  ;;  %v6963_v50 = vsel %vm6934_vm12, %v12367_v18, -inf  ;;  %v5666_v16 = vrot.slane %v5664_v38, 5  ;;  %v5966_v44 = vunpack.c.l.b16 %v5561_v1 }
 0x67b   : > { %v12365_v3 = vpop.permute.xlu1 %6086  ;;  %v6941_v28 = vmax.f32 %v6939_v11, %v6940_v13  ;;  %v6947_v53 = vrot.slane %v6946_v42, 1  ;;  %v6954_v59 = vrot.slane %v6953_v51, 1  ;;  %v6007_v34 = vpop.permute.xlu0 %6006  ;;  %v6961_v32 = vrot.slane %v6960_v48, 1 }
 0x67c   : > { %v6964_v58 = vrot.slane %v6963_v50, 4  ;;  %v6970_v60 = vsel %vm6934_vm12, %v6841_v20, -inf  ;;  %6238 = vrot.lane.b32.xlu1 %v12376_v22, %s8517_s22  ;;  %v5662_v11 = vrot.slane %v5661_v36, 4  ;;  %v5798_v15 = vrot.slane %v12311_v49, 5 }
 0x67d   : > { %v6948_v25 = vmax.f32 %v6946_v42, %v6947_v53  ;;  %v6955_v0 = vmax.f32 %v6953_v51, %v6954_v59  ;;  %v6971_v7 = vrot.slane %v6970_v60, 4  ;;  %v7383_v61 = vmul.f32 0.01, %v6941_v28  ;;  %v8430_v51 = vld [vmem:[#allocation2 + $0x54] sm:$0xff]  ;;  %v12404_v53 = vld [vmem:[#allocation2 + $0x84] sm:$0xff] }
 0x67e   : > { %v6965_v10 = vmax.f32 %v6963_v50, %v6964_v58  ;;  %6203 = vrot.lane.b32.xlu2 %v12265_v31, %s8518_s29  ;;  %v6962_v9 = vmax.f32 %v6960_v48, %v6961_v32  ;;  %v12394_v57 = vpack.c.b16 %v5967_v46, %v5966_v44  ;;  %v5657_v54 = vsel %vm8698_vm2, %v5652_v24, %v12371_v41 }
 0x67f   : > { %v7384_v6 = vmul.f32 0.01, %v6948_v25  ;;  %v7385_v37 = vmul.f32 0.01, %v6955_v0  ;;  %v6972_v39 = vmax.f32 %v6970_v60, %v6971_v7  ;;  %v7447_v13 = vmax.f32 %v6941_v28, %v7383_v61 }
 0x680   : > { %v6966_v63 = vrot.slane %v6965_v10, 2  ;;  %v5667_v42 = vsel %vm8698_vm2, %v5662_v11, %v5666_v16  ;;  %v6337_v48 = vsel %vm13138_vm11, %v8430_v51, %v6007_v34  ;;  %v7386_v49 = vmul.f32 0.01, %v6962_v9 }
 0x681   : > { %v7448_v55 = vmax.f32 %v6948_v25, %v7384_v6  ;;  %v6973_v62 = vrot.slane %v6972_v39, 2  ;;  %v7449_v50 = vmax.f32 %v6955_v0, %v7385_v37  ;;  %v5974_v28 = vunpack.c.l.b16 %v5657_v54  ;;  %v6704_v60 = vpop.f32.mrf.mxu2  ;;  %v6227_v24 = vpop.permute.xlu2 %6226 }
 0x682   : > { %v6967_v30 = vmax.f32 %v6965_v10, %v6966_v63  ;;  %v5975_v59 = vunpack.c.l.b16 %v5667_v42  ;;  %v6377_v38 = vsel %vm13137_vm1, %v6337_v48, %v12365_v3  ;;  %v5796_v34 = vsel %vm9165_vm13, %v8124_v14, %v5795_v26 }
 0x683   : > { %v6192_v4 = vpop.permute.xlu1 %6191  ;;  %v6157_v20 = vpop.permute.xlu0 %6156  ;;  %v6974_v43 = vmax.f32 %v6972_v39, %v6973_v62  ;;  %v7576_v41 = vsel %vm13143_vm5, %v7448_v55, %v7447_v13  ;;  %v5799_v25 = vsel %vm9165_vm13, %v12339_v45, %v5798_v15  ;;  %vm13431_vm1 = vcmask 293888  }
 0x684   : > { %v6968_v29 = vrot.slane %v6967_v30, 1  ;;  %6265 = vrot.lane.b32.xlu1 %v12394_v57, %s8519_s15  ;;  %v12415_v1 = vpack.c.b16 %v5975_v59, %v5974_v28  ;;  %v7578_v3 = vsel %vm13142_vm6, %v7449_v50, %v7576_v41  ;;  %v6409_v52 = vsel %vm13431_vm1, %v6377_v38, %v6122_v35 }
 0x685   : > { %v6975_v58 = vrot.slane %v6974_v43, 1  ;;  %v7450_v46 = vmax.f32 %v6962_v9, %v7386_v49  ;;  %v6441_v26 = vsel %vm4336_vm9, %v6409_v52, %v6157_v20  ;;  %v8128_v10 = vrot.slane %v12333_v21, 9 }
 0x686   : > { %v6969_v32 = vmax.f32 %v6967_v30, %v6968_v29  ;;  %6230 = vrot.lane.b32.xlu2 %v12404_v53, %s8517_s22  ;;  %6273 = vrot.lane.b32.xlu0 %v12415_v1, %s8519_s15  ;;  %v5823_v7 = vrot.slane %v12347_v8, 5  ;;  %v6047_v45 = vunpack.c.l.b16 %v5799_v25  ;;  %v6474_v6 = vsel %vm6458_vm10, %v6441_v26, %v6192_v4 }
 0x687   : > { %v6976_v0 = vmax.f32 %v6974_v43, %v6975_v58  ;;  %v7580_v16 = vsel %vm13141_vm15, %v7450_v46, %v7578_v3  ;;  %vm13139_vm11 = vcmask 1045509   ;;  %v6506_v35 = vsel %vm4475_vm8, %v6474_v6, %v6227_v24 }
 0x688   : > { %v7387_v36 = vmul.f32 0.01, %v6969_v32  ;;  %v5826_v37 = vrot.slane %v12369_v12, 5  ;;  %v6046_v39 = vunpack.c.l.b16 %v5796_v34  ;;  %v5824_v55 = vsel %vm9165_vm13, %v8128_v10, %v5823_v7 }
 0x689   : > { %v7388_v14 = vmul.f32 0.01, %v6976_v0  ;;  %v5825_v11 = vrot.slane %v5823_v7, 4  ;;  %v6706_v62 = vpop.f32.mrf.mxu2  ;;  %v6054_v54 = vunpack.c.l.b16 %v5824_v55  ;;  %v6705_v42 = vadd.f32 %v12299_v33, %v6704_v60 }
 0x68a   : > { %v7451_v61 = vmax.f32 %v6969_v32, %v7387_v36  ;;  %v12441_v30 = vpack.c.b16 %v6047_v45, %v6046_v39  ;;  %v6707_v59 = vadd.f32 %v12299_v33, %v6706_v62  ;;  %v5279_v45 = vld [vmem:[#allocation2 + $0xc4] sm:$0xf]  ;;  %vm13432_vm1 = vcmask 97280  }
 0x68b   : > { %v6297_v44 = vpop.permute.xlu1 %6296  ;;  %v6262_v9 = vpop.permute.xlu0 %6261  ;;  %v7452_v63 = vmax.f32 %v6976_v0, %v7388_v14  ;;  %v5827_v12 = vsel %vm9165_vm13, %v5825_v11, %v5826_v37  ;;  %v6780_v49 = vsel %vm13144_vm14, %v6705_v42, -inf  ;;  %v5838_v62 = vshll.u32 %v5279_v45, 16 }
 0x68c   : > { %v7582_v21 = vsel %vm13140_vm0, %v7451_v61, %v7580_v16  ;;  %v6539_v8 = vsel %vm6523_vm4, %v6506_v35, %v6262_v9  ;;  %6020 = vrot.lane.b32.xlu1 %v12272_v17, %s8506_s20  ;;  %v6055_v17 = vunpack.c.l.b16 %v5827_v12  ;;  %v6783_v6 = vsel %vm13144_vm14, %v6707_v59, -inf }
 0x68d   : > { %v12438_v15 = vsel %vm13139_vm11, %v7452_v63, %v7582_v21  ;;  %v6572_v4 = vsel %vm6556_vm7, %v6539_v8, %v6297_v44  ;;  %v5857_v8 = vrot.slane %v5279_v45, 5  ;;  %vm13433_vm11 = vcmask 195584  }
 0x68e   : > { %8238 = vmatmul.msk.bf16.gmra.mxu2 %vm6648_vm3, %v6572_v4  ;;  %6300 = vrot.lane.b32.xlu0 %v12441_v30, %s8520_s9  ;;  %v12448_v13 = vpack.c.b16 %v6055_v17, %v6054_v54  ;;  %v5842_v54 = vshrl.u32 %v5279_v45, 16 }
 0x68f   : > { %v5859_v59 = vrot.slane %v5857_v8, 4 }
 0x690   : > { %6308 = vrot.lane.b32.xlu2 %v12448_v13, %s8520_s9 }
 0x693   : > { %v12479_v0 = vpop.permute.xlu0 %6008 }
 0x694   : > { %6092 = vrot.lane.b32.xlu1 %v12294_v56, %s8509_s23  ;;  %v12466_v56 = vld [vmem:[#allocation2 + $0xc0] sm:$0xf] }
 0x695   : > { %v5829_v32 = vshrl.u32 %v12466_v56, 16  ;;  %v5832_v3 = vshll.u32 %v12466_v56, 16 }
 0x696   : > { %6100 = vrot.lane.b32.xlu0 %v12265_v31, %s8509_s23 }
 0x697   : > { %v5831_v16 = vrot.slane %v5829_v32, 4  ;;  %v5834_v44 = vrot.slane %v5832_v3, 5  ;;  %v5844_v3 = vrot.slane %v5842_v54, 4 }
 0x698   : > { %v6709_v51 = vpop.f32.mrf.mxu2  ;;  %v12455_v48 = vpop.permute.xlu2 %6016  ;;  %6012 = vrot.lane.b32.xlu2 %v12225_v5, %s8506_s20 }
 0x699   : > { %v6710_v20 = vadd.f32 %v12299_v33, %v6709_v51 }
 0x69b   : > { %v6781_v50 = vsel %vm13144_vm14, %v6710_v20, -inf  ;;  %v5280_v20 = vld [vmem:[#allocation2 + $0xc8] sm:$0x1] }
 0x69c   : > { %v6782_v29 = vmax.f32 %v6780_v49, %v6781_v50  ;;  %6170 = vrot.lane.b32.xlu1 %v12415_v1, %s8515_s17  ;;  %v5835_v50 = vor.u32 %v5834_v44, %v5831_v16  ;;  %v5860_v32 = vrot.slane %v5280_v20, 5 }
 0x69e   : > { %v6844_v43 = vrot.slane %v6782_v29, 2  ;;  %v6845_v41 = vrot.slane %v6782_v29, 4  ;;  %v6846_v28 = vrot.slane %v6782_v29, 6  ;;  %v6991_v31 = vsel %vm6934_vm12, %v6782_v29, -inf  ;;  %6127 = vrot.lane.b32.xlu0 %v12404_v53, %s8516_s13 }
 0x69f   : > { %v6992_v38 = vrot.slane %v6991_v31, 4 }
 0x6a0   : > { %v6998_v58 = vsel %vm6934_vm12, %v6844_v43, -inf  ;;  %v7005_v5 = vsel %vm6934_vm12, %v6845_v41, -inf  ;;  %v7012_v34 = vsel %vm6934_vm12, %v6846_v28, -inf  ;;  %v6711_v60 = vpop.f32.mrf.mxu2  ;;  %v12474_v25 = vpop.permute.xlu2 %6088  ;;  %6135 = vrot.lane.b32.xlu2 %v12376_v22, %s8516_s13  ;;  %v8129_v43 = vrot.slane %v12466_v56, 9  ;;  %v12501_v56 = vld [vmem:[#allocation2 + $0x90] sm:$0xff] }
 0x6a1   : > { %v6993_v36 = vmax.f32 %v6991_v31, %v6992_v38  ;;  %v6999_v52 = vrot.slane %v6998_v58, 4  ;;  %v7006_v46 = vrot.slane %v7005_v5, 4  ;;  %v7013_v26 = vrot.slane %v7012_v34, 4 }
 0x6a2   : > { %v6712_v10 = vadd.f32 %v12299_v33, %v6711_v60  ;;  %v5836_v60 = vrot.slane %v5835_v50, 4 }
 0x6a3   : > { %v6994_v7 = vrot.slane %v6993_v36, 2  ;;  %v7000_v24 = vmax.f32 %v6998_v58, %v6999_v52  ;;  %v7007_v14 = vmax.f32 %v7005_v5, %v7006_v46  ;;  %v7014_v61 = vmax.f32 %v7012_v34, %v7013_v26 }
 0x6a4   : > { %v6784_v53 = vsel %vm13144_vm14, %v6712_v10, -inf  ;;  %6197 = vrot.lane.b32.xlu1 %v12441_v30, %s8518_s29  ;;  %v5840_v58 = vrot.slane %v5838_v62, 5 }
 0x6a5   : > { %v6995_v35 = vmax.f32 %v6993_v36, %v6994_v7  ;;  %v7001_v9 = vrot.slane %v7000_v24, 2  ;;  %v7008_v37 = vrot.slane %v7007_v14, 2  ;;  %v7015_v63 = vrot.slane %v7014_v61, 2 }
 0x6a6   : > { %v12488_v21 = vmax.f32 %v6783_v6, %v6784_v53  ;;  %6205 = vrot.lane.b32.xlu0 %v12448_v13, %s8518_s29  ;;  %v12496_v49 = vpop.permute.xlu0 %6131  ;;  %v5858_v7 = vsel %vm9165_vm13, %v8129_v43, %v5857_v8  ;;  %v5841_v16 = vsel %vm8698_vm2, %v5836_v60, %v5840_v58  ;;  %v5845_v44 = vor.u32 %v5844_v3, %v5840_v58 }
 0x6a7   : > { %v6996_v39 = vrot.slane %v6995_v35, 1  ;;  %v7002_v55 = vmax.f32 %v7000_v24, %v7001_v9  ;;  %v7009_v11 = vmax.f32 %v7007_v14, %v7008_v37  ;;  %v7016_v4 = vmax.f32 %v7014_v61, %v7015_v63 }
 0x6a8   : > { %v7019_v22 = vsel %vm6934_vm12, %v12488_v21, -inf  ;;  %v12492_v12 = vpop.permute.xlu2 %6166  ;;  %6162 = vrot.lane.b32.xlu2 %v12394_v57, %s8515_s17  ;;  %v5861_v24 = vsel %vm9165_vm13, %v5859_v59, %v5860_v32  ;;  %v6842_v14 = vrot.slane %v12367_v18, 4  ;;  %v6843_v61 = vrot.slane %v12367_v18, 6 }
 0x6a9   : > { %v6997_v17 = vmax.f32 %v6995_v35, %v6996_v39  ;;  %v7003_v42 = vrot.slane %v7002_v55, 1  ;;  %v7010_v51 = vrot.slane %v7009_v11, 1  ;;  %v7020_v29 = vrot.slane %v7019_v22, 4  ;;  %v8310_v39 = vld [vmem:[#allocation2 + $0xc0] sm:$0xff] }
 0x6aa   : > { %v7017_v31 = vrot.slane %v7016_v4, 1  ;;  %v5848_v35 = vshll.u32 %v5280_v20, 16  ;;  %v6174_v63 = vunpack.c.l.b16 %v5858_v7  ;;  %v6175_v8 = vunpack.c.l.b16 %v5861_v24 }
 0x6ab   : > { %v7004_v41 = vmax.f32 %v7002_v55, %v7003_v42  ;;  %v7011_v28 = vmax.f32 %v7009_v11, %v7010_v51  ;;  %v7021_v38 = vmax.f32 %v7019_v22, %v7020_v29  ;;  %v7391_v5 = vmul.f32 0.01, %v6997_v17 }
 0x6ac   : > { %v7018_v26 = vmax.f32 %v7016_v4, %v7017_v31  ;;  %v5846_v18 = vrot.slane %v5845_v44, 4  ;;  %v5850_v4 = vrot.slane %v5848_v35, 5  ;;  %v6139_v54 = vunpack.c.l.b16 %v5841_v16 }
 0x6ad   : > { %v7392_v34 = vmul.f32 0.01, %v7004_v41  ;;  %v7393_v36 = vmul.f32 0.01, %v7011_v28  ;;  %v7022_v52 = vrot.slane %v7021_v38, 2  ;;  %v7455_v53 = vmax.f32 %v6997_v17, %v7391_v5 }
 0x6ae   : > { %v6097_v46 = vpop.permute.xlu1 %6096  ;;  %6232 = vrot.lane.b32.xlu0 %v12501_v56, %s8517_s22  ;;  %v7394_v55 = vmul.f32 0.01, %v7018_v26  ;;  %v6159_v22 = vpop.permute.xlu0 %6158  ;;  %v5851_v17 = vsel %vm8698_vm2, %v5846_v18, %v5850_v4  ;;  %v6977_v42 = vsel %vm6934_vm12, %v6842_v14, -inf  ;;  %v6984_v43 = vsel %vm6934_vm12, %v6843_v61, -inf }
 0x6af   : > { %v7456_v10 = vmax.f32 %v7004_v41, %v7392_v34  ;;  %v7023_v45 = vmax.f32 %v7021_v38, %v7022_v52  ;;  %v7457_v9 = vmax.f32 %v7011_v28, %v7393_v36  ;;  %v6140_v50 = vunpack.c.l.b16 %v5851_v17  ;;  %v8431_v52 = vld [vmem:[#allocation2 + $0x60] sm:$0xff] }
 0x6b0   : > { %v6194_v6 = vpop.permute.xlu2 %6193  ;;  %6240 = vrot.lane.b32.xlu2 %v8310_v39, %s8517_s22  ;;  %v7458_v41 = vmax.f32 %v7018_v26, %v7394_v55  ;;  %v12520_v28 = vpack.c.b16 %v6175_v8, %v6174_v63  ;;  %v6978_v32 = vrot.slane %v6977_v42, 4  ;;  %v6985_v5 = vrot.slane %v6984_v43, 4 }
 0x6b1   : > { %v7024_v37 = vrot.slane %v7023_v45, 1  ;;  %v7589_v11 = vsel %vm13143_vm5, %v7456_v10, %v7455_v53  ;;  %v12522_v59 = vpack.c.b16 %v6140_v50, %v6139_v54  ;;  %v6340_v26 = vsel %vm13432_vm1, %v8431_v52, %v12479_v0 }
 0x6b2   : > { %v7590_v51 = vsel %vm13142_vm6, %v7457_v9, %v7589_v11  ;;  %v6979_v60 = vmax.f32 %v6977_v42, %v6978_v32  ;;  %v6986_v36 = vmax.f32 %v6984_v43, %v6985_v5  ;;  %v6379_v7 = vsel %vm13433_vm11, %v6340_v26, %v12474_v25  ;;  %vm13436_vm6 = vmmov %vm13433_vm11 }
 0x6b3   : > { %v7025_v62 = vmax.f32 %v7023_v45, %v7024_v37  ;;  %v7591_v58 = vsel %vm13141_vm15, %v7458_v41, %v7590_v51  ;;  %6275 = vrot.lane.b32.xlu1 %v12522_v59, %s8519_s15  ;;  %vm13435_vm15 = vcmask 293888   ;;  %v5281_v51 = vld [vmem:[#allocation2 + $0xcc] sm:$0xf]  ;;  %v6847_v50 = vrot.slane %v12488_v21, 2  ;;  %v5283_v41 = vld [vmem:[#allocation2 + $0xd4] sm:$0x1] }
 0x6b4   : > { %v6980_v45 = vrot.slane %v6979_v60, 2  ;;  %v6987_v16 = vrot.slane %v6986_v36, 2  ;;  %vm13437_vm11 = vmmov %vm13435_vm15  ;;  %v5866_v32 = vshll.u32 %v5281_v51, 16  ;;  %v6849_v52 = vrot.slane %v12488_v21, 6 }
 0x6b5   : > { %v7395_v20 = vmul.f32 0.01, %v7025_v62 }
 0x6b6   : > { %v6124_v29 = vpop.permute.xlu1 %6123  ;;  %6310 = vrot.lane.b32.xlu0 %v12520_v28, %s8520_s9  ;;  %v6237_v3 = vpop.permute.xlu0 %6236  ;;  %v6988_v44 = vmax.f32 %v6986_v36, %v6987_v16  ;;  %v5868_v26 = vrot.slane %v5866_v32, 5  ;;  %v8130_v16 = vrot.slane %v5281_v51, 9 }
 0x6b7   : > { %v7459_v31 = vmax.f32 %v7025_v62, %v7395_v20  ;;  %v6411_v14 = vsel %vm13435_vm15, %v6379_v7, %v6124_v29  ;;  %v5282_v20 = vld [vmem:[#allocation2 + $0xd0] sm:$0xf]  ;;  %v6848_v29 = vrot.slane %v12488_v21, 4  ;;  %v5882_v7 = vshll.u32 %v5283_v41, 16 }
 0x6b8   : > { %v6272_v38 = vpop.permute.xlu2 %6271  ;;  %6267 = vrot.lane.b32.xlu2 %v12186_v2, %s8519_s15  ;;  %v6443_v0 = vsel %vm4336_vm9, %v6411_v14, %v6159_v22  ;;  %v6714_v35 = vpop.f32.mrf.mxu2  ;;  %v6989_v18 = vrot.slane %v6988_v44, 1  ;;  %vm7587_vm15 = vcmask 1047559  }
 0x6b9   : > { %v12528_v34 = vsel %vm13140_vm0, %v7459_v31, %v7591_v58  ;;  %vm13434_vm0 = vmmov %vm13432_vm1  ;;  %v6715_v43 = vadd.f32 %v12299_v33, %v6714_v35  ;;  %v5863_v31 = vshrl.u32 %v5281_v51, 16  ;;  %v5872_v58 = vshll.u32 %v5282_v20, 16 }
 0x6ba   : > { %v6352_v24 = vsel %vm13434_vm0, %v12501_v56, %v12455_v48  ;;  %v6981_v48 = vmax.f32 %v6979_v60, %v6980_v45  ;;  %v6990_v4 = vmax.f32 %v6988_v44, %v6989_v18  ;;  %v5894_v44 = vrot.slane %v5283_v41, 5  ;;  %vm13440_vm1 = vmmov %vm13437_vm11 }
 0x6bb   : > { %v6387_v53 = vsel %vm13436_vm6, %v6352_v24, %v6097_v46  ;;  %6302 = vrot.lane.b32.xlu1 %v12178_v19, %s8520_s9  ;;  %v6476_v46 = vsel %vm6458_vm10, %v6443_v0, %v6194_v6  ;;  %v5865_v36 = vrot.slane %v5863_v31, 4  ;;  %vm7585_vm6 = vcmask 1046534  }
 0x6bc   : > { %v6419_v25 = vsel %vm13437_vm11, %v6387_v53, %v12496_v49  ;;  %v6982_v11 = vrot.slane %v6981_v48, 1  ;;  %v7390_v42 = vmul.f32 0.01, %v6990_v4  ;;  %v12591_v24 = vsel %vm6934_vm12, %v6848_v29, -inf }
 0x6bd   : > { %v6786_v14 = vsel %vm13144_vm14, %v6715_v43, -inf  ;;  %v5869_v0 = vor.u32 %v5868_v26, %v5865_v36 }
 0x6be   : > { %v6202_v10 = vpop.permute.xlu1 %6201  ;;  %6014 = vrot.lane.b32.xlu0 %v12394_v57, %s8506_s20  ;;  %v6451_v57 = vsel %vm4336_vm9, %v6419_v25, %v12492_v12  ;;  %v6264_v37 = vpop.permute.xlu0 %6263  ;;  %v6983_v6 = vmax.f32 %v6981_v48, %v6982_v11  ;;  %v7454_v5 = vmax.f32 %v6990_v4, %v7390_v42 }
 0x6bf   : > { %v6484_v8 = vsel %vm6458_vm10, %v6451_v57, %v6202_v10  ;;  %v5874_v10 = vrot.slane %v5872_v58, 5  ;;  %v5884_v57 = vrot.slane %v5882_v7, 5 }
 0x6c0   : > { %v6299_v61 = vpop.permute.xlu2 %6298  ;;  %6022 = vrot.lane.b32.xlu2 %v12415_v1, %s8506_s20  ;;  %v6516_v12 = vsel %vm4475_vm8, %v6484_v8, %v6237_v3  ;;  %v6716_v54 = vpop.f32.mrf.mxu2  ;;  %v5891_v3 = vrot.slane %v5282_v20, 5 }
 0x6c1   : > { %v6549_v62 = vsel %vm6523_vm4, %v6516_v12, %v6272_v38  ;;  %v8311_v38 = vld [vmem:[#allocation2 + $0xcc] sm:$0xff]  ;;  %v6717_v11 = vadd.f32 %v12299_v33, %v6716_v54 }
 0x6c2   : > { %v5893_v48 = vrot.slane %v5891_v3, 4 }
 0x6c3   : > { %6102 = vrot.lane.b32.xlu1 %v12448_v13, %s8509_s23  ;;  %v7389_v13 = vmul.f32 0.01, %v6983_v6  ;;  %v6789_v26 = vsel %vm13144_vm14, %v6717_v11, -inf }
 0x6c6   : > { %v6229_v9 = vpop.permute.xlu1 %6228  ;;  %6137 = vrot.lane.b32.xlu0 %v8310_v39, %s8516_s13 }
 0x6c7   : > { %v6508_v63 = vsel %vm4475_vm8, %v6476_v46, %v6229_v9  ;;  %v5870_v46 = vrot.slane %v5869_v0, 4 }
 0x6c8   : > { %v12557_v55 = vpop.permute.xlu2 %6098  ;;  %v6541_v49 = vsel %vm6523_vm4, %v6508_v63, %v6264_v37  ;;  %6094 = vrot.lane.b32.xlu2 %v12441_v30, %s8509_s23  ;;  %v12577_v30 = vpop.permute.xlu0 %6018  ;;  %v7040_v63 = vsel %vm6934_vm12, %v6849_v52, -inf }
 0x6c9   : > { %v6574_v1 = vsel %vm6556_vm7, %v6541_v49, %v6299_v61  ;;  %v7034_v49 = vrot.slane %v12591_v24, 4  ;;  %v5875_v18 = vsel %vm8698_vm2, %v5870_v46, %v5874_v10  ;;  %v7041_v52 = vrot.slane %v7040_v63, 4 }
 0x6ca   : > { %8239 = vmatmul.msk.bf16.gmra.mxu2 %vm6648_vm3, %v6574_v1 }
 0x6cb   : > { %6129 = vrot.lane.b32.xlu1 %v12501_v56, %s8516_s13  ;;  %v5876_v56 = vshrl.u32 %v5282_v20, 16 }
 0x6cd   : > { %v5878_v45 = vrot.slane %v5876_v56, 4 }
 0x6ce   : > { %v6307_v22 = vpop.permute.xlu1 %6306  ;;  %6164 = vrot.lane.b32.xlu0 %v12186_v2, %s8515_s17  ;;  %v7453_v2 = vmax.f32 %v6983_v6, %v7389_v13  ;;  %v5895_v13 = vsel %vm9165_vm13, %v5893_v48, %v5894_v44 }
 0x6cf   : > { %v6582_v39 = vsel %vm6556_vm7, %v6549_v62, %v6307_v22  ;;  %v5879_v35 = vor.u32 %v5878_v45, %v5874_v10 }
 0x6d0   : > { %v12570_v17 = vpop.permute.xlu2 %6125  ;;  %8243 = vmatmul.msk.bf16.vlgmr.msra.gmra.mxu3 %vm6648_vm3, %v6582_v39  ;;  %6172 = vrot.lane.b32.xlu2 %v12522_v59, %s8515_s17  ;;  %v12588_v59 = vsel %vm6934_vm12, %v6847_v50, -inf  ;;  %v7586_v21 = vsel %vm7585_vm6, %v7453_v2, %v12438_v15  ;;  %v12612_v1 = vpop.permute.xlu0 %6090  ;;  %v5892_v39 = vsel %vm9165_vm13, %v8130_v16, %v5891_v3  ;;  %v6244_v50 = vunpack.c.l.b16 %v5875_v18 }
 0x6d1   : > { %v12604_v37 = vsel %vm7587_vm15, %v7454_v5, %v7586_v21  ;;  %v7027_v8 = vrot.slane %v12588_v59, 4  ;;  %v6279_v27 = vunpack.c.l.b16 %v5892_v39  ;;  %vm13439_vm13 = vcmask 195584  }
 0x6d2   : > { %vm13441_vm11 = vmmov %vm13439_vm13 }
 0x6d3   : > { %6207 = vrot.lane.b32.xlu1 %v12520_v28, %s8518_s29  ;;  %v5880_v28 = vrot.slane %v5879_v35, 4  ;;  %v7028_v16 = vmax.f32 %v12588_v59, %v7027_v8 }
 0x6d5   : > { %v5885_v54 = vsel %vm8698_vm2, %v5880_v28, %v5884_v57  ;;  %v7029_v18 = vrot.slane %v7028_v16, 2  ;;  %vm13438_vm2 = vmmov %vm13434_vm0 }
 0x6d6   : > { %v12584_v60 = vpop.permute.xlu1 %6010  ;;  %6242 = vrot.lane.b32.xlu0 %v8311_v38, %s8517_s22  ;;  %v6280_v38 = vunpack.c.l.b16 %v5895_v13  ;;  %v6245_v32 = vunpack.c.l.b16 %v5885_v54 }
 0x6d8   : > { %v6719_v61 = vpop.f32.mrf.mxu2  ;;  %v12600_v25 = vpop.permute.xlu2 %6203  ;;  %6199 = vrot.lane.b32.xlu2 %v12178_v19, %s8518_s29  ;;  %v6281_v0 = vpack.c.b16 %v6280_v38, %v6279_v27  ;;  %v7030_v38 = vmax.f32 %v7028_v16, %v7029_v18  ;;  %s13500_s29 = smov 56  }
 0x6d9   : > { %v6720_v53 = vadd.f32 %v12299_v33, %v6719_v61  ;;  %v6169_v57 = vpop.permute.xlu0 %6168 }
 0x6db   : > { %v6787_v9 = vsel %vm13144_vm14, %v6720_v53, -inf  ;;  %6234 = vrot.lane.b32.xlu1 %v8432_v40, %s8517_s22  ;;  %s13497_s22 = smov 8  }
 0x6dc   : > { %v6788_v15 = vmax.f32 %v6786_v14, %v6787_v9 }
 0x6de   : > { %v6850_v12 = vrot.slane %v6788_v15, 2  ;;  %v6851_v6 = vrot.slane %v6788_v15, 4  ;;  %v6852_v4 = vrot.slane %v6788_v15, 6  ;;  %v7047_v22 = vsel %vm6934_vm12, %v6788_v15, -inf  ;;  %v12617_v62 = vpop.permute.xlu1 %6133  ;;  %6269 = vrot.lane.b32.xlu0 %v12231_v47, %s8519_s15 }
 0x6df   : > { %v7048_v19 = vrot.slane %v7047_v22, 4  ;;  %v6246_v47 = vpack.c.b16 %v6245_v32, %v6244_v50 }
 0x6e0   : > { %v7054_v42 = vsel %vm6934_vm12, %v6850_v12, -inf  ;;  %v7061_v51 = vsel %vm6934_vm12, %v6851_v6, -inf  ;;  %v7068_v20 = vsel %vm6934_vm12, %v6852_v4, -inf  ;;  %v6721_v29 = vpop.f32.mrf.mxu2  ;;  %v12633_v10 = vpop.permute.xlu2 %6230 }
 0x6e1   : > { %v7049_v43 = vmax.f32 %v7047_v22, %v7048_v19  ;;  %v7055_v41 = vrot.slane %v7054_v42, 4  ;;  %v7062_v31 = vrot.slane %v7061_v51, 4  ;;  %v7069_v2 = vrot.slane %v7068_v20, 4  ;;  %6277 = vrot.lane.b32.xlu2 %v6246_v47, %s8519_s15 }
 0x6e2   : > { %v6722_v58 = vadd.f32 %v12299_v33, %v6721_v29  ;;  %v7035_v33 = vmax.f32 %v12591_v24, %v7034_v49  ;;  %v7042_v24 = vmax.f32 %v7040_v63, %v7041_v52  ;;  %v6355_v63 = vsel %vm13438_vm2, %v8432_v40, %v12577_v30 }
 0x6e3   : > { %v7050_v56 = vrot.slane %v7049_v43, 2  ;;  %v7056_v5 = vmax.f32 %v7054_v42, %v7055_v41  ;;  %v7063_v3 = vmax.f32 %v7061_v51, %v7062_v31  ;;  %v7070_v36 = vmax.f32 %v7068_v20, %v7069_v2  ;;  %6312 = vrot.lane.b32.xlu1 %v6281_v0, %s8520_s9 }
 0x6e4   : > { %v6790_v7 = vsel %vm13144_vm14, %v6722_v58, -inf  ;;  %v7036_v22 = vrot.slane %v7035_v33, 2  ;;  %v7043_v20 = vrot.slane %v7042_v24, 2  ;;  %vm13442_vm2 = vcmask 1042434  }
 0x6e5   : > { %v7051_v14 = vmax.f32 %v7049_v43, %v7050_v56  ;;  %v7057_v61 = vrot.slane %v7056_v5, 2  ;;  %v7064_v45 = vrot.slane %v7063_v3, 2  ;;  %v7071_v53 = vrot.slane %v7070_v36, 2 }
 0x6e6   : > { %v12639_v21 = vmax.f32 %v6789_v26, %v6790_v7  ;;  %v12641_v48 = vpop.permute.xlu1 %6160  ;;  %v7037_v32 = vmax.f32 %v7035_v33, %v7036_v22  ;;  %v7044_v52 = vmax.f32 %v7042_v24, %v7043_v20  ;;  %v8433_v26 = vld [vmem:[#allocation2 + $0x6c] sm:$0xff]  ;;  %v7031_v33 = vrot.slane %v7030_v38, 1 }
 0x6e7   : > { %v7052_v44 = vrot.slane %v7051_v14, 1  ;;  %v7058_v35 = vmax.f32 %v7056_v5, %v7057_v61  ;;  %v7065_v9 = vmax.f32 %v7063_v3, %v7064_v45  ;;  %v7072_v46 = vmax.f32 %v7070_v36, %v7071_v53 }
 0x6e8   : > { %v6853_v15 = vrot.slane %v12639_v21, 2  ;;  %v6854_v28 = vrot.slane %v12639_v21, 4  ;;  %v7075_v59 = vsel %vm6934_vm12, %v12639_v21, -inf  ;;  %v6389_v5 = vsel %vm13439_vm13, %v6355_v63, %v12557_v55 }
 0x6e9   : > { %v7053_v8 = vmax.f32 %v7051_v14, %v7052_v44  ;;  %v7059_v49 = vrot.slane %v7058_v35, 1  ;;  %v7066_v11 = vrot.slane %v7065_v9, 1  ;;  %v7076_v12 = vrot.slane %v7075_v59, 4  ;;  %6304 = vrot.lane.b32.xlu2 %v12221_v23, %s8520_s9  ;;  %v6196_v14 = vpop.permute.xlu0 %6195  ;;  %s8248_s9 = sshll.u32 %s8584_s28, 3 }
 0x6ea   : > { %v7082_v6 = vsel %vm6934_vm12, %v6853_v15, -inf  ;;  %v7089_v4 = vsel %vm6934_vm12, %v6854_v28, -inf  ;;  %v7073_v13 = vrot.slane %v7072_v46, 1  ;;  %v6309_v27 = vpop.permute.xlu2 %6308  ;;  %v6343_v47 = vsel %vm13434_vm0, %v8433_v26, %v12584_v60  ;;  %vm13444_vm0 = vmmov %vm13440_vm1  ;;  %s7806_s16 = scalar_lea.hbm %s13069_s7, %s8248_s9 }
 0x6eb   : > { %v7060_v19 = vmax.f32 %v7058_v35, %v7059_v49  ;;  %v7067_v39 = vmax.f32 %v7065_v9, %v7066_v11  ;;  %v7077_v54 = vmax.f32 %v7075_v59, %v7076_v12  ;;  %v7083_v42 = vrot.slane %v7082_v6, 4  ;;  %s7810_s20 = sshll.u32 %s7806_s16, 4  ;;  %s7811_s20 = int_to_ptr.hbm [resolvable:$true] %s7810_s20 }
 0x6ec   : > { %v7090_v51 = vrot.slane %v7089_v4, 4  ;;  %v7399_v50 = vmul.f32 0.01, %v7053_v8  ;;  %v7074_v58 = vmax.f32 %v7072_v46, %v7073_v13  ;;  %v6421_v23 = vsel %vm13440_vm1, %v6389_v5, %v12617_v62  ;;  %s8453_s13 = sshra.s32 %s7811_s20, 4  ;;  %s8454_s13 = int_to_ptr.hbm [resolvable:$true] %s8453_s13 }
 0x6ed   : > { %v7400_v29 = vmul.f32 0.01, %v7060_v19  ;;  %v7401_v43 = vmul.f32 0.01, %v7067_v39  ;;  %v7078_v41 = vrot.slane %v7077_v54, 2  ;;  %v7084_v31 = vmax.f32 %v7082_v6, %v7083_v42  ;;  %p8460_p0 = scmp.lt.s32.totalorder %s8454_s13, %s13069_s7 }
 0x6ee   : > { %v7091_v2 = vmax.f32 %v7089_v4, %v7090_v51  ;;  %v6239_v40 = vpop.permute.xlu1 %6238  ;;  %v7463_v7 = vmax.f32 %v7053_v8, %v7399_v50  ;;  %v7038_v55 = vrot.slane %v7037_v32, 1  ;;  %v7402_v0 = vmul.f32 0.01, %v7074_v58 }
 0x6ef   : > { %v7464_v56 = vmax.f32 %v7060_v19, %v7400_v29  ;;  %v7079_v3 = vmax.f32 %v7077_v54, %v7078_v41  ;;  %v7085_v36 = vrot.slane %v7084_v31, 2  ;;  %v7465_v61 = vmax.f32 %v7067_v39, %v7401_v43 }
 0x6f0   : > { %v7092_v30 = vrot.slane %v7091_v2, 2  ;;  %v6381_v60 = vsel %vm13441_vm11, %v6343_v47, %v12612_v1  ;;  %v6453_v15 = vsel %vm4336_vm9, %v6421_v23, %v6169_v57  ;;  %v7032_v49 = vmax.f32 %v7030_v38, %v7031_v33 }
 0x6f1   : > { %v7080_v45 = vrot.slane %v7079_v3, 1  ;;  %v7086_v53 = vmax.f32 %v7084_v31, %v7085_v36  ;;  %v7596_v44 = vsel %vm13143_vm5, %v7464_v56, %v7463_v7  ;;  %v7039_v11 = vmax.f32 %v7037_v32, %v7038_v55 }
 0x6f2   : > { %v7093_v16 = vmax.f32 %v7091_v2, %v7092_v30  ;;  %v7597_v62 = vsel %vm13442_vm2, %v7465_v61, %v7596_v44  ;;  %v12665_v8 = vpop.permute.xlu2 %6012  ;;  %v7045_v18 = vrot.slane %v7044_v52, 1  ;;  %v7466_v12 = vmax.f32 %v7074_v58, %v7402_v0  ;;  %v6724_v56 = vpop.f32.mrf.mxu2 }
 0x6f3   : > { %v7081_v35 = vmax.f32 %v7079_v3, %v7080_v45  ;;  %v7087_v9 = vrot.slane %v7086_v53, 1  ;;  %v6486_v19 = vsel %vm6458_vm10, %v6453_v15, %v12600_v25  ;;  %vm13443_vm13 = vcmask 1043459  }
 0x6f4   : > { %v7094_v46 = vrot.slane %v7093_v16, 1  ;;  %v7598_v1 = vsel %vm13443_vm13, %v7466_v12, %v7597_v62  ;;  %v6413_v57 = vsel %vm13444_vm0, %v6381_v60, %v12570_v17  ;;  %v6518_v39 = vsel %vm4475_vm8, %v6486_v19, %v6239_v40 }
 0x6f5   : > { %v7088_v28 = vmax.f32 %v7086_v53, %v7087_v9  ;;  %v7403_v24 = vmul.f32 0.01, %v7081_v35  ;;  %vm13445_vm1 = vcmask 1044484   ;;  %v6445_v51 = vsel %vm4336_vm9, %v6413_v57, %v12641_v48 }
 0x6f6   : > { %v7095_v59 = vmax.f32 %v7093_v16, %v7094_v46  ;;  %v6266_v20 = vpop.permute.xlu1 %6265  ;;  %v7046_v63 = vmax.f32 %v7044_v52, %v7045_v18  ;;  %v7396_v50 = vmul.f32 0.01, %v7032_v49  ;;  %v7397_v43 = vmul.f32 0.01, %v7039_v11 }
 0x6f7   : > { %v7404_v6 = vmul.f32 0.01, %v7088_v28  ;;  %v7467_v22 = vmax.f32 %v7081_v35, %v7403_v24  ;;  %vm13446_vm11 = vcmask 1045509   ;;  %v6478_v31 = vsel %vm6458_vm10, %v6445_v51, %v6196_v14  ;;  %v8435_v51 = vld [vmem:[#allocation2 + $0xa8] sm:$0xff] }
 0x6f8   : > { %v7405_v4 = vmul.f32 0.01, %v7095_v59  ;;  %v6274_v29 = vpop.permute.xlu0 %6273  ;;  %v7398_v48 = vmul.f32 0.01, %v7046_v63  ;;  %v7460_v32 = vmax.f32 %v7032_v49, %v7396_v50  ;;  %v7461_v58 = vmax.f32 %v7039_v11, %v7397_v43  ;;  %vm13447_vm2 = vmmov %vm13446_vm11 }
 0x6f9   : > { %v7468_v13 = vmax.f32 %v7088_v28, %v7404_v6  ;;  %v7599_v42 = vsel %vm13445_vm1, %v7467_v22, %v7598_v1  ;;  %v6551_v41 = vsel %vm6523_vm4, %v6518_v39, %v6274_v29  ;;  %v6510_v5 = vsel %vm4475_vm8, %v6478_v31, %v12633_v10 }
 0x6fa   : > { %v7469_v54 = vmax.f32 %v7095_v59, %v7405_v4  ;;  %v6584_v2 = vsel %vm6556_vm7, %v6551_v41, %v6309_v27  ;;  %v12684_v38 = vpop.permute.xlu2 %6135  ;;  %v6543_v3 = vsel %vm6523_vm4, %v6510_v5, %v6266_v20  ;;  %v7462_v36 = vmax.f32 %v7046_v63, %v7398_v48  ;;  %v6726_v10 = vpop.f32.mrf.mxu2 }
 0x6fb   : > { %v7600_v25 = vsel %vm13446_vm11, %v7468_v13, %v7599_v42  ;;  %8244 = vmatmul.msk.bf16.gmra.mxu3 %vm6648_vm3, %v6584_v2  ;;  %v7593_v40 = vsel %vm13447_vm2, %v7460_v32, %v12528_v34  ;;  %v12706_v34 = vld [vmem:[%s13068_s6] ss:$0 sm:$0xff]  ;;  %vm13448_vm13 = vcmask 97280   ;;  %v6855_v41 = vrot.slane %v12639_v21, 6 }
 0x6fc   : > { %v12679_v17 = vsel %vm7585_vm6, %v7469_v54, %v7600_v25  ;;  %v7594_v26 = vsel %vm7585_vm6, %v7461_v58, %v7593_v40  ;;  %v6725_v45 = vadd.f32 %v12706_v34, %v6724_v56  ;;  %v6727_v28 = vadd.f32 %v12706_v34, %v6726_v10  ;;  %vm13451_vm11 = vmmov %vm13448_vm13 }
 0x6fd   : > { %v12695_v47 = vsel %vm7587_vm15, %v7462_v36, %v7594_v26  ;;  %vm13449_vm0 = vcmask 195584   ;;  %v7096_v21 = vsel %vm6934_vm12, %v6855_v41, -inf  ;;  %vm13450_vm1 = vcmask 293888  }
 0x6fe   : > { %v6021_v52 = vpop.permute.xlu1 %6020  ;;  %v6792_v55 = vsel %vm13144_vm14, %v6725_v45, -inf  ;;  %v6795_v42 = vsel %vm13144_vm14, %v6727_v28, -inf  ;;  %vm13452_vm2 = vmmov %vm13449_vm0 }
 0x6ff   : > { %v6358_v20 = vsel %vm13448_vm13, %v8435_v51, %v6021_v52  ;;  %vm13453_vm13 = vmmov %vm13450_vm1 }
 0x700   : > { %v6301_v30 = vpop.permute.xlu0 %6300 }
 0x701   : > { %v6576_v27 = vsel %vm6556_vm7, %v6543_v3, %v6301_v30 }
 0x702   : > { %8240 = vmatmul.msk.bf16.gmra.mxu2 %vm6648_vm3, %v6576_v27  ;;  %v12697_v7 = vpop.permute.xlu2 %6162 }
 0x706   : > { %v12699_v14 = vpop.permute.xlu1 %6092 }
 0x708   : > { %v6101_v23 = vpop.permute.xlu0 %6100 }
 0x709   : > { %v6391_v56 = vsel %vm13449_vm0, %v6358_v20, %v6101_v23  ;;  %vm13454_vm0 = vcmask 1042434  }
 0x70a   : > { %v12701_v61 = vpop.permute.xlu2 %6240  ;;  %v6423_v23 = vsel %vm13450_vm1, %v6391_v56, %v12684_v38  ;;  %vm13455_vm1 = vcmask 1043459  }
 0x70e   : > { %v6171_v35 = vpop.permute.xlu1 %6170 }
 0x710   : > { %v12709_v16 = vpop.permute.xlu0 %6127 }
 0x711   : > { %v6729_v53 = vpop.f32.mrf.mxu2 }
 0x712   : > { %v6730_v33 = vadd.f32 %v12706_v34, %v6729_v53  ;;  %v12716_v59 = vpop.permute.xlu2 %6267 }
 0x714   : > { %v6793_v0 = vsel %vm13144_vm14, %v6730_v33, -inf }
 0x715   : > { %v6794_v44 = vmax.f32 %v6792_v55, %v6793_v0  ;;  %v8436_v0 = vld [vmem:[#allocation2 + $0x78] sm:$0xff] }
 0x716   : > { %v6198_v5 = vpop.permute.xlu1 %6197 }
 0x717   : > { %v6856_v9 = vrot.slane %v6794_v44, 2  ;;  %v6857_v46 = vrot.slane %v6794_v44, 4  ;;  %v6858_v60 = vrot.slane %v6794_v44, 6  ;;  %v7103_v15 = vsel %vm6934_vm12, %v6794_v44, -inf }
 0x718   : > { %v7104_v62 = vrot.slane %v7103_v15, 4  ;;  %v6206_v12 = vpop.permute.xlu0 %6205  ;;  %v6346_v44 = vsel %vm13451_vm11, %v8436_v0, %v12665_v8  ;;  %vm13456_vm11 = vcmask 1044484  }
 0x719   : > { %v7110_v24 = vsel %vm6934_vm12, %v6856_v9, -inf  ;;  %v7117_v49 = vsel %vm6934_vm12, %v6857_v46, -inf  ;;  %v7124_v11 = vsel %vm6934_vm12, %v6858_v60, -inf  ;;  %v6731_v18 = vpop.f32.mrf.mxu2  ;;  %v6455_v9 = vsel %vm4336_vm9, %v6423_v23, %v6171_v35 }
 0x71a   : > { %v7105_v6 = vmax.f32 %v7103_v15, %v7104_v62  ;;  %v7111_v4 = vrot.slane %v7110_v24, 4  ;;  %v7118_v22 = vrot.slane %v7117_v49, 4  ;;  %v7125_v19 = vrot.slane %v7124_v11, 4  ;;  %v12733_v26 = vpop.permute.xlu2 %6022 }
 0x71b   : > { %v6732_v1 = vadd.f32 %v12706_v34, %v6731_v18  ;;  %v7097_v15 = vrot.slane %v7096_v21, 4  ;;  %v6383_v62 = vsel %vm13452_vm2, %v6346_v44, %v12699_v14  ;;  %v6488_v18 = vsel %vm6458_vm10, %v6455_v9, %v6206_v12 }
 0x71c   : > { %v7106_v57 = vrot.slane %v7105_v6, 2  ;;  %v7112_v39 = vmax.f32 %v7110_v24, %v7111_v4  ;;  %v7119_v13 = vmax.f32 %v7117_v49, %v7118_v22  ;;  %v7126_v54 = vmax.f32 %v7124_v11, %v7125_v19 }
 0x71d   : > { %v6796_v63 = vsel %vm13144_vm14, %v6732_v1, -inf  ;;  %v6415_v8 = vsel %vm13453_vm13, %v6383_v62, %v12709_v16  ;;  %v7098_v19 = vmax.f32 %v7096_v21, %v7097_v15  ;;  %vm13457_vm2 = vcmask 1045509  }
 0x71e   : > { %v7107_v50 = vmax.f32 %v7105_v6, %v7106_v57  ;;  %v7113_v29 = vrot.slane %v7112_v39, 2  ;;  %v7120_v43 = vrot.slane %v7119_v13, 2  ;;  %v7127_v25 = vrot.slane %v7126_v54, 2 }
 0x71f   : > { %v12726_v31 = vmax.f32 %v6795_v42, %v6796_v63  ;;  %v6520_v42 = vsel %vm4475_vm8, %v6488_v18, %v12701_v61  ;;  %v6447_v20 = vsel %vm4336_vm9, %v6415_v8, %v12697_v7  ;;  %v7099_v41 = vrot.slane %v7098_v19, 2  ;;  %v8438_v8 = vld [vmem:[#allocation2 + $0xb4] sm:$0xff] }
 0x720   : > { %v7108_v2 = vrot.slane %v7107_v50, 1  ;;  %v7114_v48 = vmax.f32 %v7112_v39, %v7113_v29  ;;  %v7121_v32 = vmax.f32 %v7119_v13, %v7120_v43  ;;  %v7128_v58 = vmax.f32 %v7126_v54, %v7127_v25  ;;  %v6233_v30 = vpop.permute.xlu0 %6232 }
 0x721   : > { %v6859_v3 = vrot.slane %v12726_v31, 2  ;;  %v7131_v36 = vsel %vm6934_vm12, %v12726_v31, -inf  ;;  %v6480_v63 = vsel %vm6458_vm10, %v6447_v20, %v6198_v5  ;;  %v7649_v15 = vrot.slane %v12604_v37, 4 }
 0x722   : > { %v7109_v40 = vmax.f32 %v7107_v50, %v7108_v2  ;;  %v7115_v27 = vrot.slane %v7114_v48, 1  ;;  %v7122_v52 = vrot.slane %v7121_v32, 1  ;;  %v7132_v10 = vrot.slane %v7131_v36, 4  ;;  %v6095_v43 = vpop.permute.xlu2 %6094 }
 0x723   : > { %v7138_v45 = vsel %vm6934_vm12, %v6859_v3, -inf  ;;  %v7129_v55 = vrot.slane %v7128_v58, 1  ;;  %v7100_v3 = vmax.f32 %v7098_v19, %v7099_v41  ;;  %vm7647_vm13 = vcmask 1047556  }
 0x724   : > { %v7116_v53 = vmax.f32 %v7114_v48, %v7115_v27  ;;  %v7123_v33 = vmax.f32 %v7121_v32, %v7122_v52  ;;  %v7133_v46 = vmax.f32 %v7131_v36, %v7132_v10  ;;  %v7139_v60 = vrot.slane %v7138_v45, 4 }
 0x725   : > { %v7407_v28 = vmul.f32 0.01, %v7109_v40  ;;  %v7130_v6 = vmax.f32 %v7128_v58, %v7129_v55  ;;  %v6276_v54 = vpop.permute.xlu1 %6275  ;;  %v6512_v58 = vsel %vm4475_vm8, %v6480_v63, %v6233_v30  ;;  %v7101_v30 = vrot.slane %v7100_v3, 1 }
 0x726   : > { %v7408_v24 = vmul.f32 0.01, %v7116_v53  ;;  %v7409_v49 = vmul.f32 0.01, %v7123_v33  ;;  %v7134_v11 = vrot.slane %v7133_v46, 2  ;;  %v7140_v38 = vmax.f32 %v7138_v45, %v7139_v60 }
 0x727   : > { %v7471_v1 = vmax.f32 %v7109_v40, %v7407_v28  ;;  %v7410_v51 = vmul.f32 0.01, %v7130_v6  ;;  %v6553_v16 = vsel %vm6523_vm4, %v6520_v42, %v6276_v54  ;;  %v6545_v21 = vsel %vm6523_vm4, %v6512_v58, %v12716_v59 }
 0x728   : > { %v7472_v4 = vmax.f32 %v7116_v53, %v7408_v24  ;;  %v7135_v22 = vmax.f32 %v7133_v46, %v7134_v11  ;;  %v7141_v35 = vrot.slane %v7140_v38, 2  ;;  %v6311_v57 = vpop.permute.xlu0 %6310  ;;  %v7473_v39 = vmax.f32 %v7123_v33, %v7409_v49  ;;  %v8437_v49 = vld [vmem:[#allocation2 + $0x84] sm:$0xff] }
 0x729   : > { %v6586_v25 = vsel %vm6556_vm7, %v6553_v16, %v6311_v57  ;;  %v7474_v32 = vmax.f32 %v7130_v6, %v7410_v51  ;;  %v7102_v53 = vmax.f32 %v7100_v3, %v7101_v30  ;;  %v6860_v54 = vrot.slane %v12726_v31, 4 }
 0x72a   : > { %v7136_v13 = vrot.slane %v7135_v22, 1  ;;  %v7142_v14 = vmax.f32 %v7140_v38, %v7141_v35  ;;  %v7603_v12 = vsel %vm13143_vm5, %v7472_v4, %v7471_v1  ;;  %8245 = vmatmul.msk.bf16.gmra.mxu3 %vm6648_vm3, %v6586_v25  ;;  %v6173_v23 = vpop.permute.xlu2 %6172  ;;  %v6861_v20 = vrot.slane %v12726_v31, 6 }
 0x72b   : > { %v7604_v61 = vsel %vm13454_vm0, %v7473_v39, %v7603_v12  ;;  %v7406_v0 = vmul.f32 0.01, %v7102_v53  ;;  %vm13458_vm0 = vcmask 97280   ;;  %v7145_v63 = vsel %vm6934_vm12, %v6860_v54, -inf }
 0x72c   : > { %v7137_v50 = vmax.f32 %v7135_v22, %v7136_v13  ;;  %v7143_v29 = vrot.slane %v7142_v14, 1  ;;  %v7605_v5 = vsel %vm13455_vm1, %v7474_v32, %v7604_v61  ;;  %vm13459_vm1 = vcmask 195584  }
 0x72d   : > { %v6303_v52 = vpop.permute.xlu1 %6302  ;;  %v7470_v9 = vmax.f32 %v7102_v53, %v7406_v0  ;;  %vm13462_vm5 = vmmov %vm13459_vm1  ;;  %v7152_v25 = vsel %vm6934_vm12, %v6861_v20, -inf }
 0x72e   : > { %v7144_v2 = vmax.f32 %v7142_v14, %v7143_v29  ;;  %v7411_v48 = vmul.f32 0.01, %v7137_v50  ;;  %v6578_v10 = vsel %vm6556_vm7, %v6545_v21, %v6303_v52  ;;  %v7153_v61 = vrot.slane %v7152_v25, 4 }
 0x72f   : > { %8241 = vmatmul.msk.bf16.gmra.mxu2 %vm6648_vm3, %v6578_v10  ;;  %v7602_v59 = vsel %vm7587_vm15, %v7470_v9, %v12679_v17 }
 0x730   : > { %v7412_v7 = vmul.f32 0.01, %v7144_v2  ;;  %v7475_v56 = vmax.f32 %v7137_v50, %v7411_v48  ;;  %v6015_v36 = vpop.permute.xlu0 %6014  ;;  %v7646_v62 = vrot.slane %v7602_v59, 4  ;;  %v7650_v28 = vsel %vm7647_vm13, %v7602_v59, %v7649_v15 }
 0x731   : > { %v6349_v11 = vsel %vm13458_vm0, %v8437_v49, %v6015_v36  ;;  %v7154_v48 = vmax.f32 %v7152_v25, %v7153_v61 }
 0x732   : > { %v7476_v40 = vmax.f32 %v7144_v2, %v7412_v7  ;;  %v7606_v27 = vsel %vm13456_vm11, %v7475_v56, %v7605_v5  ;;  %v6200_v44 = vpop.permute.xlu2 %6199  ;;  %v7648_v24 = vsel %vm7647_vm13, %v7646_v62, %v12604_v37  ;;  %v6385_v4 = vsel %vm13459_vm1, %v6349_v11, %v6095_v43  ;;  %vm13460_vm11 = vmmov %vm13458_vm0 }
 0x733   : > { %v6361_v22 = vsel %vm13460_vm11, %v8438_v8, %v12733_v26  ;;  %v7146_v43 = vrot.slane %v7145_v63, 4  ;;  %v7155_v58 = vrot.slane %v7154_v48, 2  ;;  %vm13472_vm1 = vcmask 1041409  }
 0x734   : > { %v12763_v45 = vsel %vm13457_vm2, %v7476_v40, %v7606_v27  ;;  %vm13461_vm2 = vcmask 293888   ;;  %v8521_v40 = vmov 1983009808   ;;  %vm13473_vm11 = vmmov %vm13472_vm1 }
 0x735   : > { %v6103_v55 = vpop.permute.xlu1 %6102  ;;  %vm13463_vm14 = vmmov %vm13461_vm2  ;;  %v7147_v2 = vmax.f32 %v7145_v63, %v7146_v43  ;;  %v7156_v7 = vmax.f32 %v7154_v48, %v7155_v58  ;;  %v7652_v27 = vunpack.c.l.s4 %v8521_v40 }
 0x736   : > { %v6393_v35 = vsel %vm13462_vm5, %v6361_v22, %v6103_v55  ;;  %v7661_v55 = vrot.slane %v12695_v47, 4 }
 0x737   : > { %v7148_v32 = vrot.slane %v7147_v2, 2  ;;  %v7157_v3 = vrot.slane %v7156_v7, 1  ;;  %v12795_v10 = vunpack.c.0.s8 %v7652_v27 }
 0x738   : > { %v6138_v33 = vpop.permute.xlu0 %6137 }
 0x739   : > { %v6425_v37 = vsel %vm13463_vm14, %v6393_v35, %v6138_v33  ;;  %v7149_v31 = vmax.f32 %v7147_v2, %v7148_v32  ;;  %v7158_v36 = vmax.f32 %v7156_v7, %v7157_v3  ;;  %v7658_v53 = vperm.slane %v7650_v28, %v12795_v10 }
 0x73a   : > { %v6457_v39 = vsel %vm4336_vm9, %v6425_v37, %v6173_v23 }
 0x73b   : > { %v6278_v18 = vpop.permute.xlu2 %6277  ;;  %v7150_v56 = vrot.slane %v7149_v31, 1  ;;  %v7414_v21 = vmul.f32 0.01, %v7158_v36  ;;  %v7709_v15 = vrot.slane %v7658_v53, 4 }
 0x73d   : > { %v6130_v60 = vpop.permute.xlu1 %6129  ;;  %v7151_v5 = vmax.f32 %v7149_v31, %v7150_v56  ;;  %v7478_v23 = vmax.f32 %v7158_v36, %v7414_v21 }
 0x73e   : > { %v6417_v17 = vsel %vm13461_vm2, %v6385_v4, %v6130_v60  ;;  %vm13474_vm2 = vcmask 1042434  }
 0x73f   : > { %v7413_v52 = vmul.f32 0.01, %v7151_v5 }
 0x740   : > { %v6165_v46 = vpop.permute.xlu0 %6164 }
 0x741   : > { %v6449_v19 = vsel %vm4336_vm9, %v6417_v17, %v6165_v46  ;;  %v7477_v30 = vmax.f32 %v7151_v5, %v7413_v52 }
 0x742   : > { %v6482_v57 = vsel %vm6458_vm10, %v6449_v19, %v6200_v44  ;;  %v7654_v44 = vperm.slane %v7648_v24, %v12795_v10 }
 0x743   : > { %v6305_v42 = vpop.permute.xlu2 %6304  ;;  %v7608_v33 = vsel %vm7585_vm6, %v7477_v30, %v12763_v45 }
 0x744   : > { %v7609_v0 = vsel %vm7587_vm15, %v7478_v23, %v7608_v33  ;;  %v7697_v28 = vrot.slane %v7654_v44, 4 }
 0x745   : > { %v6208_v6 = vpop.permute.xlu1 %6207  ;;  %v7659_v9 = vrot.slane %v7609_v0, 4  ;;  %v7662_v46 = vsel %vm7647_vm13, %v7609_v0, %v7661_v55 }
 0x746   : > { %v6490_v26 = vsel %vm6458_vm10, %v6457_v39, %v6208_v6  ;;  %v7670_v60 = vperm.slane %v7662_v46, %v12795_v10 }
 0x747   : > { %v7660_v59 = vsel %vm7647_vm13, %v7659_v9, %v12695_v47 }
 0x748   : > { %v6243_v38 = vpop.permute.xlu0 %6242  ;;  %v7666_v62 = vperm.slane %v7660_v59, %v12795_v10  ;;  %v12809_v45 = vsel %vm7647_vm13, %v7670_v60, %v7709_v15  ;;  %v7707_v49 = vrot.slane %v7670_v60, 4 }
 0x749   : > { %v6522_v16 = vsel %vm4475_vm8, %v6490_v26, %v6243_v38 }
 0x74a   : > { %v6555_v29 = vsel %vm6523_vm4, %v6522_v16, %v6278_v18  ;;  %v12812_v11 = vsel %vm7647_vm13, %v7666_v62, %v7697_v28  ;;  %v7695_v24 = vrot.slane %v7666_v62, 4  ;;  %v12815_v38 = vsel %vm7647_vm13, %v7707_v49, %v7658_v53 }
 0x74c   : > { %v12818_v18 = vsel %vm7647_vm13, %v7695_v24, %v7654_v44 }
 0x74d   : > { %v6235_v1 = vpop.permute.xlu1 %6234  ;;  %v6734_v4 = vpop.f32.mrf.mxu2 }
 0x74e   : > { %v6514_v14 = vsel %vm4475_vm8, %v6482_v57, %v6235_v1  ;;  %v6735_v1 = vadd.f32 %v12706_v34, %v6734_v4 }
 0x750   : > { %v6270_v13 = vpop.permute.xlu0 %6269 }
 0x751   : > { %v6547_v51 = vsel %vm6523_vm4, %v6514_v14, %v6270_v13 }
 0x752   : > { %v6580_v12 = vsel %vm6556_vm7, %v6547_v51, %v6305_v42 }
 0x753   : > { %8242 = vmatmul.msk.bf16.gmra.mxu2 %vm6648_vm3, %v6580_v12  ;;  %v6754_v6 = vpop.f32.mrf.mxu3 }
 0x754   : > { %v6755_v19 = vadd.f32 %v12706_v34, %v6754_v6 }
 0x755   : > { %v6313_v50 = vpop.permute.xlu1 %6312  ;;  %v6736_v8 = vpop.f32.mrf.mxu2 }
 0x756   : > { %v6588_v41 = vsel %vm6556_vm7, %v6555_v29, %v6313_v50  ;;  %v6737_v59 = vadd.f32 %v12706_v34, %v6736_v8 }
 0x757   : > { %8246 = vmatmul.msk.bf16.gmra.mxu3 %vm6648_vm3, %v6588_v41  ;;  %vm13464_vm3 = vcmask 64512  }
 0x758   : > { %vm13465_vm14 = vmmov %vm13464_vm3 }
 0x759   : > { %v6810_v39 = vsel %vm13465_vm14, %v6755_v19, -inf  ;;  %vm13466_vm7 = vmmov %vm13464_vm3  ;;  %vm13476_vm14 = vcmask 1043459  }
 0x75a   : > { %vm13467_vm8 = vmmov %vm13464_vm3 }
 0x75b   : > { %v6756_v47 = vpop.f32.mrf.mxu3  ;;  %v6798_v54 = vsel %vm13467_vm8, %v6735_v1, -inf  ;;  %vm13468_vm10 = vmmov %vm13464_vm3 }
 0x75c   : > { %v6757_v50 = vadd.f32 %v12706_v34, %v6756_v47  ;;  %vm13469_vm4 = vmmov %vm13464_vm3 }
 0x75d   : > { %vm13470_vm5 = vmmov %vm13464_vm3 }
 0x75e   : > { %v6813_v58 = vsel %vm13469_vm4, %v6757_v50, -inf  ;;  %vm13471_vm0 = vmmov %vm13464_vm3  ;;  %vm13480_vm4 = vcmask 1044484  }
 0x75f   : > { %vm13478_vm8 = vmmov %vm13471_vm0 }
 0x77e   : > { %v6759_v22 = vpop.f32.mrf.mxu3 }
 0x77f   : > { %v6760_v35 = vadd.f32 %v12706_v34, %v6759_v22 }
 0x781   : > { %v6811_v57 = vsel %vm13464_vm3, %v6760_v35, -inf  ;;  %vm13475_vm3 = vmmov %vm13474_vm2 }
 0x782   : > { %v6812_v14 = vmax.f32 %v6810_v39, %v6811_v57  ;;  %v6801_v57 = vsel %vm13471_vm0, %v6737_v59, -inf }
 0x784   : > { %v6874_v51 = vrot.slane %v6812_v14, 2  ;;  %v7271_v12 = vsel %vm6934_vm12, %v6812_v14, -inf  ;;  %v6875_v63 = vrot.slane %v6812_v14, 4  ;;  %v6876_v29 = vrot.slane %v6812_v14, 6 }
 0x785   : > { %v6739_v17 = vpop.f32.mrf.mxu2  ;;  %v7272_v43 = vrot.slane %v7271_v12, 4 }
 0x786   : > { %v6740_v37 = vadd.f32 %v12706_v34, %v6739_v17  ;;  %v6761_v42 = vpop.f32.mrf.mxu3  ;;  %v7278_v25 = vsel %vm6934_vm12, %v6874_v51, -inf  ;;  %v7285_v32 = vsel %vm6934_vm12, %v6875_v63, -inf  ;;  %v7292_v7 = vsel %vm6934_vm12, %v6876_v29, -inf }
 0x787   : > { %v6762_v16 = vadd.f32 %v12706_v34, %v6761_v42  ;;  %v7279_v48 = vrot.slane %v7278_v25, 4  ;;  %v7273_v31 = vmax.f32 %v7271_v12, %v7272_v43  ;;  %v7286_v27 = vrot.slane %v7285_v32, 4 }
 0x788   : > { %v6799_v13 = vsel %vm13466_vm7, %v6740_v37, -inf  ;;  %v7293_v23 = vrot.slane %v7292_v7, 4  ;;  %vm13477_vm7 = vmmov %vm13476_vm14 }
 0x789   : > { %v6800_v26 = vmax.f32 %v6798_v54, %v6799_v13  ;;  %v6814_v2 = vsel %vm13468_vm10, %v6762_v16, -inf  ;;  %v7280_v52 = vmax.f32 %v7278_v25, %v7279_v48  ;;  %v7274_v33 = vrot.slane %v7273_v31, 2  ;;  %vm13479_vm10 = vmmov %vm13471_vm0 }
 0x78a   : > { %v6815_v40 = vmax.f32 %v6813_v58, %v6814_v2  ;;  %v7287_v9 = vmax.f32 %v7285_v32, %v7286_v27  ;;  %v7294_v24 = vmax.f32 %v7292_v7, %v7293_v23 }
 0x78b   : > { %v6862_v20 = vrot.slane %v6800_v26, 2  ;;  %v6863_v41 = vrot.slane %v6800_v26, 4  ;;  %v7159_v56 = vsel %vm6934_vm12, %v6800_v26, -inf  ;;  %v6864_v3 = vrot.slane %v6800_v26, 6 }
 0x78c   : > { %v7160_v21 = vrot.slane %v7159_v56, 4  ;;  %v6877_v44 = vrot.slane %v6815_v40, 2  ;;  %v6878_v46 = vrot.slane %v6815_v40, 4  ;;  %v7299_v60 = vsel %vm6934_vm12, %v6815_v40, -inf }
 0x78d   : > { %v7166_v61 = vsel %vm6934_vm12, %v6862_v20, -inf  ;;  %v7173_v36 = vsel %vm6934_vm12, %v6863_v41, -inf  ;;  %v6741_v30 = vpop.f32.mrf.mxu2  ;;  %v7180_v0 = vsel %vm6934_vm12, %v6864_v3, -inf  ;;  %v7281_v62 = vrot.slane %v7280_v52, 2 }
 0x78e   : > { %v7167_v5 = vrot.slane %v7166_v61, 4  ;;  %v7174_v53 = vrot.slane %v7173_v36, 4  ;;  %v6742_v15 = vadd.f32 %v12706_v34, %v6741_v30  ;;  %v7161_v28 = vmax.f32 %v7159_v56, %v7160_v21 }
 0x78f   : > { %v6879_v49 = vrot.slane %v6815_v40, 6  ;;  %v7181_v4 = vrot.slane %v7180_v0, 4  ;;  %v7300_v22 = vrot.slane %v7299_v60, 4  ;;  %v7306_v17 = vsel %vm6934_vm12, %v6877_v44, -inf }
 0x790   : > { %v7168_v55 = vmax.f32 %v7166_v61, %v7167_v5  ;;  %v7175_v6 = vmax.f32 %v7173_v36, %v7174_v53  ;;  %v7275_v35 = vmax.f32 %v7273_v31, %v7274_v33  ;;  %v7288_v19 = vrot.slane %v7287_v9, 2 }
 0x791   : > { %v7313_v37 = vsel %vm6934_vm12, %v6878_v46, -inf  ;;  %v6802_v1 = vsel %vm13470_vm5, %v6742_v15, -inf  ;;  %v7282_v39 = vmax.f32 %v7280_v52, %v7281_v62  ;;  %v7162_v8 = vrot.slane %v7161_v28, 2 }
 0x792   : > { %v7169_v47 = vrot.slane %v7168_v55, 2  ;;  %v7320_v13 = vsel %vm6934_vm12, %v6879_v49, -inf  ;;  %v7295_v14 = vrot.slane %v7294_v24, 2  ;;  %v7176_v54 = vrot.slane %v7175_v6, 2 }
 0x793   : > { %v7182_v26 = vmax.f32 %v7180_v0, %v7181_v4  ;;  %v7307_v42 = vrot.slane %v7306_v17, 4  ;;  %v7301_v12 = vmax.f32 %v7299_v60, %v7300_v22  ;;  %v7314_v20 = vrot.slane %v7313_v37, 4 }
 0x794   : > { %v7170_v51 = vmax.f32 %v7168_v55, %v7169_v47  ;;  %v6803_v16 = vmax.f32 %v6801_v57, %v6802_v1  ;;  %v7276_v63 = vrot.slane %v7275_v35, 1  ;;  %v7289_v50 = vmax.f32 %v7287_v9, %v7288_v19 }
 0x795   : > { %v7321_v29 = vrot.slane %v7320_v13, 4  ;;  %v7283_v43 = vrot.slane %v7282_v39, 1  ;;  %v7163_v25 = vmax.f32 %v7161_v28, %v7162_v8  ;;  %v7296_v41 = vmax.f32 %v7294_v24, %v7295_v14 }
 0x796   : > { %v7177_v61 = vmax.f32 %v7175_v6, %v7176_v54  ;;  %v7183_v2 = vrot.slane %v7182_v26, 2  ;;  %v7308_v48 = vmax.f32 %v7306_v17, %v7307_v42  ;;  %v7171_v32 = vrot.slane %v7170_v51, 1 }
 0x797   : > { %v7302_v58 = vrot.slane %v7301_v12, 2  ;;  %v7315_v31 = vmax.f32 %v7313_v37, %v7314_v20  ;;  %v6865_v7 = vrot.slane %v6803_v16, 2  ;;  %v7277_v56 = vmax.f32 %v7275_v35, %v7276_v63 }
 0x798   : > { %v7290_v3 = vrot.slane %v7289_v50, 1  ;;  %v7322_v5 = vmax.f32 %v7320_v13, %v7321_v29  ;;  %v7284_v36 = vmax.f32 %v7282_v39, %v7283_v43  ;;  %v7164_v40 = vrot.slane %v7163_v25, 1 }
 0x799   : > { %v6866_v27 = vrot.slane %v6803_v16, 4  ;;  %v7187_v52 = vsel %vm6934_vm12, %v6803_v16, -inf  ;;  %v7297_v30 = vrot.slane %v7296_v41, 1  ;;  %v7178_v23 = vrot.slane %v7177_v61, 1 }
 0x79a   : > { %v7184_v53 = vmax.f32 %v7182_v26, %v7183_v2  ;;  %v7309_v33 = vrot.slane %v7308_v48, 2  ;;  %v7172_v55 = vmax.f32 %v7170_v51, %v7171_v32  ;;  %v7303_v0 = vmax.f32 %v7301_v12, %v7302_v58 }
 0x79b   : > { %v7316_v44 = vrot.slane %v7315_v31, 2  ;;  %v7194_v9 = vsel %vm6934_vm12, %v6865_v7, -inf  ;;  %v7291_v46 = vmax.f32 %v7289_v50, %v7290_v3  ;;  %v7323_v60 = vrot.slane %v7322_v5, 2 }
 0x79c   : > { %v6867_v15 = vrot.slane %v6803_v16, 6  ;;  %v7188_v59 = vrot.slane %v7187_v52, 4  ;;  %v7431_v62 = vmul.f32 0.01, %v7277_v56  ;;  %v7432_v28 = vmul.f32 0.01, %v7284_v36 }
 0x79d   : > { %v7165_v49 = vmax.f32 %v7163_v25, %v7164_v40  ;;  %v7201_v24 = vsel %vm6934_vm12, %v6866_v27, -inf  ;;  %v7179_v6 = vmax.f32 %v7177_v61, %v7178_v23  ;;  %v7185_v4 = vrot.slane %v7184_v53, 1 }
 0x79e   : > { %v7310_v47 = vmax.f32 %v7308_v48, %v7309_v33  ;;  %v7195_v22 = vrot.slane %v7194_v9, 4  ;;  %v7298_v17 = vmax.f32 %v7296_v41, %v7297_v30  ;;  %v7416_v35 = vmul.f32 0.01, %v7172_v55 }
 0x79f   : > { %v7304_v19 = vrot.slane %v7303_v0, 1  ;;  %v7317_v37 = vmax.f32 %v7315_v31, %v7316_v44  ;;  %v7324_v57 = vmax.f32 %v7322_v5, %v7323_v60  ;;  %v7189_v39 = vmax.f32 %v7187_v52, %v7188_v59 }
 0x7a0   : > { %v7202_v8 = vrot.slane %v7201_v24, 4  ;;  %v7208_v13 = vsel %vm6934_vm12, %v6867_v15, -inf  ;;  %v7433_v14 = vmul.f32 0.01, %v7291_v46  ;;  %v7495_v54 = vmax.f32 %v7277_v56, %v7431_v62 }
 0x7a1   : > { %v7496_v26 = vmax.f32 %v7284_v36, %v7432_v28  ;;  %v7415_v42 = vmul.f32 0.01, %v7165_v49  ;;  %v7186_v51 = vmax.f32 %v7184_v53, %v7185_v4  ;;  %v7417_v12 = vmul.f32 0.01, %v7179_v6 }
 0x7a2   : > { %v7311_v20 = vrot.slane %v7310_v47, 1  ;;  %v7196_v16 = vmax.f32 %v7194_v9, %v7195_v22  ;;  %v7480_v63 = vmax.f32 %v7172_v55, %v7416_v35  ;;  %v7305_v50 = vmax.f32 %v7303_v0, %v7304_v19 }
 0x7a3   : > { %v7318_v29 = vrot.slane %v7317_v37, 1  ;;  %v7209_v43 = vrot.slane %v7208_v13, 4  ;;  %v7325_v41 = vrot.slane %v7324_v57, 1  ;;  %v7190_v61 = vrot.slane %v7189_v39, 2 }
 0x7a4   : > { %v7203_v2 = vmax.f32 %v7201_v24, %v7202_v8  ;;  %v7434_v48 = vmul.f32 0.01, %v7298_v17  ;;  %v7497_v32 = vmax.f32 %v7291_v46, %v7433_v14  ;;  %v7624_v58 = vsel %vm13472_vm1, %v7496_v26, %v7495_v54  ;;  %vm13482_vm1 = vmmov %vm13471_vm0 }
 0x7a5   : > { %v7479_v31 = vmax.f32 %v7165_v49, %v7415_v42  ;;  %v7418_v7 = vmul.f32 0.01, %v7186_v51  ;;  %v7481_v56 = vmax.f32 %v7179_v6, %v7417_v12  ;;  %v7312_v3 = vmax.f32 %v7310_v47, %v7311_v20 }
 0x7a6   : > { %v7197_v5 = vrot.slane %v7196_v16, 2  ;;  %v12860_v40 = vmax.f32 %v7317_v37, %v7318_v29  ;;  %v7435_v27 = vmul.f32 0.01, %v7305_v50  ;;  %v7210_v52 = vmax.f32 %v7208_v13, %v7209_v43 }
 0x7a7   : > { %v7610_v36 = vsel %vm13473_vm11, %v7480_v63, %v7479_v31  ;;  %v12862_v30 = vmax.f32 %v7324_v57, %v7325_v41  ;;  %v7191_v23 = vmax.f32 %v7189_v39, %v7190_v61  ;;  %v7204_v53 = vrot.slane %v7203_v2, 2  ;;  %vm13483_vm11 = vmmov %vm13471_vm0 }
 0x7a8   : > { %v7498_v33 = vmax.f32 %v7298_v17, %v7434_v48  ;;  %v7625_v55 = vsel %vm13474_vm2, %v7497_v32, %v7624_v58  ;;  %v7611_v44 = vsel %vm13475_vm3, %v7481_v56, %v7610_v36  ;;  %v7436_v9 = vmul.f32 0.01, %v7312_v3  ;;  %vm13484_vm2 = vmmov %vm13471_vm0 }
 0x7a9   : > { %v7198_v46 = vmax.f32 %v7196_v16, %v7197_v5  ;;  %v7482_v15 = vmax.f32 %v7186_v51, %v7418_v7  ;;  %v12871_v59 = vmul.f32 0.01, %v12860_v40  ;;  %v7499_v62 = vmax.f32 %v7305_v50, %v7435_v27  ;;  %vm13485_vm3 = vmmov %vm13480_vm4 }
 0x7aa   : > { %v7211_v28 = vrot.slane %v7210_v52, 2  ;;  %v12874_v24 = vmul.f32 0.01, %v12862_v30  ;;  %v7192_v6 = vrot.slane %v7191_v23, 1  ;;  %v7205_v4 = vmax.f32 %v7203_v2, %v7204_v53 }
 0x7ab   : > { %v7626_v22 = vsel %vm13476_vm14, %v7498_v33, %v7625_v55  ;;  %v12879_v17 = vsel %vm13477_vm7, %v7482_v15, %v7611_v44  ;;  %v7199_v35 = vrot.slane %v7198_v46, 1  ;;  %v7501_v57 = vmax.f32 %v12860_v40, %v12871_v59  ;;  %vm13487_vm7 = vmmov %vm13471_vm0 }
 0x7ac   : > { %v7627_v39 = vsel %vm13480_vm4, %v7499_v62, %v7626_v22  ;;  %v7212_v8 = vmax.f32 %v7210_v52, %v7211_v28  ;;  %v7502_v14 = vmax.f32 %v12862_v30, %v12874_v24  ;;  %v12888_v54 = vmax.f32 %v7191_v23, %v7192_v6  ;;  %vm13490_vm4 = vmmov %vm13471_vm0 }
 0x7ad   : > { %v12853_v1 = vpop.f32.mrf.mxu3  ;;  %v7206_v26 = vrot.slane %v7205_v4, 1  ;;  %vm13481_vm5 = vcmask 1045509   ;;  %v12896_v29 = vmax.f32 %v7198_v46, %v7199_v35  ;;  %vm13486_vm14 = vcmask 1041409  }
 0x7ae   : > { %v6765_v42 = vadd.f32 %v12706_v34, %v12853_v1  ;;  %v7213_v61 = vrot.slane %v7212_v8, 1  ;;  %v12905_v5 = vmul.f32 0.01, %v12888_v54 }
 0x7af   : > { %v12912_v44 = vmul.f32 0.01, %v12896_v29 }
 0x7b0   : > { %v6816_v36 = vsel %vm13471_vm0, %v6765_v42, -inf  ;;  %v12909_v55 = vmax.f32 %v7212_v8, %v7213_v61  ;;  %vm13492_vm0 = vmmov %vm13486_vm14 }
 0x7b2   : > { %v12849_v21 = vpop.f32.mrf.mxu2 }
 0x7b3   : > { %v6745_v60 = vadd.f32 %v12706_v34, %v12849_v21  ;;  %v7500_v21 = vmax.f32 %v7312_v3, %v7436_v9  ;;  %v12902_v3 = vmax.f32 %v7205_v4, %v7206_v26 }
 0x7b5   : > { %v12865_v0 = vpop.f32.mrf.mxu3  ;;  %v6804_v19 = vsel %vm13478_vm8, %v6745_v60, -inf  ;;  %v12894_v50 = vsel %vm13481_vm5, %v7500_v21, %v7627_v39  ;;  %vm13488_vm8 = vcmask 1042434  }
 0x7ba   : > { %v12856_v25 = vpop.f32.mrf.mxu2 }
 0x7d6   : > { %v6749_v49 = vpop.f32.mrf.mxu2 }
 0x7d7   : > { %v6750_v47 = vadd.f32 %v12706_v34, %v6749_v49 }
 0x7d9   : > { %v6805_v37 = vsel %vm13479_vm10, %v6750_v47, -inf  ;;  %vm13489_vm10 = vcmask 1043459  }
 0x7da   : > { %v6806_v13 = vmax.f32 %v6804_v19, %v6805_v37  ;;  %v6769_v63 = vpop.f32.mrf.mxu3  ;;  %v6747_v37 = vadd.f32 %v12706_v34, %v12856_v25 }
 0x7db   : > { %v6770_v41 = vadd.f32 %v12706_v34, %v6769_v63 }
 0x7dc   : > { %v6868_v51 = vrot.slane %v6806_v13, 2  ;;  %v6869_v12 = vrot.slane %v6806_v13, 4  ;;  %v6870_v20 = vrot.slane %v6806_v13, 6  ;;  %v7215_v16 = vsel %vm6934_vm12, %v6806_v13, -inf }
 0x7dd   : > { %v7216_v43 = vrot.slane %v7215_v16, 4  ;;  %v6817_v27 = vsel %vm13482_vm1, %v6770_v41, -inf  ;;  %v12922_v41 = vmul.f32 0.01, %v12902_v3  ;;  %vm13493_vm1 = vmmov %vm13481_vm5 }
 0x7de   : > { %v7222_v2 = vsel %vm6934_vm12, %v6868_v51, -inf  ;;  %v7229_v48 = vsel %vm6934_vm12, %v6869_v12, -inf  ;;  %v7236_v1 = vsel %vm6934_vm12, %v6870_v20, -inf  ;;  %v6751_v56 = vpop.f32.mrf.mxu2  ;;  %v6818_v9 = vmax.f32 %v6816_v36, %v6817_v27 }
 0x7df   : > { %v7217_v32 = vmax.f32 %v7215_v16, %v7216_v43  ;;  %v7223_v58 = vrot.slane %v7222_v2, 4  ;;  %v7230_v31 = vrot.slane %v7229_v48, 4  ;;  %v7237_v7 = vrot.slane %v7236_v1, 4 }
 0x7e0   : > { %v6752_v46 = vadd.f32 %v12706_v34, %v6751_v56  ;;  %v6880_v49 = vrot.slane %v6818_v9, 2  ;;  %v6881_v6 = vrot.slane %v6818_v9, 4  ;;  %v6882_v4 = vrot.slane %v6818_v9, 6 }
 0x7e1   : > { %v7218_v52 = vrot.slane %v7217_v32, 2  ;;  %v7224_v23 = vmax.f32 %v7222_v2, %v7223_v58  ;;  %v7231_v53 = vmax.f32 %v7229_v48, %v7230_v31  ;;  %v7238_v33 = vmax.f32 %v7236_v1, %v7237_v7 }
 0x7e2   : > { %v7327_v47 = vsel %vm6934_vm12, %v6818_v9, -inf  ;;  %v7334_v8 = vsel %vm6934_vm12, %v6880_v49, -inf  ;;  %v7341_v13 = vsel %vm6934_vm12, %v6881_v6, -inf  ;;  %v7348_v12 = vsel %vm6934_vm12, %v6882_v4, -inf }
 0x7e3   : > { %v7219_v60 = vmax.f32 %v7217_v32, %v7218_v52  ;;  %v7225_v15 = vrot.slane %v7224_v23, 2  ;;  %v7232_v62 = vrot.slane %v7231_v53, 2  ;;  %v7239_v28 = vrot.slane %v7238_v33, 2 }
 0x7e4   : > { %v7328_v39 = vrot.slane %v7327_v47, 4  ;;  %v7335_v63 = vrot.slane %v7334_v8, 4  ;;  %v7342_v43 = vrot.slane %v7341_v13, 4  ;;  %v6808_v25 = vsel %vm13483_vm11, %v6752_v46, -inf  ;;  %vm13494_vm11 = vmmov %vm13488_vm8 }
 0x7e5   : > { %v7220_v22 = vrot.slane %v7219_v60, 1  ;;  %v7226_v21 = vmax.f32 %v7224_v23, %v7225_v15  ;;  %v7233_v35 = vmax.f32 %v7231_v53, %v7232_v62  ;;  %v7240_v19 = vmax.f32 %v7238_v33, %v7239_v28 }
 0x7e6   : > { %v7329_v16 = vmax.f32 %v7327_v47, %v7328_v39  ;;  %v7336_v1 = vmax.f32 %v7334_v8, %v7335_v63  ;;  %v7343_v32 = vmax.f32 %v7341_v13, %v7342_v43  ;;  %v7349_v58 = vrot.slane %v7348_v12, 4 }
 0x7e7   : > { %v7221_v26 = vmax.f32 %v7219_v60, %v7220_v22  ;;  %v7227_v42 = vrot.slane %v7226_v21, 1  ;;  %v7234_v51 = vrot.slane %v7233_v35, 1  ;;  %v7241_v20 = vrot.slane %v7240_v19, 1 }
 0x7e8   : > { %v7483_v31 = vmax.f32 %v12888_v54, %v12905_v5  ;;  %v7484_v7 = vmax.f32 %v12896_v29, %v12912_v44  ;;  %v7330_v36 = vrot.slane %v7329_v16, 2  ;;  %v12930_v27 = vmul.f32 0.01, %v12909_v55 }
 0x7e9   : > { %v7228_v61 = vmax.f32 %v7226_v21, %v7227_v42  ;;  %v7235_v2 = vmax.f32 %v7233_v35, %v7234_v51  ;;  %v7423_v48 = vmul.f32 0.01, %v7221_v26  ;;  %v6807_v52 = vsel %vm13484_vm2, %v6747_v37, -inf  ;;  %vm13495_vm2 = vmmov %vm13489_vm10 }
 0x7ea   : > { %v7242_v23 = vmax.f32 %v7240_v19, %v7241_v20  ;;  %v7485_v33 = vmax.f32 %v12902_v3, %v12922_v41  ;;  %v7337_v46 = vrot.slane %v7336_v1, 2  ;;  %v6809_v60 = vmax.f32 %v6807_v52, %v6808_v25 }
 0x7eb   : > { %v7424_v56 = vmul.f32 0.01, %v7228_v61  ;;  %v7425_v53 = vmul.f32 0.01, %v7235_v2  ;;  %v6767_v54 = vadd.f32 %v12706_v34, %v12865_v0  ;;  %v7487_v5 = vmax.f32 %v7221_v26, %v7423_v48 }
 0x7ec   : > { %v7344_v29 = vrot.slane %v7343_v32, 2  ;;  %v7350_v44 = vmax.f32 %v7348_v12, %v7349_v58  ;;  %v7331_v15 = vmax.f32 %v7329_v16, %v7330_v36  ;;  %v6871_v62 = vrot.slane %v6809_v60, 2  ;;  %v6771_v12 = vpop.f32.mrf.mxu3 }
 0x7ed   : > { %v7488_v9 = vmax.f32 %v7228_v61, %v7424_v56  ;;  %v6872_v28 = vrot.slane %v6809_v60, 4  ;;  %v6873_v49 = vrot.slane %v6809_v60, 6  ;;  %v7486_v6 = vmax.f32 %v12909_v55, %v12930_v27 }
 0x7ee   : > { %v7613_v4 = vsel %vm13485_vm3, %v7483_v31, %v12879_v17  ;;  %v7426_v47 = vmul.f32 0.01, %v7242_v23  ;;  %v7489_v22 = vmax.f32 %v7235_v2, %v7425_v53  ;;  %v7338_v35 = vmax.f32 %v7336_v1, %v7337_v46 }
 0x7ef   : > { %v7617_v21 = vsel %vm13486_vm14, %v7488_v9, %v7487_v5  ;;  %v7243_v0 = vsel %vm6934_vm12, %v6809_v60, -inf  ;;  %v7250_v19 = vsel %vm6934_vm12, %v6871_v62, -inf  ;;  %v6819_v37 = vsel %vm13487_vm7, %v6767_v54, -inf  ;;  %vm13496_vm14 = vmmov %vm13493_vm1 }
 0x7f0   : > { %v7345_v39 = vmax.f32 %v7343_v32, %v7344_v29  ;;  %v7351_v8 = vrot.slane %v7350_v44, 2  ;;  %v7244_v13 = vrot.slane %v7243_v0, 4  ;;  %v7332_v26 = vrot.slane %v7331_v15, 1 }
 0x7f1   : > { %v7251_v42 = vrot.slane %v7250_v19, 4  ;;  %v7257_v51 = vsel %vm6934_vm12, %v6872_v28, -inf  ;;  %v7264_v17 = vsel %vm6934_vm12, %v6873_v49, -inf  ;;  %v7490_v20 = vmax.f32 %v7242_v23, %v7426_v47 }
 0x7f2   : > { %v7618_v16 = vsel %vm13488_vm8, %v7489_v22, %v7617_v21  ;;  %v7245_v63 = vmax.f32 %v7243_v0, %v7244_v13  ;;  %v12953_v43 = vsel %vm7585_vm6, %v7501_v57, %v12894_v50  ;;  %v7339_v61 = vrot.slane %v7338_v35, 1 }
 0x7f3   : > { %v7252_v2 = vmax.f32 %v7250_v19, %v7251_v42  ;;  %v7258_v25 = vrot.slane %v7257_v51, 4  ;;  %v7265_v48 = vrot.slane %v7264_v17, 4  ;;  %v7346_v1 = vrot.slane %v7345_v39, 1 }
 0x7f4   : > { %v7352_v32 = vmax.f32 %v7350_v44, %v7351_v8  ;;  %v7246_v58 = vrot.slane %v7245_v63, 2  ;;  %v6772_v31 = vadd.f32 %v12706_v34, %v6771_v12  ;;  %v7333_v56 = vmax.f32 %v7331_v15, %v7332_v26 }
 0x7f5   : > { %v7253_v36 = vrot.slane %v7252_v2, 2  ;;  %v7259_v52 = vmax.f32 %v7257_v51, %v7258_v25  ;;  %v7266_v23 = vmax.f32 %v7264_v17, %v7265_v48  ;;  %v7619_v53 = vsel %vm13489_vm10, %v7490_v20, %v7618_v16 }
 0x7f6   : > { %v7247_v9 = vmax.f32 %v7245_v63, %v7246_v58  ;;  %v6820_v40 = vsel %vm13490_vm4, %v6772_v31, -inf  ;;  %v7614_v59 = vsel %vm13481_vm5, %v7484_v7, %v7613_v4  ;;  %v7340_v57 = vmax.f32 %v7338_v35, %v7339_v61 }
 0x7f7   : > { %v7254_v50 = vmax.f32 %v7252_v2, %v7253_v36  ;;  %v7260_v46 = vrot.slane %v7259_v52, 2  ;;  %v7267_v60 = vrot.slane %v7266_v23, 2  ;;  %v12959_v54 = vmax.f32 %v7345_v39, %v7346_v1 }
 0x7f8   : > { %v7353_v5 = vrot.slane %v7352_v32, 1  ;;  %v7248_v29 = vrot.slane %v7247_v9, 1  ;;  %v6821_v34 = vmax.f32 %v6819_v37, %v6820_v40  ;;  %v7439_v44 = vmul.f32 0.01, %v7333_v56 }
 0x7f9   : > { %v7255_v15 = vrot.slane %v7254_v50, 1  ;;  %v7261_v62 = vmax.f32 %v7259_v52, %v7260_v46  ;;  %v7268_v28 = vmax.f32 %v7266_v23, %v7267_v60  ;;  %v7440_v0 = vmul.f32 0.01, %v7340_v57 }
 0x7fa   : > { %v7249_v49 = vmax.f32 %v7247_v9, %v7248_v29  ;;  %v6883_v47 = vrot.slane %v6821_v34, 2  ;;  %v6884_v22 = vrot.slane %v6821_v34, 4  ;;  %v6885_v21 = vrot.slane %v6821_v34, 6 }
 0x7fb   : > { %v7256_v19 = vmax.f32 %v7254_v50, %v7255_v15  ;;  %v7262_v7 = vrot.slane %v7261_v62, 1  ;;  %v7355_v4 = vsel %vm6934_vm12, %v6821_v34, -inf  ;;  %v7354_v37 = vmax.f32 %v7352_v32, %v7353_v5 }
 0x7fc   : > { %v7427_v35 = vmul.f32 0.01, %v7249_v49  ;;  %v7356_v8 = vrot.slane %v7355_v4, 4  ;;  %v7362_v39 = vsel %vm6934_vm12, %v6883_v47, -inf  ;;  %v7369_v13 = vsel %vm6934_vm12, %v6884_v22, -inf }
 0x7fd   : > { %v7263_v26 = vmax.f32 %v7261_v62, %v7262_v7  ;;  %v7269_v42 = vrot.slane %v7268_v28, 1  ;;  %v7363_v51 = vrot.slane %v7362_v39, 4  ;;  %v7428_v17 = vmul.f32 0.01, %v7256_v19 }
 0x7fe   : > { %v7357_v12 = vmax.f32 %v7355_v4, %v7356_v8  ;;  %v7370_v20 = vrot.slane %v7369_v13, 4  ;;  %v7376_v16 = vsel %vm6934_vm12, %v6885_v21, -inf  ;;  %v7441_v63 = vmul.f32 0.01, %v12959_v54  ;;  %vm13491_vm12 = vmmov %vm13485_vm3 }
 0x7ff   : > { %v7503_v61 = vmax.f32 %v7333_v56, %v7439_v44  ;;  %v7491_v2 = vmax.f32 %v7249_v49, %v7427_v35  ;;  %v7364_v25 = vmax.f32 %v7362_v39, %v7363_v51  ;;  %v7504_v48 = vmax.f32 %v7340_v57, %v7440_v0 }
 0x800   : > { %v7358_v1 = vrot.slane %v7357_v12, 2  ;;  %v7371_v58 = vmax.f32 %v7369_v13, %v7370_v20  ;;  %v7377_v31 = vrot.slane %v7376_v16, 4  ;;  %v7270_v36 = vmax.f32 %v7268_v28, %v7269_v42 }
 0x801   : > { %v7429_v52 = vmul.f32 0.01, %v7263_v26  ;;  %v7365_v32 = vrot.slane %v7364_v25, 2  ;;  %v7615_v23 = vsel %vm7585_vm6, %v7485_v33, %v7614_v59  ;;  %v7492_v9 = vmax.f32 %v7256_v19, %v7428_v17 }
 0x802   : > { %v7359_v40 = vmax.f32 %v7357_v12, %v7358_v1  ;;  %v7372_v50 = vrot.slane %v7371_v58, 2  ;;  %v7378_v46 = vmax.f32 %v7376_v16, %v7377_v31  ;;  %v7442_v60 = vmul.f32 0.01, %v7354_v37 }
 0x803   : > { %v7505_v56 = vmax.f32 %v12959_v54, %v7441_v63  ;;  %v7620_v57 = vsel %vm13491_vm12, %v7491_v2, %v7619_v53  ;;  %v7366_v5 = vmax.f32 %v7364_v25, %v7365_v32  ;;  %v7631_v29 = vsel %vm13492_vm0, %v7504_v48, %v7503_v61 }
 0x804   : > { %v7360_v34 = vrot.slane %v7359_v40, 1  ;;  %v7373_v44 = vmax.f32 %v7371_v58, %v7372_v50  ;;  %v7379_v15 = vrot.slane %v7378_v46, 2  ;;  %v7430_v62 = vmul.f32 0.01, %v7270_v36 }
 0x805   : > { %v7493_v28 = vmax.f32 %v7263_v26, %v7429_v52  ;;  %v7367_v3 = vrot.slane %v7366_v5, 1  ;;  %v7616_v41 = vsel %vm7587_vm15, %v7486_v6, %v7615_v23  ;;  %v7621_v54 = vsel %vm13493_vm1, %v7492_v9, %v7620_v57 }
 0x806   : > { %v7361_v33 = vmax.f32 %v7359_v40, %v7360_v34  ;;  %v7374_v59 = vrot.slane %v7373_v44, 1  ;;  %v7380_v49 = vmax.f32 %v7378_v46, %v7379_v15  ;;  %v7630_v47 = vsel %vm7587_vm15, %v7502_v14, %v12953_v43 }
 0x807   : > { %v7368_v53 = vmax.f32 %v7366_v5, %v7367_v3  ;;  %v7632_v22 = vsel %vm13494_vm11, %v7505_v56, %v7631_v29  ;;  %v7506_v55 = vmax.f32 %v7354_v37, %v7442_v60  ;;  %v7622_v6 = vsel %vm7585_vm6, %v7493_v28, %v7621_v54 }
 0x808   : > { %v7375_v21 = vmax.f32 %v7373_v44, %v7374_v59  ;;  %v7381_v0 = vrot.slane %v7380_v49, 1  ;;  %v7443_v19 = vmul.f32 0.01, %v7361_v33  ;;  %v7673_v7 = vrot.slane %v7616_v41, 4 }
 0x809   : > { %v7444_v27 = vmul.f32 0.01, %v7368_v53  ;;  %v7494_v4 = vmax.f32 %v7270_v36, %v7430_v62  ;;  %v7633_v13 = vsel %vm13495_vm2, %v7506_v55, %v7632_v22  ;;  %v7671_v30 = vrot.slane %v7630_v47, 4 }
 0x80a   : > { %v7382_v35 = vmax.f32 %v7380_v49, %v7381_v0  ;;  %v7445_v8 = vmul.f32 0.01, %v7375_v21  ;;  %v7507_v39 = vmax.f32 %v7361_v33, %v7443_v19  ;;  %v8522_v17 = vmov 1934713408  }
 0x80b   : > { %v7508_v26 = vmax.f32 %v7368_v53, %v7444_v27  ;;  %v7623_v42 = vsel %vm7587_vm15, %v7494_v4, %v7622_v6  ;;  %v7672_v51 = vsel %vm7647_vm13, %v7671_v30, %v7616_v41  ;;  %v7700_v12 = vunpack.c.l.s4 %v8522_v17 }
 0x80c   : > { %v7446_v24 = vmul.f32 0.01, %v7382_v35  ;;  %v7509_v14 = vmax.f32 %v7375_v21, %v7445_v8  ;;  %v7634_v43 = vsel %vm13485_vm3, %v7507_v39, %v7633_v13  ;;  %v7674_v20 = vsel %vm7647_vm13, %v7630_v47, %v7673_v7 }
 0x80d   : > { %v7635_v37 = vsel %vm13496_vm14, %v7508_v26, %v7634_v43  ;;  %v7685_v61 = vrot.slane %v7623_v42, 4  ;;  %v7678_v25 = vperm.slane %v7672_v51, %v12795_v10  ;;  %v7682_v48 = vperm.slane %v7674_v20, %v12795_v10 }
 0x80e   : > { %v7510_v16 = vmax.f32 %v7382_v35, %v7446_v24  ;;  %v7636_v63 = vsel %vm7585_vm6, %v7509_v14, %v7635_v37  ;;  %v7701_v58 = vunpack.c.0.s8 %v7700_v12  ;;  %vm13501_vm6 = vmmov %vm13490_vm4  ;;  %vm13503_vm7 = vcmask 195584  }
 0x80f   : > { %v7721_v40 = vrot.slane %v7678_v25, 4  ;;  %v7733_v50 = vrot.slane %v7682_v48, 4  ;;  %vm13504_vm8 = vcmask 261120   ;;  %vm13505_vm10 = vcmask 326656  }
 0x810   : > { %v7637_v2 = vsel %vm7587_vm15, %v7510_v16, %v7636_v63  ;;  %v7706_v32 = vperm.slane %v12812_v11, %v7701_v58  ;;  %v7702_v23 = vperm.slane %v12818_v18, %v7701_v58  ;;  %v7714_v59 = vperm.slane %v12815_v38, %v7701_v58 }
 0x811   : > { %v7683_v1 = vrot.slane %v7637_v2, 4  ;;  %v7686_v31 = vsel %vm7647_vm13, %v7637_v2, %v7685_v61  ;;  %v7718_v49 = vperm.slane %v12809_v45, %v7701_v58  ;;  %vm13502_vm15 = vcmask 130048  }
 0x812   : > { %v7694_v36 = vperm.slane %v7686_v31, %v12795_v10  ;;  %v7749_v29 = vrot.slane %v7706_v32, 4  ;;  %v7745_v44 = vrot.slane %v7702_v23, 4  ;;  %v7753_v47 = vrot.slane %v7714_v59, 4 }
 0x813   : > { %v7684_v52 = vsel %vm7647_vm13, %v7683_v1, %v7623_v42  ;;  %v7757_v0 = vrot.slane %v7718_v49, 4  ;;  %vm13507_vm4 = vcmask 523264  }
 0x814   : > { %v7690_v9 = vperm.slane %v7684_v52, %v12795_v10  ;;  %v7731_v46 = vrot.slane %v7694_v36, 4  ;;  %v7734_v57 = vsel %vm7647_vm13, %v7694_v36, %v7733_v50 }
 0x815   : > { %v7742_v10 = vperm.slane %v7734_v57, %v7701_v58 }
 0x816   : > { %v7722_v60 = vsel %vm7647_vm13, %v7690_v9, %v7721_v40  ;;  %v7719_v56 = vrot.slane %v7690_v9, 4  ;;  %v7732_v15 = vsel %vm7647_vm13, %v7731_v46, %v7682_v48 }
 0x817   : > { %v7730_v5 = vperm.slane %v7722_v60, %v7701_v58  ;;  %v7738_v41 = vperm.slane %v7732_v15, %v7701_v58  ;;  %v7755_v33 = vrot.slane %v7742_v10, 4  ;;  %v7758_v38 = vsel %vm7647_vm13, %v7742_v10, %v7757_v0 }
 0x818   : > { %v7720_v34 = vsel %vm7647_vm13, %v7719_v56, %v7678_v25 }
 0x819   : > { %v7750_v11 = vsel %vm7647_vm13, %v7730_v5, %v7749_v29  ;;  %v7747_v18 = vrot.slane %v7730_v5, 4  ;;  %v7726_v62 = vperm.slane %v7720_v34, %v7701_v58  ;;  %v7751_v54 = vrot.slane %v7738_v41, 4 }
 0x81a   : > { %7768 = vrot.lane.b32.xlu2 %v7750_v11, %s8509_s23  ;;  %v7756_v53 = vsel %vm7647_vm13, %v7755_v33, %v7718_v49  ;;  %v7754_v22 = vsel %vm7647_vm13, %v7738_v41, %v7753_v47  ;;  %s13499_s23 = smov 32  }
 0x81b   : > { %v7748_v28 = vsel %vm7647_vm13, %v7747_v18, %v7706_v32  ;;  %v7746_v3 = vsel %vm7647_vm13, %v7726_v62, %v7745_v44  ;;  %v7752_v21 = vsel %vm7647_vm13, %v7751_v54, %v7714_v59  ;;  %v7743_v45 = vrot.slane %v7726_v62, 4 }
 0x81c   : > { %7764 = vrot.lane.b32.xlu1 %v7748_v28, %s8507_s21  ;;  %7760 = vrot.lane.b32.xlu0 %v7746_v3, %s13497_s22  ;;  %s13498_s21 = smov 40   ;;  %s8455_s22 = scalar_lea.hbm %s8454_s13, 8 }
 0x81d   : > { %v7744_v27 = vsel %vm7647_vm13, %v7743_v45, %v7702_v23  ;;  %vm13506_vm13 = vcmask 457728   ;;  %p8456_p11 = scmp.ne.s32.totalorder %s8454_s13, %s8455_s22 }
 0x81f   : > { %p8457_p12 = pnand %p8456_p11, %p8601_p5 }
 0x821   : > { %p8458_p13 = pneg %p8457_p12 }
 0x822   : > { %7780 = vrot.lane.b32.xlu2 %v7756_v53, %s8515_s17  ;;  %s269_s17 = sand.u32 1, %s8493_s25  }
 0x823   : > { %s7874_s15 = sshll.u32 %s269_s17, 3  ;;  %s7796_s28 = scalar_lea.sflag [#allocation5], %s269_s17 }
 0x824   : > { %7776 = vrot.lane.b32.xlu1 %v7754_v22, %s13498_s21  ;;  %7772 = vrot.lane.b32.xlu0 %v7752_v21, %s13499_s23  ;;  %s271_s18 = scalar_lea.vmem [#allocation4], %s7874_s15 }
 0x825   : > { %s7808_s19 = sshll.u32 %s271_s18, 4  ;;  %s7809_s19 = int_to_ptr.vmem [resolvable:$true] %s7808_s19 }
 0x82c   : > { %7784 = vrot.lane.b32.xlu0 %v7758_v38, %s13500_s29  ;;  %s8459_s29 = scalar_lea.hbm %s13069_s7, 16 }
 0x82d   : > { %p8461_p1 = scmp.lt.s32.totalorder %s8459_s29, %s8455_s22 }
 0x82f   : > { %p8462_p2 = por %p8461_p1, %p8460_p0 }
 0x831   : > { %p8463_p3 = pnand %p8462_p2, %p8458_p13 }
 0x874   : > { %v7769_v7 = vpop.permute.xlu2 %7768 }
 0x87c   : > { %v7781_v30 = vpop.permute.xlu2 %7780 }
 0x88e   : > { %v7765_v19 = vpop.permute.xlu1 %7764  ;;  %v7761_v55 = vpop.permute.xlu0 %7760 }
 0x88f   : > { %v7787_v6 = vsel %vm13501_vm6, %v7744_v27, %v7761_v55 }
 0x890   : > { %v7788_v4 = vsel %vm13502_vm15, %v7787_v6, %v7765_v19 }
 0x891   : > { %v7789_v8 = vsel %vm13503_vm7, %v7788_v4, %v7769_v7 }
 0x896   : > { %v7773_v35 = vpop.permute.xlu0 %7772  ;;  %v7777_v39 = vpop.permute.xlu1 %7776 }
 0x897   : > { %v7790_v13 = vsel %vm13504_vm8, %v7789_v8, %v7773_v35 }
 0x898   : > { %v7791_v26 = vsel %vm13505_vm10, %v7790_v13, %v7777_v39 }
 0x899   : > { %v7792_v14 = vsel %vm4336_vm9, %v7791_v26, %v7781_v30 }
 0x89e   : > { %v7785_v24 = vpop.permute.xlu0 %7784 }
 0x89f   : > { %v7793_v43 = vsel %vm13506_vm13, %v7792_v14, %v7785_v24 }
 0x8a0   : > { %7794 = vst.msk [vmem:[%s271_s18] sm:$0xff] %vm13507_vm4, %v7793_v43 }
 0x8a1   : > { %8466 = shalt.err (!%p8463_p3)
}
 0x8a2   : > { %8334 = dma.vmem_to_hbm [thread:$0]  (%p8601_p5), %s7809_s19, 128, %s7811_s20, %s7796_s28  }
 0x8a3 PF: > { %p8340_p4 = scmp.ge.s32.totalorder %s8501_s27, 2  ;;  %s7822_s17 = sand.u32 1, %s8489_s24  }
 0x8a4   : > { %s7823_s14 = scalar_lea.sflag [#allocation5], %s7822_s17 }
 0x8a5   : > { %p8337_p7 = pnand %p8340_p4, %p8605_p6 }
 0x8a7   : > { %p8338_p8 = pneg %p8337_p7 }
 0x8a9   : > { %8484 = dma.done.wait (%p8338_p8), %s7823_s14, 128  }
 0x8aa   : > { %8486 = vsyncadd (%p8338_p8), %s7823_s14, 4294967168  ;;  %p17_p9 = scmp.ge.s32.totalorder %s8588_s30, 4   ;;  %s13508_s24 = smov %s8493_s25 }
 0x8ab   : > { %s13509_s25 = smov %s8497_s26  ;;  %s13510_s26 = smov %s8599_s10 }
 0x8ac   : > { %s13511_s27 = smov %s8588_s30  ;;  %19 = sbr.rel (!%p17_p9) target bundleno = 3 (0x3), region = 87 }
 0x8b1   :  { %7829 = vsyncpa [#allocation5], 1 }
 0x8b2   :  { %7831 = vsyncpa [#allocation5 + $0x1], 1 }

</bundles_post_ra>
